<compile_context>
chip_gen: v7x
topology: tpu7x:2x2x1
jax: 0.10.0
libtpu: 0.0.40
codegen_flags: <defaults>
</compile_context>

<pallas_src>
import functools

import numpy as np
import jax
import jax.numpy as jnp
from jax.experimental import pallas as pl
from jax.experimental.pallas import tpu as pltpu

EPS = 1e-5
VMEM_SPEC = pl.BlockSpec(memory_space=pltpu.MemorySpace.VMEM)


# ----------------------------------------------------------------------------
# Fused Conv3x3(+folded BN) + ReLU + MaxPool2x2 kernel   (one sample per grid step)
# ----------------------------------------------------------------------------
def _conv_bn_relu_pool_kernel(x_ref, w_ref, b_ref, s_ref, o_ref, xp_ref,
                              *, H, W, Wp, L, La, HoWo):
    """x_ref: (1, Cin, H, W)   w_ref: (9, Cout, Cin) bf16   b_ref: (Cout, 1) f32
       s_ref: (La, Ho*Wo) f32 stride-2 selection matrix
       o_ref: (1, Cout, Ho*Wo)   xp_ref: (Cin, (H+2)*(W+2)) bf16 scratch."""
    Cin = x_ref.shape[1]
    Cout = w_ref.shape[1]

    # 1) In-kernel padding: zero the row-flattened padded scratch, copy rows in.
    xp_ref[...] = jnp.zeros_like(xp_ref)
    x3 = x_ref[0]                                    # (Cin, H, W)
    for h in range(H):                               # static, small
        base = (h + 1) * Wp + 1
        xp_ref[:, base:base + W] = x3[:, h, :].astype(xp_ref.dtype)
    xp = xp_ref[...]                                 # (Cin, Hp*Wp) bf16

    # 2) Conv as 9 shifted matmuls; spatial axis on lanes; f32 accumulation.
    #    Output position m' = h*Wp + w needs input at m' + kh*Wp + kw.
    acc = jnp.zeros((Cout, L), jnp.float32)
    for kh in range(3):
        for kw in range(3):
            k = kh * 3 + kw
            s = kh * Wp + kw
            wk = w_ref[k]                            # (Cout, Cin) bf16
            xv = xp[:, s:s + L]                      # (Cin, L)    bf16
            if Cin == 1:
                # K=1 contraction -> plain VPU broadcast multiply-add.
                acc = acc + wk.astype(jnp.float32) * xv.astype(jnp.float32)
            else:
                acc = acc + jnp.dot(wk, xv, preferred_element_type=jnp.float32)

    # 3) Folded BatchNorm / bias + ReLU (f32 elementwise).
    y = jnp.maximum(acc + b_ref[...], 0.0)           # (Cout, L)

    # 4) Fused 2x2 max-pool: 4 shifted views -> max, then stride-2 selection
    #    expressed as a constant 0/1 matmul (no strided gather needed).
    t00 = y[:, 0:La]
    t01 = y[:, 1:1 + La]
    t10 = y[:, Wp:Wp + La]
    t11 = y[:, Wp + 1:Wp + 1 + La]
    pmax = jnp.maximum(jnp.maximum(t00, t01), jnp.maximum(t10, t11))  # (Cout, La)
    if La == 1 and HoWo == 1:
        pooled = pmax                                # degenerate 2x2 -> 1x1 case
    else:
        pooled = jnp.dot(pmax, s_ref[...], preferred_element_type=jnp.float32)
    o_ref[0] = pooled.astype(o_ref.dtype)            # (Cout, Ho*Wo)


def _pool_select_matrix(H, W, Wp):
    """S[m', j] = 1 iff anchor m' = 2*(j//Wo)*Wp + 2*(j%Wo)."""
    Ho, Wo = H // 2, W // 2
    La = (H - 2) * Wp + W - 1
    S = np.zeros((La, Ho * Wo), np.float32)
    for ho in range(Ho):
        for wo in range(Wo):
            S[2 * ho * Wp + 2 * wo, ho * Wo + wo] = 1.0
    return jnp.asarray(S)


def conv_bn_relu_pool(x_nchw, w9, b):
    """x: (N, Cin, H, W);  w9: (9, Cout, Cin) bf16 (BN folded);  b: (Cout, 1) f32.
       Returns (N, Cout, H//2, W//2) bf16 in NCHW order."""
    N, Cin, H, W = x_nchw.shape
    Cout = w9.shape[1]
    Hp, Wp = H + 2, W + 2
    L = (H - 1) * Wp + W                 # lane extent of the conv output slab
    La = (H - 2) * Wp + W - 1            # lane extent of pooling anchors
    Ho, Wo = H // 2, W // 2
    S = _pool_select_matrix(H, W, Wp)

    kernel = functools.partial(_conv_bn_relu_pool_kernel,
                               H=H, W=W, Wp=Wp, L=L, La=La, HoWo=Ho * Wo)
    out = pl.pallas_call(
        kernel,
        out_shape=jax.ShapeDtypeStruct((N, Cout, Ho * Wo), jnp.bfloat16),
        grid=(N,),
        in_specs=[
            pl.BlockSpec((1, Cin, H, W), lambda n: (n, 0, 0, 0)),
            pl.BlockSpec((9, Cout, Cin), lambda n: (0, 0, 0)),
            pl.BlockSpec((Cout, 1), lambda n: (0, 0)),
            pl.BlockSpec((La, Ho * Wo), lambda n: (0, 0)),
        ],
        out_specs=pl.BlockSpec((1, Cout, Ho * Wo), lambda n: (n, 0, 0)),
        scratch_shapes=[pltpu.VMEM((Cin, Hp * Wp), jnp.bfloat16)],
        compiler_params=pltpu.CompilerParams(dimension_semantics=("parallel",)),
    )(x_nchw, w9, b, S)
    return out.reshape(N, Cout, Ho, Wo)


# ----------------------------------------------------------------------------
# Gridded dense (matmul + bias + activation) kernel for fc1 / fc3
# ----------------------------------------------------------------------------
def _dense_kernel(x_ref, w_ref, b_ref, o_ref, acc_ref, *, act):
    k = pl.program_id(2)

    @pl.when(k == 0)
    def _():
        acc_ref[...] = jnp.zeros_like(acc_ref)

    acc_ref[...] += jnp.dot(x_ref[...], w_ref[...],
                            preferred_element_type=jnp.float32)

    @pl.when(k == pl.num_programs(2) - 1)
    def _():
        y = acc_ref[...] + b_ref[...]
        if act == "relu":
            y = jnp.maximum(y, 0.0)
        elif act == "sigmoid":
            y = jax.nn.sigmoid(y)
        o_ref[...] = y.astype(o_ref.dtype)


def dense(x, w, b, *, act, out_dtype, tn=512, tk=512):
    """x: (M, K) bf16, w: (K, Nf) bf16, b: (1, Nf) f32.  Output (M, Nf)."""
    M, K = x.shape
    Nf = w.shape[1]
    tm = M                               # batch rows are small; keep them whole
    tn = min(tn, Nf)
    tk = min(tk, K)
    assert Nf % tn == 0 and K % tk == 0
    grid = (M // tm, Nf // tn, K // tk)
    return pl.pallas_call(
        functools.partial(_dense_kernel, act=act),
        out_shape=jax.ShapeDtypeStruct((M, Nf), out_dtype),
        grid=grid,
        in_specs=[
            pl.BlockSpec((tm, tk), lambda i, j, k: (i, k)),
            pl.BlockSpec((tk, tn), lambda i, j, k: (k, j)),
            pl.BlockSpec((1, tn), lambda i, j, k: (0, j)),
        ],
        out_specs=pl.BlockSpec((tm, tn), lambda i, j, k: (i, j)),
        scratch_shapes=[pltpu.VMEM((tm, tn), jnp.float32)],
        compiler_params=pltpu.CompilerParams(
            dimension_semantics=("parallel", "parallel", "arbitrary")),
    )(x, w, b)


# ----------------------------------------------------------------------------
# LSTM kernel (PyTorch gate order i, f, g, o; zero initial state; f32 math)
# ----------------------------------------------------------------------------
def _lstm_kernel(x_ref, wih_ref, whh_ref, b_ref, o_ref, *, T, D):
    """x_ref: (B, T, D)   wih/whh: (D, 4D) f32   b: (1, 4D) f32   o_ref: (B, T*D)."""
    B = x_ref.shape[0]
    x = x_ref[...].astype(jnp.float32)
    wih = wih_ref[...]
    whh = whh_ref[...]
    b = b_ref[...]
    h = jnp.zeros((B, D), jnp.float32)
    c = jnp.zeros((B, D), jnp.float32)
    hs = []
    for t in range(T):                   # T is tiny & static -> unrolled
        xt = x[:, t, :]                  # (B, D)
        g = (jnp.dot(xt, wih, preferred_element_type=jnp.float32)
             + jnp.dot(h, whh, preferred_element_type=jnp.float32) + b)
        i = jax.nn.sigmoid(g[:, 0 * D:1 * D])
        f = jax.nn.sigmoid(g[:, 1 * D:2 * D])
        gg = jnp.tanh(g[:, 2 * D:3 * D])
        o = jax.nn.sigmoid(g[:, 3 * D:4 * D])
        c = f * c + i * gg
        h = o * jnp.tanh(c)
        hs.append(h)
    # Single batched store instead of T tiny masked per-step stores.
    o_ref[...] = jnp.concatenate(hs, axis=-1).astype(o_ref.dtype)


def lstm_forward(x_btd, wih, whh, b):
    B, T, D = x_btd.shape
    out = pl.pallas_call(
        functools.partial(_lstm_kernel, T=T, D=D),
        out_shape=jax.ShapeDtypeStruct((B, T * D), jnp.bfloat16),
        in_specs=[VMEM_SPEC] * 4,
        out_specs=VMEM_SPEC,
    )(x_btd, wih, whh, b)
    return out                           # (B, T*D); reshape is free (contiguous)


# ----------------------------------------------------------------------------
# Parameter construction (deterministic, synthetic; BN folded at build time)
# ----------------------------------------------------------------------------
def make_params(key, features_dim, out_num):
    H, W = features_dim
    assert H % 16 == 0 and W % 16 == 0, "features_dim must be divisible by 16"
    keys = iter(jax.random.split(key, 64))

    def nrm(shape, s=0.1):
        return s * jax.random.normal(next(keys), shape, dtype=jnp.float32)

    params = {}
    conv_cfgs = [("layer1", 1, 8, True),
                 ("layer2", 8, 16, True),
                 ("layer3", 16, 32, True),
                 ("layer4", 32, 32, False)]
    for name, cin, cout, has_bn in conv_cfgs:
        w = nrm((cout, cin, 3, 3))
        b = nrm((cout,))
        if has_bn:
            gamma = 1.0 + nrm((cout,), 0.05)
            beta = nrm((cout,), 0.05)
            mean = nrm((cout,), 0.05)
            var = jnp.abs(1.0 + nrm((cout,), 0.05))
            scale = gamma / jnp.sqrt(var + EPS)
            shift = beta - mean * scale
        else:
            scale = jnp.ones((cout,), jnp.float32)
            shift = jnp.zeros((cout,), jnp.float32)
        # Fold BN into weight & bias: y = conv(x; w*scale) + (b*scale + shift)
        wf = w * scale[:, None, None, None]
        bf = b * scale + shift
        # (Cout, Cin, kh, kw) -> (kh*3+kw, Cout, Cin), bf16 for the MXU.
        w9 = jnp.transpose(wf, (2, 3, 0, 1)).reshape(9, cout, cin)
        params[name] = dict(w=w9.astype(jnp.bfloat16),
                            b=bf.reshape(cout, 1).astype(jnp.float32))

    D = W // 8
    params["lstm"] = dict(wih=nrm((D, 4 * D)),
                          whh=nrm((D, 4 * D)),
                          b=nrm((1, 4 * D)))        # b_ih + b_hh combined

    fc1_in = 32 * (H // 16) * (W // 16)
    params["fc1"] = dict(w=nrm((fc1_in, 2048)).astype(jnp.bfloat16),
                         b=nrm((1, 2048)))

    out_pad = ((out_num + 127) // 128) * 128        # lane-dense fc3 output
    w3 = nrm((2048, out_num))
    b3 = nrm((1, out_num))
    w3p = jnp.zeros((2048, out_pad), jnp.float32).at[:, :out_num].set(w3)
    b3p = jnp.zeros((1, out_pad), jnp.float32).at[:, :out_num].set(b3)
    params["fc3"] = dict(w=w3p.astype(jnp.bfloat16), b=b3p)
    return params


# ----------------------------------------------------------------------------
# Full forward pass (eval semantics: BN folded, Dropout identity)
# ----------------------------------------------------------------------------
def orchmatchnet_forward(x_nchw, params, out_num):
    N = x_nchw.shape[0]
    h = x_nchw
    for name in ("layer1", "layer2", "layer3"):
        p = params[name]
        h = conv_bn_relu_pool(h, p["w"], p["b"])     # (N, C, H/2, W/2) bf16, NCHW

    _, C3, Hh, Ww = h.shape                          # (N, 32, H//8, W//8)
    # PyTorch: out.view(-1, Hh, Ww) on NCHW memory -> free reshape (no transpose)
    seq = h.reshape(N * C3, Hh, Ww)
    lp = params["lstm"]
    seq = lstm_forward(seq, lp["wih"], lp["whh"], lp["b"])   # (N*32, Hh*Ww)
    h = seq.reshape(N, C3, Hh, Ww)                   # out.view(-1, 32, Hh, Ww)

    p = params["layer4"]                             # conv + relu + pool (+dropout=id)
    h = conv_bn_relu_pool(h, p["w"], p["b"])         # (N, 32, Hh//2, Ww//2)

    flat = h.reshape(N, -1)                          # NCHW flatten, no transpose
    h1 = dense(flat, params["fc1"]["w"], params["fc1"]["b"],
               act="relu", out_dtype=jnp.bfloat16)
    y = dense(h1, params["fc3"]["w"], params["fc3"]["b"],
              act="sigmoid", out_dtype=jnp.float32)
    return y[:, :out_num]                            # drop lane padding


if __name__ == "__main__":
    key = jax.random.PRNGKey(0)
    k_x, k_p = jax.random.split(key)

    features_dim = (16, 16)   # (H, W), divisible by 16
    out_num = 10
    batch = 2

    x = jax.random.normal(k_x, (batch, 1, features_dim[0], features_dim[1]),
                          dtype=jnp.float32)
    params = make_params(k_p, features_dim, out_num)

    fwd = jax.jit(functools.partial(orchmatchnet_forward,
                                    params=params, out_num=out_num))
    out = jax.block_until_ready(fwd(x))

    assert out.shape == (batch, out_num), out.shape
    assert bool(jnp.all(jnp.isfinite(out)))
    assert bool(jnp.all((out >= 0.0) & (out <= 1.0)))
    print("KERNEL_OK")
</pallas_src>

<mosaic_0001>
module attributes {stable_mosaic.version = 11 : i64} {
  func.func @_conv_bn_relu_pool_kernel(%arg0: i32, %arg1: memref<1x8x8x8xbf16, #tpu.memory_space<vmem>>, %arg2: memref<9x16x8xbf16, #tpu.memory_space<vmem>>, %arg3: memref<16x1xf32, #tpu.memory_space<vmem>>, %arg4: memref<67x16xf32, #tpu.memory_space<vmem>>, %arg5: memref<1x16x16xbf16, #tpu.memory_space<vmem>>, %arg6: memref<8x100xbf16, #tpu.memory_space<vmem>>) attributes {dimension_semantics = [#tpu.dimension_semantics<parallel>], iteration_bounds = array<i64: 2>, scalar_prefetch = 0 : i64, scratch_operands = 1 : i64, tpu.core_type = #tpu.core_type<tc>, window_params = [{transform_indices = @transform_0, window_bounds = array<i64: 1, 8, 8, 8>}, {pipeline_mode = #tpu.pipeline_mode<synchronous>, transform_indices = @transform_1, window_bounds = array<i64: 9, 16, 8>}, {pipeline_mode = #tpu.pipeline_mode<synchronous>, transform_indices = @transform_2, window_bounds = array<i64: 16, 1>}, {pipeline_mode = #tpu.pipeline_mode<synchronous>, transform_indices = @transform_3, window_bounds = array<i64: 67, 16>}, {transform_indices = @transform_4, window_bounds = array<i64: 1, 16, 16>}]} {
    %cst = arith.constant 0.000000e+00 : bf16
    %0 = vector.broadcast %cst : bf16 to vector<8x100xbf16>
    %c0 = arith.constant 0 : index
    %c0_0 = arith.constant 0 : index
    %1 = vector.load %arg6[%c0, %c0_0] : memref<8x100xbf16, #tpu.memory_space<vmem>>, vector<8x100xbf16>
    tpu.vector_store %arg6[%c0, %c0_0], %0 {strides = array<i32>} : memref<8x100xbf16, #tpu.memory_space<vmem>>, vector<8x100xbf16>,
    %c0_1 = arith.constant 0 : index
    %c0_2 = arith.constant 0 : index
    %c0_3 = arith.constant 0 : index
    %c0_4 = arith.constant 0 : index
    %2 = vector.load %arg1[%c0_1, %c0_2, %c0_3, %c0_4] : memref<1x8x8x8xbf16, #tpu.memory_space<vmem>>, vector<1x8x8x8xbf16>
    %3 = vector.shape_cast %2 : vector<1x8x8x8xbf16> to vector<8x8x8xbf16>
    %4 = vector.extract_strided_slice %3 {offsets = [0, 0, 0], sizes = [8, 1, 8], strides = [1, 1, 1]} : vector<8x8x8xbf16> to vector<8x1x8xbf16>
    %5 = vector.shape_cast %4 : vector<8x1x8xbf16> to vector<8x8xbf16>
    %c0_5 = arith.constant 0 : index
    %c11 = arith.constant 11 : index
    %6 = vector.load %arg6[%c0_5, %c11] : memref<8x100xbf16, #tpu.memory_space<vmem>>, vector<8x8xbf16>
    tpu.vector_store %arg6[%c0_5, %c11], %5 {strides = array<i32>} : memref<8x100xbf16, #tpu.memory_space<vmem>>, vector<8x8xbf16>,
    %7 = vector.extract_strided_slice %3 {offsets = [0, 1, 0], sizes = [8, 1, 8], strides = [1, 1, 1]} : vector<8x8x8xbf16> to vector<8x1x8xbf16>
    %8 = vector.shape_cast %7 : vector<8x1x8xbf16> to vector<8x8xbf16>
    %c0_6 = arith.constant 0 : index
    %c21 = arith.constant 21 : index
    %9 = vector.load %arg6[%c0_6, %c21] : memref<8x100xbf16, #tpu.memory_space<vmem>>, vector<8x8xbf16>
    tpu.vector_store %arg6[%c0_6, %c21], %8 {strides = array<i32>} : memref<8x100xbf16, #tpu.memory_space<vmem>>, vector<8x8xbf16>,
    %10 = vector.extract_strided_slice %3 {offsets = [0, 2, 0], sizes = [8, 1, 8], strides = [1, 1, 1]} : vector<8x8x8xbf16> to vector<8x1x8xbf16>
    %11 = vector.shape_cast %10 : vector<8x1x8xbf16> to vector<8x8xbf16>
    %c0_7 = arith.constant 0 : index
    %c31 = arith.constant 31 : index
    %12 = vector.load %arg6[%c0_7, %c31] : memref<8x100xbf16, #tpu.memory_space<vmem>>, vector<8x8xbf16>
    tpu.vector_store %arg6[%c0_7, %c31], %11 {strides = array<i32>} : memref<8x100xbf16, #tpu.memory_space<vmem>>, vector<8x8xbf16>,
    %13 = vector.extract_strided_slice %3 {offsets = [0, 3, 0], sizes = [8, 1, 8], strides = [1, 1, 1]} : vector<8x8x8xbf16> to vector<8x1x8xbf16>
    %14 = vector.shape_cast %13 : vector<8x1x8xbf16> to vector<8x8xbf16>
    %c0_8 = arith.constant 0 : index
    %c41 = arith.constant 41 : index
    %15 = vector.load %arg6[%c0_8, %c41] : memref<8x100xbf16, #tpu.memory_space<vmem>>, vector<8x8xbf16>
    tpu.vector_store %arg6[%c0_8, %c41], %14 {strides = array<i32>} : memref<8x100xbf16, #tpu.memory_space<vmem>>, vector<8x8xbf16>,
    %16 = vector.extract_strided_slice %3 {offsets = [0, 4, 0], sizes = [8, 1, 8], strides = [1, 1, 1]} : vector<8x8x8xbf16> to vector<8x1x8xbf16>
    %17 = vector.shape_cast %16 : vector<8x1x8xbf16> to vector<8x8xbf16>
    %c0_9 = arith.constant 0 : index
    %c51 = arith.constant 51 : index
    %18 = vector.load %arg6[%c0_9, %c51] : memref<8x100xbf16, #tpu.memory_space<vmem>>, vector<8x8xbf16>
    tpu.vector_store %arg6[%c0_9, %c51], %17 {strides = array<i32>} : memref<8x100xbf16, #tpu.memory_space<vmem>>, vector<8x8xbf16>,
    %19 = vector.extract_strided_slice %3 {offsets = [0, 5, 0], sizes = [8, 1, 8], strides = [1, 1, 1]} : vector<8x8x8xbf16> to vector<8x1x8xbf16>
    %20 = vector.shape_cast %19 : vector<8x1x8xbf16> to vector<8x8xbf16>
    %c0_10 = arith.constant 0 : index
    %c61 = arith.constant 61 : index
    %21 = vector.load %arg6[%c0_10, %c61] : memref<8x100xbf16, #tpu.memory_space<vmem>>, vector<8x8xbf16>
    tpu.vector_store %arg6[%c0_10, %c61], %20 {strides = array<i32>} : memref<8x100xbf16, #tpu.memory_space<vmem>>, vector<8x8xbf16>,
    %22 = vector.extract_strided_slice %3 {offsets = [0, 6, 0], sizes = [8, 1, 8], strides = [1, 1, 1]} : vector<8x8x8xbf16> to vector<8x1x8xbf16>
    %23 = vector.shape_cast %22 : vector<8x1x8xbf16> to vector<8x8xbf16>
    %c0_11 = arith.constant 0 : index
    %c71 = arith.constant 71 : index
    %24 = vector.load %arg6[%c0_11, %c71] : memref<8x100xbf16, #tpu.memory_space<vmem>>, vector<8x8xbf16>
    tpu.vector_store %arg6[%c0_11, %c71], %23 {strides = array<i32>} : memref<8x100xbf16, #tpu.memory_space<vmem>>, vector<8x8xbf16>,
    %25 = vector.extract_strided_slice %3 {offsets = [0, 7, 0], sizes = [8, 1, 8], strides = [1, 1, 1]} : vector<8x8x8xbf16> to vector<8x1x8xbf16>
    %26 = vector.shape_cast %25 : vector<8x1x8xbf16> to vector<8x8xbf16>
    %c0_12 = arith.constant 0 : index
    %c81 = arith.constant 81 : index
    %27 = vector.load %arg6[%c0_12, %c81] : memref<8x100xbf16, #tpu.memory_space<vmem>>, vector<8x8xbf16>
    tpu.vector_store %arg6[%c0_12, %c81], %26 {strides = array<i32>} : memref<8x100xbf16, #tpu.memory_space<vmem>>, vector<8x8xbf16>,
    %c0_13 = arith.constant 0 : index
    %c0_14 = arith.constant 0 : index
    %28 = vector.load %arg6[%c0_13, %c0_14] : memref<8x100xbf16, #tpu.memory_space<vmem>>, vector<8x100xbf16>
    %cst_15 = arith.constant 0.000000e+00 : f32
    %29 = vector.broadcast %cst_15 : f32 to vector<16x78xf32>
    %c0_16 = arith.constant 0 : index
    %c0_17 = arith.constant 0 : index
    %c0_18 = arith.constant 0 : index
    %30 = vector.load %arg2[%c0_16, %c0_17, %c0_18] : memref<9x16x8xbf16, #tpu.memory_space<vmem>>, vector<1x16x8xbf16>
    %31 = vector.shape_cast %30 : vector<1x16x8xbf16> to vector<16x8xbf16>
    %32 = vector.extract_strided_slice %28 {offsets = [0, 0], sizes = [8, 78], strides = [1, 1]} : vector<8x100xbf16> to vector<8x78xbf16>
    %cst_19 = arith.constant dense<0.000000e+00> : vector<16x78xf32>
    %33 = tpu.matmul %31, %32, %cst_19 {dimension_numbers = #tpu.dot_dimension_numbers<[1], [0], [0], [1], [0, 0, 1, 1], [], []>} : vector<16x8xbf16>, vector<8x78xbf16>, vector<16x78xf32> -> vector<16x78xf32>
    %34 = arith.addf %29, %33 : vector<16x78xf32>
    %c1 = arith.constant 1 : index
    %c0_20 = arith.constant 0 : index
    %c0_21 = arith.constant 0 : index
    %35 = vector.load %arg2[%c1, %c0_20, %c0_21] : memref<9x16x8xbf16, #tpu.memory_space<vmem>>, vector<1x16x8xbf16>
    %36 = vector.shape_cast %35 : vector<1x16x8xbf16> to vector<16x8xbf16>
    %37 = vector.extract_strided_slice %28 {offsets = [0, 1], sizes = [8, 78], strides = [1, 1]} : vector<8x100xbf16> to vector<8x78xbf16>
    %cst_22 = arith.constant dense<0.000000e+00> : vector<16x78xf32>
    %38 = tpu.matmul %36, %37, %cst_22 {dimension_numbers = #tpu.dot_dimension_numbers<[1], [0], [0], [1], [0, 0, 1, 1], [], []>} : vector<16x8xbf16>, vector<8x78xbf16>, vector<16x78xf32> -> vector<16x78xf32>
    %39 = arith.addf %34, %38 : vector<16x78xf32>
    %c2 = arith.constant 2 : index
    %c0_23 = arith.constant 0 : index
    %c0_24 = arith.constant 0 : index
    %40 = vector.load %arg2[%c2, %c0_23, %c0_24] : memref<9x16x8xbf16, #tpu.memory_space<vmem>>, vector<1x16x8xbf16>
    %41 = vector.shape_cast %40 : vector<1x16x8xbf16> to vector<16x8xbf16>
    %42 = vector.extract_strided_slice %28 {offsets = [0, 2], sizes = [8, 78], strides = [1, 1]} : vector<8x100xbf16> to vector<8x78xbf16>
    %cst_25 = arith.constant dense<0.000000e+00> : vector<16x78xf32>
    %43 = tpu.matmul %41, %42, %cst_25 {dimension_numbers = #tpu.dot_dimension_numbers<[1], [0], [0], [1], [0, 0, 1, 1], [], []>} : vector<16x8xbf16>, vector<8x78xbf16>, vector<16x78xf32> -> vector<16x78xf32>
    %44 = arith.addf %39, %43 : vector<16x78xf32>
    %c3 = arith.constant 3 : index
    %c0_26 = arith.constant 0 : index
    %c0_27 = arith.constant 0 : index
    %45 = vector.load %arg2[%c3, %c0_26, %c0_27] : memref<9x16x8xbf16, #tpu.memory_space<vmem>>, vector<1x16x8xbf16>
    %46 = vector.shape_cast %45 : vector<1x16x8xbf16> to vector<16x8xbf16>
    %47 = vector.extract_strided_slice %28 {offsets = [0, 10], sizes = [8, 78], strides = [1, 1]} : vector<8x100xbf16> to vector<8x78xbf16>
    %cst_28 = arith.constant dense<0.000000e+00> : vector<16x78xf32>
    %48 = tpu.matmul %46, %47, %cst_28 {dimension_numbers = #tpu.dot_dimension_numbers<[1], [0], [0], [1], [0, 0, 1, 1], [], []>} : vector<16x8xbf16>, vector<8x78xbf16>, vector<16x78xf32> -> vector<16x78xf32>
    %49 = arith.addf %44, %48 : vector<16x78xf32>
    %c4 = arith.constant 4 : index
    %c0_29 = arith.constant 0 : index
    %c0_30 = arith.constant 0 : index
    %50 = vector.load %arg2[%c4, %c0_29, %c0_30] : memref<9x16x8xbf16, #tpu.memory_space<vmem>>, vector<1x16x8xbf16>
    %51 = vector.shape_cast %50 : vector<1x16x8xbf16> to vector<16x8xbf16>
    %52 = vector.extract_strided_slice %28 {offsets = [0, 11], sizes = [8, 78], strides = [1, 1]} : vector<8x100xbf16> to vector<8x78xbf16>
    %cst_31 = arith.constant dense<0.000000e+00> : vector<16x78xf32>
    %53 = tpu.matmul %51, %52, %cst_31 {dimension_numbers = #tpu.dot_dimension_numbers<[1], [0], [0], [1], [0, 0, 1, 1], [], []>} : vector<16x8xbf16>, vector<8x78xbf16>, vector<16x78xf32> -> vector<16x78xf32>
    %54 = arith.addf %49, %53 : vector<16x78xf32>
    %c5 = arith.constant 5 : index
    %c0_32 = arith.constant 0 : index
    %c0_33 = arith.constant 0 : index
    %55 = vector.load %arg2[%c5, %c0_32, %c0_33] : memref<9x16x8xbf16, #tpu.memory_space<vmem>>, vector<1x16x8xbf16>
    %56 = vector.shape_cast %55 : vector<1x16x8xbf16> to vector<16x8xbf16>
    %57 = vector.extract_strided_slice %28 {offsets = [0, 12], sizes = [8, 78], strides = [1, 1]} : vector<8x100xbf16> to vector<8x78xbf16>
    %cst_34 = arith.constant dense<0.000000e+00> : vector<16x78xf32>
    %58 = tpu.matmul %56, %57, %cst_34 {dimension_numbers = #tpu.dot_dimension_numbers<[1], [0], [0], [1], [0, 0, 1, 1], [], []>} : vector<16x8xbf16>, vector<8x78xbf16>, vector<16x78xf32> -> vector<16x78xf32>
    %59 = arith.addf %54, %58 : vector<16x78xf32>
    %c6 = arith.constant 6 : index
    %c0_35 = arith.constant 0 : index
    %c0_36 = arith.constant 0 : index
    %60 = vector.load %arg2[%c6, %c0_35, %c0_36] : memref<9x16x8xbf16, #tpu.memory_space<vmem>>, vector<1x16x8xbf16>
    %61 = vector.shape_cast %60 : vector<1x16x8xbf16> to vector<16x8xbf16>
    %62 = vector.extract_strided_slice %28 {offsets = [0, 20], sizes = [8, 78], strides = [1, 1]} : vector<8x100xbf16> to vector<8x78xbf16>
    %cst_37 = arith.constant dense<0.000000e+00> : vector<16x78xf32>
    %63 = tpu.matmul %61, %62, %cst_37 {dimension_numbers = #tpu.dot_dimension_numbers<[1], [0], [0], [1], [0, 0, 1, 1], [], []>} : vector<16x8xbf16>, vector<8x78xbf16>, vector<16x78xf32> -> vector<16x78xf32>
    %64 = arith.addf %59, %63 : vector<16x78xf32>
    %c7 = arith.constant 7 : index
    %c0_38 = arith.constant 0 : index
    %c0_39 = arith.constant 0 : index
    %65 = vector.load %arg2[%c7, %c0_38, %c0_39] : memref<9x16x8xbf16, #tpu.memory_space<vmem>>, vector<1x16x8xbf16>
    %66 = vector.shape_cast %65 : vector<1x16x8xbf16> to vector<16x8xbf16>
    %67 = vector.extract_strided_slice %28 {offsets = [0, 21], sizes = [8, 78], strides = [1, 1]} : vector<8x100xbf16> to vector<8x78xbf16>
    %cst_40 = arith.constant dense<0.000000e+00> : vector<16x78xf32>
    %68 = tpu.matmul %66, %67, %cst_40 {dimension_numbers = #tpu.dot_dimension_numbers<[1], [0], [0], [1], [0, 0, 1, 1], [], []>} : vector<16x8xbf16>, vector<8x78xbf16>, vector<16x78xf32> -> vector<16x78xf32>
    %69 = arith.addf %64, %68 : vector<16x78xf32>
    %c8 = arith.constant 8 : index
    %c0_41 = arith.constant 0 : index
    %c0_42 = arith.constant 0 : index
    %70 = vector.load %arg2[%c8, %c0_41, %c0_42] : memref<9x16x8xbf16, #tpu.memory_space<vmem>>, vector<1x16x8xbf16>
    %71 = vector.shape_cast %70 : vector<1x16x8xbf16> to vector<16x8xbf16>
    %72 = vector.extract_strided_slice %28 {offsets = [0, 22], sizes = [8, 78], strides = [1, 1]} : vector<8x100xbf16> to vector<8x78xbf16>
    %cst_43 = arith.constant dense<0.000000e+00> : vector<16x78xf32>
    %73 = tpu.matmul %71, %72, %cst_43 {dimension_numbers = #tpu.dot_dimension_numbers<[1], [0], [0], [1], [0, 0, 1, 1], [], []>} : vector<16x8xbf16>, vector<8x78xbf16>, vector<16x78xf32> -> vector<16x78xf32>
    %74 = arith.addf %69, %73 : vector<16x78xf32>
    %c0_44 = arith.constant 0 : index
    %c0_45 = arith.constant 0 : index
    %75 = vector.load %arg3[%c0_44, %c0_45] : memref<16x1xf32, #tpu.memory_space<vmem>>, vector<16x1xf32>
    %76 = vector.broadcast %75 : vector<16x1xf32> to vector<16x78xf32>
    %77 = arith.addf %74, %76 : vector<16x78xf32>
    %cst_46 = arith.constant 0.000000e+00 : f32
    %78 = vector.broadcast %cst_46 : f32 to vector<16x78xf32>
    %79 = arith.maximumf %77, %78 : vector<16x78xf32>
    %80 = vector.extract_strided_slice %79 {offsets = [0, 0], sizes = [16, 67], strides = [1, 1]} : vector<16x78xf32> to vector<16x67xf32>
    %81 = vector.extract_strided_slice %79 {offsets = [0, 1], sizes = [16, 67], strides = [1, 1]} : vector<16x78xf32> to vector<16x67xf32>
    %82 = vector.extract_strided_slice %79 {offsets = [0, 10], sizes = [16, 67], strides = [1, 1]} : vector<16x78xf32> to vector<16x67xf32>
    %83 = vector.extract_strided_slice %79 {offsets = [0, 11], sizes = [16, 67], strides = [1, 1]} : vector<16x78xf32> to vector<16x67xf32>
    %84 = arith.maximumf %80, %81 : vector<16x67xf32>
    %85 = arith.maximumf %82, %83 : vector<16x67xf32>
    %86 = arith.maximumf %84, %85 : vector<16x67xf32>
    %c0_47 = arith.constant 0 : index
    %c0_48 = arith.constant 0 : index
    %87 = vector.load %arg4[%c0_47, %c0_48] : memref<67x16xf32, #tpu.memory_space<vmem>>, vector<67x16xf32>
    %cst_49 = arith.constant dense<0.000000e+00> : vector<16x16xf32>
    %88 = tpu.matmul %86, %87, %cst_49 {dimension_numbers = #tpu.dot_dimension_numbers<[1], [0], [0], [1], [0, 0, 1, 1], [], []>} : vector<16x67xf32>, vector<67x16xf32>, vector<16x16xf32> -> vector<16x16xf32>
    %89 = arith.truncf %88 : vector<16x16xf32> to vector<16x16xbf16>
    %c0_50 = arith.constant 0 : index
    %c0_51 = arith.constant 0 : index
    %c0_52 = arith.constant 0 : index
    %90 = vector.load %arg5[%c0_50, %c0_51, %c0_52] : memref<1x16x16xbf16, #tpu.memory_space<vmem>>, vector<1x16x16xbf16>
    %91 = vector.shape_cast %90 : vector<1x16x16xbf16> to vector<16x16xbf16>
    %92 = vector.shape_cast %89 : vector<16x16xbf16> to vector<1x16x16xbf16>
    tpu.vector_store %arg5[%c0_50, %c0_51, %c0_52], %92 {strides = array<i32>} : memref<1x16x16xbf16, #tpu.memory_space<vmem>>, vector<1x16x16xbf16>,
    return
  }
  func.func @transform_0(%arg0: i32) -> (i32, i32, i32, i32) {
    %c0_i32 = arith.constant 0 : i32
    %c0_i32_0 = arith.constant 0 : i32
    %c0_i32_1 = arith.constant 0 : i32
    %c0_i32_2 = arith.constant 0 : i32
    return %arg0, %c0_i32, %c0_i32_0, %c0_i32_1 : i32, i32, i32, i32
  }
  func.func @transform_1(%arg0: i32) -> (i32, i32, i32) {
    %c0_i32 = arith.constant 0 : i32
    %c0_i32_0 = arith.constant 0 : i32
    %c0_i32_1 = arith.constant 0 : i32
    %c0_i32_2 = arith.constant 0 : i32
    return %c0_i32, %c0_i32_0, %c0_i32_1 : i32, i32, i32
  }
  func.func @transform_2(%arg0: i32) -> (i32, i32) {
    %c0_i32 = arith.constant 0 : i32
    %c0_i32_0 = arith.constant 0 : i32
    %c0_i32_1 = arith.constant 0 : i32
    return %c0_i32, %c0_i32_0 : i32, i32
  }
  func.func @transform_3(%arg0: i32) -> (i32, i32) {
    %c0_i32 = arith.constant 0 : i32
    %c0_i32_0 = arith.constant 0 : i32
    %c0_i32_1 = arith.constant 0 : i32
    return %c0_i32, %c0_i32_0 : i32, i32
  }
  func.func @transform_4(%arg0: i32) -> (i32, i32, i32) {
    %c0_i32 = arith.constant 0 : i32
    %c0_i32_0 = arith.constant 0 : i32
    %c0_i32_1 = arith.constant 0 : i32
    return %arg0, %c0_i32, %c0_i32_0 : i32, i32, i32
  }
}

module attributes {stable_mosaic.version = 11 : i64} {
  func.func @_conv_bn_relu_pool_kernel(%arg0: i32, %arg1: memref<1x1x16x16xf32, #tpu.memory_space<vmem>>, %arg2: memref<9x8x1xbf16, #tpu.memory_space<vmem>>, %arg3: memref<8x1xf32, #tpu.memory_space<vmem>>, %arg4: memref<267x64xf32, #tpu.memory_space<vmem>>, %arg5: memref<1x8x64xbf16, #tpu.memory_space<vmem>>, %arg6: memref<1x324xbf16, #tpu.memory_space<vmem>>) attributes {dimension_semantics = [#tpu.dimension_semantics<parallel>], iteration_bounds = array<i64: 2>, scalar_prefetch = 0 : i64, scratch_operands = 1 : i64, tpu.core_type = #tpu.core_type<tc>, window_params = [{transform_indices = @transform_0, window_bounds = array<i64: 1, 1, 16, 16>}, {pipeline_mode = #tpu.pipeline_mode<synchronous>, transform_indices = @transform_1, window_bounds = array<i64: 9, 8, 1>}, {pipeline_mode = #tpu.pipeline_mode<synchronous>, transform_indices = @transform_2, window_bounds = array<i64: 8, 1>}, {pipeline_mode = #tpu.pipeline_mode<synchronous>, transform_indices = @transform_3, window_bounds = array<i64: 267, 64>}, {transform_indices = @transform_4, window_bounds = array<i64: 1, 8, 64>}]} {
    %cst = arith.constant 0.000000e+00 : bf16
    %0 = vector.broadcast %cst : bf16 to vector<1x324xbf16>
    %c0 = arith.constant 0 : index
    %c0_0 = arith.constant 0 : index
    %1 = vector.load %arg6[%c0, %c0_0] : memref<1x324xbf16, #tpu.memory_space<vmem>>, vector<1x324xbf16>
    tpu.vector_store %arg6[%c0, %c0_0], %0 {strides = array<i32>} : memref<1x324xbf16, #tpu.memory_space<vmem>>, vector<1x324xbf16>,
    %c0_1 = arith.constant 0 : index
    %c0_2 = arith.constant 0 : index
    %c0_3 = arith.constant 0 : index
    %c0_4 = arith.constant 0 : index
    %2 = vector.load %arg1[%c0_1, %c0_2, %c0_3, %c0_4] : memref<1x1x16x16xf32, #tpu.memory_space<vmem>>, vector<1x1x16x16xf32>
    %3 = vector.shape_cast %2 : vector<1x1x16x16xf32> to vector<1x16x16xf32>
    %4 = vector.extract_strided_slice %3 {offsets = [0, 0, 0], sizes = [1, 1, 16], strides = [1, 1, 1]} : vector<1x16x16xf32> to vector<1x1x16xf32>
    %5 = vector.shape_cast %4 : vector<1x1x16xf32> to vector<1x16xf32>
    %6 = arith.truncf %5 : vector<1x16xf32> to vector<1x16xbf16>
    %c0_5 = arith.constant 0 : index
    %c19 = arith.constant 19 : index
    %7 = vector.load %arg6[%c0_5, %c19] : memref<1x324xbf16, #tpu.memory_space<vmem>>, vector<1x16xbf16>
    tpu.vector_store %arg6[%c0_5, %c19], %6 {strides = array<i32>} : memref<1x324xbf16, #tpu.memory_space<vmem>>, vector<1x16xbf16>,
    %8 = vector.extract_strided_slice %3 {offsets = [0, 1, 0], sizes = [1, 1, 16], strides = [1, 1, 1]} : vector<1x16x16xf32> to vector<1x1x16xf32>
    %9 = vector.shape_cast %8 : vector<1x1x16xf32> to vector<1x16xf32>
    %10 = arith.truncf %9 : vector<1x16xf32> to vector<1x16xbf16>
    %c0_6 = arith.constant 0 : index
    %c37 = arith.constant 37 : index
    %11 = vector.load %arg6[%c0_6, %c37] : memref<1x324xbf16, #tpu.memory_space<vmem>>, vector<1x16xbf16>
    tpu.vector_store %arg6[%c0_6, %c37], %10 {strides = array<i32>} : memref<1x324xbf16, #tpu.memory_space<vmem>>, vector<1x16xbf16>,
    %12 = vector.extract_strided_slice %3 {offsets = [0, 2, 0], sizes = [1, 1, 16], strides = [1, 1, 1]} : vector<1x16x16xf32> to vector<1x1x16xf32>
    %13 = vector.shape_cast %12 : vector<1x1x16xf32> to vector<1x16xf32>
    %14 = arith.truncf %13 : vector<1x16xf32> to vector<1x16xbf16>
    %c0_7 = arith.constant 0 : index
    %c55 = arith.constant 55 : index
    %15 = vector.load %arg6[%c0_7, %c55] : memref<1x324xbf16, #tpu.memory_space<vmem>>, vector<1x16xbf16>
    tpu.vector_store %arg6[%c0_7, %c55], %14 {strides = array<i32>} : memref<1x324xbf16, #tpu.memory_space<vmem>>, vector<1x16xbf16>,
    %16 = vector.extract_strided_slice %3 {offsets = [0, 3, 0], sizes = [1, 1, 16], strides = [1, 1, 1]} : vector<1x16x16xf32> to vector<1x1x16xf32>
    %17 = vector.shape_cast %16 : vector<1x1x16xf32> to vector<1x16xf32>
    %18 = arith.truncf %17 : vector<1x16xf32> to vector<1x16xbf16>
    %c0_8 = arith.constant 0 : index
    %c73 = arith.constant 73 : index
    %19 = vector.load %arg6[%c0_8, %c73] : memref<1x324xbf16, #tpu.memory_space<vmem>>, vector<1x16xbf16>
    tpu.vector_store %arg6[%c0_8, %c73], %18 {strides = array<i32>} : memref<1x324xbf16, #tpu.memory_space<vmem>>, vector<1x16xbf16>,
    %20 = vector.extract_strided_slice %3 {offsets = [0, 4, 0], sizes = [1, 1, 16], strides = [1, 1, 1]} : vector<1x16x16xf32> to vector<1x1x16xf32>
    %21 = vector.shape_cast %20 : vector<1x1x16xf32> to vector<1x16xf32>
    %22 = arith.truncf %21 : vector<1x16xf32> to vector<1x16xbf16>
    %c0_9 = arith.constant 0 : index
    %c91 = arith.constant 91 : index
    %23 = vector.load %arg6[%c0_9, %c91] : memref<1x324xbf16, #tpu.memory_space<vmem>>, vector<1x16xbf16>
    tpu.vector_store %arg6[%c0_9, %c91], %22 {strides = array<i32>} : memref<1x324xbf16, #tpu.memory_space<vmem>>, vector<1x16xbf16>,
    %24 = vector.extract_strided_slice %3 {offsets = [0, 5, 0], sizes = [1, 1, 16], strides = [1, 1, 1]} : vector<1x16x16xf32> to vector<1x1x16xf32>
    %25 = vector.shape_cast %24 : vector<1x1x16xf32> to vector<1x16xf32>
    %26 = arith.truncf %25 : vector<1x16xf32> to vector<1x16xbf16>
    %c0_10 = arith.constant 0 : index
    %c109 = arith.constant 109 : index
    %27 = vector.load %arg6[%c0_10, %c109] : memref<1x324xbf16, #tpu.memory_space<vmem>>, vector<1x16xbf16>
    tpu.vector_store %arg6[%c0_10, %c109], %26 {strides = array<i32>} : memref<1x324xbf16, #tpu.memory_space<vmem>>, vector<1x16xbf16>,
    %28 = vector.extract_strided_slice %3 {offsets = [0, 6, 0], sizes = [1, 1, 16], strides = [1, 1, 1]} : vector<1x16x16xf32> to vector<1x1x16xf32>
    %29 = vector.shape_cast %28 : vector<1x1x16xf32> to vector<1x16xf32>
    %30 = arith.truncf %29 : vector<1x16xf32> to vector<1x16xbf16>
    %c0_11 = arith.constant 0 : index
    %c127 = arith.constant 127 : index
    %31 = vector.load %arg6[%c0_11, %c127] : memref<1x324xbf16, #tpu.memory_space<vmem>>, vector<1x16xbf16>
    tpu.vector_store %arg6[%c0_11, %c127], %30 {strides = array<i32>} : memref<1x324xbf16, #tpu.memory_space<vmem>>, vector<1x16xbf16>,
    %32 = vector.extract_strided_slice %3 {offsets = [0, 7, 0], sizes = [1, 1, 16], strides = [1, 1, 1]} : vector<1x16x16xf32> to vector<1x1x16xf32>
    %33 = vector.shape_cast %32 : vector<1x1x16xf32> to vector<1x16xf32>
    %34 = arith.truncf %33 : vector<1x16xf32> to vector<1x16xbf16>
    %c0_12 = arith.constant 0 : index
    %c145 = arith.constant 145 : index
    %35 = vector.load %arg6[%c0_12, %c145] : memref<1x324xbf16, #tpu.memory_space<vmem>>, vector<1x16xbf16>
    tpu.vector_store %arg6[%c0_12, %c145], %34 {strides = array<i32>} : memref<1x324xbf16, #tpu.memory_space<vmem>>, vector<1x16xbf16>,
    %36 = vector.extract_strided_slice %3 {offsets = [0, 8, 0], sizes = [1, 1, 16], strides = [1, 1, 1]} : vector<1x16x16xf32> to vector<1x1x16xf32>
    %37 = vector.shape_cast %36 : vector<1x1x16xf32> to vector<1x16xf32>
    %38 = arith.truncf %37 : vector<1x16xf32> to vector<1x16xbf16>
    %c0_13 = arith.constant 0 : index
    %c163 = arith.constant 163 : index
    %39 = vector.load %arg6[%c0_13, %c163] : memref<1x324xbf16, #tpu.memory_space<vmem>>, vector<1x16xbf16>
    tpu.vector_store %arg6[%c0_13, %c163], %38 {strides = array<i32>} : memref<1x324xbf16, #tpu.memory_space<vmem>>, vector<1x16xbf16>,
    %40 = vector.extract_strided_slice %3 {offsets = [0, 9, 0], sizes = [1, 1, 16], strides = [1, 1, 1]} : vector<1x16x16xf32> to vector<1x1x16xf32>
    %41 = vector.shape_cast %40 : vector<1x1x16xf32> to vector<1x16xf32>
    %42 = arith.truncf %41 : vector<1x16xf32> to vector<1x16xbf16>
    %c0_14 = arith.constant 0 : index
    %c181 = arith.constant 181 : index
    %43 = vector.load %arg6[%c0_14, %c181] : memref<1x324xbf16, #tpu.memory_space<vmem>>, vector<1x16xbf16>
    tpu.vector_store %arg6[%c0_14, %c181], %42 {strides = array<i32>} : memref<1x324xbf16, #tpu.memory_space<vmem>>, vector<1x16xbf16>,
    %44 = vector.extract_strided_slice %3 {offsets = [0, 10, 0], sizes = [1, 1, 16], strides = [1, 1, 1]} : vector<1x16x16xf32> to vector<1x1x16xf32>
    %45 = vector.shape_cast %44 : vector<1x1x16xf32> to vector<1x16xf32>
    %46 = arith.truncf %45 : vector<1x16xf32> to vector<1x16xbf16>
    %c0_15 = arith.constant 0 : index
    %c199 = arith.constant 199 : index
    %47 = vector.load %arg6[%c0_15, %c199] : memref<1x324xbf16, #tpu.memory_space<vmem>>, vector<1x16xbf16>
    tpu.vector_store %arg6[%c0_15, %c199], %46 {strides = array<i32>} : memref<1x324xbf16, #tpu.memory_space<vmem>>, vector<1x16xbf16>,
    %48 = vector.extract_strided_slice %3 {offsets = [0, 11, 0], sizes = [1, 1, 16], strides = [1, 1, 1]} : vector<1x16x16xf32> to vector<1x1x16xf32>
    %49 = vector.shape_cast %48 : vector<1x1x16xf32> to vector<1x16xf32>
    %50 = arith.truncf %49 : vector<1x16xf32> to vector<1x16xbf16>
    %c0_16 = arith.constant 0 : index
    %c217 = arith.constant 217 : index
    %51 = vector.load %arg6[%c0_16, %c217] : memref<1x324xbf16, #tpu.memory_space<vmem>>, vector<1x16xbf16>
    tpu.vector_store %arg6[%c0_16, %c217], %50 {strides = array<i32>} : memref<1x324xbf16, #tpu.memory_space<vmem>>, vector<1x16xbf16>,
    %52 = vector.extract_strided_slice %3 {offsets = [0, 12, 0], sizes = [1, 1, 16], strides = [1, 1, 1]} : vector<1x16x16xf32> to vector<1x1x16xf32>
    %53 = vector.shape_cast %52 : vector<1x1x16xf32> to vector<1x16xf32>
    %54 = arith.truncf %53 : vector<1x16xf32> to vector<1x16xbf16>
    %c0_17 = arith.constant 0 : index
    %c235 = arith.constant 235 : index
    %55 = vector.load %arg6[%c0_17, %c235] : memref<1x324xbf16, #tpu.memory_space<vmem>>, vector<1x16xbf16>
    tpu.vector_store %arg6[%c0_17, %c235], %54 {strides = array<i32>} : memref<1x324xbf16, #tpu.memory_space<vmem>>, vector<1x16xbf16>,
    %56 = vector.extract_strided_slice %3 {offsets = [0, 13, 0], sizes = [1, 1, 16], strides = [1, 1, 1]} : vector<1x16x16xf32> to vector<1x1x16xf32>
    %57 = vector.shape_cast %56 : vector<1x1x16xf32> to vector<1x16xf32>
    %58 = arith.truncf %57 : vector<1x16xf32> to vector<1x16xbf16>
    %c0_18 = arith.constant 0 : index
    %c253 = arith.constant 253 : index
    %59 = vector.load %arg6[%c0_18, %c253] : memref<1x324xbf16, #tpu.memory_space<vmem>>, vector<1x16xbf16>
    tpu.vector_store %arg6[%c0_18, %c253], %58 {strides = array<i32>} : memref<1x324xbf16, #tpu.memory_space<vmem>>, vector<1x16xbf16>,
    %60 = vector.extract_strided_slice %3 {offsets = [0, 14, 0], sizes = [1, 1, 16], strides = [1, 1, 1]} : vector<1x16x16xf32> to vector<1x1x16xf32>
    %61 = vector.shape_cast %60 : vector<1x1x16xf32> to vector<1x16xf32>
    %62 = arith.truncf %61 : vector<1x16xf32> to vector<1x16xbf16>
    %c0_19 = arith.constant 0 : index
    %c271 = arith.constant 271 : index
    %63 = vector.load %arg6[%c0_19, %c271] : memref<1x324xbf16, #tpu.memory_space<vmem>>, vector<1x16xbf16>
    tpu.vector_store %arg6[%c0_19, %c271], %62 {strides = array<i32>} : memref<1x324xbf16, #tpu.memory_space<vmem>>, vector<1x16xbf16>,
    %64 = vector.extract_strided_slice %3 {offsets = [0, 15, 0], sizes = [1, 1, 16], strides = [1, 1, 1]} : vector<1x16x16xf32> to vector<1x1x16xf32>
    %65 = vector.shape_cast %64 : vector<1x1x16xf32> to vector<1x16xf32>
    %66 = arith.truncf %65 : vector<1x16xf32> to vector<1x16xbf16>
    %c0_20 = arith.constant 0 : index
    %c289 = arith.constant 289 : index
    %67 = vector.load %arg6[%c0_20, %c289] : memref<1x324xbf16, #tpu.memory_space<vmem>>, vector<1x16xbf16>
    tpu.vector_store %arg6[%c0_20, %c289], %66 {strides = array<i32>} : memref<1x324xbf16, #tpu.memory_space<vmem>>, vector<1x16xbf16>,
    %c0_21 = arith.constant 0 : index
    %c0_22 = arith.constant 0 : index
    %68 = vector.load %arg6[%c0_21, %c0_22] : memref<1x324xbf16, #tpu.memory_space<vmem>>, vector<1x324xbf16>
    %cst_23 = arith.constant 0.000000e+00 : f32
    %69 = vector.broadcast %cst_23 : f32 to vector<8x286xf32>
    %c0_24 = arith.constant 0 : index
    %c0_25 = arith.constant 0 : index
    %c0_26 = arith.constant 0 : index
    %70 = vector.load %arg2[%c0_24, %c0_25, %c0_26] : memref<9x8x1xbf16, #tpu.memory_space<vmem>>, vector<1x8x1xbf16>
    %71 = vector.shape_cast %70 : vector<1x8x1xbf16> to vector<8x1xbf16>
    %72 = vector.extract_strided_slice %68 {offsets = [0, 0], sizes = [1, 286], strides = [1, 1]} : vector<1x324xbf16> to vector<1x286xbf16>
    %73 = arith.extf %71 : vector<8x1xbf16> to vector<8x1xf32>
    %74 = arith.extf %72 : vector<1x286xbf16> to vector<1x286xf32>
    %75 = vector.broadcast %73 : vector<8x1xf32> to vector<8x286xf32>
    %76 = vector.broadcast %74 : vector<1x286xf32> to vector<8x286xf32>
    %77 = arith.mulf %75, %76 : vector<8x286xf32>
    %78 = arith.addf %69, %77 : vector<8x286xf32>
    %c1 = arith.constant 1 : index
    %c0_27 = arith.constant 0 : index
    %c0_28 = arith.constant 0 : index
    %79 = vector.load %arg2[%c1, %c0_27, %c0_28] : memref<9x8x1xbf16, #tpu.memory_space<vmem>>, vector<1x8x1xbf16>
    %80 = vector.shape_cast %79 : vector<1x8x1xbf16> to vector<8x1xbf16>
    %81 = vector.extract_strided_slice %68 {offsets = [0, 1], sizes = [1, 286], strides = [1, 1]} : vector<1x324xbf16> to vector<1x286xbf16>
    %82 = arith.extf %80 : vector<8x1xbf16> to vector<8x1xf32>
    %83 = arith.extf %81 : vector<1x286xbf16> to vector<1x286xf32>
    %84 = vector.broadcast %82 : vector<8x1xf32> to vector<8x286xf32>
    %85 = vector.broadcast %83 : vector<1x286xf32> to vector<8x286xf32>
    %86 = arith.mulf %84, %85 : vector<8x286xf32>
    %87 = arith.addf %78, %86 : vector<8x286xf32>
    %c2 = arith.constant 2 : index
    %c0_29 = arith.constant 0 : index
    %c0_30 = arith.constant 0 : index
    %88 = vector.load %arg2[%c2, %c0_29, %c0_30] : memref<9x8x1xbf16, #tpu.memory_space<vmem>>, vector<1x8x1xbf16>
    %89 = vector.shape_cast %88 : vector<1x8x1xbf16> to vector<8x1xbf16>
    %90 = vector.extract_strided_slice %68 {offsets = [0, 2], sizes = [1, 286], strides = [1, 1]} : vector<1x324xbf16> to vector<1x286xbf16>
    %91 = arith.extf %89 : vector<8x1xbf16> to vector<8x1xf32>
    %92 = arith.extf %90 : vector<1x286xbf16> to vector<1x286xf32>
    %93 = vector.broadcast %91 : vector<8x1xf32> to vector<8x286xf32>
    %94 = vector.broadcast %92 : vector<1x286xf32> to vector<8x286xf32>
    %95 = arith.mulf %93, %94 : vector<8x286xf32>
    %96 = arith.addf %87, %95 : vector<8x286xf32>
    %c3 = arith.constant 3 : index
    %c0_31 = arith.constant 0 : index
    %c0_32 = arith.constant 0 : index
    %97 = vector.load %arg2[%c3, %c0_31, %c0_32] : memref<9x8x1xbf16, #tpu.memory_space<vmem>>, vector<1x8x1xbf16>
    %98 = vector.shape_cast %97 : vector<1x8x1xbf16> to vector<8x1xbf16>
    %99 = vector.extract_strided_slice %68 {offsets = [0, 18], sizes = [1, 286], strides = [1, 1]} : vector<1x324xbf16> to vector<1x286xbf16>
    %100 = arith.extf %98 : vector<8x1xbf16> to vector<8x1xf32>
    %101 = arith.extf %99 : vector<1x286xbf16> to vector<1x286xf32>
    %102 = vector.broadcast %100 : vector<8x1xf32> to vector<8x286xf32>
    %103 = vector.broadcast %101 : vector<1x286xf32> to vector<8x286xf32>
    %104 = arith.mulf %102, %103 : vector<8x286xf32>
    %105 = arith.addf %96, %104 : vector<8x286xf32>
    %c4 = arith.constant 4 : index
    %c0_33 = arith.constant 0 : index
    %c0_34 = arith.constant 0 : index
    %106 = vector.load %arg2[%c4, %c0_33, %c0_34] : memref<9x8x1xbf16, #tpu.memory_space<vmem>>, vector<1x8x1xbf16>
    %107 = vector.shape_cast %106 : vector<1x8x1xbf16> to vector<8x1xbf16>
    %108 = vector.extract_strided_slice %68 {offsets = [0, 19], sizes = [1, 286], strides = [1, 1]} : vector<1x324xbf16> to vector<1x286xbf16>
    %109 = arith.extf %107 : vector<8x1xbf16> to vector<8x1xf32>
    %110 = arith.extf %108 : vector<1x286xbf16> to vector<1x286xf32>
    %111 = vector.broadcast %109 : vector<8x1xf32> to vector<8x286xf32>
    %112 = vector.broadcast %110 : vector<1x286xf32> to vector<8x286xf32>
    %113 = arith.mulf %111, %112 : vector<8x286xf32>
    %114 = arith.addf %105, %113 : vector<8x286xf32>
    %c5 = arith.constant 5 : index
    %c0_35 = arith.constant 0 : index
    %c0_36 = arith.constant 0 : index
    %115 = vector.load %arg2[%c5, %c0_35, %c0_36] : memref<9x8x1xbf16, #tpu.memory_space<vmem>>, vector<1x8x1xbf16>
    %116 = vector.shape_cast %115 : vector<1x8x1xbf16> to vector<8x1xbf16>
    %117 = vector.extract_strided_slice %68 {offsets = [0, 20], sizes = [1, 286], strides = [1, 1]} : vector<1x324xbf16> to vector<1x286xbf16>
    %118 = arith.extf %116 : vector<8x1xbf16> to vector<8x1xf32>
    %119 = arith.extf %117 : vector<1x286xbf16> to vector<1x286xf32>
    %120 = vector.broadcast %118 : vector<8x1xf32> to vector<8x286xf32>
    %121 = vector.broadcast %119 : vector<1x286xf32> to vector<8x286xf32>
    %122 = arith.mulf %120, %121 : vector<8x286xf32>
    %123 = arith.addf %114, %122 : vector<8x286xf32>
    %c6 = arith.constant 6 : index
    %c0_37 = arith.constant 0 : index
    %c0_38 = arith.constant 0 : index
    %124 = vector.load %arg2[%c6, %c0_37, %c0_38] : memref<9x8x1xbf16, #tpu.memory_space<vmem>>, vector<1x8x1xbf16>
    %125 = vector.shape_cast %124 : vector<1x8x1xbf16> to vector<8x1xbf16>
    %126 = vector.extract_strided_slice %68 {offsets = [0, 36], sizes = [1, 286], strides = [1, 1]} : vector<1x324xbf16> to vector<1x286xbf16>
    %127 = arith.extf %125 : vector<8x1xbf16> to vector<8x1xf32>
    %128 = arith.extf %126 : vector<1x286xbf16> to vector<1x286xf32>
    %129 = vector.broadcast %127 : vector<8x1xf32> to vector<8x286xf32>
    %130 = vector.broadcast %128 : vector<1x286xf32> to vector<8x286xf32>
    %131 = arith.mulf %129, %130 : vector<8x286xf32>
    %132 = arith.addf %123, %131 : vector<8x286xf32>
    %c7 = arith.constant 7 : index
    %c0_39 = arith.constant 0 : index
    %c0_40 = arith.constant 0 : index
    %133 = vector.load %arg2[%c7, %c0_39, %c0_40] : memref<9x8x1xbf16, #tpu.memory_space<vmem>>, vector<1x8x1xbf16>
    %134 = vector.shape_cast %133 : vector<1x8x1xbf16> to vector<8x1xbf16>
    %135 = vector.extract_strided_slice %68 {offsets = [0, 37], sizes = [1, 286], strides = [1, 1]} : vector<1x324xbf16> to vector<1x286xbf16>
    %136 = arith.extf %134 : vector<8x1xbf16> to vector<8x1xf32>
    %137 = arith.extf %135 : vector<1x286xbf16> to vector<1x286xf32>
    %138 = vector.broadcast %136 : vector<8x1xf32> to vector<8x286xf32>
    %139 = vector.broadcast %137 : vector<1x286xf32> to vector<8x286xf32>
    %140 = arith.mulf %138, %139 : vector<8x286xf32>
    %141 = arith.addf %132, %140 : vector<8x286xf32>
    %c8 = arith.constant 8 : index
    %c0_41 = arith.constant 0 : index
    %c0_42 = arith.constant 0 : index
    %142 = vector.load %arg2[%c8, %c0_41, %c0_42] : memref<9x8x1xbf16, #tpu.memory_space<vmem>>, vector<1x8x1xbf16>
    %143 = vector.shape_cast %142 : vector<1x8x1xbf16> to vector<8x1xbf16>
    %144 = vector.extract_strided_slice %68 {offsets = [0, 38], sizes = [1, 286], strides = [1, 1]} : vector<1x324xbf16> to vector<1x286xbf16>
    %145 = arith.extf %143 : vector<8x1xbf16> to vector<8x1xf32>
    %146 = arith.extf %144 : vector<1x286xbf16> to vector<1x286xf32>
    %147 = vector.broadcast %145 : vector<8x1xf32> to vector<8x286xf32>
    %148 = vector.broadcast %146 : vector<1x286xf32> to vector<8x286xf32>
    %149 = arith.mulf %147, %148 : vector<8x286xf32>
    %150 = arith.addf %141, %149 : vector<8x286xf32>
    %c0_43 = arith.constant 0 : index
    %c0_44 = arith.constant 0 : index
    %151 = vector.load %arg3[%c0_43, %c0_44] : memref<8x1xf32, #tpu.memory_space<vmem>>, vector<8x1xf32>
    %152 = vector.broadcast %151 : vector<8x1xf32> to vector<8x286xf32>
    %153 = arith.addf %150, %152 : vector<8x286xf32>
    %cst_45 = arith.constant 0.000000e+00 : f32
    %154 = vector.broadcast %cst_45 : f32 to vector<8x286xf32>
    %155 = arith.maximumf %153, %154 : vector<8x286xf32>
    %156 = vector.extract_strided_slice %155 {offsets = [0, 0], sizes = [8, 267], strides = [1, 1]} : vector<8x286xf32> to vector<8x267xf32>
    %157 = vector.extract_strided_slice %155 {offsets = [0, 1], sizes = [8, 267], strides = [1, 1]} : vector<8x286xf32> to vector<8x267xf32>
    %158 = vector.extract_strided_slice %155 {offsets = [0, 18], sizes = [8, 267], strides = [1, 1]} : vector<8x286xf32> to vector<8x267xf32>
    %159 = vector.extract_strided_slice %155 {offsets = [0, 19], sizes = [8, 267], strides = [1, 1]} : vector<8x286xf32> to vector<8x267xf32>
    %160 = arith.maximumf %156, %157 : vector<8x267xf32>
    %161 = arith.maximumf %158, %159 : vector<8x267xf32>
    %162 = arith.maximumf %160, %161 : vector<8x267xf32>
    %c0_46 = arith.constant 0 : index
    %c0_47 = arith.constant 0 : index
    %163 = vector.load %arg4[%c0_46, %c0_47] : memref<267x64xf32, #tpu.memory_space<vmem>>, vector<267x64xf32>
    %cst_48 = arith.constant dense<0.000000e+00> : vector<8x64xf32>
    %164 = tpu.matmul %162, %163, %cst_48 {dimension_numbers = #tpu.dot_dimension_numbers<[1], [0], [0], [1], [0, 0, 1, 1], [], []>} : vector<8x267xf32>, vector<267x64xf32>, vector<8x64xf32> -> vector<8x64xf32>
    %165 = arith.truncf %164 : vector<8x64xf32> to vector<8x64xbf16>
    %c0_49 = arith.constant 0 : index
    %c0_50 = arith.constant 0 : index
    %c0_51 = arith.constant 0 : index
    %166 = vector.load %arg5[%c0_49, %c0_50, %c0_51] : memref<1x8x64xbf16, #tpu.memory_space<vmem>>, vector<1x8x64xbf16>
    %167 = vector.shape_cast %166 : vector<1x8x64xbf16> to vector<8x64xbf16>
    %168 = vector.shape_cast %165 : vector<8x64xbf16> to vector<1x8x64xbf16>
    tpu.vector_store %arg5[%c0_49, %c0_50, %c0_51], %168 {strides = array<i32>} : memref<1x8x64xbf16, #tpu.memory_space<vmem>>, vector<1x8x64xbf16>,
    return
  }
  func.func @transform_0(%arg0: i32) -> (i32, i32, i32, i32) {
    %c0_i32 = arith.constant 0 : i32
    %c0_i32_0 = arith.constant 0 : i32
    %c0_i32_1 = arith.constant 0 : i32
    %c0_i32_2 = arith.constant 0 : i32
    return %arg0, %c0_i32, %c0_i32_0, %c0_i32_1 : i32, i32, i32, i32
  }
  func.func @transform_1(%arg0: i32) -> (i32, i32, i32) {
    %c0_i32 = arith.constant 0 : i32
    %c0_i32_0 = arith.constant 0 : i32
    %c0_i32_1 = arith.constant 0 : i32
    %c0_i32_2 = arith.constant 0 : i32
    return %c0_i32, %c0_i32_0, %c0_i32_1 : i32, i32, i32
  }
  func.func @transform_2(%arg0: i32) -> (i32, i32) {
    %c0_i32 = arith.constant 0 : i32
    %c0_i32_0 = arith.constant 0 : i32
    %c0_i32_1 = arith.constant 0 : i32
    return %c0_i32, %c0_i32_0 : i32, i32
  }
  func.func @transform_3(%arg0: i32) -> (i32, i32) {
    %c0_i32 = arith.constant 0 : i32
    %c0_i32_0 = arith.constant 0 : i32
    %c0_i32_1 = arith.constant 0 : i32
    return %c0_i32, %c0_i32_0 : i32, i32
  }
  func.func @transform_4(%arg0: i32) -> (i32, i32, i32) {
    %c0_i32 = arith.constant 0 : i32
    %c0_i32_0 = arith.constant 0 : i32
    %c0_i32_1 = arith.constant 0 : i32
    return %arg0, %c0_i32, %c0_i32_0 : i32, i32, i32
  }
}

module attributes {stable_mosaic.version = 11 : i64} {
  func.func @_conv_bn_relu_pool_kernel(%arg0: i32, %arg1: memref<1x16x4x4xbf16, #tpu.memory_space<vmem>>, %arg2: memref<9x32x16xbf16, #tpu.memory_space<vmem>>, %arg3: memref<32x1xf32, #tpu.memory_space<vmem>>, %arg4: memref<15x4xf32, #tpu.memory_space<vmem>>, %arg5: memref<1x32x4xbf16, #tpu.memory_space<vmem>>, %arg6: memref<16x36xbf16, #tpu.memory_space<vmem>>) attributes {dimension_semantics = [#tpu.dimension_semantics<parallel>], iteration_bounds = array<i64: 2>, scalar_prefetch = 0 : i64, scratch_operands = 1 : i64, tpu.core_type = #tpu.core_type<tc>, window_params = [{transform_indices = @transform_0, window_bounds = array<i64: 1, 16, 4, 4>}, {pipeline_mode = #tpu.pipeline_mode<synchronous>, transform_indices = @transform_1, window_bounds = array<i64: 9, 32, 16>}, {pipeline_mode = #tpu.pipeline_mode<synchronous>, transform_indices = @transform_2, window_bounds = array<i64: 32, 1>}, {pipeline_mode = #tpu.pipeline_mode<synchronous>, transform_indices = @transform_3, window_bounds = array<i64: 15, 4>}, {transform_indices = @transform_4, window_bounds = array<i64: 1, 32, 4>}]} {
    %cst = arith.constant 0.000000e+00 : bf16
    %0 = vector.broadcast %cst : bf16 to vector<16x36xbf16>
    %c0 = arith.constant 0 : index
    %c0_0 = arith.constant 0 : index
    %1 = vector.load %arg6[%c0, %c0_0] : memref<16x36xbf16, #tpu.memory_space<vmem>>, vector<16x36xbf16>
    tpu.vector_store %arg6[%c0, %c0_0], %0 {strides = array<i32>} : memref<16x36xbf16, #tpu.memory_space<vmem>>, vector<16x36xbf16>,
    %c0_1 = arith.constant 0 : index
    %c0_2 = arith.constant 0 : index
    %c0_3 = arith.constant 0 : index
    %c0_4 = arith.constant 0 : index
    %2 = vector.load %arg1[%c0_1, %c0_2, %c0_3, %c0_4] : memref<1x16x4x4xbf16, #tpu.memory_space<vmem>>, vector<1x16x4x4xbf16>
    %3 = vector.shape_cast %2 : vector<1x16x4x4xbf16> to vector<16x4x4xbf16>
    %4 = vector.extract_strided_slice %3 {offsets = [0, 0, 0], sizes = [16, 1, 4], strides = [1, 1, 1]} : vector<16x4x4xbf16> to vector<16x1x4xbf16>
    %5 = vector.shape_cast %4 : vector<16x1x4xbf16> to vector<16x4xbf16>
    %c0_5 = arith.constant 0 : index
    %c7 = arith.constant 7 : index
    %6 = vector.load %arg6[%c0_5, %c7] : memref<16x36xbf16, #tpu.memory_space<vmem>>, vector<16x4xbf16>
    tpu.vector_store %arg6[%c0_5, %c7], %5 {strides = array<i32>} : memref<16x36xbf16, #tpu.memory_space<vmem>>, vector<16x4xbf16>,
    %7 = vector.extract_strided_slice %3 {offsets = [0, 1, 0], sizes = [16, 1, 4], strides = [1, 1, 1]} : vector<16x4x4xbf16> to vector<16x1x4xbf16>
    %8 = vector.shape_cast %7 : vector<16x1x4xbf16> to vector<16x4xbf16>
    %c0_6 = arith.constant 0 : index
    %c13 = arith.constant 13 : index
    %9 = vector.load %arg6[%c0_6, %c13] : memref<16x36xbf16, #tpu.memory_space<vmem>>, vector<16x4xbf16>
    tpu.vector_store %arg6[%c0_6, %c13], %8 {strides = array<i32>} : memref<16x36xbf16, #tpu.memory_space<vmem>>, vector<16x4xbf16>,
    %10 = vector.extract_strided_slice %3 {offsets = [0, 2, 0], sizes = [16, 1, 4], strides = [1, 1, 1]} : vector<16x4x4xbf16> to vector<16x1x4xbf16>
    %11 = vector.shape_cast %10 : vector<16x1x4xbf16> to vector<16x4xbf16>
    %c0_7 = arith.constant 0 : index
    %c19 = arith.constant 19 : index
    %12 = vector.load %arg6[%c0_7, %c19] : memref<16x36xbf16, #tpu.memory_space<vmem>>, vector<16x4xbf16>
    tpu.vector_store %arg6[%c0_7, %c19], %11 {strides = array<i32>} : memref<16x36xbf16, #tpu.memory_space<vmem>>, vector<16x4xbf16>,
    %13 = vector.extract_strided_slice %3 {offsets = [0, 3, 0], sizes = [16, 1, 4], strides = [1, 1, 1]} : vector<16x4x4xbf16> to vector<16x1x4xbf16>
    %14 = vector.shape_cast %13 : vector<16x1x4xbf16> to vector<16x4xbf16>
    %c0_8 = arith.constant 0 : index
    %c25 = arith.constant 25 : index
    %15 = vector.load %arg6[%c0_8, %c25] : memref<16x36xbf16, #tpu.memory_space<vmem>>, vector<16x4xbf16>
    tpu.vector_store %arg6[%c0_8, %c25], %14 {strides = array<i32>} : memref<16x36xbf16, #tpu.memory_space<vmem>>, vector<16x4xbf16>,
    %c0_9 = arith.constant 0 : index
    %c0_10 = arith.constant 0 : index
    %16 = vector.load %arg6[%c0_9, %c0_10] : memref<16x36xbf16, #tpu.memory_space<vmem>>, vector<16x36xbf16>
    %cst_11 = arith.constant 0.000000e+00 : f32
    %17 = vector.broadcast %cst_11 : f32 to vector<32x22xf32>
    %c0_12 = arith.constant 0 : index
    %c0_13 = arith.constant 0 : index
    %c0_14 = arith.constant 0 : index
    %18 = vector.load %arg2[%c0_12, %c0_13, %c0_14] : memref<9x32x16xbf16, #tpu.memory_space<vmem>>, vector<1x32x16xbf16>
    %19 = vector.shape_cast %18 : vector<1x32x16xbf16> to vector<32x16xbf16>
    %20 = vector.extract_strided_slice %16 {offsets = [0, 0], sizes = [16, 22], strides = [1, 1]} : vector<16x36xbf16> to vector<16x22xbf16>
    %cst_15 = arith.constant dense<0.000000e+00> : vector<32x22xf32>
    %21 = tpu.matmul %19, %20, %cst_15 {dimension_numbers = #tpu.dot_dimension_numbers<[1], [0], [0], [1], [0, 0, 1, 1], [], []>} : vector<32x16xbf16>, vector<16x22xbf16>, vector<32x22xf32> -> vector<32x22xf32>
    %22 = arith.addf %17, %21 : vector<32x22xf32>
    %c1 = arith.constant 1 : index
    %c0_16 = arith.constant 0 : index
    %c0_17 = arith.constant 0 : index
    %23 = vector.load %arg2[%c1, %c0_16, %c0_17] : memref<9x32x16xbf16, #tpu.memory_space<vmem>>, vector<1x32x16xbf16>
    %24 = vector.shape_cast %23 : vector<1x32x16xbf16> to vector<32x16xbf16>
    %25 = vector.extract_strided_slice %16 {offsets = [0, 1], sizes = [16, 22], strides = [1, 1]} : vector<16x36xbf16> to vector<16x22xbf16>
    %cst_18 = arith.constant dense<0.000000e+00> : vector<32x22xf32>
    %26 = tpu.matmul %24, %25, %cst_18 {dimension_numbers = #tpu.dot_dimension_numbers<[1], [0], [0], [1], [0, 0, 1, 1], [], []>} : vector<32x16xbf16>, vector<16x22xbf16>, vector<32x22xf32> -> vector<32x22xf32>
    %27 = arith.addf %22, %26 : vector<32x22xf32>
    %c2 = arith.constant 2 : index
    %c0_19 = arith.constant 0 : index
    %c0_20 = arith.constant 0 : index
    %28 = vector.load %arg2[%c2, %c0_19, %c0_20] : memref<9x32x16xbf16, #tpu.memory_space<vmem>>, vector<1x32x16xbf16>
    %29 = vector.shape_cast %28 : vector<1x32x16xbf16> to vector<32x16xbf16>
    %30 = vector.extract_strided_slice %16 {offsets = [0, 2], sizes = [16, 22], strides = [1, 1]} : vector<16x36xbf16> to vector<16x22xbf16>
    %cst_21 = arith.constant dense<0.000000e+00> : vector<32x22xf32>
    %31 = tpu.matmul %29, %30, %cst_21 {dimension_numbers = #tpu.dot_dimension_numbers<[1], [0], [0], [1], [0, 0, 1, 1], [], []>} : vector<32x16xbf16>, vector<16x22xbf16>, vector<32x22xf32> -> vector<32x22xf32>
    %32 = arith.addf %27, %31 : vector<32x22xf32>
    %c3 = arith.constant 3 : index
    %c0_22 = arith.constant 0 : index
    %c0_23 = arith.constant 0 : index
    %33 = vector.load %arg2[%c3, %c0_22, %c0_23] : memref<9x32x16xbf16, #tpu.memory_space<vmem>>, vector<1x32x16xbf16>
    %34 = vector.shape_cast %33 : vector<1x32x16xbf16> to vector<32x16xbf16>
    %35 = vector.extract_strided_slice %16 {offsets = [0, 6], sizes = [16, 22], strides = [1, 1]} : vector<16x36xbf16> to vector<16x22xbf16>
    %cst_24 = arith.constant dense<0.000000e+00> : vector<32x22xf32>
    %36 = tpu.matmul %34, %35, %cst_24 {dimension_numbers = #tpu.dot_dimension_numbers<[1], [0], [0], [1], [0, 0, 1, 1], [], []>} : vector<32x16xbf16>, vector<16x22xbf16>, vector<32x22xf32> -> vector<32x22xf32>
    %37 = arith.addf %32, %36 : vector<32x22xf32>
    %c4 = arith.constant 4 : index
    %c0_25 = arith.constant 0 : index
    %c0_26 = arith.constant 0 : index
    %38 = vector.load %arg2[%c4, %c0_25, %c0_26] : memref<9x32x16xbf16, #tpu.memory_space<vmem>>, vector<1x32x16xbf16>
    %39 = vector.shape_cast %38 : vector<1x32x16xbf16> to vector<32x16xbf16>
    %40 = vector.extract_strided_slice %16 {offsets = [0, 7], sizes = [16, 22], strides = [1, 1]} : vector<16x36xbf16> to vector<16x22xbf16>
    %cst_27 = arith.constant dense<0.000000e+00> : vector<32x22xf32>
    %41 = tpu.matmul %39, %40, %cst_27 {dimension_numbers = #tpu.dot_dimension_numbers<[1], [0], [0], [1], [0, 0, 1, 1], [], []>} : vector<32x16xbf16>, vector<16x22xbf16>, vector<32x22xf32> -> vector<32x22xf32>
    %42 = arith.addf %37, %41 : vector<32x22xf32>
    %c5 = arith.constant 5 : index
    %c0_28 = arith.constant 0 : index
    %c0_29 = arith.constant 0 : index
    %43 = vector.load %arg2[%c5, %c0_28, %c0_29] : memref<9x32x16xbf16, #tpu.memory_space<vmem>>, vector<1x32x16xbf16>
    %44 = vector.shape_cast %43 : vector<1x32x16xbf16> to vector<32x16xbf16>
    %45 = vector.extract_strided_slice %16 {offsets = [0, 8], sizes = [16, 22], strides = [1, 1]} : vector<16x36xbf16> to vector<16x22xbf16>
    %cst_30 = arith.constant dense<0.000000e+00> : vector<32x22xf32>
    %46 = tpu.matmul %44, %45, %cst_30 {dimension_numbers = #tpu.dot_dimension_numbers<[1], [0], [0], [1], [0, 0, 1, 1], [], []>} : vector<32x16xbf16>, vector<16x22xbf16>, vector<32x22xf32> -> vector<32x22xf32>
    %47 = arith.addf %42, %46 : vector<32x22xf32>
    %c6 = arith.constant 6 : index
    %c0_31 = arith.constant 0 : index
    %c0_32 = arith.constant 0 : index
    %48 = vector.load %arg2[%c6, %c0_31, %c0_32] : memref<9x32x16xbf16, #tpu.memory_space<vmem>>, vector<1x32x16xbf16>
    %49 = vector.shape_cast %48 : vector<1x32x16xbf16> to vector<32x16xbf16>
    %50 = vector.extract_strided_slice %16 {offsets = [0, 12], sizes = [16, 22], strides = [1, 1]} : vector<16x36xbf16> to vector<16x22xbf16>
    %cst_33 = arith.constant dense<0.000000e+00> : vector<32x22xf32>
    %51 = tpu.matmul %49, %50, %cst_33 {dimension_numbers = #tpu.dot_dimension_numbers<[1], [0], [0], [1], [0, 0, 1, 1], [], []>} : vector<32x16xbf16>, vector<16x22xbf16>, vector<32x22xf32> -> vector<32x22xf32>
    %52 = arith.addf %47, %51 : vector<32x22xf32>
    %c7_34 = arith.constant 7 : index
    %c0_35 = arith.constant 0 : index
    %c0_36 = arith.constant 0 : index
    %53 = vector.load %arg2[%c7_34, %c0_35, %c0_36] : memref<9x32x16xbf16, #tpu.memory_space<vmem>>, vector<1x32x16xbf16>
    %54 = vector.shape_cast %53 : vector<1x32x16xbf16> to vector<32x16xbf16>
    %55 = vector.extract_strided_slice %16 {offsets = [0, 13], sizes = [16, 22], strides = [1, 1]} : vector<16x36xbf16> to vector<16x22xbf16>
    %cst_37 = arith.constant dense<0.000000e+00> : vector<32x22xf32>
    %56 = tpu.matmul %54, %55, %cst_37 {dimension_numbers = #tpu.dot_dimension_numbers<[1], [0], [0], [1], [0, 0, 1, 1], [], []>} : vector<32x16xbf16>, vector<16x22xbf16>, vector<32x22xf32> -> vector<32x22xf32>
    %57 = arith.addf %52, %56 : vector<32x22xf32>
    %c8 = arith.constant 8 : index
    %c0_38 = arith.constant 0 : index
    %c0_39 = arith.constant 0 : index
    %58 = vector.load %arg2[%c8, %c0_38, %c0_39] : memref<9x32x16xbf16, #tpu.memory_space<vmem>>, vector<1x32x16xbf16>
    %59 = vector.shape_cast %58 : vector<1x32x16xbf16> to vector<32x16xbf16>
    %60 = vector.extract_strided_slice %16 {offsets = [0, 14], sizes = [16, 22], strides = [1, 1]} : vector<16x36xbf16> to vector<16x22xbf16>
    %cst_40 = arith.constant dense<0.000000e+00> : vector<32x22xf32>
    %61 = tpu.matmul %59, %60, %cst_40 {dimension_numbers = #tpu.dot_dimension_numbers<[1], [0], [0], [1], [0, 0, 1, 1], [], []>} : vector<32x16xbf16>, vector<16x22xbf16>, vector<32x22xf32> -> vector<32x22xf32>
    %62 = arith.addf %57, %61 : vector<32x22xf32>
    %c0_41 = arith.constant 0 : index
    %c0_42 = arith.constant 0 : index
    %63 = vector.load %arg3[%c0_41, %c0_42] : memref<32x1xf32, #tpu.memory_space<vmem>>, vector<32x1xf32>
    %64 = vector.broadcast %63 : vector<32x1xf32> to vector<32x22xf32>
    %65 = arith.addf %62, %64 : vector<32x22xf32>
    %cst_43 = arith.constant 0.000000e+00 : f32
    %66 = vector.broadcast %cst_43 : f32 to vector<32x22xf32>
    %67 = arith.maximumf %65, %66 : vector<32x22xf32>
    %68 = vector.extract_strided_slice %67 {offsets = [0, 0], sizes = [32, 15], strides = [1, 1]} : vector<32x22xf32> to vector<32x15xf32>
    %69 = vector.extract_strided_slice %67 {offsets = [0, 1], sizes = [32, 15], strides = [1, 1]} : vector<32x22xf32> to vector<32x15xf32>
    %70 = vector.extract_strided_slice %67 {offsets = [0, 6], sizes = [32, 15], strides = [1, 1]} : vector<32x22xf32> to vector<32x15xf32>
    %71 = vector.extract_strided_slice %67 {offsets = [0, 7], sizes = [32, 15], strides = [1, 1]} : vector<32x22xf32> to vector<32x15xf32>
    %72 = arith.maximumf %68, %69 : vector<32x15xf32>
    %73 = arith.maximumf %70, %71 : vector<32x15xf32>
    %74 = arith.maximumf %72, %73 : vector<32x15xf32>
    %c0_44 = arith.constant 0 : index
    %c0_45 = arith.constant 0 : index
    %75 = vector.load %arg4[%c0_44, %c0_45] : memref<15x4xf32, #tpu.memory_space<vmem>>, vector<15x4xf32>
    %cst_46 = arith.constant dense<0.000000e+00> : vector<32x4xf32>
    %76 = tpu.matmul %74, %75, %cst_46 {dimension_numbers = #tpu.dot_dimension_numbers<[1], [0], [0], [1], [0, 0, 1, 1], [], []>} : vector<32x15xf32>, vector<15x4xf32>, vector<32x4xf32> -> vector<32x4xf32>
    %77 = arith.truncf %76 : vector<32x4xf32> to vector<32x4xbf16>
    %c0_47 = arith.constant 0 : index
    %c0_48 = arith.constant 0 : index
    %c0_49 = arith.constant 0 : index
    %78 = vector.load %arg5[%c0_47, %c0_48, %c0_49] : memref<1x32x4xbf16, #tpu.memory_space<vmem>>, vector<1x32x4xbf16>
    %79 = vector.shape_cast %78 : vector<1x32x4xbf16> to vector<32x4xbf16>
    %80 = vector.shape_cast %77 : vector<32x4xbf16> to vector<1x32x4xbf16>
    tpu.vector_store %arg5[%c0_47, %c0_48, %c0_49], %80 {strides = array<i32>} : memref<1x32x4xbf16, #tpu.memory_space<vmem>>, vector<1x32x4xbf16>,
    return
  }
  func.func @transform_0(%arg0: i32) -> (i32, i32, i32, i32) {
    %c0_i32 = arith.constant 0 : i32
    %c0_i32_0 = arith.constant 0 : i32
    %c0_i32_1 = arith.constant 0 : i32
    %c0_i32_2 = arith.constant 0 : i32
    return %arg0, %c0_i32, %c0_i32_0, %c0_i32_1 : i32, i32, i32, i32
  }
  func.func @transform_1(%arg0: i32) -> (i32, i32, i32) {
    %c0_i32 = arith.constant 0 : i32
    %c0_i32_0 = arith.constant 0 : i32
    %c0_i32_1 = arith.constant 0 : i32
    %c0_i32_2 = arith.constant 0 : i32
    return %c0_i32, %c0_i32_0, %c0_i32_1 : i32, i32, i32
  }
  func.func @transform_2(%arg0: i32) -> (i32, i32) {
    %c0_i32 = arith.constant 0 : i32
    %c0_i32_0 = arith.constant 0 : i32
    %c0_i32_1 = arith.constant 0 : i32
    return %c0_i32, %c0_i32_0 : i32, i32
  }
  func.func @transform_3(%arg0: i32) -> (i32, i32) {
    %c0_i32 = arith.constant 0 : i32
    %c0_i32_0 = arith.constant 0 : i32
    %c0_i32_1 = arith.constant 0 : i32
    return %c0_i32, %c0_i32_0 : i32, i32
  }
  func.func @transform_4(%arg0: i32) -> (i32, i32, i32) {
    %c0_i32 = arith.constant 0 : i32
    %c0_i32_0 = arith.constant 0 : i32
    %c0_i32_1 = arith.constant 0 : i32
    return %arg0, %c0_i32, %c0_i32_0 : i32, i32, i32
  }
}

module attributes {stable_mosaic.version = 11 : i64} {
  func.func @_lstm_kernel(%arg0: memref<64x2x2xbf16, #tpu.memory_space<vmem>>, %arg1: memref<2x8xf32, #tpu.memory_space<vmem>>, %arg2: memref<2x8xf32, #tpu.memory_space<vmem>>, %arg3: memref<1x8xf32, #tpu.memory_space<vmem>>, %arg4: memref<64x4xbf16, #tpu.memory_space<vmem>>) attributes {dimension_semantics = [], scalar_prefetch = 0 : i64, scratch_operands = 0 : i64, tpu.core_type = #tpu.core_type<tc>} {
    %c0 = arith.constant 0 : index
    %c0_0 = arith.constant 0 : index
    %c0_1 = arith.constant 0 : index
    %0 = vector.load %arg0[%c0, %c0_0, %c0_1] : memref<64x2x2xbf16, #tpu.memory_space<vmem>>, vector<64x2x2xbf16>
    %1 = arith.extf %0 : vector<64x2x2xbf16> to vector<64x2x2xf32>
    %c0_2 = arith.constant 0 : index
    %c0_3 = arith.constant 0 : index
    %2 = vector.load %arg1[%c0_2, %c0_3] : memref<2x8xf32, #tpu.memory_space<vmem>>, vector<2x8xf32>
    %c0_4 = arith.constant 0 : index
    %c0_5 = arith.constant 0 : index
    %3 = vector.load %arg2[%c0_4, %c0_5] : memref<2x8xf32, #tpu.memory_space<vmem>>, vector<2x8xf32>
    %c0_6 = arith.constant 0 : index
    %c0_7 = arith.constant 0 : index
    %4 = vector.load %arg3[%c0_6, %c0_7] : memref<1x8xf32, #tpu.memory_space<vmem>>, vector<1x8xf32>
    %cst = arith.constant 0.000000e+00 : f32
    %5 = vector.broadcast %cst : f32 to vector<64x2xf32>
    %cst_8 = arith.constant 0.000000e+00 : f32
    %6 = vector.broadcast %cst_8 : f32 to vector<64x2xf32>
    %7 = vector.extract_strided_slice %1 {offsets = [0, 0, 0], sizes = [64, 1, 2], strides = [1, 1, 1]} : vector<64x2x2xf32> to vector<64x1x2xf32>
    %8 = vector.shape_cast %7 : vector<64x1x2xf32> to vector<64x2xf32>
    %cst_9 = arith.constant dense<0.000000e+00> : vector<64x8xf32>
    %9 = tpu.matmul %8, %2, %cst_9 {dimension_numbers = #tpu.dot_dimension_numbers<[1], [0], [0], [1], [0, 0, 1, 1], [], []>} : vector<64x2xf32>, vector<2x8xf32>, vector<64x8xf32> -> vector<64x8xf32>
    %cst_10 = arith.constant dense<0.000000e+00> : vector<64x8xf32>
    %10 = tpu.matmul %5, %3, %cst_10 {dimension_numbers = #tpu.dot_dimension_numbers<[1], [0], [0], [1], [0, 0, 1, 1], [], []>} : vector<64x2xf32>, vector<2x8xf32>, vector<64x8xf32> -> vector<64x8xf32>
    %11 = arith.addf %9, %10 : vector<64x8xf32>
    %12 = vector.broadcast %4 : vector<1x8xf32> to vector<64x8xf32>
    %13 = arith.addf %11, %12 : vector<64x8xf32>
    %14 = vector.extract_strided_slice %13 {offsets = [0, 0], sizes = [64, 2], strides = [1, 1]} : vector<64x8xf32> to vector<64x2xf32>
    %15 = arith.negf %14 : vector<64x2xf32>
    %16 = math.exp %15 : vector<64x2xf32>
    %cst_11 = arith.constant 1.000000e+00 : f32
    %17 = vector.broadcast %cst_11 : f32 to vector<64x2xf32>
    %18 = arith.addf %17, %16 : vector<64x2xf32>
    %19 = arith.divf %17, %18 : vector<64x2xf32>
    %20 = vector.extract_strided_slice %13 {offsets = [0, 2], sizes = [64, 2], strides = [1, 1]} : vector<64x8xf32> to vector<64x2xf32>
    %21 = arith.negf %20 : vector<64x2xf32>
    %22 = math.exp %21 : vector<64x2xf32>
    %cst_12 = arith.constant 1.000000e+00 : f32
    %23 = vector.broadcast %cst_12 : f32 to vector<64x2xf32>
    %24 = arith.addf %23, %22 : vector<64x2xf32>
    %25 = arith.divf %23, %24 : vector<64x2xf32>
    %26 = vector.extract_strided_slice %13 {offsets = [0, 4], sizes = [64, 2], strides = [1, 1]} : vector<64x8xf32> to vector<64x2xf32>
    %27 = math.tanh %26 : vector<64x2xf32>
    %28 = vector.extract_strided_slice %13 {offsets = [0, 6], sizes = [64, 2], strides = [1, 1]} : vector<64x8xf32> to vector<64x2xf32>
    %29 = arith.negf %28 : vector<64x2xf32>
    %30 = math.exp %29 : vector<64x2xf32>
    %cst_13 = arith.constant 1.000000e+00 : f32
    %31 = vector.broadcast %cst_13 : f32 to vector<64x2xf32>
    %32 = arith.addf %31, %30 : vector<64x2xf32>
    %33 = arith.divf %31, %32 : vector<64x2xf32>
    %34 = arith.mulf %25, %6 : vector<64x2xf32>
    %35 = arith.mulf %19, %27 : vector<64x2xf32>
    %36 = arith.addf %34, %35 : vector<64x2xf32>
    %37 = math.tanh %36 : vector<64x2xf32>
    %38 = arith.mulf %33, %37 : vector<64x2xf32>
    %39 = vector.extract_strided_slice %1 {offsets = [0, 1, 0], sizes = [64, 1, 2], strides = [1, 1, 1]} : vector<64x2x2xf32> to vector<64x1x2xf32>
    %40 = vector.shape_cast %39 : vector<64x1x2xf32> to vector<64x2xf32>
    %cst_14 = arith.constant dense<0.000000e+00> : vector<64x8xf32>
    %41 = tpu.matmul %40, %2, %cst_14 {dimension_numbers = #tpu.dot_dimension_numbers<[1], [0], [0], [1], [0, 0, 1, 1], [], []>} : vector<64x2xf32>, vector<2x8xf32>, vector<64x8xf32> -> vector<64x8xf32>
    %cst_15 = arith.constant dense<0.000000e+00> : vector<64x8xf32>
    %42 = tpu.matmul %38, %3, %cst_15 {dimension_numbers = #tpu.dot_dimension_numbers<[1], [0], [0], [1], [0, 0, 1, 1], [], []>} : vector<64x2xf32>, vector<2x8xf32>, vector<64x8xf32> -> vector<64x8xf32>
    %43 = arith.addf %41, %42 : vector<64x8xf32>
    %44 = vector.broadcast %4 : vector<1x8xf32> to vector<64x8xf32>
    %45 = arith.addf %43, %44 : vector<64x8xf32>
    %46 = vector.extract_strided_slice %45 {offsets = [0, 0], sizes = [64, 2], strides = [1, 1]} : vector<64x8xf32> to vector<64x2xf32>
    %47 = arith.negf %46 : vector<64x2xf32>
    %48 = math.exp %47 : vector<64x2xf32>
    %cst_16 = arith.constant 1.000000e+00 : f32
    %49 = vector.broadcast %cst_16 : f32 to vector<64x2xf32>
    %50 = arith.addf %49, %48 : vector<64x2xf32>
    %51 = arith.divf %49, %50 : vector<64x2xf32>
    %52 = vector.extract_strided_slice %45 {offsets = [0, 2], sizes = [64, 2], strides = [1, 1]} : vector<64x8xf32> to vector<64x2xf32>
    %53 = arith.negf %52 : vector<64x2xf32>
    %54 = math.exp %53 : vector<64x2xf32>
    %cst_17 = arith.constant 1.000000e+00 : f32
    %55 = vector.broadcast %cst_17 : f32 to vector<64x2xf32>
    %56 = arith.addf %55, %54 : vector<64x2xf32>
    %57 = arith.divf %55, %56 : vector<64x2xf32>
    %58 = vector.extract_strided_slice %45 {offsets = [0, 4], sizes = [64, 2], strides = [1, 1]} : vector<64x8xf32> to vector<64x2xf32>
    %59 = math.tanh %58 : vector<64x2xf32>
    %60 = vector.extract_strided_slice %45 {offsets = [0, 6], sizes = [64, 2], strides = [1, 1]} : vector<64x8xf32> to vector<64x2xf32>
    %61 = arith.negf %60 : vector<64x2xf32>
    %62 = math.exp %61 : vector<64x2xf32>
    %cst_18 = arith.constant 1.000000e+00 : f32
    %63 = vector.broadcast %cst_18 : f32 to vector<64x2xf32>
    %64 = arith.addf %63, %62 : vector<64x2xf32>
    %65 = arith.divf %63, %64 : vector<64x2xf32>
    %66 = arith.mulf %57, %36 : vector<64x2xf32>
    %67 = arith.mulf %51, %59 : vector<64x2xf32>
    %68 = arith.addf %66, %67 : vector<64x2xf32>
    %69 = math.tanh %68 : vector<64x2xf32>
    %70 = arith.mulf %65, %69 : vector<64x2xf32>
    %71 = tpu.concatenate %38, %70 in 1 : vector<64x2xf32>, vector<64x2xf32> -> vector<64x4xf32>
    %72 = arith.truncf %71 : vector<64x4xf32> to vector<64x4xbf16>
    %c0_19 = arith.constant 0 : index
    %c0_20 = arith.constant 0 : index
    %73 = vector.load %arg4[%c0_19, %c0_20] : memref<64x4xbf16, #tpu.memory_space<vmem>>, vector<64x4xbf16>
    tpu.vector_store %arg4[%c0_19, %c0_20], %72 {strides = array<i32>} : memref<64x4xbf16, #tpu.memory_space<vmem>>, vector<64x4xbf16>,
    return
  }
}

module attributes {stable_mosaic.version = 11 : i64} {
  func.func @_conv_bn_relu_pool_kernel(%arg0: i32, %arg1: memref<1x32x2x2xbf16, #tpu.memory_space<vmem>>, %arg2: memref<9x32x32xbf16, #tpu.memory_space<vmem>>, %arg3: memref<32x1xf32, #tpu.memory_space<vmem>>, %arg4: memref<1x1xf32, #tpu.memory_space<vmem>>, %arg5: memref<1x32x1xbf16, #tpu.memory_space<vmem>>, %arg6: memref<32x16xbf16, #tpu.memory_space<vmem>>) attributes {dimension_semantics = [#tpu.dimension_semantics<parallel>], iteration_bounds = array<i64: 2>, scalar_prefetch = 0 : i64, scratch_operands = 1 : i64, tpu.core_type = #tpu.core_type<tc>, window_params = [{transform_indices = @transform_0, window_bounds = array<i64: 1, 32, 2, 2>}, {pipeline_mode = #tpu.pipeline_mode<synchronous>, transform_indices = @transform_1, window_bounds = array<i64: 9, 32, 32>}, {pipeline_mode = #tpu.pipeline_mode<synchronous>, transform_indices = @transform_2, window_bounds = array<i64: 32, 1>}, {pipeline_mode = #tpu.pipeline_mode<synchronous>, transform_indices = @transform_3, window_bounds = array<i64: 1, 1>}, {transform_indices = @transform_4, window_bounds = array<i64: 1, 32, 1>}]} {
    %cst = arith.constant 0.000000e+00 : bf16
    %0 = vector.broadcast %cst : bf16 to vector<32x16xbf16>
    %c0 = arith.constant 0 : index
    %c0_0 = arith.constant 0 : index
    %1 = vector.load %arg6[%c0, %c0_0] : memref<32x16xbf16, #tpu.memory_space<vmem>>, vector<32x16xbf16>
    tpu.vector_store %arg6[%c0, %c0_0], %0 {strides = array<i32>} : memref<32x16xbf16, #tpu.memory_space<vmem>>, vector<32x16xbf16>,
    %c0_1 = arith.constant 0 : index
    %c0_2 = arith.constant 0 : index
    %c0_3 = arith.constant 0 : index
    %c0_4 = arith.constant 0 : index
    %2 = vector.load %arg1[%c0_1, %c0_2, %c0_3, %c0_4] : memref<1x32x2x2xbf16, #tpu.memory_space<vmem>>, vector<1x32x2x2xbf16>
    %3 = vector.shape_cast %2 : vector<1x32x2x2xbf16> to vector<32x2x2xbf16>
    %4 = vector.extract_strided_slice %3 {offsets = [0, 0, 0], sizes = [32, 1, 2], strides = [1, 1, 1]} : vector<32x2x2xbf16> to vector<32x1x2xbf16>
    %5 = vector.shape_cast %4 : vector<32x1x2xbf16> to vector<32x2xbf16>
    %c0_5 = arith.constant 0 : index
    %c5 = arith.constant 5 : index
    %6 = vector.load %arg6[%c0_5, %c5] : memref<32x16xbf16, #tpu.memory_space<vmem>>, vector<32x2xbf16>
    tpu.vector_store %arg6[%c0_5, %c5], %5 {strides = array<i32>} : memref<32x16xbf16, #tpu.memory_space<vmem>>, vector<32x2xbf16>,
    %7 = vector.extract_strided_slice %3 {offsets = [0, 1, 0], sizes = [32, 1, 2], strides = [1, 1, 1]} : vector<32x2x2xbf16> to vector<32x1x2xbf16>
    %8 = vector.shape_cast %7 : vector<32x1x2xbf16> to vector<32x2xbf16>
    %c0_6 = arith.constant 0 : index
    %c9 = arith.constant 9 : index
    %9 = vector.load %arg6[%c0_6, %c9] : memref<32x16xbf16, #tpu.memory_space<vmem>>, vector<32x2xbf16>
    tpu.vector_store %arg6[%c0_6, %c9], %8 {strides = array<i32>} : memref<32x16xbf16, #tpu.memory_space<vmem>>, vector<32x2xbf16>,
    %c0_7 = arith.constant 0 : index
    %c0_8 = arith.constant 0 : index
    %10 = vector.load %arg6[%c0_7, %c0_8] : memref<32x16xbf16, #tpu.memory_space<vmem>>, vector<32x16xbf16>
    %cst_9 = arith.constant 0.000000e+00 : f32
    %11 = vector.broadcast %cst_9 : f32 to vector<32x6xf32>
    %c0_10 = arith.constant 0 : index
    %c0_11 = arith.constant 0 : index
    %c0_12 = arith.constant 0 : index
    %12 = vector.load %arg2[%c0_10, %c0_11, %c0_12] : memref<9x32x32xbf16, #tpu.memory_space<vmem>>, vector<1x32x32xbf16>
    %13 = vector.shape_cast %12 : vector<1x32x32xbf16> to vector<32x32xbf16>
    %14 = vector.extract_strided_slice %10 {offsets = [0, 0], sizes = [32, 6], strides = [1, 1]} : vector<32x16xbf16> to vector<32x6xbf16>
    %cst_13 = arith.constant dense<0.000000e+00> : vector<32x6xf32>
    %15 = tpu.matmul %13, %14, %cst_13 {dimension_numbers = #tpu.dot_dimension_numbers<[1], [0], [0], [1], [0, 0, 1, 1], [], []>} : vector<32x32xbf16>, vector<32x6xbf16>, vector<32x6xf32> -> vector<32x6xf32>
    %16 = arith.addf %11, %15 : vector<32x6xf32>
    %c1 = arith.constant 1 : index
    %c0_14 = arith.constant 0 : index
    %c0_15 = arith.constant 0 : index
    %17 = vector.load %arg2[%c1, %c0_14, %c0_15] : memref<9x32x32xbf16, #tpu.memory_space<vmem>>, vector<1x32x32xbf16>
    %18 = vector.shape_cast %17 : vector<1x32x32xbf16> to vector<32x32xbf16>
    %19 = vector.extract_strided_slice %10 {offsets = [0, 1], sizes = [32, 6], strides = [1, 1]} : vector<32x16xbf16> to vector<32x6xbf16>
    %cst_16 = arith.constant dense<0.000000e+00> : vector<32x6xf32>
    %20 = tpu.matmul %18, %19, %cst_16 {dimension_numbers = #tpu.dot_dimension_numbers<[1], [0], [0], [1], [0, 0, 1, 1], [], []>} : vector<32x32xbf16>, vector<32x6xbf16>, vector<32x6xf32> -> vector<32x6xf32>
    %21 = arith.addf %16, %20 : vector<32x6xf32>
    %c2 = arith.constant 2 : index
    %c0_17 = arith.constant 0 : index
    %c0_18 = arith.constant 0 : index
    %22 = vector.load %arg2[%c2, %c0_17, %c0_18] : memref<9x32x32xbf16, #tpu.memory_space<vmem>>, vector<1x32x32xbf16>
    %23 = vector.shape_cast %22 : vector<1x32x32xbf16> to vector<32x32xbf16>
    %24 = vector.extract_strided_slice %10 {offsets = [0, 2], sizes = [32, 6], strides = [1, 1]} : vector<32x16xbf16> to vector<32x6xbf16>
    %cst_19 = arith.constant dense<0.000000e+00> : vector<32x6xf32>
    %25 = tpu.matmul %23, %24, %cst_19 {dimension_numbers = #tpu.dot_dimension_numbers<[1], [0], [0], [1], [0, 0, 1, 1], [], []>} : vector<32x32xbf16>, vector<32x6xbf16>, vector<32x6xf32> -> vector<32x6xf32>
    %26 = arith.addf %21, %25 : vector<32x6xf32>
    %c3 = arith.constant 3 : index
    %c0_20 = arith.constant 0 : index
    %c0_21 = arith.constant 0 : index
    %27 = vector.load %arg2[%c3, %c0_20, %c0_21] : memref<9x32x32xbf16, #tpu.memory_space<vmem>>, vector<1x32x32xbf16>
    %28 = vector.shape_cast %27 : vector<1x32x32xbf16> to vector<32x32xbf16>
    %29 = vector.extract_strided_slice %10 {offsets = [0, 4], sizes = [32, 6], strides = [1, 1]} : vector<32x16xbf16> to vector<32x6xbf16>
    %cst_22 = arith.constant dense<0.000000e+00> : vector<32x6xf32>
    %30 = tpu.matmul %28, %29, %cst_22 {dimension_numbers = #tpu.dot_dimension_numbers<[1], [0], [0], [1], [0, 0, 1, 1], [], []>} : vector<32x32xbf16>, vector<32x6xbf16>, vector<32x6xf32> -> vector<32x6xf32>
    %31 = arith.addf %26, %30 : vector<32x6xf32>
    %c4 = arith.constant 4 : index
    %c0_23 = arith.constant 0 : index
    %c0_24 = arith.constant 0 : index
    %32 = vector.load %arg2[%c4, %c0_23, %c0_24] : memref<9x32x32xbf16, #tpu.memory_space<vmem>>, vector<1x32x32xbf16>
    %33 = vector.shape_cast %32 : vector<1x32x32xbf16> to vector<32x32xbf16>
    %34 = vector.extract_strided_slice %10 {offsets = [0, 5], sizes = [32, 6], strides = [1, 1]} : vector<32x16xbf16> to vector<32x6xbf16>
    %cst_25 = arith.constant dense<0.000000e+00> : vector<32x6xf32>
    %35 = tpu.matmul %33, %34, %cst_25 {dimension_numbers = #tpu.dot_dimension_numbers<[1], [0], [0], [1], [0, 0, 1, 1], [], []>} : vector<32x32xbf16>, vector<32x6xbf16>, vector<32x6xf32> -> vector<32x6xf32>
    %36 = arith.addf %31, %35 : vector<32x6xf32>
    %c5_26 = arith.constant 5 : index
    %c0_27 = arith.constant 0 : index
    %c0_28 = arith.constant 0 : index
    %37 = vector.load %arg2[%c5_26, %c0_27, %c0_28] : memref<9x32x32xbf16, #tpu.memory_space<vmem>>, vector<1x32x32xbf16>
    %38 = vector.shape_cast %37 : vector<1x32x32xbf16> to vector<32x32xbf16>
    %39 = vector.extract_strided_slice %10 {offsets = [0, 6], sizes = [32, 6], strides = [1, 1]} : vector<32x16xbf16> to vector<32x6xbf16>
    %cst_29 = arith.constant dense<0.000000e+00> : vector<32x6xf32>
    %40 = tpu.matmul %38, %39, %cst_29 {dimension_numbers = #tpu.dot_dimension_numbers<[1], [0], [0], [1], [0, 0, 1, 1], [], []>} : vector<32x32xbf16>, vector<32x6xbf16>, vector<32x6xf32> -> vector<32x6xf32>
    %41 = arith.addf %36, %40 : vector<32x6xf32>
    %c6 = arith.constant 6 : index
    %c0_30 = arith.constant 0 : index
    %c0_31 = arith.constant 0 : index
    %42 = vector.load %arg2[%c6, %c0_30, %c0_31] : memref<9x32x32xbf16, #tpu.memory_space<vmem>>, vector<1x32x32xbf16>
    %43 = vector.shape_cast %42 : vector<1x32x32xbf16> to vector<32x32xbf16>
    %44 = vector.extract_strided_slice %10 {offsets = [0, 8], sizes = [32, 6], strides = [1, 1]} : vector<32x16xbf16> to vector<32x6xbf16>
    %cst_32 = arith.constant dense<0.000000e+00> : vector<32x6xf32>
    %45 = tpu.matmul %43, %44, %cst_32 {dimension_numbers = #tpu.dot_dimension_numbers<[1], [0], [0], [1], [0, 0, 1, 1], [], []>} : vector<32x32xbf16>, vector<32x6xbf16>, vector<32x6xf32> -> vector<32x6xf32>
    %46 = arith.addf %41, %45 : vector<32x6xf32>
    %c7 = arith.constant 7 : index
    %c0_33 = arith.constant 0 : index
    %c0_34 = arith.constant 0 : index
    %47 = vector.load %arg2[%c7, %c0_33, %c0_34] : memref<9x32x32xbf16, #tpu.memory_space<vmem>>, vector<1x32x32xbf16>
    %48 = vector.shape_cast %47 : vector<1x32x32xbf16> to vector<32x32xbf16>
    %49 = vector.extract_strided_slice %10 {offsets = [0, 9], sizes = [32, 6], strides = [1, 1]} : vector<32x16xbf16> to vector<32x6xbf16>
    %cst_35 = arith.constant dense<0.000000e+00> : vector<32x6xf32>
    %50 = tpu.matmul %48, %49, %cst_35 {dimension_numbers = #tpu.dot_dimension_numbers<[1], [0], [0], [1], [0, 0, 1, 1], [], []>} : vector<32x32xbf16>, vector<32x6xbf16>, vector<32x6xf32> -> vector<32x6xf32>
    %51 = arith.addf %46, %50 : vector<32x6xf32>
    %c8 = arith.constant 8 : index
    %c0_36 = arith.constant 0 : index
    %c0_37 = arith.constant 0 : index
    %52 = vector.load %arg2[%c8, %c0_36, %c0_37] : memref<9x32x32xbf16, #tpu.memory_space<vmem>>, vector<1x32x32xbf16>
    %53 = vector.shape_cast %52 : vector<1x32x32xbf16> to vector<32x32xbf16>
    %54 = vector.extract_strided_slice %10 {offsets = [0, 10], sizes = [32, 6], strides = [1, 1]} : vector<32x16xbf16> to vector<32x6xbf16>
    %cst_38 = arith.constant dense<0.000000e+00> : vector<32x6xf32>
    %55 = tpu.matmul %53, %54, %cst_38 {dimension_numbers = #tpu.dot_dimension_numbers<[1], [0], [0], [1], [0, 0, 1, 1], [], []>} : vector<32x32xbf16>, vector<32x6xbf16>, vector<32x6xf32> -> vector<32x6xf32>
    %56 = arith.addf %51, %55 : vector<32x6xf32>
    %c0_39 = arith.constant 0 : index
    %c0_40 = arith.constant 0 : index
    %57 = vector.load %arg3[%c0_39, %c0_40] : memref<32x1xf32, #tpu.memory_space<vmem>>, vector<32x1xf32>
    %58 = vector.broadcast %57 : vector<32x1xf32> to vector<32x6xf32>
    %59 = arith.addf %56, %58 : vector<32x6xf32>
    %cst_41 = arith.constant 0.000000e+00 : f32
    %60 = vector.broadcast %cst_41 : f32 to vector<32x6xf32>
    %61 = arith.maximumf %59, %60 : vector<32x6xf32>
    %62 = vector.extract_strided_slice %61 {offsets = [0, 0], sizes = [32, 1], strides = [1, 1]} : vector<32x6xf32> to vector<32x1xf32>
    %63 = vector.extract_strided_slice %61 {offsets = [0, 1], sizes = [32, 1], strides = [1, 1]} : vector<32x6xf32> to vector<32x1xf32>
    %64 = vector.extract_strided_slice %61 {offsets = [0, 4], sizes = [32, 1], strides = [1, 1]} : vector<32x6xf32> to vector<32x1xf32>
    %65 = vector.extract_strided_slice %61 {offsets = [0, 5], sizes = [32, 1], strides = [1, 1]} : vector<32x6xf32> to vector<32x1xf32>
    %66 = arith.maximumf %62, %63 : vector<32x1xf32>
    %67 = arith.maximumf %64, %65 : vector<32x1xf32>
    %68 = arith.maximumf %66, %67 : vector<32x1xf32>
    %69 = arith.truncf %68 : vector<32x1xf32> to vector<32x1xbf16>
    %c0_42 = arith.constant 0 : index
    %c0_43 = arith.constant 0 : index
    %c0_44 = arith.constant 0 : index
    %70 = vector.load %arg5[%c0_42, %c0_43, %c0_44] : memref<1x32x1xbf16, #tpu.memory_space<vmem>>, vector<1x32x1xbf16>
    %71 = vector.shape_cast %70 : vector<1x32x1xbf16> to vector<32x1xbf16>
    %72 = vector.shape_cast %69 : vector<32x1xbf16> to vector<1x32x1xbf16>
    tpu.vector_store %arg5[%c0_42, %c0_43, %c0_44], %72 {strides = array<i32>} : memref<1x32x1xbf16, #tpu.memory_space<vmem>>, vector<1x32x1xbf16>,
    return
  }
  func.func @transform_0(%arg0: i32) -> (i32, i32, i32, i32) {
    %c0_i32 = arith.constant 0 : i32
    %c0_i32_0 = arith.constant 0 : i32
    %c0_i32_1 = arith.constant 0 : i32
    %c0_i32_2 = arith.constant 0 : i32
    return %arg0, %c0_i32, %c0_i32_0, %c0_i32_1 : i32, i32, i32, i32
  }
  func.func @transform_1(%arg0: i32) -> (i32, i32, i32) {
    %c0_i32 = arith.constant 0 : i32
    %c0_i32_0 = arith.constant 0 : i32
    %c0_i32_1 = arith.constant 0 : i32
    %c0_i32_2 = arith.constant 0 : i32
    return %c0_i32, %c0_i32_0, %c0_i32_1 : i32, i32, i32
  }
  func.func @transform_2(%arg0: i32) -> (i32, i32) {
    %c0_i32 = arith.constant 0 : i32
    %c0_i32_0 = arith.constant 0 : i32
    %c0_i32_1 = arith.constant 0 : i32
    return %c0_i32, %c0_i32_0 : i32, i32
  }
  func.func @transform_3(%arg0: i32) -> (i32, i32) {
    %c0_i32 = arith.constant 0 : i32
    %c0_i32_0 = arith.constant 0 : i32
    %c0_i32_1 = arith.constant 0 : i32
    return %c0_i32, %c0_i32_0 : i32, i32
  }
  func.func @transform_4(%arg0: i32) -> (i32, i32, i32) {
    %c0_i32 = arith.constant 0 : i32
    %c0_i32_0 = arith.constant 0 : i32
    %c0_i32_1 = arith.constant 0 : i32
    return %arg0, %c0_i32, %c0_i32_0 : i32, i32, i32
  }
}

module attributes {stable_mosaic.version = 11 : i64} {
  func.func @_dense_kernel(%arg0: i32, %arg1: i32, %arg2: i32, %arg3: memref<2x512xbf16, #tpu.memory_space<vmem>>, %arg4: memref<512x128xbf16, #tpu.memory_space<vmem>>, %arg5: memref<1x128xf32, #tpu.memory_space<vmem>>, %arg6: memref<2x128xf32, #tpu.memory_space<vmem>>, %arg7: memref<2x128xf32, #tpu.memory_space<vmem>>) attributes {dimension_semantics = [#tpu.dimension_semantics<parallel>, #tpu.dimension_semantics<parallel>, #tpu.dimension_semantics<arbitrary>], iteration_bounds = array<i64: 1, 1, 4>, scalar_prefetch = 0 : i64, scratch_operands = 1 : i64, tpu.core_type = #tpu.core_type<tc>, window_params = [{transform_indices = @transform_0, window_bounds = array<i64: 2, 512>}, {transform_indices = @transform_1, window_bounds = array<i64: 512, 128>}, {transform_indices = @transform_2, window_bounds = array<i64: 1, 128>}, {transform_indices = @transform_3, window_bounds = array<i64: 2, 128>}]} {
    %c0_i32 = arith.constant 0 : i32
    %0 = arith.cmpi eq, %arg2, %c0_i32 : i32
    %1 = arith.extui %0 : i1 to i32
    %c0_i32_0 = arith.constant 0 : i32
    %2 = arith.cmpi ne, %1, %c0_i32_0 : i32
    scf.if %2 {
      %cst_9 = arith.constant 0.000000e+00 : f32
      %12 = vector.broadcast %cst_9 : f32 to vector<2x128xf32>
      %c0_10 = arith.constant 0 : index
      %c0_11 = arith.constant 0 : index
      %13 = vector.load %arg7[%c0_10, %c0_11] : memref<2x128xf32, #tpu.memory_space<vmem>>, vector<2x128xf32>
      tpu.vector_store %arg7[%c0_10, %c0_11], %12 {strides = array<i32>} : memref<2x128xf32, #tpu.memory_space<vmem>>, vector<2x128xf32>,
    } else {
    }
    %c0 = arith.constant 0 : index
    %c0_1 = arith.constant 0 : index
    %3 = vector.load %arg7[%c0, %c0_1] : memref<2x128xf32, #tpu.memory_space<vmem>>, vector<2x128xf32>
    %c0_2 = arith.constant 0 : index
    %c0_3 = arith.constant 0 : index
    %4 = vector.load %arg3[%c0_2, %c0_3] : memref<2x512xbf16, #tpu.memory_space<vmem>>, vector<2x512xbf16>
    %c0_4 = arith.constant 0 : index
    %c0_5 = arith.constant 0 : index
    %5 = vector.load %arg4[%c0_4, %c0_5] : memref<512x128xbf16, #tpu.memory_space<vmem>>, vector<512x128xbf16>
    %cst = arith.constant dense<0.000000e+00> : vector<2x128xf32>
    %6 = tpu.matmul %4, %5, %cst {dimension_numbers = #tpu.dot_dimension_numbers<[1], [0], [0], [1], [0, 0, 1, 1], [], []>} : vector<2x512xbf16>, vector<512x128xbf16>, vector<2x128xf32> -> vector<2x128xf32>
    %7 = arith.addf %3, %6 : vector<2x128xf32>
    %c0_6 = arith.constant 0 : index
    %c0_7 = arith.constant 0 : index
    %8 = vector.load %arg7[%c0_6, %c0_7] : memref<2x128xf32, #tpu.memory_space<vmem>>, vector<2x128xf32>
    tpu.vector_store %arg7[%c0_6, %c0_7], %7 {strides = array<i32>} : memref<2x128xf32, #tpu.memory_space<vmem>>, vector<2x128xf32>,
    %c3_i32 = arith.constant 3 : i32
    %9 = arith.cmpi eq, %arg2, %c3_i32 : i32
    %10 = arith.extui %9 : i1 to i32
    %c0_i32_8 = arith.constant 0 : i32
    %11 = arith.cmpi ne, %10, %c0_i32_8 : i32
    scf.if %11 {
      %c0_9 = arith.constant 0 : index
      %c0_10 = arith.constant 0 : index
      %12 = vector.load %arg7[%c0_9, %c0_10] : memref<2x128xf32, #tpu.memory_space<vmem>>, vector<2x128xf32>
      %c0_11 = arith.constant 0 : index
      %c0_12 = arith.constant 0 : index
      %13 = vector.load %arg5[%c0_11, %c0_12] : memref<1x128xf32, #tpu.memory_space<vmem>>, vector<1x128xf32>
      %14 = vector.broadcast %13 : vector<1x128xf32> to vector<2x128xf32>
      %15 = arith.addf %12, %14 : vector<2x128xf32>
      %16 = arith.negf %15 : vector<2x128xf32>
      %17 = math.exp %16 : vector<2x128xf32>
      %cst_13 = arith.constant 1.000000e+00 : f32
      %18 = vector.broadcast %cst_13 : f32 to vector<2x128xf32>
      %19 = arith.addf %18, %17 : vector<2x128xf32>
      %20 = arith.divf %18, %19 : vector<2x128xf32>
      %c0_14 = arith.constant 0 : index
      %c0_15 = arith.constant 0 : index
      %21 = vector.load %arg6[%c0_14, %c0_15] : memref<2x128xf32, #tpu.memory_space<vmem>>, vector<2x128xf32>
      tpu.vector_store %arg6[%c0_14, %c0_15], %20 {strides = array<i32>} : memref<2x128xf32, #tpu.memory_space<vmem>>, vector<2x128xf32>,
    } else {
    }
    return
  }
  func.func @transform_0(%arg0: i32, %arg1: i32, %arg2: i32) -> (i32, i32) {
    %c0_i32 = arith.constant 0 : i32
    return %arg0, %arg2 : i32, i32
  }
  func.func @transform_1(%arg0: i32, %arg1: i32, %arg2: i32) -> (i32, i32) {
    %c0_i32 = arith.constant 0 : i32
    return %arg2, %arg1 : i32, i32
  }
  func.func @transform_2(%arg0: i32, %arg1: i32, %arg2: i32) -> (i32, i32) {
    %c0_i32 = arith.constant 0 : i32
    %c0_i32_0 = arith.constant 0 : i32
    return %c0_i32, %arg1 : i32, i32
  }
  func.func @transform_3(%arg0: i32, %arg1: i32, %arg2: i32) -> (i32, i32) {
    %c0_i32 = arith.constant 0 : i32
    return %arg0, %arg1 : i32, i32
  }
}

module attributes {stable_mosaic.version = 11 : i64} {
  func.func @_dense_kernel(%arg0: i32, %arg1: i32, %arg2: i32, %arg3: memref<2x32xbf16, #tpu.memory_space<vmem>>, %arg4: memref<32x512xbf16, #tpu.memory_space<vmem>>, %arg5: memref<1x512xf32, #tpu.memory_space<vmem>>, %arg6: memref<2x512xbf16, #tpu.memory_space<vmem>>, %arg7: memref<2x512xf32, #tpu.memory_space<vmem>>) attributes {dimension_semantics = [#tpu.dimension_semantics<parallel>, #tpu.dimension_semantics<parallel>, #tpu.dimension_semantics<arbitrary>], iteration_bounds = array<i64: 1, 4, 1>, scalar_prefetch = 0 : i64, scratch_operands = 1 : i64, tpu.core_type = #tpu.core_type<tc>, window_params = [{transform_indices = @transform_0, window_bounds = array<i64: 2, 32>}, {transform_indices = @transform_1, window_bounds = array<i64: 32, 512>}, {transform_indices = @transform_2, window_bounds = array<i64: 1, 512>}, {transform_indices = @transform_3, window_bounds = array<i64: 2, 512>}]} {
    %c0_i32 = arith.constant 0 : i32
    %0 = arith.cmpi eq, %arg2, %c0_i32 : i32
    %1 = arith.extui %0 : i1 to i32
    %c0_i32_0 = arith.constant 0 : i32
    %2 = arith.cmpi ne, %1, %c0_i32_0 : i32
    scf.if %2 {
      %cst_10 = arith.constant 0.000000e+00 : f32
      %12 = vector.broadcast %cst_10 : f32 to vector<2x512xf32>
      %c0_11 = arith.constant 0 : index
      %c0_12 = arith.constant 0 : index
      %13 = vector.load %arg7[%c0_11, %c0_12] : memref<2x512xf32, #tpu.memory_space<vmem>>, vector<2x512xf32>
      tpu.vector_store %arg7[%c0_11, %c0_12], %12 {strides = array<i32>} : memref<2x512xf32, #tpu.memory_space<vmem>>, vector<2x512xf32>,
    } else {
    }
    %c0 = arith.constant 0 : index
    %c0_1 = arith.constant 0 : index
    %3 = vector.load %arg7[%c0, %c0_1] : memref<2x512xf32, #tpu.memory_space<vmem>>, vector<2x512xf32>
    %c0_2 = arith.constant 0 : index
    %c0_3 = arith.constant 0 : index
    %4 = vector.load %arg3[%c0_2, %c0_3] : memref<2x32xbf16, #tpu.memory_space<vmem>>, vector<2x32xbf16>
    %c0_4 = arith.constant 0 : index
    %c0_5 = arith.constant 0 : index
    %5 = vector.load %arg4[%c0_4, %c0_5] : memref<32x512xbf16, #tpu.memory_space<vmem>>, vector<32x512xbf16>
    %cst = arith.constant dense<0.000000e+00> : vector<2x512xf32>
    %6 = tpu.matmul %4, %5, %cst {dimension_numbers = #tpu.dot_dimension_numbers<[1], [0], [0], [1], [0, 0, 1, 1], [], []>} : vector<2x32xbf16>, vector<32x512xbf16>, vector<2x512xf32> -> vector<2x512xf32>
    %7 = arith.addf %3, %6 : vector<2x512xf32>
    %c0_6 = arith.constant 0 : index
    %c0_7 = arith.constant 0 : index
    %8 = vector.load %arg7[%c0_6, %c0_7] : memref<2x512xf32, #tpu.memory_space<vmem>>, vector<2x512xf32>
    tpu.vector_store %arg7[%c0_6, %c0_7], %7 {strides = array<i32>} : memref<2x512xf32, #tpu.memory_space<vmem>>, vector<2x512xf32>,
    %c0_i32_8 = arith.constant 0 : i32
    %9 = arith.cmpi eq, %arg2, %c0_i32_8 : i32
    %10 = arith.extui %9 : i1 to i32
    %c0_i32_9 = arith.constant 0 : i32
    %11 = arith.cmpi ne, %10, %c0_i32_9 : i32
    scf.if %11 {
      %c0_10 = arith.constant 0 : index
      %c0_11 = arith.constant 0 : index
      %12 = vector.load %arg7[%c0_10, %c0_11] : memref<2x512xf32, #tpu.memory_space<vmem>>, vector<2x512xf32>
      %c0_12 = arith.constant 0 : index
      %c0_13 = arith.constant 0 : index
      %13 = vector.load %arg5[%c0_12, %c0_13] : memref<1x512xf32, #tpu.memory_space<vmem>>, vector<1x512xf32>
      %14 = vector.broadcast %13 : vector<1x512xf32> to vector<2x512xf32>
      %15 = arith.addf %12, %14 : vector<2x512xf32>
      %cst_14 = arith.constant 0.000000e+00 : f32
      %16 = vector.broadcast %cst_14 : f32 to vector<2x512xf32>
      %17 = arith.maximumf %15, %16 : vector<2x512xf32>
      %18 = arith.truncf %17 : vector<2x512xf32> to vector<2x512xbf16>
      %c0_15 = arith.constant 0 : index
      %c0_16 = arith.constant 0 : index
      %19 = vector.load %arg6[%c0_15, %c0_16] : memref<2x512xbf16, #tpu.memory_space<vmem>>, vector<2x512xbf16>
      tpu.vector_store %arg6[%c0_15, %c0_16], %18 {strides = array<i32>} : memref<2x512xbf16, #tpu.memory_space<vmem>>, vector<2x512xbf16>,
    } else {
    }
    return
  }
  func.func @transform_0(%arg0: i32, %arg1: i32, %arg2: i32) -> (i32, i32) {
    %c0_i32 = arith.constant 0 : i32
    return %arg0, %arg2 : i32, i32
  }
  func.func @transform_1(%arg0: i32, %arg1: i32, %arg2: i32) -> (i32, i32) {
    %c0_i32 = arith.constant 0 : i32
    return %arg2, %arg1 : i32, i32
  }
  func.func @transform_2(%arg0: i32, %arg1: i32, %arg2: i32) -> (i32, i32) {
    %c0_i32 = arith.constant 0 : i32
    %c0_i32_0 = arith.constant 0 : i32
    return %c0_i32, %arg1 : i32, i32
  }
  func.func @transform_3(%arg0: i32, %arg1: i32, %arg2: i32) -> (i32, i32) {
    %c0_i32 = arith.constant 0 : i32
    return %arg0, %arg1 : i32, i32
  }
}

</mosaic_0001>

<bundles_post_ra>
// kernel: orchmatchnet_forward.8
= control target key start
LH: loop header
LB: loop body
LE: loop exit
PB: predicated region body
PF: predicated region fallthrough
CT: control target
= control target key end

     0   :  { %s1404_s15 = smov 0   ;;  %s1672_s0 = inlined_call_operand.vmem [shape: bf16[2,8,8,8], index: 0, kind: input, shape index: {}]   ;;  %s1673_s1 = inlined_call_operand.vmem [shape: bf16[9,16,8], index: 1, kind: input, shape index: {}]   ;;  %s1674_s2 = inlined_call_operand.vmem [shape: f32[16,1], index: 2, kind: input, shape index: {}]   ;;  %s1675_s3 = inlined_call_operand.vmem [shape: f32[67,16], index: 3, kind: input, shape index: {}]   ;;  %s1676_s4 = inlined_call_operand.vmem [shape: bf16[2,16,16], index: 4, kind: output, shape index: {}]  }
   0x1 LB: > { %s1119_s16 = sadd.s32 4294967295, %s1358_s15   ;;  %p1123_p0 = scmp.ge.s32.totalorder %s1358_s15, 1  ;;  %s1358_s15 = sphi %s1404_s15, %s14_s15  }
   0x2   : > { %p162_p1 = scmp.lt.s32.totalorder %s1358_s15, 3 }
   0x4   : > { %p163_p2 = pnand %p1123_p0, %p162_p1 }
   0x5   : > { %p188_p3 = scmp.lt.s32.totalorder (!%p163_p2), %s1119_s16, 1  ;;  %vm199_vm0 = vcmask (!%p163_p2), 814080   ;;  %vm226_vm1 = vcmask (!%p163_p2), 1041409   ;;  %v1360_v0 = vmov (!%p163_p2), 0   ;;  %vm229_vm2 = vcmask (!%p163_p2), 1042434   ;;  %s1361_s21 = smov (!%p163_p2), 11  }
   0x6   : > { %166 = sbr.rel (%p163_p2) target bundleno = 1000 (0x3e8), region = 36  ;;  %200 = vst.msk [vmem:[#allocation2] sm:$0xf] (!%p163_p2), %vm199_vm0, %v1360_v0  ;;  %1340 = vset.pattern.permute.xlu0 (!%p163_p2), %v1360_v0  ;;  %1341 = vset.pattern.permute.xlu1 (!%p163_p2), %v1360_v0  ;;  %vm232_vm3 = vcmask (!%p163_p2), 1043459   ;;  %vm235_vm4 = vcmask (!%p163_p2), 1044484   ;;  %vm238_vm5 = vcmask (!%p163_p2), 1045509  }
   0x7   : > { %vm241_vm6 = vcmask (!%p163_p2), 1046534   ;;  %vm244_vm7 = vcmask (!%p163_p2), 1047559   ;;  %s1362_s22 = smov (!%p163_p2), 31   ;;  %s1363_s23 = smov (!%p163_p2), 21   ;;  %vm1370_vm8 = vmmov (!%p163_p2), 0   ;;  %vm250_vm9 = vcmask (!%p163_p2), 150616  }
   0x8   : > { %s1364_s24 = smov (!%p163_p2), 41   ;;  %s1365_s25 = smov (!%p163_p2), 51   ;;  %vm270_vm10 = vcmask (!%p163_p2), 232616   ;;  %vm290_vm11 = vcmask (!%p163_p2), 314616   ;;  %vm310_vm12 = vcmask (!%p163_p2), 396616   ;;  %vm330_vm13 = vcmask (!%p163_p2), 478616  }
   0x9   : > { %s1366_s26 = smov (!%p163_p2), 61   ;;  %s1367_s27 = smov (!%p163_p2), 71   ;;  %vm350_vm14 = vcmask (!%p163_p2), 560616   ;;  %vm370_vm15 = vcmask (!%p163_p2), 642616   ;;  %vm390_vm0 = vcmask (!%p163_p2), 724616  }
   0xa   : > { %s1369_s28 = smov (!%p163_p2), 81   ;;  %s1371_s5 = smov (!%p163_p2), 126  }
   0xb   : > { %s1372_s6 = smov (!%p163_p2), 127   ;;  %s1373_s7 = smov (!%p163_p2), 117  }
   0xc   : > { %s1374_s8 = smov (!%p163_p2), 118   ;;  %s1375_s9 = smov (!%p163_p2), 108  }
   0xd   : > { %s1678_s16 = smov (!%p188_p3, %s1119_s16), 1  ;;  %s1376_s10 = smov 116  }
   0xe   : > { %s1170_s17 = sshll.u32 %s1678_s16, 5  ;;  %s1377_s11 = smov 106  }
   0xf   : > { %s192_s20 = scalar_lea.vmem %s1672_s0, %s1170_s17  ;;  %s1378_s12 = smov 107  }
  0x10   : > { %v1175_v1 = vld [vmem:[%s192_s20] sm:$0xff]   ;;  %v1190_v2 = vld [vmem:[%s192_s20 + $0x8] sm:$0xff]   ;;  %v1191_v3 = vld [vmem:[%s192_s20 + $0x10] sm:$0xff]  }
  0x11   : > { %v1418_v4 = vunpack.c.l.b16 %v1175_v1  ;;  %v1420_v5 = vunpack.c.h.b16 %v1175_v1  ;;  %v1422_v6 = vunpack.c.l.b16 %v1190_v2  ;;  %v1424_v7 = vunpack.c.h.b16 %v1190_v2  ;;  %v1192_v8 = vld [vmem:[%s192_s20 + $0x18] sm:$0xff]  }
  0x12   : > { %v1426_v9 = vunpack.c.l.b16 %v1191_v3  ;;  %v1428_v10 = vunpack.c.h.b16 %v1191_v3  ;;  %v1430_v11 = vunpack.c.l.b16 %v1192_v8  ;;  %v1432_v12 = vunpack.c.h.b16 %v1192_v8 }
  0x13   : > { %v225_v13 = vrot.slane %v1420_v5, 7  ;;  %v228_v14 = vrot.slane %v1422_v6, 6  ;;  %v231_v15 = vrot.slane %v1424_v7, 5  ;;  %v272_v16 = vrot.slane %v1418_v4, 2 }
  0x14   : > { %v234_v17 = vrot.slane %v1426_v9, 4  ;;  %v237_v18 = vrot.slane %v1428_v10, 3  ;;  %v240_v19 = vrot.slane %v1430_v11, 2  ;;  %v243_v20 = vrot.slane %v1432_v12, 1 }
  0x15   : > { %v227_v21 = vsel %vm226_vm1, %v225_v13, %v1418_v4  ;;  %v273_v22 = vrot.slane %v1420_v5, 1  ;;  %v276_v23 = vrot.slane %v1424_v7, 7  ;;  %v278_v24 = vrot.slane %v1426_v9, 6 }
  0x16   : > { %v230_v25 = vsel %vm229_vm2, %v228_v14, %v227_v21  ;;  %v280_v26 = vrot.slane %v1428_v10, 5  ;;  %v282_v27 = vrot.slane %v1430_v11, 4  ;;  %v284_v28 = vrot.slane %v1432_v12, 3 }
  0x17   : > { %v233_v29 = vsel %vm232_vm3, %v231_v15, %v230_v25  ;;  %v274_v30 = vsel %vm226_vm1, %v273_v22, %v272_v16  ;;  %v252_v31 = vrot.slane %v1418_v4, 1  ;;  %v254_v32 = vrot.slane %v1422_v6, 7 }
  0x18   : > { %v236_v33 = vsel %vm235_vm4, %v234_v17, %v233_v29  ;;  %v275_v34 = vsel %vm229_vm2, %v1422_v6, %v274_v30  ;;  %v256_v35 = vrot.slane %v1424_v7, 6  ;;  %v258_v36 = vrot.slane %v1426_v9, 5 }
  0x19   : > { %v239_v37 = vsel %vm238_vm5, %v237_v18, %v236_v33  ;;  %v277_v38 = vsel %vm232_vm3, %v276_v23, %v275_v34  ;;  %v253_v39 = vsel %vm226_vm1, %v1420_v5, %v252_v31  ;;  %v260_v40 = vrot.slane %v1428_v10, 4 }
  0x1a   : > { %v242_v41 = vsel %vm241_vm6, %v240_v19, %v239_v37  ;;  %v279_v42 = vsel %vm235_vm4, %v278_v24, %v277_v38  ;;  %v255_v43 = vsel %vm229_vm2, %v254_v32, %v253_v39  ;;  %v262_v44 = vrot.slane %v1430_v11, 3 }
  0x1b   : > { %v245_v45 = vsel %vm244_vm7, %v243_v20, %v242_v41  ;;  %v281_v46 = vsel %vm238_vm5, %v280_v26, %v279_v42  ;;  %v257_v47 = vsel %vm232_vm3, %v256_v35, %v255_v43  ;;  %v264_v48 = vrot.slane %v1432_v12, 2 }
  0x1c   : > { %v246_v49 = vpack.c.b16 %v245_v45, %v245_v45  ;;  %v283_v50 = vsel %vm241_vm6, %v282_v27, %v281_v46  ;;  %v259_v51 = vsel %vm235_vm4, %v258_v36, %v257_v47  ;;  %v292_v52 = vrot.slane %v1418_v4, 3 }
  0x1d   : > { %v285_v53 = vsel %vm244_vm7, %v284_v28, %v283_v50  ;;  %v261_v54 = vsel %vm238_vm5, %v260_v40, %v259_v51  ;;  %v293_v55 = vrot.slane %v1420_v5, 2  ;;  %v295_v56 = vrot.slane %v1422_v6, 1 }
  0x1e   : > { %247 = vrot.lane.b32.xlu0 %v246_v49, %s1361_s21  ;;  %v286_v57 = vpack.c.b16 %v285_v53, %v285_v53  ;;  %v263_v58 = vsel %vm241_vm6, %v262_v44, %v261_v54  ;;  %v298_v59 = vrot.slane %v1426_v9, 7  ;;  %v300_v60 = vrot.slane %v1428_v10, 6 }
  0x1f   : > { %v265_v61 = vsel %vm244_vm7, %v264_v48, %v263_v58  ;;  %v294_v62 = vsel %vm226_vm1, %v293_v55, %v292_v52  ;;  %v302_v63 = vrot.slane %v1430_v11, 5  ;;  %v304_v0 = vrot.slane %v1432_v12, 4 }
  0x20   : > { %287 = vrot.lane.b32.xlu1 %v286_v57, %s1362_s22  ;;  %v266_v1 = vpack.c.b16 %v265_v61, %v265_v61  ;;  %v296_v2 = vsel %vm229_vm2, %v295_v56, %v294_v62  ;;  %v312_v3 = vrot.slane %v1418_v4, 4  ;;  %v313_v8 = vrot.slane %v1420_v5, 3 }
  0x21   : > { %v297_v13 = vsel %vm232_vm3, %v1424_v7, %v296_v2  ;;  %v315_v14 = vrot.slane %v1422_v6, 2  ;;  %v317_v15 = vrot.slane %v1424_v7, 1  ;;  %v320_v16 = vrot.slane %v1428_v10, 7 }
  0x22   : > { %267 = vrot.lane.b32.xlu0 %v266_v1, %s1363_s23  ;;  %v299_v17 = vsel %vm235_vm4, %v298_v59, %v297_v13  ;;  %v314_v18 = vsel %vm226_vm1, %v313_v8, %v312_v3  ;;  %v322_v19 = vrot.slane %v1430_v11, 6  ;;  %v324_v20 = vrot.slane %v1432_v12, 5 }
  0x23   : > { %v301_v21 = vsel %vm238_vm5, %v300_v60, %v299_v17  ;;  %v316_v22 = vsel %vm229_vm2, %v315_v14, %v314_v18  ;;  %v332_v23 = vrot.slane %v1418_v4, 5  ;;  %v333_v24 = vrot.slane %v1420_v5, 4 }
  0x24   : > { %v303_v25 = vsel %vm241_vm6, %v302_v63, %v301_v21  ;;  %v318_v26 = vsel %vm232_vm3, %v317_v15, %v316_v22  ;;  %v335_v27 = vrot.slane %v1422_v6, 3  ;;  %v337_v28 = vrot.slane %v1424_v7, 2 }
  0x25   : > { %v305_v29 = vsel %vm244_vm7, %v304_v0, %v303_v25  ;;  %v319_v30 = vsel %vm235_vm4, %v1426_v9, %v318_v26  ;;  %v334_v31 = vsel %vm226_vm1, %v333_v24, %v332_v23  ;;  %v339_v32 = vrot.slane %v1426_v9, 1  ;;  %v1343_v25 = vld [vmem:[%s1673_s1] sm:$0xff]  }
  0x26   : > { %v306_v33 = vpack.c.b16 %v305_v29, %v305_v29  ;;  %v321_v34 = vsel %vm238_vm5, %v320_v16, %v319_v30  ;;  %v336_v35 = vsel %vm229_vm2, %v335_v27, %v334_v31  ;;  %v342_v36 = vrot.slane %v1430_v11, 7  ;;  %v922_v26 = vld [vmem:[%s1674_s2] sm:$0xff]  ;;  %v923_v27 = vld [vmem:[%s1674_s2 + $0x8] sm:$0xff] }
  0x27   : > { %v323_v37 = vsel %vm241_vm6, %v322_v19, %v321_v34  ;;  %v338_v38 = vsel %vm232_vm3, %v337_v28, %v336_v35  ;;  %v344_v39 = vrot.slane %v1432_v12, 6  ;;  %v352_v40 = vrot.slane %v1418_v4, 6  ;;  %v1344_v30 = vld [vmem:[%s1673_s1 + $0x8] sm:$0xff]   ;;  %v1345_v35 = vld [vmem:[%s1673_s1 + $0x18] sm:$0xff]  }
  0x28   : > { %307 = vrot.lane.b32.xlu1 %v306_v33, %s1364_s24  ;;  %v325_v41 = vsel %vm244_vm7, %v324_v20, %v323_v37  ;;  %v340_v42 = vsel %vm235_vm4, %v339_v32, %v338_v38  ;;  %v353_v43 = vrot.slane %v1420_v5, 5  ;;  %v355_v44 = vrot.slane %v1422_v6, 4  ;;  %v1346_v38 = vld [vmem:[%s1673_s1 + $0x10] sm:$0xff]  }
  0x29   : > { %v326_v45 = vpack.c.b16 %v325_v41, %v325_v41  ;;  %v341_v46 = vsel %vm238_vm5, %v1428_v10, %v340_v42  ;;  %v357_v47 = vrot.slane %v1424_v7, 3  ;;  %v359_v48 = vrot.slane %v1426_v9, 2  ;;  %v1347_v41 = vld [vmem:[%s1673_s1 + $0x28] sm:$0xff]  }
  0x2a   : > { %v343_v49 = vsel %vm241_vm6, %v342_v36, %v341_v46  ;;  %v354_v50 = vsel %vm226_vm1, %v353_v43, %v352_v40  ;;  %v361_v51 = vrot.slane %v1428_v10, 1  ;;  %v364_v52 = vrot.slane %v1432_v12, 7 }
  0x2b   : > { %327 = vrot.lane.b32.xlu0 %v326_v45, %s1365_s25  ;;  %v345_v53 = vsel %vm244_vm7, %v344_v39, %v343_v49  ;;  %v356_v54 = vsel %vm229_vm2, %v355_v44, %v354_v50  ;;  %v372_v55 = vrot.slane %v1418_v4, 7  ;;  %v373_v56 = vrot.slane %v1420_v5, 6  ;;  %v1348_v44 = vld [vmem:[%s1673_s1 + $0x20] sm:$0xff]  }
  0x2c   : > { %v346_v57 = vpack.c.b16 %v345_v53, %v345_v53  ;;  %v358_v58 = vsel %vm232_vm3, %v357_v47, %v356_v54  ;;  %v375_v59 = vrot.slane %v1422_v6, 5  ;;  %v377_v60 = vrot.slane %v1424_v7, 4  ;;  %v1350_v47 = vld [vmem:[%s1673_s1 + $0x38] sm:$0xff]  }
  0x2d   : > { %v360_v61 = vsel %vm235_vm4, %v359_v48, %v358_v58  ;;  %v374_v62 = vsel %vm226_vm1, %v373_v56, %v372_v55  ;;  %v379_v63 = vrot.slane %v1426_v9, 3  ;;  %v381_v0 = vrot.slane %v1428_v10, 2  ;;  %v1349_v48 = vld [vmem:[%s1673_s1 + $0x30] sm:$0xff]  }
  0x2e   : > { %347 = vrot.lane.b32.xlu1 %v346_v57, %s1366_s26  ;;  %v362_v4 = vsel %vm238_vm5, %v361_v51, %v360_v61  ;;  %v376_v5 = vsel %vm229_vm2, %v375_v59, %v374_v62  ;;  %v383_v1 = vrot.slane %v1430_v11, 1  ;;  %v1368_v14 = vmov 0.0   ;;  %v1351_v51 = vld [vmem:[%s1673_s1 + $0x40] sm:$0xff]  }
  0x2f   : > { %v363_v6 = vsel %vm241_vm6, %v1430_v11, %v362_v4  ;;  %v378_v7 = vsel %vm232_vm3, %v377_v60, %v376_v5  ;;  %1228 = vmatprep.subr.bf16.mxu1 %v1368_v14  ;;  %1222 = vmatprep.subr.bf16.mxu0 %v1368_v14  ;;  %vm412_vm1 = vcmask 1043456   ;;  %vm408_vm2 = vcmask 64512  }
  0x30   : > { %v365_v2 = vsel %vm244_vm7, %v364_v52, %v363_v6  ;;  %v380_v3 = vsel %vm235_vm4, %v379_v63, %v378_v7  ;;  %1230 = vmatprep.mubr.msk.bf16.mxu1 %vm1370_vm8, %v1368_v14  ;;  %1224 = vmatprep.mubr.msk.bf16.mxu0 %vm1370_vm8, %v1368_v14  ;;  %vm974_vm3 = vcmask 1042432   ;;  %vm967_vm4 = vcmask 547840  }
  0x31   : > { %v366_v9 = vpack.c.b16 %v365_v2, %v365_v2  ;;  %v382_v10 = vsel %vm238_vm5, %v381_v0, %v380_v3  ;;  %vm1061_vm5 = vcmask 125952  }
  0x32   : > { %v384_v8 = vsel %vm241_vm6, %v383_v1, %v382_v10 }
  0x33   : > { %367 = vrot.lane.b32.xlu0 %v366_v9, %s1367_s27  ;;  %v385_v13 = vsel %vm244_vm7, %v1432_v12, %v384_v8 }
  0x34   : > { %v386_v11 = vpack.c.b16 %v385_v13, %v385_v13 }
  0x36   : > { %387 = vrot.lane.b32.xlu1 %v386_v11, %s1369_s28 }
  0x90   : > { %v248_v15 = vpop.permute.xlu0 %247 }
  0x91   : > { %251 = vst.msk [vmem:[#allocation2] sm:$0xf] %vm250_vm9, %v248_v15 }
  0x92   : > { %v288_v12 = vpop.permute.xlu1 %287 }
  0x94   : > { %v268_v16 = vpop.permute.xlu0 %267 }
  0x95   : > { %271 = vst.msk [vmem:[#allocation2] sm:$0xf] %vm270_vm10, %v268_v16 }
  0x96   : > { %291 = vst.msk [vmem:[#allocation2] sm:$0xf] %vm290_vm11, %v288_v12 }
  0x9a   : > { %v308_v17 = vpop.permute.xlu1 %307 }
  0x9b   : > { %311 = vst.msk [vmem:[#allocation2] sm:$0xf] %vm310_vm12, %v308_v17 }
  0x9d   : > { %v328_v18 = vpop.permute.xlu0 %327 }
  0x9e   : > { %331 = vst.msk [vmem:[#allocation2] sm:$0xf] %vm330_vm13, %v328_v18 }
  0xa0   : > { %v348_v19 = vpop.permute.xlu1 %347 }
  0xa1   : > { %351 = vst.msk [vmem:[#allocation2] sm:$0xf] %vm350_vm14, %v348_v19 }
  0xa5   : > { %v368_v20 = vpop.permute.xlu0 %367 }
  0xa6   : > { %371 = vst.msk [vmem:[#allocation2] sm:$0xf] %vm370_vm15, %v368_v20 }
  0xa8   : > { %v388_v21 = vpop.permute.xlu1 %387 }
  0xa9   : > { %391 = vst.msk [vmem:[#allocation2] sm:$0xf] %vm390_vm0, %v388_v21 }
  0xb0   : > { %v392_v22 = vld [vmem:[#allocation2] sm:$0xf] }
  0xb1   : > { %v1131_v23 = vcombine.low %v392_v22, %v392_v22  ;;  %v466_v24 = vsel %vm412_vm1, %v392_v22, 0 }
  0xb2   : > { %1229 = vmatpush3.bf16.msra.mxu1 %v466_v24 }
  0xb3   : > { %517 = vrot.lane.b32.xlu1 %v1131_v23, %s1371_s5  ;;  %406 = vrot.lane.b32.xlu0 %v1131_v23, %s1372_s6 }
  0xb4   : > { %1240 = vmatprep.subr.bf16.mxu1 %v1368_v14 }
  0xb5   : > { %1231 = vmatmul.mubr.msk.bf16.vlgmr.msra.gmra.mrb[0].mxu1 %vm408_vm2, %v1343_v25 }
  0xb6   : > { %1242 = vmatprep.mubr.msk.bf16.mxu1 %vm1370_vm8, %v1368_v14 }
  0xb7   : > { %635 = vrot.lane.b32.xlu1 %v1131_v23, %s1373_s7  ;;  %576 = vrot.lane.b32.xlu0 %v1131_v23, %s1374_s8 }
  0xbb   : > { %753 = vrot.lane.b32.xlu1 %v1131_v23, %s1375_s9  ;;  %694 = vrot.lane.b32.xlu0 %v1131_v23, %s1376_s10 }
  0xbf   : > { %871 = vrot.lane.b32.xlu1 %v1131_v23, %s1377_s11  ;;  %812 = vrot.lane.b32.xlu0 %v1131_v23, %s1378_s12 }
  0xc3   : > { %926 = vperm.xlu0 %1340, %v922_v26   ;;  %931 = vperm.xlu1 %1341, %v923_v27  }
 0x125   : > { %v407_v28 = vpop.permute.xlu0 %406  ;;  %v518_v31 = vpop.permute.xlu1 %517 }
 0x126   : > { %v414_v29 = vsel %vm412_vm1, %v407_v28, 0  ;;  %v523_v33 = vsel %vm412_vm1, %v518_v31, 0 }
 0x127   : > { %1223 = vmatpush3.bf16.msra.mxu0 %v414_v29 }
 0x128   : > { %1234 = vmatprep.subr.bf16.mxu0 %v1368_v14 }
 0x129   : > { %v577_v32 = vpop.permute.xlu0 %576  ;;  %v636_v39 = vpop.permute.xlu1 %635 }
 0x12a   : > { %v582_v34 = vsel %vm412_vm1, %v577_v32, 0  ;;  %1225 = vmatmul.mubr.msk.bf16.vlgmr.msra.gmra.mrb[0].mxu0 %vm408_vm2, %v1344_v30  ;;  %v641_v40 = vsel %vm412_vm1, %v636_v39, 0 }
 0x12b   : > { %1235 = vmatpush3.bf16.msra.mxu0 %v523_v33  ;;  %1241 = vmatpush3.bf16.msra.mxu1 %v582_v34  ;;  %v958_v34 = vld [vmem:[%s1675_s3] sm:$0xff] }
 0x12c   : > { %1252 = vmatprep.subr.bf16.mxu1 %v1368_v14  ;;  %1236 = vmatprep.mubr.msk.bf16.mxu0 %vm1370_vm8, %v1368_v14 }
 0x12d   : > { %v695_v36 = vpop.permute.xlu0 %694  ;;  %1246 = vmatprep.subr.bf16.mxu0 %v1368_v14  ;;  %v754_v45 = vpop.permute.xlu1 %753 }
 0x12e   : > { %v700_v37 = vsel %vm412_vm1, %v695_v36, 0  ;;  %1243 = vmatmul.mubr.msk.bf16.vlgmr.msra.gmra.mrb[4].mxu1 %vm408_vm2, %v1345_v35  ;;  %v759_v46 = vsel %vm412_vm1, %v754_v45, 0  ;;  %v959_v35 = vld [vmem:[%s1675_s3 + $0x8] sm:$0xff]  ;;  %v960_v36 = vld [vmem:[%s1675_s3 + $0x10] sm:$0xff] }
 0x12f   : > { %1253 = vmatpush3.bf16.msra.mxu1 %v700_v37  ;;  %1254 = vmatprep.mubr.msk.bf16.mxu1 %vm1370_vm8, %v1368_v14  ;;  %v1297_v37 = vpack.c.bf16 %v959_v35, %v958_v34 }
 0x130   : > { %1264 = vmatprep.subr.bf16.mxu1 %v1368_v14 }
 0x131   : > { %v813_v42 = vpop.permute.xlu0 %812  ;;  %v872_v49 = vpop.permute.xlu1 %871 }
 0x132   : > { %1237 = vmatmul.mubr.msk.bf16.vlgmr.msra.gmra.mrb[4].mxu0 %vm408_vm2, %v1346_v38  ;;  %v818_v43 = vsel %vm412_vm1, %v813_v42, 0  ;;  %v877_v50 = vsel %vm412_vm1, %v872_v49, 0  ;;  %v961_v38 = vld [vmem:[%s1675_s3 + $0x18] sm:$0xff]  ;;  %v962_v42 = vld [vmem:[%s1675_s3 + $0x20] sm:$0xff] }
 0x133   : > { %1247 = vmatpush3.bf16.msra.mxu0 %v641_v40  ;;  %1248 = vmatprep.mubr.msk.bf16.mxu0 %vm1370_vm8, %v1368_v14 }
 0x134   : > { %1258 = vmatprep.subr.bf16.mxu0 %v1368_v14 }
 0x136   : > { %1255 = vmatmul.mubr.msk.bf16.vlgmr.msra.gmra.mrb[8].mxu1 %vm408_vm2, %v1347_v41  ;;  %v1301_v41 = vpack.c.bf16 %v961_v38, %v960_v36 }
 0x137   : > { %1265 = vmatpush3.bf16.msra.mxu1 %v818_v43  ;;  %1266 = vmatprep.mubr.msk.bf16.mxu1 %vm1370_vm8, %v1368_v14  ;;  %v963_v43 = vld [vmem:[%s1675_s3 + $0x28] sm:$0xff] }
 0x138   : > { %1298 = vmatprep.subr.bf16.mxu1 %v1297_v37 }
 0x13a   : > { %1249 = vmatmul.mubr.msk.bf16.vlgmr.msra.gmra.mrb[8].mxu0 %vm408_vm2, %v1348_v44 }
 0x13b   : > { %1259 = vmatpush3.bf16.msra.mxu0 %v759_v46  ;;  %1260 = vmatprep.mubr.msk.bf16.mxu0 %vm1370_vm8, %v1368_v14 }
 0x13c   : > { %1270 = vmatprep.subr.bf16.mxu0 %v1368_v14 }
 0x13e   : > { %1267 = vmatmul.mubr.msk.bf16.vlgmr.msra.gmra.mrb[12].mxu1 %vm408_vm2, %v1350_v47 }
 0x13f   : > { %1300 = vmatpush3.bf16.msra.mxu1 %v1297_v37 }
 0x140   : > { %1302 = vmatprep.subr.bf16.mxu1 %v1301_v41 }
 0x142   : > { %1261 = vmatmul.mubr.msk.bf16.vlgmr.msra.gmra.mrb[12].mxu0 %vm408_vm2, %v1349_v48  ;;  %v927_v40 = vpop.permute.xlu0 %926  ;;  %v932_v47 = vpop.permute.xlu1 %931 }
 0x143   : > { %1271 = vmatpush3.bf16.msra.mxu0 %v877_v50  ;;  %1272 = vmatprep.mubr.msk.bf16.mxu0 %vm1370_vm8, %v1368_v14 }
 0x144   : > { %1304 = vmatpush3.bf16.msra.mxu1 %v1301_v41 }
 0x14a   : > { %1273 = vmatmul.mubr.msk.bf16.vlgmr.msra.gmra.mrb[16].mxu0 %vm408_vm2, %v1351_v51  ;;  %v1305_v51 = vpack.c.bf16 %v963_v43, %v962_v42 }
 0x14c   : > { %1306 = vmatprep.subr.bf16.mxu1 %v1305_v51 }
 0x14d   : > { %1308 = vmatpush3.bf16.msra.mxu1 %v1305_v51 }
 0x188   : > { %v502_v52 = vpop.f32.mrb[0].mxu1 }
 0x189   : > { %v1232_v53 = vpop.f32.mrb[1].mxu1 }
 0x18a   : > { %v505_v54 = vpop.f32.mrb[2].mxu1  ;;  %v965_v53 = vld [vmem:[%s1675_s3 + $0x38] sm:$0xff] }
 0x18b   : > { %v1233_v55 = vpop.f32.mrb[3].mxu1 }
 0x1fd   : > { %v450_v56 = vpop.f32.mrb[0].mxu0 }
 0x1fe   : > { %v503_v57 = vadd.f32 %v502_v52, %v450_v56  ;;  %v1226_v58 = vpop.f32.mrb[1].mxu0  ;;  %v964_v52 = vld [vmem:[%s1675_s3 + $0x30] sm:$0xff] }
 0x1ff   : > { %v453_v59 = vpop.f32.mrb[2].mxu0  ;;  %v966_v58 = vld [vmem:[%s1675_s3 + $0x40] sm:$0x7] }
 0x200   : > { %v506_v60 = vadd.f32 %v505_v54, %v453_v59  ;;  %v1227_v61 = vpop.f32.mrb[3].mxu0 }
 0x201   : > { %v618_v62 = vpop.f32.mrb[4].mxu1 }
 0x202   : > { %v1244_v63 = vpop.f32.mrb[5].mxu1 }
 0x203   : > { %v621_v0 = vpop.f32.mrb[6].mxu1 }
 0x204   : > { %v1245_v4 = vpop.f32.mrb[7].mxu1 }
 0x205   : > { %v559_v5 = vpop.f32.mrb[4].mxu0 }
 0x206   : > { %v566_v1 = vadd.f32 %v559_v5, %v503_v57  ;;  %v1238_v6 = vpop.f32.mrb[5].mxu0  ;;  %v1309_v57 = vpack.c.bf16 %v965_v53, %v964_v52 }
 0x207   : > { %v562_v7 = vpop.f32.mrb[6].mxu0 }
 0x208   : > { %v567_v2 = vadd.f32 %v562_v7, %v506_v60  ;;  %v625_v3 = vadd.f32 %v618_v62, %v566_v1  ;;  %v1239_v9 = vpop.f32.mrb[7].mxu0  ;;  %1310 = vmatprep.subr.bf16.mxu1 %v1309_v57 }
 0x209   : > { %v736_v10 = vpop.f32.mrb[8].mxu1  ;;  %1312 = vmatpush3.bf16.msra.mxu1 %v1309_v57 }
 0x20a   : > { %v626_v8 = vadd.f32 %v621_v0, %v567_v2  ;;  %v1256_v13 = vpop.f32.mrb[9].mxu1  ;;  %1292 = vmatprep.subr.msk.mxu1 %vm974_vm3, %v966_v58 }
 0x20b   : > { %v739_v14 = vpop.f32.mrb[10].mxu1 }
 0x20c   : > { %v1257_v11 = vpop.f32.mrb[11].mxu1 }
 0x20d   : > { %v677_v15 = vpop.f32.mrb[8].mxu0  ;;  %1293 = vmatpush3.msk.msra.mxu1 %vm974_vm3, %v966_v58 }
 0x20e   : > { %v684_v12 = vadd.f32 %v677_v15, %v625_v3  ;;  %v1250_v16 = vpop.f32.mrb[9].mxu0 }
 0x20f   : > { %v680_v17 = vpop.f32.mrb[10].mxu0 }
 0x210   : > { %v685_v18 = vadd.f32 %v680_v17, %v626_v8  ;;  %v743_v19 = vadd.f32 %v736_v10, %v684_v12  ;;  %v1251_v20 = vpop.f32.mrb[11].mxu0 }
 0x211   : > { %v854_v21 = vpop.f32.mrb[12].mxu1 }
 0x212   : > { %v744_v22 = vadd.f32 %v739_v14, %v685_v18  ;;  %v1268_v23 = vpop.f32.mrb[13].mxu1 }
 0x213   : > { %v857_v24 = vpop.f32.mrb[14].mxu1 }
 0x214   : > { %v1269_v25 = vpop.f32.mrb[15].mxu1 }
 0x215   : > { %v795_v26 = vpop.f32.mrb[12].mxu0 }
 0x216   : > { %v802_v27 = vadd.f32 %v795_v26, %v743_v19  ;;  %v1262_v28 = vpop.f32.mrb[13].mxu0 }
 0x217   : > { %v798_v29 = vpop.f32.mrb[14].mxu0 }
 0x218   : > { %v803_v30 = vadd.f32 %v798_v29, %v744_v22  ;;  %v861_v31 = vadd.f32 %v854_v21, %v802_v27  ;;  %v1263_v32 = vpop.f32.mrb[15].mxu0 }
 0x21a   : > { %v862_v33 = vadd.f32 %v857_v24, %v803_v30 }
 0x21d   : > { %v913_v39 = vpop.f32.mrb[16].mxu0 }
 0x21e   : > { %v920_v44 = vadd.f32 %v913_v39, %v861_v31  ;;  %v1274_v45 = vpop.f32.mrb[17].mxu0 }
 0x21f   : > { %v916_v46 = vpop.f32.mrb[18].mxu0 }
 0x220   : > { %v921_v48 = vadd.f32 %v916_v46, %v862_v33  ;;  %v934_v49 = vadd.f32 %v927_v40, %v920_v44  ;;  %v1275_v50 = vpop.f32.mrb[19].mxu0 }
 0x222   : > { %v936_v54 = vmax.f32 %v934_v49, 0.0  ;;  %v935_v55 = vadd.f32 %v932_v47, %v921_v48 }
 0x224   : > { %v937_v56 = vmax.f32 %v935_v55, 0.0  ;;  %940 = vrot.lane.b32.xlu1 %v936_v54, %s1372_s6 }
 0x226   : > { %942 = vrot.lane.b32.xlu0 %v937_v56, %s1372_s6  ;;  %s1171_s6 = sshll.u32 %s1678_s16, 3 }
 0x227   : > { %s197_s9 = scalar_lea.vmem %s1676_s4, %s1171_s6 }
 0x296   : > { %v941_v59 = vpop.permute.xlu1 %940 }
 0x297   : > { %v946_v60 = vmax.f32 %v936_v54, %v941_v59 }
 0x298   : > { %v943_v61 = vpop.permute.xlu0 %942 }
 0x299   : > { %v947_v62 = vmax.f32 %v937_v56, %v943_v61  ;;  %950 = vrot.lane.b32.xlu1 %v946_v60, %s1374_s8 }
 0x29b   : > { %952 = vrot.lane.b32.xlu0 %v947_v62, %s1374_s8 }
 0x30b   : > { %v951_v63 = vpop.permute.xlu1 %950 }
 0x30c   : > { %v956_v0 = vmax.f32 %v946_v60, %v951_v63 }
 0x30d   : > { %v953_v4 = vpop.permute.xlu0 %952 }
 0x30e   : > { %v957_v5 = vmax.f32 %v947_v62, %v953_v4  ;;  %1294 = vmatprep.mubr.msk.f32.mxu1 %vm967_vm4, %v956_v0 }
 0x310   : > { %1295 = vmatmul.mubr.msk.f32.vlgmr.msra.gmra.mrb[16].mxu1 %vm967_vm4, %v957_v5 }
 0x3e3   : > { %v1296_v1 = vpop.f32.mrb[16].mxu1 }
 0x3e4   : > { %v1173_v6 = vpack.c.bf16 %v1296_v1, %v1296_v1  ;;  %v1044_v7 = vpop.f32.mrb[17].mxu1 }
 0x3e5   : > { %v1172_v2 = vpack.c.bf16 %v1044_v7, %v1044_v7 }
 0x3e6   : > { %1063 = vst.msk [vmem:[%s197_s9 + $0x4] sm:$0xf] %vm1061_vm5, %v1173_v6 }
 0x3e7   : > { %1062 = vst.msk [vmem:[%s197_s9] sm:$0xf] %vm1061_vm5, %v1172_v2 }
 0x3e8 PF: > { %s14_s15 = sadd.s32 1, %s1358_s15  }
 0x3e9   : > { %p11_p4 = scmp.ge.s32.totalorder %s14_s15, 4  }
 0x3eb   :  { %13 = sbr.rel (!%p11_p4) target bundleno = 1 (0x1), region = 74 }

// kernel: orchmatchnet_forward.7
= control target key start
LH: loop header
LB: loop body
LE: loop exit
PB: predicated region body
PF: predicated region fallthrough
CT: control target
= control target key end

     0   :  { %9 = vsyncpa [#allocation4], 0  ;;  %s1710_s0 = inlined_call_operand.hbm [shape: f32[2,1,16,16], index: 0, kind: input, shape index: {}]   ;;  %s1711_s1 = inlined_call_operand.vmem [shape: bf16[9,8,1], index: 1, kind: input, shape index: {}]   ;;  %s1712_s2 = inlined_call_operand.vmem [shape: f32[8,1], index: 2, kind: input, shape index: {}]   ;;  %s1713_s3 = inlined_call_operand.hbm [shape: f32[267,64], index: 3, kind: input, shape index: {}]   ;;  %s1714_s4 = inlined_call_operand.vmem [shape: bf16[2,8,64], index: 4, kind: output, shape index: {}]  }
   0x1   :  { %11 = vsyncpa [#allocation4 + $0x1], 0 }
   0x2   :  { %12 = vsyncpa [#allocation6], 0  ;;  %s1419_s15 = smov 0   ;;  %s1421_s16 = smov 0  }
   0x3   :  { %s1423_s17 = smov 0   ;;  %s1425_s18 = smov 0  }
   0x4 LB: > { %s1438_s19 = sadd.s32 4294967295, %s1361_s18   ;;  %p38_p0 = scmp.ne.s32.totalorder %s1353_s16, %s1349_s15  ;;  %s1361_s18 = sphi %s1425_s18, %s1729_s18   ;;  %s1357_s17 = sphi %s1423_s17, %s1728_s17   ;;  %s1353_s16 = sphi %s1421_s16, %s1727_s16   ;;  %s1349_s15 = sphi %s1419_s15, %s1726_s15  }
   0x5   : > { %p1715_p1 = scmp.eq.s32.totalorder %s1438_s19, 0  ;;  %p1062_p2 = scmp.ge.s32.totalorder %s1361_s18, 1 }
   0x6   : > { %p138_p3 = scmp.lt.s32.totalorder %s1361_s18, 3  ;;  %s1363_s22 = smov [#allocation5]  }
   0x7   : > { %p1446_p4 = por %p1715_p1, %p38_p0  ;;  %s156_s23 = sshll.u32 %s1363_s22, 4  ;;  %s157_s23 = int_to_ptr.vmem [resolvable:$true] %s156_s23 }
   0x8   : > { %p1450_p5 = pnand %p1062_p2, %p138_p3  ;;  %s1463_s25 = sadd.s32 1, %s1361_s18  }
   0x9   : > { %s1718_s20 = scalar_select %p1446_p4, 1, 0 }
   0xa   : > { %s1719_s21 = scalar_select %p1450_p5, 1, 0 }
   0xb   : > { %p1180_p6 = pneg %p1450_p5  ;;  %s25_s26 = sadd.s32 1, %s1357_s17 }
   0xc   : > { %s22_s27 = ssub.s32 %s1361_s18, %s1463_s25  ;;  %s1265_s30 = scalar_lea.hbm %s1713_s3, 4352 }
   0xd   : > { %p1458_p7 = pnand %p1180_p6, %p1715_p1  ;;  %p1266_p8 = scmp.ne.s32.totalorder %s1713_s3, %s1265_s30 }
   0xe   : > { %p1272_p12 = scmp.lt.u32.totalorder %s1265_s30, %s1713_s3 }
   0xf   : > { %p1267_p9 = pneg %p1458_p7 }
  0x11   : > { %p1268_p10 = pnand %p1267_p9, %p1266_p8 }
  0x13   : > { %p1269_p11 = pneg %p1268_p10 }
  0x15   : > { %p1274_p13 = pnand %p1272_p12, %p1269_p11 }
  0x17   : > { %1277 = shalt.err (!%p1274_p13)
}
  0x18   : > { %s1278_s9 = scalar_lea.vmem %s157_s23, 4352  ;;  %p1286_p6 = scmp.lt.s32.totalorder %s157_s23, %s157_s23 }
  0x19   : > { %p1279_p0 = scmp.ne.s32.totalorder %s157_s23, %s1278_s9  ;;  %p1287_p1 = scmp.lt.s32.totalorder %s1278_s9, %s1278_s9 }
  0x1b   : > { %p1281_p2 = pnand %p1279_p0, %p1267_p9  ;;  %p1288_p4 = por %p1287_p1, %p1286_p6 }
  0x1d   : > { %p1282_p3 = pneg %p1281_p2 }
  0x1f   : > { %p1289_p5 = pnand %p1288_p4, %p1282_p3 }
  0x21   : > { %1292 = shalt.err (!%p1289_p5)
}
  0x22   : > { %s1364_s10 = smov 128   ;;  %s1365_s11 = smov 8  }
  0x23   : > { %1183 = dma.hbm_to_vmem [thread:$0]  (!%p1458_p7), %s1713_s3, 4352, %s157_s23, [#allocation6], %s1364_s10, %s1364_s10, %s1365_s11  }
  0x24   : > { %p23_p1 = scmp.eq.s32.totalorder %s22_s27, 0  ;;  %p32_p4 = scmp.ne.s32.totalorder %s1357_s17, %s1353_s16 }
  0x25   : > { %p33_p5 = scmp.eq.s32.totalorder %s1361_s18, 0  ;;  %p1189_p8 = scmp.lt.s32.totalorder %s1361_s18, 2 }
  0x26   : > { %s1492_s14 = scalar_select %p23_p1, %s1357_s17, %s25_s26  }
  0x27   : > { %p34_p9 = por %p33_p5, %p32_p4  ;;  %s170_s15 = sand.u32 1, %s1357_s17  }
  0x28   : > { %s1065_s22 = sshll.u32 %s170_s15, 4  ;;  %s1092_s28 = sshll.u32 %s1361_s18, 8 }
  0x29   : > { %s1499_s24 = scalar_lea.hbm %s1710_s0, %s1092_s28  ;;  %s174_s23 = scalar_lea.vmem [#allocation3], %s1065_s22 }
  0x2a   : > { %s181_s27 = sshll.u32 %s174_s23, 4  ;;  %p1503_p7 = pnand %p1189_p8, %p34_p9  ;;  %s1501_s27 = int_to_ptr.vmem [resolvable:$true] %s181_s27 }
  0x2b   : > { %s1507_s18 = scalar_lea.sflag [#allocation4], %s170_s15  ;;  %s1293_s5 = scalar_lea.hbm %s1499_s24, 256 }
  0x2c   : > { %p1294_p10 = scmp.ne.s32.totalorder %s1499_s24, %s1293_s5  ;;  %p1295_p11 = pneg %p1503_p7 }
  0x2d   : > { %s1298_s8 = scalar_lea.hbm %s1710_s0, 512  ;;  %p1299_p0 = scmp.lt.u32.totalorder %s1499_s24, %s1710_s0 }
  0x2e   : > { %p1296_p12 = pnand %p1295_p11, %p1294_p10  ;;  %p1300_p2 = scmp.lt.u32.totalorder %s1298_s8, %s1293_s5 }
  0x2f   : > { %p1302_p6 = scmp.lt.u32.totalorder %s1293_s5, %s1499_s24 }
  0x30   : > { %p1297_p13 = pneg %p1296_p12  ;;  %p1301_p3 = por %p1300_p2, %p1299_p0 }
  0x32   : > { %p1303_p1 = por %p1302_p6, %p1301_p3 }
  0x34   : > { %p1304_p4 = pnand %p1303_p1, %p1297_p13 }
  0x36   : > { %1307 = shalt.err (!%p1304_p4)
}
  0x37   : > { %s1308_s13 = scalar_lea.vmem %s1501_s27, 256  ;;  %s1366_s15 = smov [#allocation3]  }
  0x38   : > { %p1309_p5 = scmp.ne.s32.totalorder %s1501_s27, %s1308_s13  ;;  %s1313_s22 = sshll.u32 %s1366_s15, 4  ;;  %s1314_s22 = int_to_ptr.vmem [resolvable:$false] %s1313_s22 }
  0x39   : > { %s1315_s28 = scalar_lea.vmem %s1314_s22, 512  ;;  %p1316_p10 = scmp.lt.s32.totalorder %s1501_s27, %s1314_s22 }
  0x3a   : > { %p1311_p8 = pnand %p1309_p5, %p1295_p11  ;;  %p1317_p12 = scmp.lt.s32.totalorder %s1315_s28, %s1308_s13 }
  0x3c   : > { %p1312_p9 = pneg %p1311_p8  ;;  %p1318_p0 = por %p1317_p12, %p1316_p10 }
  0x3e   : > { %p1319_p2 = pnand %p1318_p0, %p1312_p9 }
  0x40   : > { %1322 = shalt.err (!%p1319_p2)
}
  0x41   : > { %1187 = dma.hbm_to_vmem [thread:$0]  (!%p1503_p7), %s1499_s24, 256, %s1501_s27, %s1507_s18, %s1364_s10, %s1364_s10, %s1365_s11  }
  0x42   : > { %p1722_p11 = scmp.ne.s32.totalorder %s1719_s21, 0 }
  0x43   : > { %s195_s29 = sand.u32 (!%p1722_p11), 1, %s1353_s16   ;;  %p1723_p13 = scmp.ne.s32.totalorder (!%p1722_p11), %s1718_s20, 0 }
  0x44   : > { %193 = sbr.rel (%p1722_p11) target bundleno = 992 (0x3e0), region = 36  ;;  %s1541_s30 = sshll.u32 (!%p1722_p11), %s195_s29, 4 }
  0x45   : > { %s196_s23 = scalar_lea.sflag (!%p1722_p11), [#allocation4], %s195_s29  ;;  %s199_s5 = scalar_lea.vmem (!%p1722_p11), [#allocation3], %s1541_s30 }
  0x4b   : > { %1340 = dma.done.wait (%p1723_p13), %s196_s23, 256  }
  0x4c   : > { %1342 = vsyncadd (%p1723_p13), %s196_s23, 4294967040  ;;  %p1724_p3 = scmp.eq.s32.totalorder %s1438_s19, 0 }
  0x4e   : > { %1344 = dma.done.wait (%p1724_p3), [#allocation6], 4352   ;;  %p1725_p7 = pmov %p1724_p3 }
  0x4f   : > { %v253_v0 = vlaneseq  ;;  %v1367_v1 = vmov 1966171168   ;;  %vm232_vm0 = vcmask 1040384   ;;  %vm233_vm1 = vsmask.f32 256  ;;  %v246_v7 = vld [vmem:[%s199_s5] sm:$0xff] }
  0x50   : > { %1346 = vsyncadd (%p1725_p7), [#allocation6], 4294962944  ;;  %v251_v2 = vunpack.c.l.s4 %v1367_v1  ;;  %vm235_vm2 = vcmask 1041409   ;;  %vm236_vm4 = vsmask.f32 1280  ;;  %vm239_vm5 = vcmask 550914  }
  0x51   : > { %v1552_v3 = vshrl.u32 %v253_v0, 7  ;;  %vm234_vm3 = vmand %vm232_vm0, %vm233_vm1  ;;  %vm240_vm7 = vsmask.f32 2304  ;;  %v1368_v5 = vmov 0   ;;  %v248_v8 = vpack.c.bf16 %v246_v7, %v246_v7  ;;  %v243_v9 = vld [vmem:[#allocation2] sm:$0x7] }
  0x52   : > { %v252_v4 = vunpack.c.0.s8 %v251_v2  ;;  %vm237_vm6 = vmand %vm235_vm2, %vm236_vm4  ;;  %1254 = vset.pattern.permute.xlu1 %v1368_v5  ;;  %1253 = vset.pattern.permute.xlu0 %v1368_v5  ;;  %s1369_s20 = smov 19   ;;  %v247_v16 = vld [vmem:[%s199_s5 + $0x8] sm:$0xff]  ;;  %s1370_s21 = smov 55   ;;  %vm267_vm11 = vcmask 278680   ;;  %vm280_vm13 = vcmask 426280   ;;  %vm296_vm15 = vcmask 573880  }
  0x53   : > { %vm238_vm8 = vmor %vm237_vm6, %vm234_vm3  ;;  %s1371_s10 = smov 37   ;;  %v364_v19 = vpack.c.bf16 %v247_v16, %v247_v16  ;;  %s1372_s11 = smov 73   ;;  %v1080_v32 = vld [vmem:[%s1711_s1] sm:$0xff]   ;;  %v1081_v34 = vld [vmem:[%s1711_s1 + $0x8] sm:$0xff]   ;;  %vm309_vm2 = vcmask 721480  }
  0x54   : > { %vm241_vm9 = vmand %vm239_vm5, %vm240_vm7  ;;  %v255_v6 = vsub.s32 %v252_v4, %v1552_v3  ;;  %s1373_s24 = smov 91   ;;  %s1374_s27 = smov 109   ;;  %v525_v35 = vunpack.c.h.bf16 %v1080_v32  ;;  %v1083_v36 = vld [vmem:[%s1711_s1 + $0x10] sm:$0xf]  ;;  %v554_v37 = vunpack.c.l.bf16 %v1081_v34  ;;  %v583_v39 = vunpack.c.h.bf16 %v1081_v34  ;;  %v1084_v40 = vld [vmem:[%s1711_s1 + $0x14] sm:$0xff]  }
  0x55   : > { %vm242_vm10 = vmor %vm241_vm9, %vm238_vm8  ;;  %s1375_s26 = smov 127   ;;  %s1376_s18 = smov 17   ;;  %v612_v38 = vunpack.c.l.bf16 %v1083_v36  ;;  %v670_v41 = vunpack.c.h.bf16 %v1084_v40  ;;  %v641_v42 = vunpack.c.l.bf16 %v1084_v40  ;;  %v1086_v43 = vld [vmem:[%s1711_s1 + $0x1c] sm:$0xff]   ;;  %v482_v46 = vunpack.c.l.bf16 %v1080_v32 }
  0x56   : > { %v244_v10 = vsel %vm242_vm10, 0, %v243_v9  ;;  %v256_v11 = vrot.slane %v248_v8, %v255_v6  ;;  %v372_v22 = vrot.slane %v364_v19, %v255_v6  ;;  %s1377_s6 = smov 35   ;;  %s1378_s7 = smov 53   ;;  %v728_v44 = vunpack.c.h.bf16 %v1086_v43  ;;  %v755_v47 = vld [vmem:[%s1712_s2] sm:$0xff]  ;;  %vm268_vm12 = vmand %vm267_vm11, %vm233_vm1 }
  0x57   : > { %245 = vst [vmem:[#allocation2] sm:$0x7] %v244_v10  ;;  %s1379_s8 = smov 71   ;;  %s1380_s9 = smov 89   ;;  %v699_v45 = vunpack.c.l.bf16 %v1086_v43  ;;  %vm281_vm14 = vmand %vm280_vm13, %vm233_vm1  ;;  %vm318_vm5 = vcmask 869080   ;;  %vm331_vm7 = vcmask 1016680  }
  0x58   : > { %v263_v12 = vrot.slane %v256_v11, %v255_v6  ;;  %v285_v13 = vcombine.high %v256_v11, %v256_v11  ;;  %v379_v24 = vrot.slane %v372_v22, %v255_v6  ;;  %v401_v25 = vcombine.high %v372_v22, %v372_v22  ;;  %s1381_s12 = smov 107   ;;  %s1382_s22 = smov 125   ;;  %vm297_vm0 = vmand %vm296_vm15, %vm233_vm1 }
  0x59   : > { %s1383_s30 = smov 15   ;;  %vm310_vm3 = vmand %vm309_vm2, %vm233_vm1  ;;  %vm343_vm9 = vcmask 1041400   ;;  %vm345_vm10 = vcmask 115713   ;;  %vm340_vm13 = vcmask 1039360   ;;  %vm359_vm15 = vcmask 262280   ;;  %s1388_s13 = smov 92  }
  0x5a   : > { %264 = vrot.lane.b32.xlu0 %v263_v12, %s1369_s20  ;;  %v273_v14 = vshrl.u32 %v263_v12, 16  ;;  %v292_v15 = vrot.slane %v285_v13, %v255_v6  ;;  %v314_v18 = vcombine.high %v263_v12, %v263_v12  ;;  %v389_v26 = vshrl.u32 %v379_v24, 16  ;;  %s1384_s20 = smov 33   ;;  %vm319_vm6 = vmand %vm318_vm5, %vm233_vm1  ;;  %p227_p6 = scmp.lt.s32.totalorder %s1438_s19, 1 }
  0x5b   : > { %v408_v27 = vrot.slane %v401_v25, %v255_v6  ;;  %v430_v29 = vcombine.high %v379_v24, %v379_v24  ;;  %vm332_vm8 = vmand %vm331_vm7, %vm233_vm1  ;;  %vm383_vm2 = vcmask 409880   ;;  %vm396_vm5 = vcmask 557480  }
  0x5c   : > { %293 = vrot.lane.b32.xlu1 %v292_v15, %s1370_s21  ;;  %v302_v17 = vshrl.u32 %v292_v15, 16  ;;  %v324_v20 = vshrl.u32 %v314_v18, 16  ;;  %v336_v21 = vcombine.high %v292_v15, %v292_v15  ;;  %vm344_vm11 = vmand %vm343_vm9, %vm233_vm1  ;;  %vm412_vm7 = vcmask 705080   ;;  %s1731_s19 = smov (!%p227_p6, %s1438_s19), 1 }
  0x5d   : > { %v418_v28 = vshrl.u32 %v408_v27, 16  ;;  %v440_v30 = vshrl.u32 %v430_v29, 16  ;;  %v458_v31 = vcombine.high %v408_v27, %v408_v27  ;;  %vm425_vm9 = vcmask 852680  }
  0x5e   : > { %277 = vrot.lane.b32.xlu0 %v273_v14, %s1371_s10  ;;  %v352_v23 = vshrl.u32 %v336_v21, 16  ;;  %v269_v48 = vld [vmem:[#allocation2] sm:$0x1] }
  0x5f   : > { %v468_v33 = vshrl.u32 %v458_v31, 16 }
  0x60   : > { %306 = vrot.lane.b32.xlu1 %v302_v17, %s1372_s11 }
  0x62   : > { %315 = vrot.lane.b32.xlu0 %v314_v18, %s1373_s24 }
  0x64   : > { %328 = vrot.lane.b32.xlu1 %v324_v20, %s1374_s27 }
  0x66   : > { %337 = vrot.lane.b32.xlu0 %v336_v21, %s1375_s26 }
  0x68   : > { %356 = vrot.lane.b32.xlu1 %v352_v23, %s1376_s18 }
  0x6a   : > { %380 = vrot.lane.b32.xlu0 %v379_v24, %s1377_s6 }
  0x6c   : > { %393 = vrot.lane.b32.xlu1 %v389_v26, %s1378_s7 }
  0x6e   : > { %409 = vrot.lane.b32.xlu0 %v408_v27, %s1379_s8  ;;  %s1385_s8 = smov 126  }
  0x70   : > { %422 = vrot.lane.b32.xlu1 %v418_v28, %s1380_s9  ;;  %s1386_s9 = smov 110  }
  0x72   : > { %431 = vrot.lane.b32.xlu0 %v430_v29, %s1381_s12  ;;  %s1387_s12 = smov 108  }
  0x74   : > { %444 = vrot.lane.b32.xlu1 %v440_v30, %s1382_s22 }
  0x76   : > { %459 = vrot.lane.b32.xlu0 %v458_v31, %s1383_s30 }
  0x78   : > { %472 = vrot.lane.b32.xlu1 %v468_v33, %s1384_s20 }
  0x7a   : > { %528 = vperm.xlu0 %1253, %v525_v35  }
  0x7c   : > { %557 = vperm.xlu1 %1254, %v554_v37   ;;  %v496_v37 = vsub.s32 2, %v1552_v3 }
  0x7e   : > { %615 = vperm.xlu0 %1253, %v612_v38   ;;  %v500_v38 = vsub.s32 4, %v1552_v3 }
  0x80   : > { %586 = vperm.xlu1 %1254, %v583_v39   ;;  %v492_v39 = vsub.s32 0, %v1552_v3 }
  0x82   : > { %673 = vperm.xlu0 %1253, %v670_v41  }
  0x84   : > { %644 = vperm.xlu1 %1254, %v641_v42  }
  0x86   : > { %731 = vperm.xlu0 %1253, %v728_v44  }
  0x88   : > { %702 = vperm.xlu1 %1254, %v699_v45  }
  0x8c   : > { %486 = vperm.xlu1 %1254, %v482_v46  }
  0x90   : > { %758 = vperm.xlu1 %1254, %v755_v47  }
  0xcc   : > { %v265_v49 = vpop.permute.xlu0 %264 }
  0xcd   : > { %v270_v50 = vsel %vm268_vm12, %v265_v49, %v269_v48  ;;  %vm346_vm12 = vmand %vm345_vm10, %vm236_vm4 }
  0xce   : > { %271 = vst [vmem:[#allocation2] sm:$0x1] %v270_v50  ;;  %v294_v54 = vpop.permute.xlu1 %293  ;;  %vm426_vm10 = vmand %vm425_vm9, %vm233_vm1 }
  0xd0   : > { %v278_v51 = vpop.permute.xlu0 %277 }
  0xd2   : > { %v307_v57 = vpop.permute.xlu1 %306 }
  0xd4   : > { %v316_v60 = vpop.permute.xlu0 %315 }
  0xd5   : > { %v282_v52 = vld [vmem:[#allocation2] sm:$0x1] }
  0xd6   : > { %v283_v53 = vsel %vm281_vm14, %v278_v51, %v282_v52  ;;  %v329_v63 = vpop.permute.xlu1 %328  ;;  %vm347_vm14 = vmor %vm346_vm12, %vm344_vm11  ;;  %vm434_vm11 = vcmask 1000280  }
  0xd7   : > { %284 = vst [vmem:[#allocation2] sm:$0x1] %v283_v53  ;;  %vm435_vm12 = vmand %vm434_vm11, %vm233_vm1  ;;  %vm659_vm11 = vcmask 883712  }
  0xd8   : > { %v338_v2 = vpop.permute.xlu0 %337 }
  0xd9   : > { %v339_v4 = vrot.slane %v338_v2, 7 }
  0xda   : > { %v357_v8 = vpop.permute.xlu1 %356 }
  0xdb   : > { %v341_v5 = vsel %vm340_vm13, %v339_v4, %v338_v2 }
  0xdc   : > { %v381_v11 = vpop.permute.xlu0 %380 }
  0xde   : > { %v298_v55 = vld [vmem:[#allocation2] sm:$0x1]  ;;  %v394_v14 = vpop.permute.xlu1 %393 }
  0xdf   : > { %v299_v56 = vsel %vm297_vm0, %v294_v54, %v298_v55  ;;  %vm360_vm0 = vmand %vm359_vm15, %vm233_vm1  ;;  %vm452_vm15 = vcmask 99329  }
  0xe0   : > { %300 = vst [vmem:[#allocation2] sm:$0x1] %v299_v56  ;;  %v410_v17 = vpop.permute.xlu0 %409 }
  0xe2   : > { %v423_v20 = vpop.permute.xlu1 %422 }
  0xe4   : > { %v432_v23 = vpop.permute.xlu0 %431 }
  0xe6   : > { %v445_v26 = vpop.permute.xlu1 %444 }
  0xe7   : > { %v311_v58 = vld [vmem:[#allocation2] sm:$0x1]  ;;  %v446_v27 = vrot.slane %v445_v26, 7 }
  0xe8   : > { %v312_v59 = vsel %vm310_vm3, %v307_v57, %v311_v58  ;;  %vm384_vm3 = vmand %vm383_vm2, %vm233_vm1  ;;  %v460_v31 = vpop.permute.xlu0 %459 }
  0xe9   : > { %313 = vst [vmem:[#allocation2] sm:$0x1] %v312_v59  ;;  %vm453_vm2 = vmand %vm452_vm15, %vm236_vm4  ;;  %vm601_vm4 = vcmask 900096   ;;  %vm746_vm15 = vcmask 736256  }
  0xea   : > { %v473_v34 = vpop.permute.xlu1 %472 }
  0xf0   : > { %v320_v61 = vld [vmem:[#allocation2] sm:$0x1] }
  0xf1   : > { %v321_v62 = vsel %vm319_vm6, %v316_v60, %v320_v61  ;;  %vm397_vm6 = vmand %vm396_vm5, %vm233_vm1 }
  0xf2   : > { %322 = vst [vmem:[#allocation2] sm:$0x1] %v321_v62 }
  0xf9   : > { %v333_v0 = vld [vmem:[#allocation2] sm:$0x1]  ;;  %v529_v47 = vpop.permute.xlu0 %528 }
  0xfa   : > { %v334_v1 = vsel %vm332_vm8, %v329_v63, %v333_v0  ;;  %vm413_vm8 = vmand %vm412_vm7, %vm233_vm1 }
  0xfb   : > { %335 = vst [vmem:[#allocation2] sm:$0x1] %v334_v1  ;;  %v558_v3 = vpop.permute.xlu1 %557 }
  0xfd   : > { %v616_v59 = vpop.permute.xlu0 %615 }
  0xff   : > { %v587_v55 = vpop.permute.xlu1 %586 }
 0x101   : > { %v674_v4 = vpop.permute.xlu0 %673 }
 0x102   : > { %v348_v6 = vld [vmem:[#allocation2] sm:$0x3] }
 0x103   : > { %v349_v7 = vsel %vm347_vm14, %v341_v5, %v348_v6  ;;  %vm450_vm14 = vcmask 1041384   ;;  %v645_v63 = vpop.permute.xlu1 %644 }
 0x104   : > { %350 = vst [vmem:[#allocation2] sm:$0x3] %v349_v7 }
 0x107   : > { %v703_v6 = vpop.permute.xlu1 %702 }
 0x10b   : > { %v361_v9 = vld [vmem:[#allocation2 + $0x1] sm:$0x1] }
 0x10c   : > { %v362_v10 = vsel %vm360_vm0, %v357_v8, %v361_v9  ;;  %vm451_vm0 = vmand %vm450_vm14, %vm233_vm1  ;;  %vm717_vm14 = vcmask 744448  }
 0x10d   : > { %363 = vst [vmem:[#allocation2 + $0x1] sm:$0x1] %v362_v10  ;;  %vm454_vm5 = vmor %vm453_vm2, %vm451_vm0  ;;  %vm839_vm0 = vcmask 1042432   ;;  %vm1391_vm2 = vmmov 1  }
 0x114   : > { %v385_v12 = vld [vmem:[#allocation2 + $0x1] sm:$0x1] }
 0x115   : > { %v386_v13 = vsel %vm384_vm3, %v381_v11, %v385_v12  ;;  %vm447_vm3 = vcmask 1022976   ;;  %v732_v11 = vpop.permute.xlu0 %731 }
 0x116   : > { %387 = vst [vmem:[#allocation2 + $0x1] sm:$0x1] %v386_v13  ;;  %v448_v28 = vsel %vm447_vm3, %v446_v27, %v445_v26  ;;  %vm1172_vm3 = vmpackc.low %vm839_vm0, %vm1391_vm2 }
 0x11d   : > { %v398_v15 = vld [vmem:[#allocation2 + $0x1] sm:$0x1] }
 0x11e   : > { %v399_v16 = vsel %vm397_vm6, %v394_v14, %v398_v15  ;;  %vm462_vm6 = vcmask 245880  }
 0x11f   : > { %400 = vst [vmem:[#allocation2 + $0x1] sm:$0x1] %v399_v16  ;;  %vm463_vm7 = vmand %vm462_vm6, %vm233_vm1  ;;  %v487_v16 = vpop.permute.xlu1 %486  ;;  %vm835_vm6 = vcmask 89088  }
 0x126   : > { %v414_v18 = vld [vmem:[#allocation2 + $0x1] sm:$0x1] }
 0x127   : > { %v415_v19 = vsel %vm413_vm8, %v410_v17, %v414_v18  ;;  %vm475_vm8 = vcmask 393480   ;;  %v1646_v17 = vpop.permute.xlu1 %758 }
 0x128   : > { %416 = vst [vmem:[#allocation2 + $0x1] sm:$0x1] %v415_v19  ;;  %vm476_vm9 = vmand %vm475_vm8, %vm233_vm1  ;;  %vm572_vm1 = vcmask 1031168  }
 0x12f   : > { %v427_v21 = vld [vmem:[#allocation2 + $0x1] sm:$0x1] }
 0x130   : > { %v428_v22 = vsel %vm426_vm10, %v423_v20, %v427_v21  ;;  %vm630_vm10 = vcmask 891904  }
 0x131   : > { %429 = vst [vmem:[#allocation2 + $0x1] sm:$0x1] %v428_v22 }
 0x138   : > { %v436_v24 = vld [vmem:[#allocation2 + $0x1] sm:$0x1] }
 0x139   : > { %v437_v25 = vsel %vm435_vm12, %v432_v23, %v436_v24  ;;  %vm688_vm12 = vcmask 752640  }
 0x13a   : > { %438 = vst [vmem:[#allocation2 + $0x1] sm:$0x1] %v437_v25 }
 0x141   : > { %v455_v29 = vld [vmem:[#allocation2 + $0x1] sm:$0x3] }
 0x142   : > { %v456_v30 = vsel %vm454_vm5, %v448_v28, %v455_v29  ;;  %vm1392_vm5 = vmmov 0  }
 0x143   : > { %457 = vst [vmem:[#allocation2 + $0x1] sm:$0x3] %v456_v30 }
 0x14a   : > { %v464_v32 = vld [vmem:[#allocation2 + $0x2] sm:$0x1] }
 0x14b   : > { %v465_v33 = vsel %vm463_vm7, %v460_v31, %v464_v32 }
 0x14c   : > { %466 = vst [vmem:[#allocation2 + $0x2] sm:$0x1] %v465_v33 }
 0x153   : > { %v477_v35 = vld [vmem:[#allocation2 + $0x2] sm:$0x1] }
 0x154   : > { %v478_v36 = vsel %vm476_vm9, %v473_v34, %v477_v35 }
 0x155   : > { %479 = vst [vmem:[#allocation2 + $0x2] sm:$0x1] %v478_v36 }
 0x15c   : > { %v480_v40 = vld [vmem:[#allocation2] sm:$0x7] }
 0x15d   : > { %v483_v41 = vunpack.c.l.bf16 %v480_v40 }
 0x15f   : > { %v497_v42 = vrot.slane %v483_v41, %v496_v37  ;;  %v501_v43 = vrot.slane %v483_v41, %v500_v38  ;;  %v493_v44 = vrot.slane %v483_v41, %v492_v39 }
 0x161   : > { %v1604_v45 = vrot.slane %v497_v42, %v492_v39  ;;  %v1606_v46 = vrot.slane %v501_v43, %v492_v39  ;;  %v1608_v48 = vrot.slane %v493_v44, %v492_v39 }
 0x163   : > { %v532_v49 = vmul.f32 %v529_v47, %v1604_v45  ;;  %v533_v50 = vmul.f32 %v529_v47, %v1606_v46  ;;  %v531_v51 = vmul.f32 %v529_v47, %v1608_v48  ;;  %v561_v52 = vmul.f32 %v558_v3, %v1604_v45 }
 0x164   : > { %v562_v53 = vmul.f32 %v558_v3, %v1606_v46  ;;  %v560_v54 = vmul.f32 %v558_v3, %v1608_v48  ;;  %v590_v56 = vmul.f32 %v587_v55, %v1604_v45  ;;  %v591_v57 = vmul.f32 %v587_v55, %v1606_v46 }
 0x165   : > { %539 = vrot.lane.b32.xlu0 %v532_v49, %s1375_s26  ;;  %541 = vrot.lane.b32.xlu1 %v533_v50, %s1375_s26  ;;  %v589_v58 = vmul.f32 %v587_v55, %v1608_v48  ;;  %v619_v60 = vmul.f32 %v616_v59, %v1604_v45  ;;  %v620_v61 = vmul.f32 %v616_v59, %v1606_v46 }
 0x166   : > { %v618_v62 = vmul.f32 %v616_v59, %v1608_v48  ;;  %v648_v0 = vmul.f32 %v645_v63, %v1604_v45  ;;  %v649_v1 = vmul.f32 %v645_v63, %v1606_v46  ;;  %v647_v2 = vmul.f32 %v645_v63, %v1608_v48 }
 0x167   : > { %v677_v5 = vmul.f32 %v674_v4, %v1604_v45  ;;  %v678_v7 = vmul.f32 %v674_v4, %v1606_v46  ;;  %v706_v8 = vmul.f32 %v703_v6, %v1604_v45  ;;  %v676_v9 = vmul.f32 %v674_v4, %v1608_v48 }
 0x168   : > { %v705_v10 = vmul.f32 %v703_v6, %v1608_v48  ;;  %v707_v12 = vmul.f32 %v703_v6, %v1606_v46  ;;  %v736_v13 = vmul.f32 %v732_v11, %v1606_v46  ;;  %v735_v14 = vmul.f32 %v732_v11, %v1604_v45 }
 0x169   : > { %537 = vrot.lane.b32.xlu0 %v531_v51, %s1375_s26  ;;  %568 = vrot.lane.b32.xlu1 %v561_v52, %s1385_s8  ;;  %v734_v15 = vmul.f32 %v732_v11, %v1608_v48  ;;  %v519_v32 = vmul.f32 %v1606_v46, %v487_v16  ;;  %v518_v37 = vmul.f32 %v1604_v45, %v487_v16 }
 0x16a   : > { %v517_v41 = vmul.f32 %v1608_v48, %v487_v16 }
 0x16d   : > { %570 = vrot.lane.b32.xlu0 %v562_v53, %s1385_s8  ;;  %566 = vrot.lane.b32.xlu1 %v560_v54, %s1385_s8 }
 0x171   : > { %597 = vrot.lane.b32.xlu0 %v590_v56, %s1386_s9  ;;  %599 = vrot.lane.b32.xlu1 %v591_v57, %s1386_s9 }
 0x175   : > { %595 = vrot.lane.b32.xlu0 %v589_v58, %s1386_s9  ;;  %626 = vrot.lane.b32.xlu1 %v619_v60, %s1374_s27 }
 0x179   : > { %628 = vrot.lane.b32.xlu0 %v620_v61, %s1374_s27  ;;  %624 = vrot.lane.b32.xlu1 %v618_v62, %s1374_s27  ;;  %s1389_s27 = smov 90  }
 0x17d   : > { %655 = vrot.lane.b32.xlu0 %v648_v0, %s1387_s12  ;;  %657 = vrot.lane.b32.xlu1 %v649_v1, %s1387_s12 }
 0x181   : > { %653 = vrot.lane.b32.xlu0 %v647_v2, %s1387_s12  ;;  %684 = vrot.lane.b32.xlu1 %v677_v5, %s1388_s13 }
 0x185   : > { %686 = vrot.lane.b32.xlu0 %v678_v7, %s1388_s13  ;;  %713 = vrot.lane.b32.xlu1 %v706_v8, %s1373_s24 }
 0x189   : > { %682 = vrot.lane.b32.xlu0 %v676_v9, %s1388_s13  ;;  %711 = vrot.lane.b32.xlu1 %v705_v10, %s1373_s24 }
 0x18d   : > { %715 = vrot.lane.b32.xlu0 %v707_v12, %s1373_s24  ;;  %744 = vrot.lane.b32.xlu1 %v736_v13, %s1389_s27  ;;  %s1071_s24 = sshll.u32 %s1731_s19, 2 }
 0x18e   : > { %s230_s22 = scalar_lea.vmem %s1714_s4, %s1071_s24 }
 0x191   : > { %742 = vrot.lane.b32.xlu0 %v735_v14, %s1389_s27 }
 0x195   : > { %740 = vrot.lane.b32.xlu0 %v734_v15, %s1389_s27 }
 0x1d7   : > { %v540_v18 = vpop.permute.xlu0 %539  ;;  %v542_v19 = vpop.permute.xlu1 %541 }
 0x1d8   : > { %v551_v34 = vadd.f32 %v542_v19, %v519_v32  ;;  %v545_v35 = vsel %vm340_vm13, %v540_v18, %v542_v19  ;;  %v820_v32 = vld [vmem:[#allocation5 + $0x98] sm:$0xff] }
 0x1d9   : > { %v550_v42 = vadd.f32 %v545_v35, %v518_v37 }
 0x1db   : > { %v538_v20 = vpop.permute.xlu0 %537  ;;  %v569_v21 = vpop.permute.xlu1 %568 }
 0x1dc   : > { %v544_v38 = vsel %vm340_vm13, %v538_v20, %v540_v18 }
 0x1dd   : > { %v549_v50 = vadd.f32 %v544_v38, %v517_v41  ;;  %v803_v38 = vld [vmem:[#allocation5 + $0x10] sm:$0xff] }
 0x1df   : > { %v571_v22 = vpop.permute.xlu0 %570  ;;  %v567_v23 = vpop.permute.xlu1 %566 }
 0x1e0   : > { %v574_v39 = vsel %vm572_vm1, %v569_v21, %v571_v22  ;;  %v580_v40 = vadd.f32 %v571_v22, %v551_v34  ;;  %v573_v44 = vsel %vm572_vm1, %v567_v23, %v569_v21 }
 0x1e1   : > { %v579_v3 = vadd.f32 %v574_v39, %v550_v42  ;;  %v578_v53 = vadd.f32 %v573_v44, %v549_v50  ;;  %v804_v39 = vld [vmem:[#allocation5 + $0x18] sm:$0xff]  ;;  %v834_v44 = vld [vmem:[#allocation5 + $0x108] sm:$0x7] }
 0x1e2   : > { %v1144_v42 = vpack.c.bf16 %v804_v39, %v803_v38 }
 0x1e3   : > { %v598_v24 = vpop.permute.xlu0 %597  ;;  %v600_v25 = vpop.permute.xlu1 %599 }
 0x1e4   : > { %v609_v46 = vadd.f32 %v600_v25, %v580_v40  ;;  %v603_v47 = vsel %vm601_vm4, %v598_v24, %v600_v25  ;;  %v822_v40 = vld [vmem:[#allocation5 + $0xa8] sm:$0xff] }
 0x1e5   : > { %v608_v54 = vadd.f32 %v603_v47, %v579_v3  ;;  %v805_v47 = vld [vmem:[#allocation5 + $0x20] sm:$0xff] }
 0x1e7   : > { %v596_v26 = vpop.permute.xlu0 %595  ;;  %v627_v27 = vpop.permute.xlu1 %626 }
 0x1e8   : > { %v602_v45 = vsel %vm601_vm4, %v596_v26, %v598_v24  ;;  %v817_v26 = vld [vmem:[#allocation5 + $0x80] sm:$0xff] }
 0x1e9   : > { %v607_v59 = vadd.f32 %v602_v45, %v578_v53  ;;  %v823_v45 = vld [vmem:[#allocation5 + $0xb0] sm:$0xff] }
 0x1eb   : > { %v629_v28 = vpop.permute.xlu0 %628  ;;  %v625_v29 = vpop.permute.xlu1 %624 }
 0x1ec   : > { %v632_v51 = vsel %vm630_vm10, %v627_v27, %v629_v28  ;;  %v638_v52 = vadd.f32 %v629_v28, %v609_v46  ;;  %v631_v55 = vsel %vm630_vm10, %v625_v29, %v627_v27  ;;  %v818_v27 = vld [vmem:[#allocation5 + $0x88] sm:$0xff]  ;;  %v801_v28 = vld [vmem:[#allocation5] sm:$0xff] }
 0x1ed   : > { %v637_v60 = vadd.f32 %v632_v51, %v608_v54  ;;  %v636_v0 = vadd.f32 %v631_v55, %v607_v59  ;;  %v1138_v29 = vpack.c.bf16 %v818_v27, %v817_v26  ;;  %v824_v51 = vld [vmem:[#allocation5 + $0xb8] sm:$0xff] }
 0x1ee   : > { %v1150_v53 = vpack.c.bf16 %v824_v51, %v823_v45  ;;  %v808_v54 = vld [vmem:[#allocation5 + $0x38] sm:$0xff] }
 0x1ef   : > { %v656_v30 = vpop.permute.xlu0 %655  ;;  %v658_v31 = vpop.permute.xlu1 %657  ;;  %1139 = vmatprep.subr.bf16.mxu0 %v1138_v29 }
 0x1f0   : > { %v667_v56 = vadd.f32 %v658_v31, %v638_v52  ;;  %v661_v57 = vsel %vm659_vm11, %v656_v30, %v658_v31  ;;  %v819_v31 = vld [vmem:[#allocation5 + $0x90] sm:$0xff] }
 0x1f1   : > { %v666_v1 = vadd.f32 %v661_v57, %v637_v60  ;;  %v1142_v37 = vpack.c.bf16 %v820_v32, %v819_v31  ;;  %v807_v52 = vld [vmem:[#allocation5 + $0x30] sm:$0xff]  ;;  %v826_v57 = vld [vmem:[#allocation5 + $0xc8] sm:$0xff] }
 0x1f2   : > { %v1152_v55 = vpack.c.bf16 %v808_v54, %v807_v52  ;;  %v810_v60 = vld [vmem:[#allocation5 + $0x48] sm:$0xff] }
 0x1f3   : > { %v654_v33 = vpop.permute.xlu0 %653  ;;  %v685_v36 = vpop.permute.xlu1 %684 }
 0x1f4   : > { %v660_v61 = vsel %vm659_vm11, %v654_v33, %v656_v30  ;;  %v802_v30 = vld [vmem:[#allocation5 + $0x8] sm:$0xff]  ;;  %v1390_v33 = vmov 0.0|0.0  }
 0x1f5   : > { %v665_v7 = vadd.f32 %v660_v61, %v636_v0  ;;  %1170 = vmatprep.subr.bf16.mxu1 %v1390_v33  ;;  %v827_v61 = vld [vmem:[#allocation5 + $0xd0] sm:$0xff] }
 0x1f7   : > { %v687_v43 = vpop.permute.xlu0 %686  ;;  %v714_v49 = vpop.permute.xlu1 %713 }
 0x1f8   : > { %v690_v62 = vsel %vm688_vm12, %v685_v36, %v687_v43  ;;  %v696_v63 = vadd.f32 %v687_v43, %v667_v56  ;;  %v833_v43 = vld [vmem:[#allocation5 + $0x100] sm:$0xff] }
 0x1f9   : > { %v695_v8 = vadd.f32 %v690_v62, %v666_v1  ;;  %v1171_v50 = vpack.c.bf16 %v834_v44, %v833_v43  ;;  %v825_v56 = vld [vmem:[#allocation5 + $0xc0] sm:$0xff]  ;;  %v828_v62 = vld [vmem:[#allocation5 + $0xd8] sm:$0xff]  ;;  %v811_v1 = vld [vmem:[#allocation5 + $0x50] sm:$0xff] }
 0x1fa   : > { %v1154_v59 = vpack.c.bf16 %v826_v57, %v825_v56  ;;  %v1158_v0 = vpack.c.bf16 %v828_v62, %v827_v61 }
 0x1fb   : > { %v683_v48 = vpop.permute.xlu0 %682  ;;  %v712_v58 = vpop.permute.xlu1 %711  ;;  %1173 = vmatpush3.bf16.msk.msra.mxu1 %vm1172_vm3, %v1171_v50 }
 0x1fc   : > { %v689_v4 = vsel %vm688_vm12, %v683_v48, %v685_v36  ;;  %v718_v18 = vsel %vm717_vm14, %v712_v58, %v714_v49  ;;  %v1140_v36 = vpack.c.bf16 %v802_v30, %v801_v28  ;;  %v1393_v48 = vmov 0.0   ;;  %v809_v58 = vld [vmem:[#allocation5 + $0x40] sm:$0xff] }
 0x1fd   : > { %v694_v11 = vadd.f32 %v689_v4, %v665_v7  ;;  %1135 = vmatprep.mubr.msk.f32.mxu1 %vm1392_vm5, %v1393_v48  ;;  %v829_v4 = vld [vmem:[#allocation5 + $0xe0] sm:$0xff] }
 0x1fe   : > { %1141 = vmatpush3.bf16.msra.mxu0 %v1140_v36 }
 0x1ff   : > { %v716_v2 = vpop.permute.xlu0 %715  ;;  %v745_v9 = vpop.permute.xlu1 %744  ;;  %v723_v21 = vadd.f32 %v718_v18, %v694_v11  ;;  %1143 = vmatprep.subr.bf16.mxu0 %v1142_v37 }
 0x200   : > { %v719_v5 = vsel %vm717_vm14, %v714_v49, %v716_v2  ;;  %v725_v6 = vadd.f32 %v716_v2, %v696_v63  ;;  %v806_v49 = vld [vmem:[#allocation5 + $0x28] sm:$0xff]  ;;  %v1156_v63 = vpack.c.bf16 %v810_v60, %v809_v58  ;;  %v812_v2 = vld [vmem:[#allocation5 + $0x58] sm:$0xff] }
 0x201   : > { %v724_v12 = vadd.f32 %v719_v5, %v695_v8  ;;  %v1148_v3 = vpack.c.bf16 %v806_v49, %v805_v47  ;;  %v830_v5 = vld [vmem:[#allocation5 + $0xe8] sm:$0xff]  ;;  %v813_v8 = vld [vmem:[#allocation5 + $0x60] sm:$0xff] }
 0x202   : > { %v754_v10 = vadd.f32 %v745_v9, %v725_v6  ;;  %1145 = vmatpush3.bf16.msra.mxu0 %v1144_v42  ;;  %v1160_v6 = vpack.c.bf16 %v812_v2, %v811_v1  ;;  %v1162_v7 = vpack.c.bf16 %v830_v5, %v829_v4 }
 0x203   : > { %v743_v13 = vpop.permute.xlu0 %742 }
 0x204   : > { %v748_v14 = vsel %vm746_vm15, %v743_v13, %v745_v9  ;;  %v1659_v15 = vadd.f32 %v1646_v17, %v754_v10  ;;  %v814_v9 = vld [vmem:[#allocation5 + $0x68] sm:$0xff] }
 0x205   : > { %v753_v16 = vadd.f32 %v748_v14, %v724_v12  ;;  %v1164_v12 = vpack.c.bf16 %v814_v9, %v813_v8  ;;  %v832_v14 = vld [vmem:[#allocation5 + $0xf8] sm:$0xff] }
 0x206   : > { %v766_v19 = vmax.f32 %v1659_v15, 0.0 }
 0x207   : > { %v741_v20 = vpop.permute.xlu0 %740  ;;  %v1667_v23 = vadd.f32 %v1646_v17, %v753_v16  ;;  %v815_v16 = vld [vmem:[#allocation5 + $0x70] sm:$0xff] }
 0x208   : > { %v747_v22 = vsel %vm746_vm15, %v741_v20, %v743_v13  ;;  %774 = vrot.lane.b32.xlu0 %v766_v19, %s1375_s26  ;;  %v831_v13 = vld [vmem:[#allocation5 + $0xf0] sm:$0xff]  ;;  %v816_v20 = vld [vmem:[#allocation5 + $0x78] sm:$0xff] }
 0x209   : > { %v752_v24 = vadd.f32 %v747_v22, %v723_v21  ;;  %v765_v34 = vmax.f32 %v1667_v23, 0.0  ;;  %v1166_v18 = vpack.c.bf16 %v832_v14, %v831_v13  ;;  %v1168_v21 = vpack.c.bf16 %v816_v20, %v815_v16 }
 0x20b   : > { %v1670_v25 = vadd.f32 %v1646_v17, %v752_v24  ;;  %v821_v17 = vld [vmem:[#allocation5 + $0xa0] sm:$0xff] }
 0x20c   : > { %v1146_v46 = vpack.c.bf16 %v822_v40, %v821_v17 }
 0x20d   : > { %v764_v35 = vmax.f32 %v1670_v25, 0.0 }
 0x20e   : > { %1147 = vmatprep.subr.bf16.mxu0 %v1146_v46 }
 0x20f   : > { %v1255_v41 = vpack.i.bf16 %v764_v35, %v765_v34  ;;  %1149 = vmatpush3.bf16.msra.mxu0 %v1148_v3 }
 0x210   : > { %1151 = vmatprep.subr.bf16.mxu0 %v1150_v53 }
 0x211   : > { %1256 = vrot.lane.b32.xlu1 %v1255_v41, %s1375_s26 }
 0x213   : > { %1153 = vmatpush3.bf16.msra.mxu0 %v1152_v55 }
 0x214   : > { %1155 = vmatprep.subr.bf16.mxu0 %v1154_v59 }
 0x217   : > { %1157 = vmatpush3.bf16.msra.mxu0 %v1156_v63 }
 0x218   : > { %1159 = vmatprep.subr.bf16.mxu0 %v1158_v0 }
 0x21b   : > { %1161 = vmatpush3.bf16.msra.mxu0 %v1160_v6 }
 0x21c   : > { %1163 = vmatprep.subr.bf16.mxu0 %v1162_v7 }
 0x21f   : > { %1165 = vmatpush3.bf16.msra.mxu0 %v1164_v12 }
 0x220   : > { %1167 = vmatprep.subr.bf16.mxu0 %v1166_v18 }
 0x223   : > { %1169 = vmatpush3.bf16.msra.mxu0 %v1168_v21 }
 0x27a   : > { %v775_v10 = vpop.permute.xlu0 %774 }
 0x27b   : > { %v783_v11 = vmax.f32 %v766_v19, %v775_v10 }
 0x27d   : > { %791 = vrot.lane.b32.xlu0 %v783_v11, %s1386_s9 }
 0x283   : > { %v1257_v22 = vpop.permute.xlu1 %1256 }
 0x284   : > { %v1259_v24 = vunpack.i.h.bf16 %v1257_v22  ;;  %v1258_v26 = vunpack.i.l.bf16 %v1257_v22 }
 0x286   : > { %v776_v15 = vsel %vm340_vm13, %v1259_v24, %v1258_v26  ;;  %v777_v19 = vsel %vm340_vm13, %v1258_v26, %v775_v10  ;;  %vm984_vm13 = vcmask 519168  }
 0x287   : > { %v781_v27 = vmax.f32 %v764_v35, %v776_v15  ;;  %v782_v28 = vmax.f32 %v765_v34, %v777_v19 }
 0x289   : > { %v1260_v29 = vpack.i.bf16 %v781_v27, %v782_v28 }
 0x28b   : > { %1261 = vrot.lane.b32.xlu1 %v1260_v29, %s1386_s9 }
 0x2ef   : > { %v792_v30 = vpop.permute.xlu0 %791 }
 0x2f0   : > { %v800_v31 = vmax.f32 %v783_v11, %v792_v30 }
 0x2f2   : > { %1136 = vmatmul.mubr.msk.f32.vlgmr.msra.gmra.mrb[0].mxu1 %vm835_vm6, %v800_v31 }
 0x2fd   : > { %v1262_v32 = vpop.permute.xlu1 %1261 }
 0x2fe   : > { %v1264_v33 = vunpack.i.h.bf16 %v1262_v32  ;;  %v1263_v36 = vunpack.i.l.bf16 %v1262_v32 }
 0x300   : > { %v794_v37 = vsel %vm601_vm4, %v1263_v36, %v792_v30  ;;  %v793_v25 = vsel %vm601_vm4, %v1264_v33, %v1263_v36 }
 0x301   : > { %v799_v35 = vmax.f32 %v782_v28, %v794_v37  ;;  %v798_v38 = vmax.f32 %v781_v27, %v793_v25 }
 0x303   : > { %907 = vmatprep.mubr.f32.mxu0 %v799_v35 }
 0x304   : > { %908 = vmatmul.mubr.f32.vlgmr.msra.gmra.mrb[0].mxu0 %v798_v38 }
 0x3c5   : > { %v979_v23 = vpop.f32.mrb[0].mxu1 }
 0x3c6   : > { %v1137_v34 = vpop.f32.mrb[1].mxu1 }
 0x3d7   : > { %v1125_v39 = vpop.f32.mrb[0].mxu0 }
 0x3d8   : > { %v1126_v17 = vpop.f32.mrb[1].mxu0 }
 0x3d9   : > { %v1127_v40 = vadd.f32 %v1126_v17, %v1125_v39 }
 0x3db   : > { %v980_v41 = vadd.f32 %v1127_v40, %v979_v23 }
 0x3dd   : > { %v983_v42 = vpack.c.bf16 %v980_v41, %v980_v41 }
 0x3df   : > { %985 = vst.msk [vmem:[%s230_s22] sm:$0xf] %vm984_vm13, %v983_v42 }
 0x3e0 PF: > { %p15_p1 = scmp.ge.s32.totalorder %s1463_s25, 4   ;;  %s1726_s15 = smov %s1353_s16 }
 0x3e1   : > { %s1727_s16 = smov %s1357_s17  ;;  %s1728_s17 = smov %s1492_s14 }
 0x3e2   : > { %s1729_s18 = smov %s1463_s25  ;;  %17 = sbr.rel (!%p15_p1) target bundleno = 4 (0x4), region = 88 }
 0x3e9   :  { %1005 = vsyncpa [#allocation4], 1 }
 0x3ea   :  { %1007 = vsyncpa [#allocation4 + $0x1], 1 }
 0x3eb   :  { %1008 = vsyncpa [#allocation6], 1 }

// kernel: orchmatchnet_forward.9
= control target key start
LH: loop header
LB: loop body
LE: loop exit
PB: predicated region body
PF: predicated region fallthrough
CT: control target
= control target key end

     0   :  { %s1774_s15 = smov 0   ;;  %s2070_s0 = inlined_call_operand.vmem [shape: bf16[2,16,4,4], index: 0, kind: input, shape index: {}]   ;;  %s2071_s1 = inlined_call_operand.vmem [shape: bf16[9,32,16], index: 1, kind: input, shape index: {}]   ;;  %s2072_s2 = inlined_call_operand.vmem [shape: f32[32,1], index: 2, kind: input, shape index: {}]   ;;  %s2073_s3 = inlined_call_operand.vmem [shape: f32[15,4], index: 3, kind: input, shape index: {}]   ;;  %s2074_s4 = inlined_call_operand.vmem [shape: bf16[2,32,4], index: 4, kind: output, shape index: {}]  }
   0x1 LB: > { %s1440_s16 = sadd.s32 4294967295, %s1733_s15   ;;  %p1444_p0 = scmp.ge.s32.totalorder %s1733_s15, 1  ;;  %s1733_s15 = sphi %s1774_s15, %s14_s15  }
   0x2   : > { %p162_p1 = scmp.lt.s32.totalorder %s1733_s15, 3 }
   0x4   : > { %p163_p2 = pnand %p1444_p0, %p162_p1 }
   0x5   : > { %p188_p3 = scmp.lt.s32.totalorder (!%p163_p2), %s1440_s16, 1  ;;  %vm199_vm0 = vcmask (!%p163_p2), 293888   ;;  %vm362_vm1 = vcmask (!%p163_p2), 1041409   ;;  %vm365_vm2 = vcmask (!%p163_p2), 1042434   ;;  %vm368_vm3 = vcmask (!%p163_p2), 1043459   ;;  %s1736_s21 = smov (!%p163_p2), 7  }
   0x6   : > { %166 = sbr.rel (%p163_p2) target bundleno = 1022 (0x3fe), region = 36  ;;  %v1735_v0 = vmov (!%p163_p2), 0   ;;  %vm371_vm4 = vcmask (!%p163_p2), 1044484   ;;  %vm374_vm5 = vcmask (!%p163_p2), 1045509   ;;  %vm377_vm6 = vcmask (!%p163_p2), 1046534   ;;  %s1737_s22 = smov (!%p163_p2), 19  }
   0x7   : > { %200 = vst.msk [vmem:[#allocation2] sm:$0xff] (!%p163_p2), %vm199_vm0, %v1735_v0  ;;  %1708 = vset.pattern.permute.xlu1 (!%p163_p2), %v1735_v0  ;;  %1707 = vset.pattern.permute.xlu0 (!%p163_p2), %v1735_v0  ;;  %vm380_vm7 = vcmask (!%p163_p2), 1047559   ;;  %s1738_s23 = smov (!%p163_p2), 13   ;;  %s1739_s24 = smov (!%p163_p2), 25   ;;  %vm400_vm8 = vcmask (!%p163_p2), 89144   ;;  %vm434_vm9 = vcmask (!%p163_p2), 138344  }
   0x8   : > { %vm468_vm10 = vcmask (!%p163_p2), 187544   ;;  %vm502_vm11 = vcmask (!%p163_p2), 236744   ;;  %vm528_vm12 = vcmask (!%p163_p2), 130048   ;;  %s1740_s29 = smov (!%p163_p2), 127   ;;  %s1741_s30 = smov (!%p163_p2), 121   ;;  %vm1275_vm13 = vcmask (!%p163_p2), 1046528  }
   0x9   : > { %s1742_s5 = smov (!%p163_p2), 116   ;;  %s1743_s6 = smov (!%p163_p2), 120   ;;  %vm1748_vm14 = vmmov (!%p163_p2), 1   ;;  %vm1262_vm0 = vcmask (!%p163_p2), 121856  }
   0xa   : > { %s1744_s7 = smov (!%p163_p2), 115   ;;  %s1745_s8 = smov (!%p163_p2), 126   ;;  %vm1648_vm15 = vmpackc.low (!%p163_p2), %vm1275_vm13, %vm1748_vm14 }
   0xb   : > { %s1746_s9 = smov (!%p163_p2), 114   ;;  %s1747_s10 = smov (!%p163_p2), 122  }
   0xd   : > { %s2076_s16 = smov (!%p188_p3, %s1440_s16), 1 }
   0xe   : > { %s1544_s17 = sshll.u32 %s2076_s16, 5 }
   0xf   : > { %s1788_s20 = scalar_lea.vmem %s2070_s0, %s1544_s17 }
  0x10   : > { %v1449_v1 = vld.sshfl [vmem:[%s1788_s20] sm:$0x3 pattern:$0x76325410] }
  0x11   : > { %v1450_v2 = vld.sshfl [vmem:[%s1788_s20 + $0x2] sm:$0x3 pattern:$0x76325410]  ;;  %v1792_v3 = vunpack.c.l.b16 %v1449_v1 }
  0x12   : > { %v1451_v4 = vld.sshfl [vmem:[%s1788_s20 + $0x4] sm:$0x3 pattern:$0x76325410]  ;;  %v1795_v5 = vunpack.c.l.b16 %v1450_v2 }
  0x13   : > { %v1452_v6 = vld.sshfl [vmem:[%s1788_s20 + $0x6] sm:$0x3 pattern:$0x76325410]  ;;  %v1798_v7 = vunpack.c.l.b16 %v1451_v4  ;;  %v436_v8 = vrot.slane %v1792_v3, 2  ;;  %v402_v9 = vrot.slane %v1792_v3, 1 }
  0x14   : > { %v1453_v10 = vld.sshfl [vmem:[%s1788_s20 + $0x8] sm:$0x3 pattern:$0x76325410]  ;;  %v1803_v11 = vunpack.c.l.b16 %v1452_v6  ;;  %v361_v12 = vrot.slane %v1795_v5, 7  ;;  %v437_v13 = vrot.slane %v1795_v5, 1 }
  0x15   : > { %v1454_v14 = vld.sshfl [vmem:[%s1788_s20 + $0xa] sm:$0x3 pattern:$0x76325410]  ;;  %v1808_v15 = vunpack.c.l.b16 %v1453_v10  ;;  %v364_v16 = vrot.slane %v1798_v7, 6  ;;  %v1813_v17 = vsel %vm362_vm1, %v1795_v5, %v402_v9  ;;  %v404_v18 = vrot.slane %v1798_v7, 7 }
  0x16   : > { %v1455_v19 = vld.sshfl [vmem:[%s1788_s20 + $0xc] sm:$0x3 pattern:$0x76325410]  ;;  %v1817_v20 = vunpack.c.l.b16 %v1454_v14  ;;  %v363_v21 = vsel %vm362_vm1, %v361_v12, %v1792_v3  ;;  %v367_v22 = vrot.slane %v1803_v11, 5  ;;  %v438_v23 = vsel %vm362_vm1, %v437_v13, %v436_v8 }
  0x17   : > { %v1456_v24 = vld.sshfl [vmem:[%s1788_s20 + $0xe] sm:$0x3 pattern:$0x76325410]  ;;  %v1824_v25 = vunpack.c.l.b16 %v1455_v19  ;;  %v366_v26 = vsel %vm365_vm2, %v364_v16, %v363_v21  ;;  %v370_v27 = vrot.slane %v1808_v15, 4  ;;  %v439_v28 = vsel %vm365_vm2, %v1798_v7, %v438_v23 }
  0x18   : > { %v1457_v29 = vld.sshfl [vmem:[%s1788_s20 + $0x10] sm:$0x3 pattern:$0x76325410]  ;;  %v1831_v30 = vunpack.c.l.b16 %v1456_v24  ;;  %v369_v31 = vsel %vm368_vm3, %v367_v22, %v366_v26  ;;  %v373_v32 = vrot.slane %v1817_v20, 3  ;;  %v440_v33 = vrot.slane %v1803_v11, 7 }
  0x19   : > { %v1458_v34 = vld.sshfl [vmem:[%s1788_s20 + $0x12] sm:$0x3 pattern:$0x76325410]  ;;  %v1837_v35 = vunpack.c.l.b16 %v1457_v29  ;;  %v372_v36 = vsel %vm371_vm4, %v370_v27, %v369_v31  ;;  %v376_v37 = vrot.slane %v1824_v25, 2  ;;  %v442_v38 = vrot.slane %v1808_v15, 6 }
  0x1a   : > { %v1459_v39 = vld.sshfl [vmem:[%s1788_s20 + $0x14] sm:$0x3 pattern:$0x76325410]  ;;  %v1843_v40 = vunpack.c.l.b16 %v1458_v34  ;;  %v375_v41 = vsel %vm374_vm5, %v373_v32, %v372_v36  ;;  %v379_v42 = vrot.slane %v1831_v30, 1  ;;  %v441_v43 = vsel %vm368_vm3, %v440_v33, %v439_v28 }
  0x1b   : > { %v1460_v44 = vld.sshfl [vmem:[%s1788_s20 + $0x16] sm:$0x3 pattern:$0x76325410]  ;;  %v1849_v45 = vunpack.c.l.b16 %v1459_v39  ;;  %v378_v46 = vsel %vm377_vm6, %v376_v37, %v375_v41  ;;  %v443_v47 = vsel %vm371_vm4, %v442_v38, %v441_v43  ;;  %v444_v48 = vrot.slane %v1817_v20, 5 }
  0x1c   : > { %v1461_v49 = vld.sshfl [vmem:[%s1788_s20 + $0x18] sm:$0x3 pattern:$0x76325410]  ;;  %v1855_v50 = vunpack.c.l.b16 %v1460_v44  ;;  %v381_v51 = vsel %vm380_vm7, %v379_v42, %v378_v46  ;;  %v382_v52 = vrot.slane %v1843_v40, 7  ;;  %v446_v53 = vrot.slane %v1824_v25, 4 }
  0x1d   : > { %v1462_v54 = vld.sshfl [vmem:[%s1788_s20 + $0x1a] sm:$0x3 pattern:$0x76325410]  ;;  %v1861_v55 = vunpack.c.l.b16 %v1461_v49  ;;  %v384_v56 = vrot.slane %v1849_v45, 6  ;;  %v445_v57 = vsel %vm374_vm5, %v444_v48, %v443_v47  ;;  %v448_v58 = vrot.slane %v1831_v30, 3 }
  0x1e   : > { %v1463_v59 = vld.sshfl [vmem:[%s1788_s20 + $0x1c] sm:$0x3 pattern:$0x76325410]  ;;  %v1867_v60 = vunpack.c.l.b16 %v1462_v54  ;;  %v383_v61 = vsel %vm362_vm1, %v382_v52, %v1837_v35  ;;  %v386_v62 = vrot.slane %v1855_v50, 5  ;;  %v447_v63 = vsel %vm377_vm6, %v446_v53, %v445_v57 }
  0x1f   : > { %v1464_v0 = vld.sshfl [vmem:[%s1788_s20 + $0x1e] sm:$0x3 pattern:$0x76325410]  ;;  %v1874_v1 = vunpack.c.l.b16 %v1463_v59  ;;  %v385_v2 = vsel %vm365_vm2, %v384_v56, %v383_v61  ;;  %v388_v4 = vrot.slane %v1861_v55, 4  ;;  %v449_v6 = vsel %vm380_vm7, %v448_v58, %v447_v63 }
  0x20   : > { %v1879_v8 = vunpack.c.l.b16 %v1464_v0  ;;  %v387_v9 = vsel %vm368_vm3, %v386_v62, %v385_v2  ;;  %v390_v10 = vrot.slane %v1867_v60, 3  ;;  %v450_v12 = vrot.slane %v1837_v35, 2 }
  0x21   : > { %v389_v13 = vsel %vm371_vm4, %v388_v4, %v387_v9  ;;  %v392_v14 = vrot.slane %v1874_v1, 2  ;;  %v451_v16 = vrot.slane %v1843_v40, 1  ;;  %v454_v19 = vrot.slane %v1855_v50, 7 }
  0x22   : > { %v391_v21 = vsel %vm374_vm5, %v390_v10, %v389_v13  ;;  %v394_v22 = vrot.slane %v1879_v8, 1  ;;  %v456_v23 = vrot.slane %v1861_v55, 6  ;;  %v458_v24 = vrot.slane %v1867_v60, 5 }
  0x23   : > { %v393_v26 = vsel %vm377_vm6, %v392_v14, %v391_v21  ;;  %v452_v27 = vsel %vm362_vm1, %v451_v16, %v450_v12  ;;  %v460_v28 = vrot.slane %v1874_v1, 4  ;;  %v462_v29 = vrot.slane %v1879_v8, 3 }
  0x24   : > { %v395_v31 = vsel %vm380_vm7, %v394_v22, %v393_v26  ;;  %v453_v32 = vsel %vm365_vm2, %v1849_v45, %v452_v27  ;;  %v405_v33 = vsel %vm365_vm2, %v404_v18, %v1813_v17  ;;  %v406_v34 = vrot.slane %v1803_v11, 6 }
  0x25   : > { %v396_v36 = vpack.c.b16 %v395_v31, %v381_v51  ;;  %v455_v37 = vsel %vm368_vm3, %v454_v19, %v453_v32  ;;  %v408_v38 = vrot.slane %v1808_v15, 5  ;;  %v410_v39 = vrot.slane %v1817_v20, 4 }
  0x26   : > { %v457_v41 = vsel %vm371_vm4, %v456_v23, %v455_v37  ;;  %v407_v42 = vsel %vm368_vm3, %v406_v34, %v405_v33  ;;  %v412_v43 = vrot.slane %v1824_v25, 3  ;;  %v414_v44 = vrot.slane %v1831_v30, 2  ;;  %v1709_v34 = vld [vmem:[%s2071_s1 + $0x10] sm:$0xff]  }
  0x27   : > { %397 = vrot.lane.b32.xlu0 %v396_v36, %s1736_s21  ;;  %v459_v17 = vsel %vm374_vm5, %v458_v24, %v457_v41  ;;  %v409_v18 = vsel %vm371_vm4, %v408_v38, %v407_v42  ;;  %v416_v46 = vrot.slane %v1837_v35, 1  ;;  %v418_v47 = vrot.slane %v1849_v45, 7  ;;  %v1710_v36 = vld [vmem:[%s2071_s1 + $0x40] sm:$0xff]   ;;  %1585 = vmatprep.mubr.msk.bf16.mxu1 %vm528_vm12, %v1709_v34  ;;  %v1190_v42 = vld [vmem:[%s2072_s2 + $0x10] sm:$0xff] }
  0x28   : > { %v461_v48 = vsel %vm377_vm6, %v460_v28, %v459_v17  ;;  %v411_v49 = vsel %vm374_vm5, %v410_v39, %v409_v18  ;;  %v420_v51 = vrot.slane %v1855_v50, 6  ;;  %v422_v52 = vrot.slane %v1861_v55, 5  ;;  %1609 = vmatprep.mubr.msk.bf16.mxu0 %vm528_vm12, %v1710_v36  ;;  %v1189_v39 = vld [vmem:[%s2072_s2 + $0x8] sm:$0xff]  ;;  %v1188_v41 = vld [vmem:[%s2072_s2] sm:$0xff]  ;;  %v1711_v18 = vld [vmem:[%s2071_s1 + $0x18] sm:$0xff]  }
  0x29   : > { %v463_v53 = vsel %vm380_vm7, %v462_v29, %v461_v48  ;;  %v413_v54 = vsel %vm377_vm6, %v412_v43, %v411_v49  ;;  %v417_v56 = vsel %vm362_vm1, %v1843_v40, %v416_v46  ;;  %v424_v57 = vrot.slane %v1867_v60, 4  ;;  %v1191_v43 = vld [vmem:[%s2072_s2 + $0x18] sm:$0xff]  ;;  %v1712_v46 = vld [vmem:[%s2071_s1 + $0x48] sm:$0xff]   ;;  %v1714_v49 = vld [vmem:[%s2071_s1 + $0x50] sm:$0xff]  }
  0x2a   : > { %v464_v58 = vpack.c.b16 %v463_v53, %v449_v6  ;;  %v415_v59 = vsel %vm380_vm7, %v414_v44, %v413_v54  ;;  %v419_v61 = vsel %vm365_vm2, %v418_v47, %v417_v56  ;;  %v426_v62 = vrot.slane %v1874_v1, 3  ;;  %v1713_v47 = vld [vmem:[%s2071_s1] sm:$0xff]   ;;  %v1715_v53 = vld [vmem:[%s2071_s1 + $0x8] sm:$0xff]   ;;  %v1716_v54 = vld [vmem:[%s2071_s1 + $0x58] sm:$0xff]  }
  0x2b   : > { %v421_v63 = vsel %vm368_vm3, %v420_v51, %v419_v61  ;;  %v428_v0 = vrot.slane %v1879_v8, 2  ;;  %v470_v2 = vrot.slane %v1792_v3, 3  ;;  %v471_v4 = vrot.slane %v1795_v5, 2  ;;  %v1717_v56 = vld [vmem:[%s2071_s1 + $0x20] sm:$0xff]   ;;  %v1719_v61 = vld [vmem:[%s2071_s1 + $0x28] sm:$0xff]  }
  0x2c   : > { %465 = vrot.lane.b32.xlu1 %v464_v58, %s1737_s22  ;;  %v423_v9 = vsel %vm371_vm4, %v422_v52, %v421_v63  ;;  %v473_v6 = vrot.slane %v1798_v7, 1  ;;  %v476_v10 = vrot.slane %v1808_v15, 7  ;;  %v478_v12 = vrot.slane %v1817_v20, 6  ;;  %v1721_v63 = vld [vmem:[%s2071_s1 + $0x30] sm:$0xff]  }
  0x2d   : > { %v425_v13 = vsel %vm374_vm5, %v424_v57, %v423_v9  ;;  %v472_v14 = vsel %vm362_vm1, %v471_v4, %v470_v2  ;;  %v480_v16 = vrot.slane %v1824_v25, 5  ;;  %v482_v3 = vrot.slane %v1831_v30, 4  ;;  %v1718_v57 = vld [vmem:[%s2071_s1 + $0x60] sm:$0xff]   ;;  %v1723_v4 = vld [vmem:[%s2071_s1 + $0x38] sm:$0xff]  }
  0x2e   : > { %v427_v5 = vsel %vm377_vm6, %v426_v62, %v425_v13  ;;  %v474_v19 = vsel %vm365_vm2, %v473_v6, %v472_v14  ;;  %v484_v21 = vrot.slane %v1837_v35, 3  ;;  %v485_v7 = vrot.slane %v1843_v40, 2  ;;  %v1720_v62 = vld [vmem:[%s2071_s1 + $0x68] sm:$0xff]   ;;  %v1724_v9 = vld [vmem:[%s2071_s1 + $0x78] sm:$0xff]   ;;  %v1725_v6 = vld [vmem:[%s2071_s1 + $0x80] sm:$0xff]  }
  0x2f   : > { %v429_v15 = vsel %vm380_vm7, %v428_v0, %v427_v5  ;;  %v475_v20 = vsel %vm368_vm3, %v1803_v11, %v474_v19  ;;  %v487_v22 = vrot.slane %v1849_v45, 1  ;;  %v490_v23 = vrot.slane %v1861_v55, 7  ;;  %v1722_v0 = vld [vmem:[%s2071_s1 + $0x70] sm:$0xff]  }
  0x30   : > { %v430_v25 = vpack.c.b16 %v429_v15, %v415_v59  ;;  %v477_v30 = vsel %vm371_vm4, %v476_v10, %v475_v20  ;;  %v486_v24 = vsel %vm362_vm1, %v485_v7, %v484_v21  ;;  %v492_v26 = vrot.slane %v1867_v60, 6  ;;  %v1726_v10 = vld [vmem:[%s2071_s1 + $0x88] sm:$0xff]  }
  0x31   : > { %v479_v35 = vsel %vm374_vm5, %v478_v12, %v477_v30  ;;  %v488_v40 = vsel %vm365_vm2, %v487_v22, %v486_v24  ;;  %v494_v27 = vrot.slane %v1874_v1, 5  ;;  %v496_v55 = vrot.slane %v1879_v8, 4  ;;  %v1260_v30 = vld [vmem:[%s2073_s3] sm:$0xff]  ;;  %v1261_v24 = vld [vmem:[%s2073_s3 + $0x8] sm:$0x7f] }
  0x32   : > { %431 = vrot.lane.b32.xlu0 %v430_v25, %s1738_s23  ;;  %v481_v11 = vsel %vm377_vm6, %v480_v16, %v479_v35  ;;  %v489_v45 = vsel %vm368_vm3, %v1855_v50, %v488_v40  ;;  %v1647_v40 = vpack.c.bf16 %v1261_v24, %v1260_v30  ;;  %vm1380_vm1 = vcmask 27648  }
  0x33   : > { %v491_v28 = vsel %vm371_vm4, %v490_v23, %v489_v45  ;;  %v483_v29 = vsel %vm380_vm7, %v482_v3, %v481_v11 }
  0x34   : > { %v493_v60 = vsel %vm374_vm5, %v492_v26, %v491_v28 }
  0x35   : > { %v495_v31 = vsel %vm377_vm6, %v494_v27, %v493_v60 }
  0x36   : > { %v497_v32 = vsel %vm380_vm7, %v496_v55, %v495_v31 }
  0x37   : > { %v498_v1 = vpack.c.b16 %v497_v32, %v483_v29 }
  0x39   : > { %499 = vrot.lane.b32.xlu1 %v498_v1, %s1739_s24 }
  0x99   : > { %v398_v33 = vpop.permute.xlu0 %397 }
  0x9a   : > { %401 = vst.msk [vmem:[#allocation2] sm:$0xff] %vm400_vm8, %v398_v33 }
  0x9e   : > { %v466_v8 = vpop.permute.xlu1 %465 }
  0xa4   : > { %v432_v50 = vpop.permute.xlu0 %431 }
  0xa5   : > { %435 = vst.msk [vmem:[#allocation2] sm:$0xff] %vm434_vm9, %v432_v50 }
  0xa6   : > { %469 = vst.msk [vmem:[#allocation2] sm:$0xff] %vm468_vm10, %v466_v8 }
  0xab   : > { %v500_v37 = vpop.permute.xlu1 %499 }
  0xac   : > { %503 = vst.msk [vmem:[#allocation2] sm:$0xff] %vm502_vm11, %v500_v37 }
  0xb3   : > { %v504_v38 = vld [vmem:[#allocation2] sm:$0xff] }
  0xb4   : > { %525 = vrot.lane.b32.xlu1 %v504_v38, %s1740_s29  ;;  %818 = vrot.lane.b32.xlu0 %v504_v38, %s1741_s30 }
  0xb8   : > { %972 = vrot.lane.b32.xlu1 %v504_v38, %s1742_s5  ;;  %895 = vrot.lane.b32.xlu0 %v504_v38, %s1743_s6 }
  0xbc   : > { %1049 = vrot.lane.b32.xlu1 %v504_v38, %s1744_s7  ;;  %664 = vrot.lane.b32.xlu0 %v504_v38, %s1745_s8 }
  0xc0   : > { %1126 = vrot.lane.b32.xlu1 %v504_v38, %s1746_s9  ;;  %741 = vrot.lane.b32.xlu0 %v504_v38, %s1747_s10 }
  0xc4   : > { %1199 = vperm.xlu1 %1708, %v1189_v39   ;;  %1194 = vperm.xlu0 %1707, %v1188_v41  }
  0xc8   : > { %1204 = vperm.xlu1 %1708, %v1190_v42   ;;  %1209 = vperm.xlu0 %1707, %v1191_v43  }
 0x126   : > { %v526_v44 = vpop.permute.xlu1 %525  ;;  %v819_v17 = vpop.permute.xlu0 %818 }
 0x127   : > { %1583 = vmatprep.subr.bf16.mxu1 %v526_v44  ;;  %1607 = vmatprep.subr.bf16.mxu0 %v819_v17 }
 0x128   : > { %1584 = vmatpush3.bf16.msra.mxu1 %v526_v44  ;;  %1608 = vmatpush3.bf16.msra.mxu0 %v819_v17 }
 0x129   : > { %1589 = vmatprep.subr.bf16.mxu1 %v504_v38 }
 0x12a   : > { %v896_v48 = vpop.permute.xlu0 %895  ;;  %v973_v51 = vpop.permute.xlu1 %972 }
 0x12b   : > { %1586 = vmatmul.mubr.msk.bf16.vlgmr.msra.gmra.mrb[0].mxu1 %vm528_vm12, %v1711_v18  ;;  %1610 = vmatmul.mubr.msk.bf16.vlgmr.msra.gmra.mrb[0].mxu0 %vm528_vm12, %v1712_v46 }
 0x12c   : > { %1613 = vmatprep.subr.bf16.mxu0 %v896_v48  ;;  %1590 = vmatpush3.bf16.msra.mxu1 %v504_v38 }
 0x12d   : > { %1614 = vmatpush3.bf16.msra.mxu0 %v896_v48  ;;  %1591 = vmatprep.mubr.msk.bf16.mxu1 %vm528_vm12, %v1713_v47 }
 0x12e   : > { %1619 = vmatprep.subr.bf16.mxu0 %v973_v51  ;;  %v665_v52 = vpop.permute.xlu0 %664  ;;  %1615 = vmatprep.mubr.msk.bf16.mxu0 %vm528_vm12, %v1714_v49  ;;  %v1050_v58 = vpop.permute.xlu1 %1049 }
 0x12f   : > { %1595 = vmatprep.subr.bf16.mxu1 %v665_v52 }
 0x132   : > { %v742_v59 = vpop.permute.xlu0 %741  ;;  %v1127_v2 = vpop.permute.xlu1 %1126 }
 0x137   : > { %1592 = vmatmul.mubr.msk.bf16.vlgmr.msra.gmra.mrb[0].mxu1 %vm528_vm12, %v1715_v53  ;;  %1616 = vmatmul.mubr.msk.bf16.vlgmr.msra.gmra.mrb[0].mxu0 %vm528_vm12, %v1716_v54 }
 0x138   : > { %1596 = vmatpush3.bf16.msra.mxu1 %v665_v52  ;;  %1620 = vmatpush3.bf16.msra.mxu0 %v973_v51 }
 0x139   : > { %1601 = vmatprep.subr.bf16.mxu1 %v742_v59  ;;  %1625 = vmatprep.subr.bf16.mxu0 %v1050_v58 }
 0x13a   : > { %1597 = vmatprep.mubr.msk.bf16.mxu1 %vm528_vm12, %v1717_v56  ;;  %1621 = vmatprep.mubr.msk.bf16.mxu0 %vm528_vm12, %v1718_v57 }
 0x143   : > { %1598 = vmatmul.mubr.msk.bf16.vlgmr.msra.gmra.mrb[0].mxu1 %vm528_vm12, %v1719_v61  ;;  %1622 = vmatmul.mubr.msk.bf16.vlgmr.msra.gmra.mrb[0].mxu0 %vm528_vm12, %v1720_v62  ;;  %v1200_v3 = vpop.permute.xlu1 %1199  ;;  %v1195_v5 = vpop.permute.xlu0 %1194 }
 0x144   : > { %1602 = vmatpush3.bf16.msra.mxu1 %v742_v59  ;;  %1626 = vmatpush3.bf16.msra.mxu0 %v1050_v58 }
 0x145   : > { %1631 = vmatprep.subr.bf16.mxu0 %v1127_v2  ;;  %1603 = vmatprep.mubr.msk.bf16.mxu1 %vm528_vm12, %v1721_v63 }
 0x146   : > { %1627 = vmatprep.mubr.msk.bf16.mxu0 %vm528_vm12, %v1722_v0  ;;  %1649 = vmatprep.subr.msk.bf16.mxu1 %vm1648_vm15, %v1647_v40 }
 0x147   : > { %v1205_v22 = vpop.permute.xlu1 %1204  ;;  %v1210_v27 = vpop.permute.xlu0 %1209 }
 0x14f   : > { %1604 = vmatmul.mubr.msk.bf16.vlgmr.msra.gmra.mrb[0].mxu1 %vm528_vm12, %v1723_v4  ;;  %1628 = vmatmul.mubr.msk.bf16.vlgmr.msra.gmra.mrb[0].mxu0 %vm528_vm12, %v1724_v9 }
 0x150   : > { %1632 = vmatpush3.bf16.msra.mxu0 %v1127_v2  ;;  %1633 = vmatprep.mubr.msk.bf16.mxu0 %vm528_vm12, %v1725_v6 }
 0x151   : > { %1652 = vmatpush3.bf16.msk.msra.mxu1 %vm1648_vm15, %v1647_v40 }
 0x15b   : > { %1634 = vmatmul.mubr.msk.bf16.vlgmr.msra.gmra.mrb[0].mxu0 %vm528_vm12, %v1726_v10 }
 0x222   : > { %v1605_v12 = vpop.f32.mrb[0].mxu1 }
 0x223   : > { %v784_v13 = vpop.f32.mrb[1].mxu1 }
 0x224   : > { %v1606_v14 = vpop.f32.mrb[2].mxu1 }
 0x225   : > { %v787_v16 = vpop.f32.mrb[3].mxu1 }
 0x22e   : > { %v1635_v19 = vpop.f32.mrb[0].mxu0 }
 0x22f   : > { %v1653_v21 = vadd.f32 %v1635_v19, %v1605_v12  ;;  %v1169_v7 = vpop.f32.mrb[1].mxu0 }
 0x230   : > { %v1654_v15 = vadd.f32 %v1169_v7, %v784_v13  ;;  %v1636_v20 = vpop.f32.mrb[2].mxu0 }
 0x231   : > { %v1655_v23 = vadd.f32 %v1636_v20, %v1606_v14  ;;  %v1172_v25 = vpop.f32.mrb[3].mxu0  ;;  %v1214_v45 = vadd.f32 %v1653_v21, %v1205_v22 }
 0x232   : > { %v1212_v26 = vadd.f32 %v1654_v15, %v1195_v5  ;;  %v1656_v35 = vadd.f32 %v1172_v25, %v787_v16 }
 0x233   : > { %v1215_v29 = vadd.f32 %v1655_v23, %v1210_v27  ;;  %v1218_v60 = vmax.f32 %v1214_v45, 0.0 }
 0x234   : > { %v1216_v11 = vmax.f32 %v1212_v26, 0.0  ;;  %v1213_v55 = vadd.f32 %v1656_v35, %v1200_v3 }
 0x235   : > { %v1219_v31 = vmax.f32 %v1215_v29, 0.0 }
 0x236   : > { %v1217_v28 = vmax.f32 %v1213_v55, 0.0  ;;  %1224 = vrot.lane.b32.xlu1 %v1216_v11, %s1740_s29 }
 0x238   : > { %1226 = vrot.lane.b32.xlu0 %v1217_v28, %s1740_s29 }
 0x23a   : > { %1228 = vrot.lane.b32.xlu1 %v1218_v60, %s1740_s29 }
 0x23c   : > { %1230 = vrot.lane.b32.xlu0 %v1219_v31, %s1740_s29  ;;  %s1545_s29 = sshll.u32 %s2076_s16, 4 }
 0x23d   : > { %s197_s13 = scalar_lea.vmem %s2074_s4, %s1545_s29 }
 0x2a8   : > { %v1225_v32 = vpop.permute.xlu1 %1224 }
 0x2a9   : > { %v1236_v1 = vmax.f32 %v1216_v11, %v1225_v32 }
 0x2aa   : > { %v1227_v33 = vpop.permute.xlu0 %1226 }
 0x2ab   : > { %v1237_v50 = vmax.f32 %v1217_v28, %v1227_v33  ;;  %1244 = vrot.lane.b32.xlu1 %v1236_v1, %s1747_s10 }
 0x2ac   : > { %v1229_v8 = vpop.permute.xlu1 %1228 }
 0x2ad   : > { %v1238_v34 = vmax.f32 %v1218_v60, %v1229_v8  ;;  %1246 = vrot.lane.b32.xlu0 %v1237_v50, %s1747_s10 }
 0x2ae   : > { %v1231_v36 = vpop.permute.xlu0 %1230 }
 0x2af   : > { %v1239_v37 = vmax.f32 %v1219_v31, %v1231_v36  ;;  %1248 = vrot.lane.b32.xlu1 %v1238_v34, %s1747_s10 }
 0x2b1   : > { %1250 = vrot.lane.b32.xlu0 %v1239_v37, %s1747_s10 }
 0x31d   : > { %v1245_v38 = vpop.permute.xlu1 %1244 }
 0x31e   : > { %v1256_v39 = vmax.f32 %v1236_v1, %v1245_v38 }
 0x31f   : > { %v1247_v41 = vpop.permute.xlu0 %1246 }
 0x320   : > { %v1257_v42 = vmax.f32 %v1237_v50, %v1247_v41  ;;  %1641 = vmatprep.mubr.msk.f32.mxu1 %vm1262_vm0, %v1256_v39 }
 0x321   : > { %v1249_v43 = vpop.permute.xlu1 %1248 }
 0x322   : > { %v1258_v44 = vmax.f32 %v1238_v34, %v1249_v43  ;;  %1642 = vmatmul.mubr.msk.f32.vlgmr.msra.gmra.mrb[4].mxu1 %vm1262_vm0, %v1257_v42 }
 0x323   : > { %v1251_v17 = vpop.permute.xlu0 %1250 }
 0x324   : > { %v1259_v18 = vmax.f32 %v1239_v37, %v1251_v17  ;;  %1644 = vmatprep.mubr.msk.f32.mxu1 %vm1262_vm0, %v1258_v44 }
 0x326   : > { %1645 = vmatmul.mubr.msk.f32.gmra.mrb[6].mxu1 %vm1262_vm0, %v1259_v18 }
 0x3f5   : > { %v1643_v46 = vpop.f32.mrb[4].mxu1 }
 0x3f6   : > { %v1547_v47 = vpack.c.bf16 %v1643_v46, %v1643_v46  ;;  %v1345_v48 = vpop.f32.mrb[5].mxu1 }
 0x3f7   : > { %v1546_v49 = vpack.c.bf16 %v1345_v48, %v1345_v48 }
 0x3f8   : > { %1382 = vst.msk [vmem:[%s197_s13 + $0x4] sm:$0xf] %vm1380_vm1, %v1547_v47 }
 0x3f9   : > { %1381 = vst.msk [vmem:[%s197_s13] sm:$0xf] %vm1380_vm1, %v1546_v49  ;;  %v1646_v51 = vpop.f32.mrb[6].mxu1 }
 0x3fa   : > { %v1549_v52 = vpack.c.bf16 %v1646_v51, %v1646_v51  ;;  %v1355_v53 = vpop.f32.mrb[7].mxu1 }
 0x3fb   : > { %v1548_v54 = vpack.c.bf16 %v1355_v53, %v1355_v53 }
 0x3fc   : > { %1384 = vst.msk [vmem:[%s197_s13 + $0xc] sm:$0xf] %vm1380_vm1, %v1549_v52 }
 0x3fd   : > { %1383 = vst.msk [vmem:[%s197_s13 + $0x8] sm:$0xf] %vm1380_vm1, %v1548_v54 }
 0x3fe PF: > { %s14_s15 = sadd.s32 1, %s1733_s15  }
 0x3ff   : > { %p11_p4 = scmp.ge.s32.totalorder %s14_s15, 4  }
 0x401   :  { %13 = sbr.rel (!%p11_p4) target bundleno = 1 (0x1), region = 74 }

// kernel: orchmatchnet_forward.10
= control target key start
LH: loop header
LB: loop body
LE: loop exit
PB: predicated region body
PF: predicated region fallthrough
CT: control target
= control target key end

     0   :  { %vm152_vm0 = vcmask 1041408   ;;  %v325_v0 = vlaneseq  ;;  %v2167_v2 = vmov 0.0   ;;  %vm581_vm1 = vcmask 1041409   ;;  %s2168_s8 = smov 124   ;;  %s2170_s9 = smov 4   ;;  %s3397_s2 = inlined_call_operand.vmem [shape: f32[2,8], index: 2, kind: input, shape index: {}]   ;;  %s3398_s1 = inlined_call_operand.vmem [shape: f32[2,8], index: 1, kind: input, shape index: {}]   ;;  %s3399_s0 = inlined_call_operand.vmem [shape: bf16[64,2,2], index: 0, kind: input, shape index: {}]   ;;  %s3400_s3 = inlined_call_operand.vmem [shape: f32[1,8], index: 3, kind: input, shape index: {}]   ;;  %s3401_s4 = inlined_call_operand.vmem [shape: bf16[64,4], index: 4, kind: output, shape index: {}]  }
   0x1   :  { %v146_v1 = vld [vmem:[%s3397_s2] sm:$0x3]  ;;  %1944 = vmatprep.mubr.f32.mxu0 %v2167_v2  ;;  %v2220_v6 = vld [vmem:[%s3399_s0 + $0x2] sm:$0x1]  ;;  %v2225_v7 = vld [vmem:[%s3399_s0 + $0x3] sm:$0x1] }
   0x2   :  { %v2204_v3 = vld [vmem:[%s3398_s1] sm:$0x3]  ;;  %1942 = vmatprep.subr.msk.mxu0 %vm152_vm0, %v146_v1  ;;  %1970 = vmatprep.subr.msk.mxu1 %vm152_vm0, %v146_v1  ;;  %v2232_v8 = vld [vmem:[%s3399_s0 + $0x4] sm:$0x1]  ;;  %v2237_v9 = vld [vmem:[%s3399_s0 + $0x5] sm:$0x1]  ;;  %v3433_v13 = vunpack.c.l.bf16 %v2220_v6  ;;  %v3430_v14 = vunpack.c.l.bf16 %v2225_v7 }
   0x3   :  { %v2209_v4 = vld [vmem:[%s3399_s0] sm:$0x1]  ;;  %v2215_v5 = vld [vmem:[%s3399_s0 + $0x1] sm:$0x1]  ;;  %1943 = vmatpush3.msk.msra.mxu0 %vm152_vm0, %v146_v1  ;;  %v2242_v10 = vld [vmem:[%s3399_s0 + $0x6] sm:$0x1]  ;;  %1971 = vmatpush3.msk.msra.mxu1 %vm152_vm0, %v146_v1  ;;  %v3429_v16 = vunpack.c.l.bf16 %v2232_v8  ;;  %v3425_v17 = vunpack.c.l.bf16 %v2237_v9 }
   0x4   :  { %v3438_v11 = vunpack.c.l.bf16 %v2209_v4  ;;  %v3437_v12 = vunpack.c.l.bf16 %v2215_v5  ;;  %1945 = vmatmul.mubr.f32.vlgmr.msra.gmra.mrb[0].mxu0 %v2167_v2  ;;  %1956 = vmatprep.subr.msk.mxu0 %vm152_vm0, %v2204_v3  ;;  %v2255_v15 = vld [vmem:[%s3399_s0 + $0x7] sm:$0x1]  ;;  %v3414_v18 = vunpack.c.l.bf16 %v2242_v10  ;;  %v2260_v19 = vshrl.u32 %v325_v0, 7  ;;  %v2265_v20 = vld [vmem:[%s3399_s0 + $0x8] sm:$0x1]  ;;  %s2171_s10 = smov 122  }
   0x5   :  { %1957 = vmatpush3.msk.msra.mxu0 %vm152_vm0, %v2204_v3  ;;  %1947 = vmatprep.mubr.f32.mxu0 %v2167_v2  ;;  %v3411_v21 = vunpack.c.l.bf16 %v2255_v15  ;;  %vm583_vm2 = vcmask 1042434   ;;  %vm585_vm3 = vcmask 1043459   ;;  %v2274_v22 = vld [vmem:[%s3399_s0 + $0x9] sm:$0x1]  ;;  %vm148_vm4 = vcmask 15360  }
   0x6   :  { %v2277_v23 = vsub.s32 0, %v2260_v19  ;;  %vm587_vm5 = vcmask 1044484   ;;  %vm589_vm6 = vcmask 1045509   ;;  %vm591_vm7 = vcmask 1046534   ;;  %v2282_v24 = vld [vmem:[%s3399_s0 + $0xa] sm:$0x1]  ;;  %1984 = vmatprep.subr.msk.mxu1 %vm152_vm0, %v2204_v3 }
   0x7   :  { %vm593_vm8 = vcmask 1047559   ;;  %v2289_v25 = vld [vmem:[%s3399_s0 + $0xb] sm:$0x1]  ;;  %v2294_v26 = vld [vmem:[%s3399_s0 + $0xc] sm:$0x1]  ;;  %v3427_v27 = vunpack.c.l.bf16 %v2265_v20  ;;  %v3426_v28 = vunpack.c.l.bf16 %v2274_v22  ;;  %v3424_v29 = vunpack.c.l.bf16 %v2282_v24 }
   0x8   :  { %1948 = vmatmul.mubr.f32.gmra.mrb[2].mxu0 %v2167_v2  ;;  %v328_v30 = vrot.slane %v3438_v11, %v2277_v23  ;;  %v332_v31 = vrot.slane %v3437_v12, %v2277_v23  ;;  %v336_v32 = vrot.slane %v3433_v13, %v2277_v23  ;;  %v340_v33 = vrot.slane %v3430_v14, %v2277_v23  ;;  %v2315_v34 = vld [vmem:[%s3399_s0 + $0xd] sm:$0x1]  ;;  %v2320_v35 = vld [vmem:[%s3399_s0 + $0xe] sm:$0x1]  ;;  %v2325_v36 = vld [vmem:[%s3399_s0 + $0xf] sm:$0x1] }
   0x9   :  { %1950 = vmatprep.mubr.f32.mxu0 %v2167_v2  ;;  %v344_v37 = vrot.slane %v3429_v16, %v2277_v23  ;;  %v348_v38 = vrot.slane %v3425_v17, %v2277_v23  ;;  %v352_v39 = vrot.slane %v3414_v18, %v2277_v23  ;;  %v356_v40 = vrot.slane %v3411_v21, %v2277_v23  ;;  %v2353_v49 = vld [vmem:[%s3399_s0 + $0x10] sm:$0x1]  ;;  %v2369_v54 = vld [vmem:[%s3399_s0 + $0x11] sm:$0x1]  ;;  %v2374_v55 = vld [vmem:[%s3399_s0 + $0x12] sm:$0x1] }
   0xa   :  { %v582_v41 = vsel %vm581_vm1, %v332_v31, %v328_v30  ;;  %v3413_v42 = vunpack.c.l.bf16 %v2289_v25  ;;  %v3408_v43 = vunpack.c.l.bf16 %v2294_v26  ;;  %v3407_v44 = vunpack.c.l.bf16 %v2315_v34  ;;  %v2390_v60 = vld [vmem:[%s3399_s0 + $0x13] sm:$0x1]  ;;  %v2395_v61 = vld [vmem:[%s3399_s0 + $0x14] sm:$0x1]  ;;  %v2405_v1 = vld [vmem:[%s3399_s0 + $0x15] sm:$0x1] }
   0xb   :  { %v584_v45 = vsel %vm583_vm2, %v336_v32, %v582_v41  ;;  %v3406_v46 = vunpack.c.l.bf16 %v2320_v35  ;;  %v3402_v47 = vunpack.c.l.bf16 %v2325_v36  ;;  %v360_v48 = vrot.slane %v3427_v27, %v2277_v23  ;;  %v2410_v30 = vld [vmem:[%s3399_s0 + $0x16] sm:$0x1]  ;;  %v2415_v31 = vld [vmem:[%s3399_s0 + $0x17] sm:$0x1]  ;;  %v2621_v13 = vld [vmem:[%s3399_s0 + $0x2a] sm:$0x1] }
   0xc   :  { %1951 = vmatmul.mubr.f32.gmra.mrb[4].mxu0 %v2167_v2  ;;  %v586_v50 = vsel %vm585_vm3, %v340_v33, %v584_v45  ;;  %v364_v51 = vrot.slane %v3426_v28, %v2277_v23  ;;  %v368_v52 = vrot.slane %v3424_v29, %v2277_v23  ;;  %v372_v53 = vrot.slane %v3413_v42, %v2277_v23  ;;  %v2578_v29 = vld [vmem:[%s3399_s0 + $0x27] sm:$0x1]  ;;  %v2646_v11 = vld [vmem:[%s3399_s0 + $0x2d] sm:$0x1] }
   0xd   :  { %1953 = vmatprep.mubr.f32.mxu0 %v2167_v2  ;;  %v588_v56 = vsel %vm587_vm5, %v344_v37, %v586_v50  ;;  %v376_v57 = vrot.slane %v3408_v43, %v2277_v23  ;;  %v380_v58 = vrot.slane %v3407_v44, %v2277_v23  ;;  %v384_v59 = vrot.slane %v3406_v46, %v2277_v23  ;;  %v2493_v44 = vld [vmem:[%s3399_s0 + $0x1e] sm:$0x1]  ;;  %v2498_v43 = vld [vmem:[%s3399_s0 + $0x1f] sm:$0x1] }
   0xe   :  { %v590_v62 = vsel %vm589_vm6, %v348_v38, %v588_v56  ;;  %v388_v63 = vrot.slane %v3402_v47, %v2277_v23  ;;  %v595_v0 = vsel %vm581_vm1, %v364_v51, %v360_v48  ;;  %3493 = vst [vmem:[#allocation2_spill] sm:$0xff] %v2410_v30  ;;  %3494 = vst [vmem:[#allocation3_spill] sm:$0xff] %v2415_v31  ;;  %v3420_v32 = vunpack.c.l.bf16 %v2353_v49  ;;  %v2470_v47 = vld [vmem:[%s3399_s0 + $0x1b] sm:$0x1] }
   0xf   :  { %v592_v33 = vsel %vm591_vm7, %v352_v39, %v590_v62  ;;  %v596_v37 = vsel %vm583_vm2, %v368_v52, %v595_v0  ;;  %v3419_v38 = vunpack.c.l.bf16 %v2369_v54  ;;  %v3412_v41 = vunpack.c.l.bf16 %v2374_v55  ;;  %v2445_v0 = vld [vmem:[%s3399_s0 + $0x18] sm:$0x1]  ;;  %3497 = vst [vmem:[#allocation6_spill] sm:$0xff] %v2493_v44  ;;  %3498 = vst [vmem:[#allocation7_spill] sm:$0xff] %v2498_v43 }
  0x10   :  { %1954 = vmatmul.mubr.f32.gmra.mrb[6].mxu0 %v2167_v2  ;;  %v594_v45 = vsel %vm593_vm8, %v356_v40, %v592_v33  ;;  %v597_v48 = vsel %vm585_vm3, %v372_v53, %v596_v37  ;;  %v3405_v50 = vunpack.c.l.bf16 %v2390_v60  ;;  %v3403_v51 = vunpack.c.l.bf16 %v2395_v61  ;;  %v2455_v33 = vld [vmem:[%s3399_s0 + $0x1a] sm:$0x1]  ;;  %3502 = vst [vmem:[#allocation11_spill] sm:$0xff] %v2578_v29  ;;  %3505 = vst [vmem:[#allocation14_spill] sm:$0xff] %v2646_v11 }
  0x11   :  { %1958 = vmatprep.mubr.msk.f32.mxu0 %vm148_vm4, %v594_v45  ;;  %v598_v39 = vsel %vm587_vm5, %v376_v57, %v597_v48  ;;  %v3404_v52 = vunpack.c.l.bf16 %v2405_v1  ;;  %v3410_v56 = vunpack.c.l.bf16 %v2410_v30  ;;  %v3409_v62 = vunpack.c.l.bf16 %v2415_v31  ;;  %v2732_v31 = vld [vmem:[%s3399_s0 + $0x36] sm:$0x1] }
  0x12   :  { %v599_v2 = vsel %vm589_vm6, %v380_v58, %v598_v39  ;;  %v392_v40 = vrot.slane %v3420_v32, %v2277_v23  ;;  %v396_v53 = vrot.slane %v3419_v38, %v2277_v23  ;;  %v400_v57 = vrot.slane %v3412_v41, %v2277_v23  ;;  %v2450_v58 = vld [vmem:[%s3399_s0 + $0x19] sm:$0x1]  ;;  %v2558_v32 = vld [vmem:[%s3399_s0 + $0x24] sm:$0x1]  ;;  %3511 = vst [vmem:[#allocation20_spill] sm:$0xff] %v2732_v31 }
  0x13   :  { %v600_v37 = vsel %vm591_vm7, %v384_v59, %v599_v2  ;;  %v404_v45 = vrot.slane %v3405_v50, %v2277_v23  ;;  %v408_v48 = vrot.slane %v3403_v51, %v2277_v23  ;;  %v412_v39 = vrot.slane %v3404_v52, %v2277_v23  ;;  %v2475_v59 = vld [vmem:[%s3399_s0 + $0x1c] sm:$0x1]  ;;  %v2480_v2 = vld [vmem:[%s3399_s0 + $0x1d] sm:$0x1]  ;;  %3499 = vst [vmem:[#allocation8_spill] sm:$0xff] %v2558_v32 }
  0x14   :  { %3495 = vst [vmem:[#allocation4_spill] sm:$0xff] %v2475_v59  ;;  %3496 = vst [vmem:[#allocation5_spill] sm:$0xff] %v2480_v2  ;;  %v601_v51 = vsel %vm593_vm8, %v388_v63, %v600_v37  ;;  %v416_v52 = vrot.slane %v3410_v56, %v2277_v23  ;;  %v420_v50 = vrot.slane %v3409_v62, %v2277_v23  ;;  %v3415_v37 = vunpack.c.l.bf16 %v2445_v0 }
  0x15   :  { %v602_v46 = vsel %vm581_vm1, %v396_v53, %v392_v40  ;;  %1959 = vmatmul.mubr.msk.f32.vlgmr.msra.gmra.mrb[0].mxu0 %vm148_vm4, %v601_v51  ;;  %v3418_v62 = vunpack.c.l.bf16 %v2450_v58  ;;  %v3416_v40 = vunpack.c.l.bf16 %v2455_v33  ;;  %v3417_v56 = vunpack.c.l.bf16 %v2470_v47 }
  0x16   :  { %v603_v63 = vsel %vm583_vm2, %v400_v57, %v602_v46  ;;  %v3423_v21 = vunpack.c.l.bf16 %v2475_v59  ;;  %v3421_v41 = vunpack.c.l.bf16 %v2480_v2  ;;  %v3422_v51 = vunpack.c.l.bf16 %v2493_v44  ;;  %v2818_v59 = vld [vmem:[%s3399_s0 + $0x3f] sm:$0x1] }
  0x17   :  { %v604_v53 = vsel %vm585_vm3, %v404_v45, %v603_v63  ;;  %v3428_v46 = vunpack.c.l.bf16 %v2498_v43  ;;  %v424_v57 = vrot.slane %v3415_v37, %v2277_v23  ;;  %v2518_v45 = vld [vmem:[%s3399_s0 + $0x20] sm:$0x1]  ;;  %v428_v18 = vrot.slane %v3418_v62, %v2277_v23  ;;  %v2533_v37 = vld [vmem:[%s3399_s0 + $0x21] sm:$0x1]  ;;  %3516 = vst [vmem:[#allocation24_spill] sm:$0xff] %v2818_v59 }
  0x18   :  { %v605_v42 = vsel %vm587_vm5, %v408_v48, %v604_v53  ;;  %v432_v48 = vrot.slane %v3416_v40, %v2277_v23  ;;  %v436_v53 = vrot.slane %v3417_v56, %v2277_v23  ;;  %v440_v56 = vrot.slane %v3423_v21, %v2277_v23 }
  0x19   :  { %v606_v63 = vsel %vm589_vm6, %v412_v39, %v605_v42  ;;  %v2538_v42 = vld [vmem:[%s3399_s0 + $0x22] sm:$0x1]  ;;  %v2543_v39 = vld [vmem:[%s3399_s0 + $0x23] sm:$0x1]  ;;  %v444_v62 = vrot.slane %v3421_v41, %v2277_v23  ;;  %v448_v38 = vrot.slane %v3422_v51, %v2277_v23  ;;  %v452_v51 = vrot.slane %v3428_v46, %v2277_v23 }
  0x1a   :  { %v607_v40 = vsel %vm591_vm7, %v416_v52, %v606_v63  ;;  %v2563_v52 = vld [vmem:[%s3399_s0 + $0x25] sm:$0x1]  ;;  %v2568_v63 = vld [vmem:[%s3399_s0 + $0x26] sm:$0x1]  ;;  %v609_v21 = vsel %vm581_vm1, %v428_v18, %v424_v57  ;;  %v3432_v17 = vunpack.c.l.bf16 %v2518_v45  ;;  %v3431_v27 = vunpack.c.l.bf16 %v2533_v37 }
  0x1b   :  { %3500 = vst [vmem:[#allocation9_spill] sm:$0xff] %v2563_v52  ;;  %3501 = vst [vmem:[#allocation10_spill] sm:$0xff] %v2568_v63  ;;  %v608_v41 = vsel %vm593_vm8, %v420_v50, %v607_v40  ;;  %v610_v28 = vsel %vm583_vm2, %v432_v48, %v609_v21  ;;  %v3436_v50 = vunpack.c.l.bf16 %v2538_v42  ;;  %v3434_v40 = vunpack.c.l.bf16 %v2543_v39 }
  0x1c   :  { %1961 = vmatprep.mubr.msk.f32.mxu0 %vm148_vm4, %v608_v41  ;;  %v611_v46 = vsel %vm585_vm3, %v436_v53, %v610_v28  ;;  %v3435_v18 = vunpack.c.l.bf16 %v2558_v32  ;;  %v3440_v57 = vunpack.c.l.bf16 %v2563_v52  ;;  %v3439_v16 = vunpack.c.l.bf16 %v2568_v63  ;;  %v2601_v28 = vld [vmem:[%s3399_s0 + $0x28] sm:$0x1]  ;;  %v2606_v53 = vld [vmem:[%s3399_s0 + $0x29] sm:$0x1] }
  0x1d   :  { %v612_v14 = vsel %vm587_vm5, %v440_v56, %v611_v46  ;;  %v3441_v41 = vunpack.c.l.bf16 %v2578_v29  ;;  %v456_v21 = vrot.slane %v3432_v17, %v2277_v23  ;;  %v460_v48 = vrot.slane %v3431_v27, %v2277_v23 }
  0x1e   :  { %v613_v56 = vsel %vm589_vm6, %v444_v62, %v612_v14  ;;  %v464_v46 = vrot.slane %v3436_v50, %v2277_v23  ;;  %v468_v27 = vrot.slane %v3434_v40, %v2277_v23  ;;  %v472_v17 = vrot.slane %v3435_v18, %v2277_v23  ;;  %v2626_v14 = vld [vmem:[%s3399_s0 + $0x2b] sm:$0x1]  ;;  %v2631_v62 = vld [vmem:[%s3399_s0 + $0x2c] sm:$0x1] }
  0x1f   :  { %3503 = vst [vmem:[#allocation12_spill] sm:$0xff] %v2626_v14  ;;  %3504 = vst [vmem:[#allocation13_spill] sm:$0xff] %v2631_v62  ;;  %v614_v40 = vsel %vm591_vm7, %v448_v38, %v613_v56  ;;  %v476_v18 = vrot.slane %v3440_v57, %v2277_v23  ;;  %v480_v50 = vrot.slane %v3439_v16, %v2277_v23  ;;  %v2651_v38 = vld [vmem:[%s3399_s0 + $0x2e] sm:$0x1]  ;;  %v2656_v56 = vld [vmem:[%s3399_s0 + $0x2f] sm:$0x1]  ;;  %v3449_v29 = vunpack.c.l.bf16 %v2606_v53 }
  0x20   :  { %v484_v12 = vrot.slane %v3441_v41, %v2277_v23  ;;  %3506 = vst [vmem:[#allocation15_spill] sm:$0xff] %v2651_v38  ;;  %3507 = vst [vmem:[#allocation16_spill] sm:$0xff] %v2656_v56  ;;  %v615_v16 = vsel %vm593_vm8, %v452_v51, %v614_v40  ;;  %v616_v57 = vsel %vm581_vm1, %v460_v48, %v456_v21  ;;  %v3450_v41 = vunpack.c.l.bf16 %v2601_v28 }
  0x21   :  { %1962 = vmatmul.mubr.msk.f32.gmra.mrb[2].mxu0 %vm148_vm4, %v615_v16  ;;  %v617_v43 = vsel %vm583_vm2, %v464_v46, %v616_v57  ;;  %v3448_v63 = vunpack.c.l.bf16 %v2621_v13  ;;  %v3453_v44 = vunpack.c.l.bf16 %v2626_v14  ;;  %v3451_v52 = vunpack.c.l.bf16 %v2631_v62  ;;  %v2727_v62 = vld [vmem:[%s3399_s0 + $0x35] sm:$0x1] }
  0x22   :  { %v618_v2 = vsel %vm585_vm3, %v468_v27, %v617_v43  ;;  %v3452_v51 = vunpack.c.l.bf16 %v2646_v11  ;;  %v3458_v40 = vunpack.c.l.bf16 %v2651_v38  ;;  %v3457_v21 = vunpack.c.l.bf16 %v2656_v56  ;;  %v2684_v43 = vld [vmem:[%s3399_s0 + $0x30] sm:$0x1]  ;;  %3510 = vst [vmem:[#allocation19_spill] sm:$0xff] %v2727_v62 }
  0x23   :  { %v619_v48 = vsel %vm587_vm5, %v472_v17, %v618_v2  ;;  %v488_v16 = vrot.slane %v3450_v41, %v2277_v23  ;;  %v492_v57 = vrot.slane %v3449_v29, %v2277_v23  ;;  %v496_v27 = vrot.slane %v3448_v63, %v2277_v23  ;;  %v2689_v17 = vld [vmem:[%s3399_s0 + $0x31] sm:$0x1]  ;;  %v2704_v41 = vld [vmem:[%s3399_s0 + $0x32] sm:$0x1] }
  0x24   :  { %v620_v2 = vsel %vm589_vm6, %v476_v18, %v619_v48  ;;  %v500_v46 = vrot.slane %v3453_v44, %v2277_v23  ;;  %v504_v63 = vrot.slane %v3451_v52, %v2277_v23  ;;  %v508_v29 = vrot.slane %v3452_v51, %v2277_v23  ;;  %v2709_v18 = vld [vmem:[%s3399_s0 + $0x33] sm:$0x1]  ;;  %v2714_v48 = vld [vmem:[%s3399_s0 + $0x34] sm:$0x1] }
  0x25   :  { %3508 = vst [vmem:[#allocation17_spill] sm:$0xff] %v2709_v18  ;;  %3509 = vst [vmem:[#allocation18_spill] sm:$0xff] %v2714_v48  ;;  %v621_v52 = vsel %vm591_vm7, %v480_v50, %v620_v2  ;;  %v512_v51 = vrot.slane %v3458_v40, %v2277_v23  ;;  %v516_v44 = vrot.slane %v3457_v21, %v2277_v23  ;;  %v2737_v50 = vld [vmem:[%s3399_s0 + $0x37] sm:$0x1]  ;;  %v3463_v56 = vunpack.c.l.bf16 %v2704_v41 }
  0x26   :  { %v623_v11 = vsel %vm581_vm1, %v492_v57, %v488_v16  ;;  %3512 = vst [vmem:[#allocation21_spill] sm:$0xff] %v2737_v50  ;;  %v622_v2 = vsel %vm593_vm8, %v484_v12, %v621_v52  ;;  %v3465_v16 = vunpack.c.l.bf16 %v2684_v43  ;;  %v3464_v57 = vunpack.c.l.bf16 %v2689_v17  ;;  %v2790_v52 = vld [vmem:[%s3399_s0 + $0x3b] sm:$0x1] }
  0x27   :  { %v624_v21 = vsel %vm583_vm2, %v496_v27, %v623_v11  ;;  %1964 = vmatprep.mubr.msk.f32.mxu0 %vm148_vm4, %v622_v2  ;;  %v3468_v38 = vunpack.c.l.bf16 %v2709_v18  ;;  %v3466_v14 = vunpack.c.l.bf16 %v2714_v48  ;;  %v3467_v12 = vunpack.c.l.bf16 %v2727_v62  ;;  %v2813_v18 = vld [vmem:[%s3399_s0 + $0x3e] sm:$0x1] }
  0x28   :  { %v625_v40 = vsel %vm585_vm3, %v500_v46, %v624_v21  ;;  %v3473_v11 = vunpack.c.l.bf16 %v2732_v31  ;;  %v520_v21 = vrot.slane %v3465_v16, %v2277_v23  ;;  %v524_v46 = vrot.slane %v3464_v57, %v2277_v23  ;;  %3515 = vst [vmem:[#allocation23_spill] sm:$0xff] %v2813_v18 }
  0x29   :  { %v626_v32 = vsel %vm587_vm5, %v504_v63, %v625_v40  ;;  %v528_v63 = vrot.slane %v3463_v56, %v2277_v23  ;;  %v2765_v40 = vld [vmem:[%s3399_s0 + $0x38] sm:$0x1]  ;;  %v532_v56 = vrot.slane %v3468_v38, %v2277_v23  ;;  %v536_v57 = vrot.slane %v3466_v14, %v2277_v23 }
  0x2a   :  { %v627_v27 = vsel %vm589_vm6, %v508_v29, %v626_v32  ;;  %v2770_v29 = vld [vmem:[%s3399_s0 + $0x39] sm:$0x1]  ;;  %v2775_v32 = vld [vmem:[%s3399_s0 + $0x3a] sm:$0x1]  ;;  %v540_v16 = vrot.slane %v3467_v12, %v2277_v23  ;;  %v544_v12 = vrot.slane %v3473_v11, %v2277_v23  ;;  %v3514_v38 = vunpack.c.l.bf16 %v2737_v50 }
  0x2b   :  { %v628_v2 = vsel %vm591_vm7, %v512_v51, %v627_v27  ;;  %v2795_v51 = vld [vmem:[%s3399_s0 + $0x3c] sm:$0x1]  ;;  %v2800_v27 = vld [vmem:[%s3399_s0 + $0x3d] sm:$0x1]  ;;  %v630_v48 = vsel %vm581_vm1, %v524_v46, %v520_v21  ;;  %v3481_v11 = vunpack.c.l.bf16 %v2790_v52  ;;  %vm1832_vm9 = vcmask 27648  }
  0x2c   :  { %3513 = vst [vmem:[#allocation22_spill] sm:$0xff] %v2800_v27  ;;  %v629_v14 = vsel %vm593_vm8, %v516_v44, %v628_v2  ;;  %v548_v62 = vrot.slane %v3514_v38, %v2277_v23  ;;  %v631_v44 = vsel %vm583_vm2, %v528_v63, %v630_v48  ;;  %v3477_v2 = vunpack.c.l.bf16 %v2765_v40 }
  0x2d   :  { %1965 = vmatmul.mubr.msk.f32.gmra.mrb[4].mxu0 %vm148_vm4, %v629_v14  ;;  %v3478_v38 = vunpack.c.l.bf16 %v2770_v29  ;;  %v632_v46 = vsel %vm585_vm3, %v532_v56, %v631_v44  ;;  %v3479_v50 = vunpack.c.l.bf16 %v2795_v51  ;;  %v3480_v14 = vunpack.c.l.bf16 %v2813_v18 }
  0x2e   :  { %v633_v30 = vsel %vm587_vm5, %v536_v57, %v632_v46  ;;  %v552_v63 = vrot.slane %v3477_v2, %v2277_v23  ;;  %v3517_v44 = vunpack.c.l.bf16 %v2775_v32  ;;  %v564_v57 = vrot.slane %v3481_v11, %v2277_v23 }
  0x2f   :  { %v634_v21 = vsel %vm589_vm6, %v540_v16, %v633_v30  ;;  %v556_v56 = vrot.slane %v3478_v38, %v2277_v23  ;;  %v568_v2 = vrot.slane %v3479_v50, %v2277_v23  ;;  %v3518_v16 = vunpack.c.l.bf16 %v2800_v27 }
  0x30   :  { %v560_v31 = vrot.slane %v3517_v44, %v2277_v23  ;;  %v635_v46 = vsel %vm591_vm7, %v544_v12, %v634_v21  ;;  %v576_v44 = vrot.slane %v3480_v14, %v2277_v23  ;;  %v3519_v21 = vunpack.c.l.bf16 %v2818_v59 }
  0x31   :  { %v636_v30 = vsel %vm593_vm8, %v548_v62, %v635_v46  ;;  %v572_v38 = vrot.slane %v3518_v16, %v2277_v23  ;;  %v637_v48 = vsel %vm581_vm1, %v556_v56, %v552_v63 }
  0x32   :  { %1967 = vmatprep.mubr.msk.f32.mxu0 %vm148_vm4, %v636_v30  ;;  %v638_v12 = vsel %vm583_vm2, %v560_v31, %v637_v48  ;;  %v580_v50 = vrot.slane %v3519_v21, %v2277_v23  ;;  %v2871_v31 = vld [vmem:[%s3400_s3] ss:$0 sm:$0xff]  ;;  %s2169_s3 = smov 2  }
  0x33   :  { %v639_v62 = vsel %vm585_vm3, %v564_v57, %v638_v12  ;;  %3520 = vst [vmem:[#allocation25_spill] sm:$0xff] %v2871_v31 }
  0x34   :  { %v640_v46 = vsel %vm587_vm5, %v568_v2, %v639_v62 }
  0x35   :  { %v641_v16 = vsel %vm589_vm6, %v572_v38, %v640_v46 }
  0x36   :  { %v642_v63 = vsel %vm591_vm7, %v576_v44, %v641_v16 }
  0x37   :  { %v643_v56 = vsel %vm593_vm8, %v580_v50, %v642_v63 }
  0x38   :  { %1968 = vmatmul.mubr.msk.f32.gmra.mrb[6].mxu0 %vm148_vm4, %v643_v56 }
  0xe8   :  { %v1960_v48 = vpop.f32.mrb[0].mxu0 }
  0xe9   :  { %v729_v30 = vpop.f32.mrb[1].mxu0  ;;  %v775_v57 = vadd.f32 %v1960_v48, %v2871_v31 }
  0xea   :  { %v774_v23 = vadd.f32 %v2871_v31, %v729_v30 }
  0xec   :  { %2039 = vtanh.f32 %v774_v23 }
  0xed   :  { %2041 = vtanh.f32 %v775_v57 }
  0xf4   :  { %v1963_v2 = vpop.f32.mrb[2].mxu0 }
  0xf5   :  { %v739_v38 = vpop.f32.mrb[3].mxu0  ;;  %v777_v12 = vadd.f32 %v1963_v2, %v2871_v31 }
  0xf6   :  { %v2040_v44 = vpop.eup %2039  ;;  %v776_v50 = vadd.f32 %v2871_v31, %v739_v38 }
  0xf7   :  { %854 = vrot.lane.b32.xlu0 %v2040_v44, %s2168_s8  ;;  %v2042_v21 = vpop.eup %2041  ;;  %v1859_v59 = vmul.f32 -1.442695, %v777_v12 }
  0xf8   :  { %2043 = vtanh.f32 %v776_v50 }
  0xf9   :  { %2045 = vtanh.f32 %v777_v12 }
  0xfb   :  { %856 = vrot.lane.b32.xlu0 %v2042_v21, %s2168_s8 }
 0x100   :  { %v1966_v62 = vpop.f32.mrb[4].mxu0 }
 0x101   :  { %v779_v46 = vadd.f32 %v1966_v62, %v2871_v31  ;;  %v749_v16 = vpop.f32.mrb[5].mxu0 }
 0x102   :  { %v778_v63 = vadd.f32 %v2871_v31, %v749_v16  ;;  %v2044_v56 = vpop.eup %2043 }
 0x103   :  { %2047 = vtanh.f32 %v779_v46  ;;  %858 = vrot.lane.b32.xlu1 %v2044_v56, %s2168_s8  ;;  %v2046_v48 = vpop.eup %2045  ;;  %v1856_v56 = vmul.f32 -1.442695, %v774_v23 }
 0x104   :  { %2049 = vtanh.f32 %v778_v63  ;;  %v1860_v18 = vmul.f32 -1.442695, %v778_v63 }
 0x107   :  { %860 = vrot.lane.b32.xlu1 %v2046_v48, %s2168_s8  ;;  %v1857_v48 = vmul.f32 -1.442695, %v775_v57 }
 0x10b   :  { %v1969_v30 = vpop.f32.mrb[6].mxu0 }
 0x10c   :  { %v781_v38 = vadd.f32 %v1969_v30, %v2871_v31  ;;  %v759_v44 = vpop.f32.mrb[7].mxu0  ;;  %v1858_v30 = vmul.f32 -1.442695, %v776_v50 }
 0x10d   :  { %v2048_v2 = vpop.eup %2047  ;;  %v780_v14 = vadd.f32 %v2871_v31, %v759_v44 }
 0x10e   :  { %v2050_v21 = vpop.eup %2049  ;;  %864 = vrot.lane.b32.xlu1 %v2048_v2, %s2168_s8  ;;  %2051 = vtanh.f32 %v781_v38 }
 0x10f   :  { %862 = vrot.lane.b32.xlu0 %v2050_v21, %s2168_s8  ;;  %2053 = vtanh.f32 %v780_v14  ;;  %v1861_v21 = vmul.f32 -1.442695, %v779_v46  ;;  %v1862_v46 = vmul.f32 -1.442695, %v780_v14 }
 0x110   :  { %2055 = vpow2.f32 %v1856_v56 }
 0x111   :  { %2057 = vpow2.f32 %v1857_v48 }
 0x112   :  { %2059 = vpow2.f32 %v1858_v30 }
 0x113   :  { %2061 = vpow2.f32 %v1859_v59 }
 0x118   :  { %v2052_v62 = vpop.eup %2051 }
 0x119   :  { %v2054_v16 = vpop.eup %2053  ;;  %868 = vrot.lane.b32.xlu1 %v2052_v62, %s2168_s8 }
 0x11a   :  { %866 = vrot.lane.b32.xlu0 %v2054_v16, %s2168_s8  ;;  %v2056_v11 = vpop.eup %2055 }
 0x11b   :  { %v806_v44 = vadd.f32 1.0, %v2056_v11  ;;  %v2058_v2 = vpop.eup %2057  ;;  %v1863_v11 = vmul.f32 -1.442695, %v781_v38 }
 0x11c   :  { %v807_v31 = vadd.f32 1.0, %v2058_v2  ;;  %v2060_v27 = vpop.eup %2059 }
 0x11d   :  { %2063 = vrcp.f32 %v806_v44  ;;  %v808_v62 = vadd.f32 1.0, %v2060_v27  ;;  %v2062_v23 = vpop.eup %2061 }
 0x11e   :  { %2065 = vrcp.f32 %v807_v31  ;;  %v809_v12 = vadd.f32 1.0, %v2062_v23 }
 0x11f   :  { %2067 = vpow2.f32 %v1861_v21 }
 0x120   :  { %2069 = vpow2.f32 %v1860_v18 }
 0x121   :  { %2071 = vrcp.f32 %v808_v62 }
 0x122   :  { %2073 = vrcp.f32 %v809_v12 }
 0x123   :  { %2075 = vpow2.f32 %v1863_v11 }
 0x124   :  { %2077 = vpow2.f32 %v1862_v46 }
 0x127   :  { %v2889_v57 = vpop.eup %2063 }
 0x128   :  { %v2893_v59 = vpop.eup %2065 }
 0x129   :  { %v2068_v63 = vpop.eup %2067 }
 0x12a   :  { %v2070_v27 = vpop.eup %2069  ;;  %v811_v56 = vadd.f32 1.0, %v2068_v63 }
 0x12b   :  { %v810_v48 = vadd.f32 1.0, %v2070_v27  ;;  %v2897_v30 = vpop.eup %2071 }
 0x12c   :  { %2079 = vrcp.f32 %v811_v56  ;;  %v2901_v14 = vpop.eup %2073 }
 0x12d   :  { %2081 = vrcp.f32 %v810_v48  ;;  %v2076_v21 = vpop.eup %2075 }
 0x12e   :  { %v2078_v23 = vpop.eup %2077 }
 0x136   :  { %v2905_v12 = vpop.eup %2079 }
 0x137   :  { %v2907_v46 = vpop.eup %2081 }
 0x169   :  { %v855_v16 = vpop.permute.xlu0 %854 }
 0x16a   :  { %v878_v50 = vmul.f32 %v2889_v57, %v855_v16  ;;  %v813_v16 = vadd.f32 1.0, %v2076_v21  ;;  %v838_v21 = vmul.f32 0.0, %v2889_v57 }
 0x16c   :  { %894 = vrot.lane.b32.xlu0 %v878_v50, %s2169_s3  ;;  %v812_v50 = vadd.f32 1.0, %v2078_v23  ;;  %2083 = vrcp.f32 %v813_v16  ;;  %v839_v16 = vmul.f32 0.0, %v2893_v59 }
 0x16d   :  { %v857_v31 = vpop.permute.xlu0 %856 }
 0x16e   :  { %v879_v18 = vmul.f32 %v2893_v59, %v857_v31  ;;  %2085 = vrcp.f32 %v812_v50 }
 0x170   :  { %896 = vrot.lane.b32.xlu1 %v879_v18, %s2169_s3 }
 0x175   :  { %v859_v38 = vpop.permute.xlu1 %858 }
 0x176   :  { %v880_v44 = vmul.f32 %v2897_v30, %v859_v38  ;;  %v2913_v27 = vpop.eup %2083 }
 0x178   :  { %898 = vrot.lane.b32.xlu0 %v880_v44, %s2169_s3  ;;  %v2915_v48 = vpop.eup %2085 }
 0x179   :  { %v861_v2 = vpop.permute.xlu1 %860 }
 0x17a   :  { %v881_v62 = vmul.f32 %v2901_v14, %v861_v2 }
 0x17c   :  { %900 = vrot.lane.b32.xlu1 %v881_v62, %s2169_s3 }
 0x180   :  { %v865_v11 = vpop.permute.xlu1 %864 }
 0x181   :  { %v863_v31 = vpop.permute.xlu0 %862  ;;  %v883_v63 = vmul.f32 %v2905_v12, %v865_v11 }
 0x182   :  { %v882_v18 = vmul.f32 %v2907_v46, %v863_v31  ;;  %v840_v31 = vmul.f32 0.0, %v2897_v30 }
 0x183   :  { %904 = vrot.lane.b32.xlu1 %v883_v63, %s2169_s3 }
 0x184   :  { %902 = vrot.lane.b32.xlu0 %v882_v18, %s2169_s3 }
 0x18b   :  { %v869_v56 = vpop.permute.xlu1 %868 }
 0x18c   :  { %v867_v38 = vpop.permute.xlu0 %866  ;;  %v885_v44 = vmul.f32 %v2913_v27, %v869_v56 }
 0x18d   :  { %v884_v2 = vmul.f32 %v2915_v48, %v867_v38  ;;  %v841_v38 = vmul.f32 0.0, %v2901_v14 }
 0x18e   :  { %908 = vrot.lane.b32.xlu1 %v885_v44, %s2169_s3 }
 0x18f   :  { %906 = vrot.lane.b32.xlu0 %v884_v2, %s2169_s3 }
 0x1de   :  { %v895_v62 = vpop.permute.xlu0 %894 }
 0x1df   :  { %v2922_v23 = vadd.f32 %v895_v62, %v838_v21  ;;  %v843_v62 = vmul.f32 0.0, %v2905_v12 }
 0x1e1   :  { %3521 = vst [vmem:[#allocation26_spill] sm:$0xff] %v2922_v23  ;;  %2087 = vtanh.f32 %v2922_v23 }
 0x1e2   :  { %v897_v50 = vpop.permute.xlu1 %896 }
 0x1e3   :  { %v2926_v11 = vadd.f32 %v897_v50, %v839_v16  ;;  %v842_v16 = vmul.f32 0.0, %v2907_v46 }
 0x1e5   :  { %2089 = vtanh.f32 %v2926_v11 }
 0x1ea   :  { %v899_v63 = vpop.permute.xlu0 %898 }
 0x1eb   :  { %v2088_v18 = vpop.eup %2087  ;;  %v2930_v56 = vadd.f32 %v899_v63, %v840_v31 }
 0x1ec   :  { %942 = vrot.lane.b32.xlu0 %v2088_v18, %s2170_s9 }
 0x1ed   :  { %3522 = vst [vmem:[#allocation27_spill] sm:$0xff] %v2930_v56  ;;  %2091 = vtanh.f32 %v2930_v56 }
 0x1ee   :  { %v901_v44 = vpop.permute.xlu1 %900 }
 0x1ef   :  { %v2090_v2 = vpop.eup %2089  ;;  %v2935_v21 = vadd.f32 %v901_v44, %v841_v38  ;;  %v845_v44 = vmul.f32 0.0, %v2913_v27 }
 0x1f0   :  { %944 = vrot.lane.b32.xlu1 %v2090_v2, %s2170_s9  ;;  %v844_v2 = vmul.f32 0.0, %v2915_v48 }
 0x1f1   :  { %3523 = vst [vmem:[#allocation28_spill] sm:$0xff] %v2935_v21  ;;  %2093 = vtanh.f32 %v2935_v21 }
 0x1f5   :  { %v905_v50 = vpop.permute.xlu1 %904 }
 0x1f6   :  { %v903_v31 = vpop.permute.xlu0 %902  ;;  %v2941_v63 = vadd.f32 %v905_v50, %v843_v62 }
 0x1f7   :  { %v2943_v18 = vadd.f32 %v903_v31, %v842_v16  ;;  %v2092_v56 = vpop.eup %2091 }
 0x1f8   :  { %2095 = vtanh.f32 %v2941_v63  ;;  %946 = vrot.lane.b32.xlu0 %v2092_v56, %s2170_s9 }
 0x1f9   :  { %3524 = vst [vmem:[#allocation29_spill] sm:$0xff] %v2943_v18  ;;  %2097 = vtanh.f32 %v2943_v18 }
 0x1fb   :  { %v2094_v38 = vpop.eup %2093 }
 0x1fc   :  { %948 = vrot.lane.b32.xlu1 %v2094_v38, %s2170_s9 }
 0x200   :  { %v909_v21 = vpop.permute.xlu1 %908 }
 0x201   :  { %v907_v62 = vpop.permute.xlu0 %906  ;;  %v2951_v50 = vadd.f32 %v909_v21, %v845_v44 }
 0x202   :  { %v2096_v23 = vpop.eup %2095  ;;  %v2953_v31 = vadd.f32 %v907_v62, %v844_v2 }
 0x203   :  { %3525 = vst [vmem:[#allocation30_spill] sm:$0xff] %v2951_v50  ;;  %v2098_v16 = vpop.eup %2097  ;;  %952 = vrot.lane.b32.xlu1 %v2096_v23, %s2170_s9  ;;  %2099 = vtanh.f32 %v2951_v50 }
 0x204   :  { %3526 = vst [vmem:[#allocation31_spill] sm:$0xff] %v2953_v31  ;;  %950 = vrot.lane.b32.xlu0 %v2098_v16, %s2170_s9  ;;  %2101 = vtanh.f32 %v2953_v31 }
 0x20d   :  { %v2100_v56 = vpop.eup %2099 }
 0x20e   :  { %v2102_v38 = vpop.eup %2101  ;;  %956 = vrot.lane.b32.xlu1 %v2100_v56, %s2170_s9 }
 0x20f   :  { %954 = vrot.lane.b32.xlu0 %v2102_v38, %s2170_s9 }
 0x25e   :  { %v943_v18 = vpop.permute.xlu0 %942 }
 0x25f   :  { %v966_v21 = vmul.f32 %v2889_v57, %v943_v18 }
 0x261   :  { %982 = vrot.lane.b32.xlu0 %v966_v21, %s2171_s10 }
 0x262   :  { %v945_v44 = vpop.permute.xlu1 %944 }
 0x263   :  { %v967_v23 = vmul.f32 %v2893_v59, %v945_v44 }
 0x265   :  { %984 = vrot.lane.b32.xlu1 %v967_v23, %s2171_s10 }
 0x26a   :  { %v947_v2 = vpop.permute.xlu0 %946 }
 0x26b   :  { %v968_v62 = vmul.f32 %v2897_v30, %v947_v2  ;;  %v2970_v30 = vsub.s32 1, %v2260_v19  ;;  %v3529_v19 = vunpack.c.l.bf16 %v2220_v6  ;;  %v3533_v6 = vunpack.c.l.bf16 %v2274_v22 }
 0x26c   :  { %v3537_v22 = vunpack.c.l.bf16 %v2369_v54 }
 0x26d   :  { %986 = vrot.lane.b32.xlu0 %v968_v62, %s2171_s10 }
 0x26e   :  { %v949_v16 = vpop.permute.xlu1 %948 }
 0x26f   :  { %v969_v31 = vmul.f32 %v2901_v14, %v949_v16  ;;  %v3531_v16 = vunpack.c.l.bf16 %v2232_v8  ;;  %v3535_v8 = vunpack.c.l.bf16 %v2282_v24 }
 0x271   :  { %988 = vrot.lane.b32.xlu1 %v969_v31, %s2171_s10 }
 0x275   :  { %v953_v56 = vpop.permute.xlu1 %952 }
 0x276   :  { %v951_v50 = vpop.permute.xlu0 %950  ;;  %v971_v38 = vmul.f32 %v2905_v12, %v953_v56  ;;  %v3527_v12 = vunpack.c.l.bf16 %v2209_v4  ;;  %v3530_v4 = vunpack.c.l.bf16 %v2225_v7  ;;  %v1138_v56 = vrot.slane %v3531_v16, %v2970_v30 }
 0x277   :  { %v970_v57 = vmul.f32 %v2907_v46, %v951_v50  ;;  %v3528_v50 = vunpack.c.l.bf16 %v2215_v5 }
 0x278   :  { %992 = vrot.lane.b32.xlu1 %v971_v38, %s2171_s10  ;;  %v1122_v46 = vrot.slane %v3527_v12, %v2970_v30  ;;  %v1134_v2 = vrot.slane %v3530_v4, %v2970_v30  ;;  %v1190_v12 = vrot.slane %v3537_v22, %v2970_v30 }
 0x279   :  { %990 = vrot.lane.b32.xlu0 %v970_v57, %s2171_s10  ;;  %v1158_v57 = vrot.slane %v3533_v6, %v2970_v30 }
 0x280   :  { %v957_v18 = vpop.permute.xlu1 %956 }
 0x281   :  { %v955_v21 = vpop.permute.xlu0 %954  ;;  %v973_v59 = vmul.f32 %v2913_v27, %v957_v18  ;;  %v1126_v27 = vrot.slane %v3528_v50, %v2970_v30  ;;  %v3534_v18 = vunpack.c.l.bf16 %v2237_v9  ;;  %v3538_v9 = vunpack.c.l.bf16 %v2242_v10 }
 0x282   :  { %v972_v44 = vmul.f32 %v2915_v48, %v955_v21  ;;  %v1130_v48 = vrot.slane %v3529_v19, %v2970_v30  ;;  %v3542_v10 = vunpack.c.l.bf16 %v2450_v58  ;;  %v3547_v58 = vunpack.c.l.bf16 %v2315_v34 }
 0x283   :  { %996 = vrot.lane.b32.xlu1 %v973_v59, %s2171_s10  ;;  %v1375_v23 = vsel %vm581_vm1, %v1126_v27, %v1122_v46  ;;  %v1142_v21 = vrot.slane %v3534_v18, %v2970_v30  ;;  %v1162_v59 = vrot.slane %v3535_v8, %v2970_v30  ;;  %v1146_v24 = vrot.slane %v3538_v9, %v2970_v30 }
 0x284   :  { %994 = vrot.lane.b32.xlu0 %v972_v44, %s2171_s10  ;;  %v1376_v5 = vsel %vm583_vm2, %v1130_v48, %v1375_v23  ;;  %v3540_v23 = vunpack.c.l.bf16 %v2374_v55  ;;  %v3545_v55 = vunpack.c.l.bf16 %v2255_v15  ;;  %v1174_v18 = vrot.slane %v3547_v58, %v2970_v30  ;;  %v3565_v58 = vld [vmem:[#allocation2_spill] sm:$0xff] }
 0x285   :  { %v1377_v7 = vsel %vm585_vm3, %v1134_v2, %v1376_v5  ;;  %v3541_v5 = vunpack.c.l.bf16 %v2445_v0  ;;  %v3546_v0 = vunpack.c.l.bf16 %v2294_v26  ;;  %v3549_v15 = vunpack.c.l.bf16 %v2325_v36 }
 0x286   :  { %v1378_v50 = vsel %vm587_vm5, %v1138_v56, %v1377_v7  ;;  %v1194_v4 = vrot.slane %v3540_v23, %v2970_v30  ;;  %v1222_v56 = vrot.slane %v3542_v10, %v2970_v30  ;;  %v3550_v26 = vunpack.c.l.bf16 %v2390_v60 }
 0x287   :  { %v1379_v54 = vsel %vm589_vm6, %v1142_v21, %v1378_v50  ;;  %v1218_v16 = vrot.slane %v3541_v5, %v2970_v30  ;;  %v1170_v7 = vrot.slane %v3546_v0, %v2970_v30  ;;  %v3552_v50 = vunpack.c.l.bf16 %v2538_v42 }
 0x288   :  { %v3553_v9 = vunpack.c.l.bf16 %v2601_v28  ;;  %v3557_v28 = vunpack.c.l.bf16 %v2689_v17 }
 0x289   :  { %v1258_v36 = vrot.slane %v3552_v50, %v2970_v30  ;;  %v1396_v60 = vsel %vm581_vm1, %v1222_v56, %v1218_v16 }
 0x2d3   :  { %v2972_v14 = vpop.permute.xlu0 %982 }
 0x2d4   :  { %1972 = vmatprep.mubr.msk.f32.mxu1 %vm148_vm4, %v2972_v14 }
 0x2d7   :  { %v2982_v31 = vpop.permute.xlu1 %984 }
 0x2d8   :  { %1973 = vmatmul.mubr.msk.f32.vlgmr.msra.gmra.mrb[0].mxu1 %vm148_vm4, %v2982_v31 }
 0x2d9   :  { %1985 = vmatpush3.msk.msra.mxu1 %vm152_vm0, %v2204_v3  ;;  %v3532_v3 = vunpack.c.l.bf16 %v2265_v20  ;;  %v3536_v20 = vunpack.c.l.bf16 %v2353_v49  ;;  %v3539_v49 = vunpack.c.l.bf16 %v2289_v25  ;;  %v3543_v25 = vunpack.c.l.bf16 %v2518_v45 }
 0x2da   :  { %v1380_v45 = vsel %vm591_vm7, %v1146_v24, %v1379_v54  ;;  %v1282_v24 = vrot.slane %v3553_v9, %v2970_v30 }
 0x2db   :  { %v1154_v38 = vrot.slane %v3532_v3, %v2970_v30  ;;  %v1186_v44 = vrot.slane %v3536_v20, %v2970_v30  ;;  %v1166_v19 = vrot.slane %v3539_v49, %v2970_v30  ;;  %v1250_v3 = vrot.slane %v3543_v25, %v2970_v30 }
 0x2dc   :  { %v1198_v20 = vrot.slane %v3550_v26, %v2970_v30  ;;  %v3554_v49 = vunpack.c.l.bf16 %v2606_v53 }
 0x2dd   :  { %v1382_v27 = vsel %vm581_vm1, %v1158_v57, %v1154_v38  ;;  %v1389_v2 = vsel %vm581_vm1, %v1190_v12, %v1186_v44  ;;  %v3544_v38 = vunpack.c.l.bf16 %v2533_v37  ;;  %v1150_v57 = vrot.slane %v3545_v55, %v2970_v30 }
 0x2de   :  { %v1383_v48 = vsel %vm583_vm2, %v1162_v59, %v1382_v27  ;;  %v3548_v37 = vunpack.c.l.bf16 %v2320_v35  ;;  %v3070_v59 = vrot.slane %v3549_v15, %v2970_v30  ;;  %v1390_v22 = vsel %vm583_vm2, %v1194_v4, %v1389_v2 }
 0x2df   :  { %v2996_v62 = vpop.permute.xlu0 %986  ;;  %v1254_v6 = vrot.slane %v3544_v38, %v2970_v30  ;;  %v1384_v34 = vsel %vm585_vm3, %v1166_v19, %v1383_v48  ;;  %v3551_v12 = vunpack.c.l.bf16 %v2455_v33  ;;  %v1286_v33 = vrot.slane %v3554_v49, %v2970_v30 }
 0x2e0   :  { %1975 = vmatprep.mubr.msk.f32.mxu1 %vm148_vm4, %v2996_v62  ;;  %v1178_v8 = vrot.slane %v3548_v37, %v2970_v30  ;;  %v1381_v42 = vsel %vm593_vm8, %v1150_v57, %v1380_v45  ;;  %v3555_v19 = vunpack.c.l.bf16 %v2395_v61  ;;  %v3556_v48 = vunpack.c.l.bf16 %v2684_v43  ;;  %v3567_v37 = vld [vmem:[#allocation4_spill] sm:$0xff] }
 0x2e1   :  { %v1226_v35 = vrot.slane %v3551_v12, %v2970_v30  ;;  %v1403_v27 = vsel %vm581_vm1, %v1254_v6, %v1250_v3  ;;  %v1318_v4 = vrot.slane %v3557_v28, %v2970_v30  ;;  %v1385_v53 = vsel %vm587_vm5, %v1170_v7, %v1384_v34  ;;  %v3569_v34 = vld [vmem:[#allocation8_spill] sm:$0xff] }
 0x2e2   :  { %v1202_v54 = vrot.slane %v3555_v19, %v2970_v30  ;;  %v1314_v23 = vrot.slane %v3556_v48, %v2970_v30  ;;  %v3558_v2 = vunpack.c.l.bf16 %v2405_v1  ;;  %v1391_v16 = vsel %vm585_vm3, %v1198_v20, %v1390_v22  ;;  %v3578_v48 = vld [vmem:[#allocation5_spill] sm:$0xff] }
 0x2e3   :  { %v3022_v46 = vpop.permute.xlu1 %988  ;;  %v3559_v61 = vunpack.c.l.bf16 %v2470_v47  ;;  %v1397_v56 = vsel %vm583_vm2, %v1226_v35, %v1396_v60  ;;  %v3560_v43 = vunpack.c.l.bf16 %v2543_v39  ;;  %v1404_v17 = vsel %vm583_vm2, %v1258_v36, %v1403_v27  ;;  %v3573_v60 = vld [vmem:[#allocation17_spill] sm:$0xff] }
 0x2e4   :  { %1976 = vmatmul.mubr.msk.f32.gmra.mrb[2].mxu1 %vm148_vm4, %v3022_v46  ;;  %v1206_v5 = vrot.slane %v3558_v2, %v2970_v30  ;;  %v3561_v3 = vunpack.c.l.bf16 %v2621_v13  ;;  %v1410_v1 = vsel %vm581_vm1, %v1286_v33, %v1282_v24  ;;  %v3562_v6 = vunpack.c.l.bf16 %v2704_v41  ;;  %v3576_v33 = vld [vmem:[#allocation3_spill] sm:$0xff] }
 0x2e5   :  { %v1230_v10 = vrot.slane %v3559_v61, %v2970_v30  ;;  %v1262_v25 = vrot.slane %v3560_v43, %v2970_v30  ;;  %v3563_v47 = vunpack.c.l.bf16 %v2765_v40  ;;  %v3564_v39 = vunpack.c.l.bf16 %v2770_v29  ;;  %v3580_v61 = vld [vmem:[#allocation9_spill] sm:$0xff] }
 0x2e6   :  { %v1290_v38 = vrot.slane %v3561_v3, %v2970_v30  ;;  %v1322_v55 = vrot.slane %v3562_v6, %v2970_v30  ;;  %v1386_v7 = vsel %vm589_vm6, %v1174_v18, %v1385_v53  ;;  %v3566_v13 = vunpack.c.l.bf16 %v3565_v58  ;;  %v3571_v18 = vld [vmem:[#allocation12_spill] sm:$0xff] }
 0x2e7   :  { %v1346_v57 = vrot.slane %v3563_v47, %v2970_v30  ;;  %v1350_v0 = vrot.slane %v3564_v39, %v2970_v30  ;;  %v3568_v15 = vunpack.c.l.bf16 %v3567_v37  ;;  %v1417_v41 = vsel %vm581_vm1, %v1318_v4, %v1314_v23 }
 0x2e8   :  { %v1210_v45 = vrot.slane %v3566_v13, %v2970_v30  ;;  %v1392_v20 = vsel %vm587_vm5, %v1202_v54, %v1391_v16  ;;  %v1398_v40 = vsel %vm585_vm3, %v1230_v10, %v1397_v56  ;;  %v3570_v29 = vunpack.c.l.bf16 %v3569_v34  ;;  %v3582_v56 = vld [vmem:[#allocation13_spill] sm:$0xff] }
 0x2e9   :  { %v1234_v26 = vrot.slane %v3568_v15, %v2970_v30  ;;  %v3572_v12 = vunpack.c.l.bf16 %v3571_v18  ;;  %v1405_v50 = vsel %vm585_vm3, %v1262_v25, %v1404_v17  ;;  %v1411_v36 = vsel %vm583_vm2, %v1290_v38, %v1410_v1  ;;  %v3584_v1 = vld [vmem:[#allocation18_spill] sm:$0xff]  ;;  %v3593_v18 = vld [vmem:[#allocation19_spill] sm:$0xff] }
 0x2ea   :  { %v3061_v21 = vpop.permute.xlu1 %992  ;;  %v1266_v22 = vrot.slane %v3570_v29, %v2970_v30  ;;  %v3574_v27 = vunpack.c.l.bf16 %v3573_v60  ;;  %v3575_v24 = vunpack.c.l.bf16 %v2775_v32  ;;  %v3577_v19 = vunpack.c.l.bf16 %v3576_v33  ;;  %v3596_v60 = vld [vmem:[#allocation7_spill] sm:$0xff] }
 0x2eb   :  { %v3075_v44 = vpop.permute.xlu0 %990  ;;  %v1294_v35 = vrot.slane %v3572_v12, %v2970_v30  ;;  %v3579_v23 = vunpack.c.l.bf16 %v3578_v48  ;;  %v1418_v4 = vsel %vm583_vm2, %v1322_v55, %v1417_v41  ;;  %v1424_v53 = vsel %vm581_vm1, %v1350_v0, %v1346_v57  ;;  %v3587_v0 = vld [vmem:[#allocation6_spill] sm:$0xff] }
 0x2ec   :  { %1978 = vmatprep.mubr.msk.f32.mxu1 %vm148_vm4, %v3075_v44  ;;  %v1326_v9 = vrot.slane %v3574_v27, %v2970_v30  ;;  %v1354_v49 = vrot.slane %v3575_v24, %v2970_v30  ;;  %v1214_v54 = vrot.slane %v3577_v19, %v2970_v30  ;;  %v1393_v2 = vsel %vm589_vm6, %v1206_v5, %v1392_v20  ;;  %v3589_v41 = vld [vmem:[#allocation10_spill] sm:$0xff] }
 0x2ed   :  { %1979 = vmatmul.mubr.msk.f32.gmra.mrb[4].mxu1 %vm148_vm4, %v3061_v21  ;;  %v1238_v28 = vrot.slane %v3579_v23, %v2970_v30  ;;  %v1399_v16 = vsel %vm587_vm5, %v1234_v26, %v1398_v40  ;;  %v3581_v32 = vunpack.c.l.bf16 %v3580_v61  ;;  %v3583_v43 = vunpack.c.l.bf16 %v3582_v56 }
 0x2ee   :  { %v1406_v3 = vsel %vm587_vm5, %v1266_v22, %v1405_v50  ;;  %v1412_v38 = vsel %vm585_vm3, %v1294_v35, %v1411_v36  ;;  %v3585_v6 = vunpack.c.l.bf16 %v3584_v1  ;;  %v3586_v55 = vunpack.c.l.bf16 %v2790_v52 }
 0x2ef   :  { %v1270_v10 = vrot.slane %v3581_v32, %v2970_v30  ;;  %v1298_v25 = vrot.slane %v3583_v43, %v2970_v30  ;;  %v1387_v39 = vsel %vm591_vm7, %v1178_v8, %v1386_v7  ;;  %v3588_v58 = vunpack.c.l.bf16 %v3587_v0  ;;  %v3591_v8 = vld [vmem:[#allocation14_spill] sm:$0xff]  ;;  %v3610_v0 = vld [vmem:[#allocation23_spill] sm:$0xff] }
 0x2f0   :  { %v1330_v5 = vrot.slane %v3585_v6, %v2970_v30  ;;  %v1358_v47 = vrot.slane %v3586_v55, %v2970_v30  ;;  %v1419_v37 = vsel %vm585_vm3, %v1326_v9, %v1418_v4  ;;  %v1425_v15 = vsel %vm583_vm2, %v1354_v49, %v1424_v53  ;;  %v3608_v55 = vld [vmem:[#allocation21_spill] sm:$0xff] }
 0x2f1   :  { %v1242_v13 = vrot.slane %v3588_v58, %v2970_v30  ;;  %v1394_v26 = vsel %vm591_vm7, %v1210_v45, %v1393_v2  ;;  %v1400_v52 = vsel %vm589_vm6, %v1238_v28, %v1399_v16  ;;  %v3590_v20 = vunpack.c.l.bf16 %v3589_v41  ;;  %v3602_v2 = vld [vmem:[#allocation20_spill] sm:$0xff] }
 0x2f2   :  { %v3592_v7 = vunpack.c.l.bf16 %v3591_v8  ;;  %v1407_v29 = vsel %vm589_vm6, %v1270_v10, %v1406_v3  ;;  %v1413_v22 = vsel %vm587_vm5, %v1298_v25, %v1412_v38  ;;  %v3594_v45 = vunpack.c.l.bf16 %v3593_v18  ;;  %v3606_v3 = vld [vmem:[#allocation16_spill] sm:$0xff] }
 0x2f3   :  { %v1274_v40 = vrot.slane %v3590_v20, %v2970_v30  ;;  %v3595_v35 = vunpack.c.l.bf16 %v2795_v51  ;;  %v1388_v36 = vsel %vm593_vm8, %v3070_v59, %v1387_v39  ;;  %v3597_v27 = vunpack.c.l.bf16 %v3596_v60  ;;  %v3598_v51 = vld [vmem:[#allocation11_spill] sm:$0xff] }
 0x2f4   :  { %v1302_v34 = vrot.slane %v3592_v7, %v2970_v30  ;;  %v1334_v12 = vrot.slane %v3594_v45, %v2970_v30  ;;  %v1420_v24 = vsel %vm587_vm5, %v1330_v5, %v1419_v37  ;;  %v1426_v49 = vsel %vm585_vm3, %v1358_v47, %v1425_v15 }
 0x2f5   :  { %v3173_v17 = vpop.permute.xlu1 %996  ;;  %v1362_v50 = vrot.slane %v3595_v35, %v2970_v30  ;;  %v1246_v9 = vrot.slane %v3597_v27, %v2970_v30  ;;  %v1395_v33 = vsel %vm593_vm8, %v1214_v54, %v1394_v26  ;;  %v1401_v19 = vsel %vm591_vm7, %v1242_v13, %v1400_v52  ;;  %v3604_v54 = vld [vmem:[#allocation22_spill] sm:$0xff]  ;;  %v3612_v52 = vld [vmem:[#allocation24_spill] sm:$0xff] }
 0x2f6   :  { %v3183_v57 = vpop.permute.xlu0 %994  ;;  %v3599_v48 = vunpack.c.l.bf16 %v3598_v51  ;;  %v1408_v4 = vsel %vm591_vm7, %v1274_v40, %v1407_v29  ;;  %v1414_v53 = vsel %vm589_vm6, %v1302_v34, %v1413_v22  ;;  %v3603_v16 = vunpack.c.l.bf16 %v3602_v2  ;;  %v3614_v29 = vld [vmem:[#allocation25_spill] sm:$0xff] }
 0x2f7   :  { %1981 = vmatprep.mubr.msk.f32.mxu1 %vm148_vm4, %v3183_v57  ;;  %v3605_v32 = vunpack.c.l.bf16 %v3604_v54  ;;  %v1421_v56 = vsel %vm589_vm6, %v1334_v12, %v1420_v24  ;;  %v1427_v43 = vsel %vm587_vm5, %v1362_v50, %v1426_v49  ;;  %v1402_v25 = vsel %vm593_vm8, %v1246_v9, %v1401_v19 }
 0x2f8   :  { %1982 = vmatmul.mubr.msk.f32.gmra.mrb[6].mxu1 %vm148_vm4, %v3173_v17  ;;  %v1278_v23 = vrot.slane %v3599_v48, %v2970_v30  ;;  %v1338_v61 = vrot.slane %v3603_v16, %v2970_v30  ;;  %v3607_v38 = vunpack.c.l.bf16 %v3606_v3  ;;  %v3609_v47 = vunpack.c.l.bf16 %v3608_v55 }
 0x2f9   :  { %1986 = vmatprep.mubr.msk.f32.mxu1 %vm148_vm4, %v1381_v42  ;;  %v3600_v42 = vld [vmem:[#allocation15_spill] sm:$0xff]  ;;  %v1366_v10 = vrot.slane %v3605_v32, %v2970_v30  ;;  %v3611_v58 = vunpack.c.l.bf16 %v3610_v0  ;;  %v3613_v41 = vunpack.c.l.bf16 %v3612_v52 }
 0x2fa   :  { %v3601_v28 = vunpack.c.l.bf16 %v3600_v42  ;;  %v1310_v1 = vrot.slane %v3607_v38, %v2970_v30  ;;  %v1409_v6 = vsel %vm593_vm8, %v1278_v23, %v1408_v4  ;;  %v1342_v39 = vrot.slane %v3609_v47, %v2970_v30 }
 0x2fb   :  { %v1370_v13 = vrot.slane %v3611_v58, %v2970_v30  ;;  %v1422_v37 = vsel %vm591_vm7, %v1338_v61, %v1421_v56  ;;  %v1428_v15 = vsel %vm589_vm6, %v1366_v10, %v1427_v43  ;;  %v1374_v20 = vrot.slane %v3613_v41, %v2970_v30 }
 0x2fc   :  { %v1306_v59 = vrot.slane %v3601_v28, %v2970_v30  ;;  %1987 = vmatmul.mubr.msk.f32.vlgmr.msra.gmra.mrb[0].mxu1 %vm148_vm4, %v1388_v36  ;;  %v1423_v40 = vsel %vm593_vm8, %v1342_v39, %v1422_v37 }
 0x2fd   :  { %1989 = vmatprep.mubr.msk.f32.mxu1 %vm148_vm4, %v1395_v33  ;;  %v1429_v8 = vsel %vm591_vm7, %v1370_v13, %v1428_v15 }
 0x2fe   :  { %v1415_v5 = vsel %vm591_vm7, %v1306_v59, %v1414_v53  ;;  %v1430_v7 = vsel %vm593_vm8, %v1374_v20, %v1429_v8 }
 0x2ff   :  { %v1416_v26 = vsel %vm593_vm8, %v1310_v1, %v1415_v5 }
 0x300   :  { %1990 = vmatmul.mubr.msk.f32.gmra.mrb[2].mxu1 %vm148_vm4, %v1402_v25 }
 0x301   :  { %1992 = vmatprep.mubr.msk.f32.mxu1 %vm148_vm4, %v1409_v6 }
 0x304   :  { %1993 = vmatmul.mubr.msk.f32.gmra.mrb[4].mxu1 %vm148_vm4, %v1416_v26 }
 0x305   :  { %1995 = vmatprep.mubr.msk.f32.mxu1 %vm148_vm4, %v1423_v40 }
 0x308   :  { %1996 = vmatmul.mubr.msk.f32.gmra.mrb[6].mxu1 %vm148_vm4, %v1430_v7 }
 0x3cf   :  { %v1988_v34 = vpop.f32.mrb[0].mxu1 }
 0x3d0   :  { %v1553_v22 = vadd.f32 %v1988_v34, %v3614_v29  ;;  %v1513_v18 = vpop.f32.mrb[1].mxu1 }
 0x3d1   :  { %v1552_v45 = vadd.f32 %v3614_v29, %v1513_v18 }
 0x3d2   :  { %2103 = vtanh.f32 %v1553_v22  ;;  %v1883_v2 = vmul.f32 -1.442695, %v1553_v22 }
 0x3d3   :  { %2105 = vtanh.f32 %v1552_v45  ;;  %v1991_v30 = vpop.f32.mrb[2].mxu1  ;;  %v1882_v16 = vmul.f32 -1.442695, %v1552_v45 }
 0x3d4   :  { %v1555_v12 = vadd.f32 %v1991_v30, %v3614_v29  ;;  %v1523_v35 = vpop.f32.mrb[3].mxu1 }
 0x3d5   :  { %v1554_v50 = vadd.f32 %v3614_v29, %v1523_v35 }
 0x3d6   :  { %2107 = vtanh.f32 %v1555_v12  ;;  %v1885_v61 = vmul.f32 -1.442695, %v1555_v12 }
 0x3d7   :  { %2109 = vtanh.f32 %v1554_v50  ;;  %v1994_v36 = vpop.f32.mrb[4].mxu1  ;;  %v1884_v54 = vmul.f32 -1.442695, %v1554_v50 }
 0x3d8   :  { %v1557_v60 = vadd.f32 %v1994_v36, %v3614_v29  ;;  %v1533_v27 = vpop.f32.mrb[5].mxu1 }
 0x3d9   :  { %v1556_v9 = vadd.f32 %v3614_v29, %v1533_v27 }
 0x3da   :  { %2111 = vtanh.f32 %v1557_v60  ;;  %v1887_v32 = vmul.f32 -1.442695, %v1557_v60 }
 0x3db   :  { %2113 = vtanh.f32 %v1556_v9  ;;  %v1997_v24 = vpop.f32.mrb[6].mxu1  ;;  %v1886_v10 = vmul.f32 -1.442695, %v1556_v9 }
 0x3dc   :  { %v2104_v49 = vpop.eup %2103  ;;  %v1559_v33 = vadd.f32 %v1997_v24, %v3614_v29  ;;  %v1543_v19 = vpop.f32.mrb[7].mxu1 }
 0x3dd   :  { %v2106_v51 = vpop.eup %2105  ;;  %v1558_v48 = vadd.f32 %v3614_v29, %v1543_v19  ;;  %1634 = vrot.lane.b32.xlu1 %v2104_v49, %s2168_s8 }
 0x3de   :  { %2115 = vtanh.f32 %v1559_v33  ;;  %1632 = vrot.lane.b32.xlu0 %v2106_v51, %s2168_s8  ;;  %v1889_v56 = vmul.f32 -1.442695, %v1559_v33 }
 0x3df   :  { %2117 = vtanh.f32 %v1558_v48  ;;  %v1888_v43 = vmul.f32 -1.442695, %v1558_v48 }
 0x3e0   :  { %v2108_v23 = vpop.eup %2107  ;;  %2119 = vpow2.f32 %v1883_v2 }
 0x3e1   :  { %v2110_v42 = vpop.eup %2109  ;;  %1638 = vrot.lane.b32.xlu1 %v2108_v23, %s2168_s8  ;;  %2121 = vpow2.f32 %v1882_v16  ;;  %v3616_v16 = vld [vmem:[#allocation28_spill] sm:$0xff] }
 0x3e2   :  { %1636 = vrot.lane.b32.xlu0 %v2110_v42, %s2168_s8  ;;  %2123 = vpow2.f32 %v1885_v61 }
 0x3e3   :  { %2125 = vpow2.f32 %v1884_v54 }
 0x3e4   :  { %v2112_v28 = vpop.eup %2111  ;;  %2127 = vpow2.f32 %v1887_v32  ;;  %v3617_v32 = vld [vmem:[#allocation27_spill] sm:$0xff] }
 0x3e5   :  { %v2114_v59 = vpop.eup %2113  ;;  %1642 = vrot.lane.b32.xlu1 %v2112_v28, %s2168_s8  ;;  %2129 = vpow2.f32 %v1886_v10  ;;  %v3615_v28 = vld [vmem:[#allocation26_spill] sm:$0xff] }
 0x3e6   :  { %1640 = vrot.lane.b32.xlu0 %v2114_v59, %s2168_s8  ;;  %2131 = vpow2.f32 %v1889_v56 }
 0x3e7   :  { %2133 = vpow2.f32 %v1888_v43 }
 0x3e8   :  { %v2116_v4 = vpop.eup %2115 }
 0x3e9   :  { %v2118_v53 = vpop.eup %2117  ;;  %1646 = vrot.lane.b32.xlu1 %v2116_v4, %s2168_s8 }
 0x3ea   :  { %1644 = vrot.lane.b32.xlu0 %v2118_v53, %s2168_s8  ;;  %v2120_v25 = vpop.eup %2119 }
 0x3eb   :  { %v2122_v3 = vpop.eup %2121  ;;  %v1585_v38 = vadd.f32 1.0, %v2120_v25 }
 0x3ec   :  { %v2124_v1 = vpop.eup %2123  ;;  %v1584_v6 = vadd.f32 1.0, %v2122_v3 }
 0x3ed   :  { %v2126_v5 = vpop.eup %2125  ;;  %2135 = vrcp.f32 %v1585_v38  ;;  %v1587_v55 = vadd.f32 1.0, %v2124_v1  ;;  %v3618_v38 = vld [vmem:[#allocation29_spill] sm:$0xff] }
 0x3ee   :  { %v2128_v47 = vpop.eup %2127  ;;  %2137 = vrcp.f32 %v1584_v6  ;;  %v1586_v39 = vadd.f32 1.0, %v2126_v5 }
 0x3ef   :  { %v2130_v0 = vpop.eup %2129  ;;  %2139 = vrcp.f32 %v1587_v55  ;;  %v1589_v58 = vadd.f32 1.0, %v2128_v47  ;;  %v3619_v47 = vld [vmem:[#allocation30_spill] sm:$0xff] }
 0x3f0   :  { %v2132_v13 = vpop.eup %2131  ;;  %2141 = vrcp.f32 %v1586_v39  ;;  %v1588_v37 = vadd.f32 1.0, %v2130_v0 }
 0x3f1   :  { %v2134_v15 = vpop.eup %2133  ;;  %2143 = vrcp.f32 %v1589_v58  ;;  %v1591_v26 = vadd.f32 1.0, %v2132_v13  ;;  %v3620_v58 = vld [vmem:[#allocation31_spill] sm:$0xff] }
 0x3f2   :  { %2145 = vrcp.f32 %v1588_v37  ;;  %v1590_v52 = vadd.f32 1.0, %v2134_v15 }
 0x3f3   :  { %2147 = vrcp.f32 %v1591_v26 }
 0x3f4   :  { %2149 = vrcp.f32 %v1590_v52 }
 0x3f7   :  { %v3281_v41 = vpop.eup %2135 }
 0x3f8   :  { %v3283_v40 = vpop.eup %2137  ;;  %v1617_v23 = vmul.f32 %v3281_v41, %v2926_v11 }
 0x3f9   :  { %v3288_v29 = vpop.eup %2139  ;;  %v1616_v59 = vmul.f32 %v3283_v40, %v3615_v28 }
 0x3fa   :  { %v3291_v18 = vpop.eup %2141  ;;  %v1619_v61 = vmul.f32 %v3288_v29, %v3616_v16 }
 0x3fb   :  { %v3296_v35 = vpop.eup %2143  ;;  %v1618_v10 = vmul.f32 %v3291_v18, %v3617_v32 }
 0x3fc   :  { %v3299_v36 = vpop.eup %2145  ;;  %v1621_v11 = vmul.f32 %v3296_v35, %v2941_v63 }
 0x3fd   :  { %v3304_v24 = vpop.eup %2147  ;;  %v1620_v1 = vmul.f32 %v3299_v36, %v3618_v38 }
 0x3fe   :  { %v3307_v33 = vpop.eup %2149  ;;  %v1623_v39 = vmul.f32 %v3304_v24, %v3619_v47 }
 0x3ff   :  { %v1622_v13 = vmul.f32 %v3307_v33, %v3620_v58 }
 0x44f   :  { %v1635_v20 = vpop.permute.xlu1 %1634 }
 0x450   :  { %v1657_v8 = vmul.f32 %v3281_v41, %v1635_v20  ;;  %v1633_v7 = vpop.permute.xlu0 %1632 }
 0x451   :  { %v1656_v34 = vmul.f32 %v3283_v40, %v1633_v7 }
 0x452   :  { %1674 = vrot.lane.b32.xlu1 %v1657_v8, %s2169_s3 }
 0x453   :  { %v1639_v22 = vpop.permute.xlu1 %1638  ;;  %1672 = vrot.lane.b32.xlu0 %v1656_v34, %s2169_s3 }
 0x454   :  { %v1659_v45 = vmul.f32 %v3288_v29, %v1639_v22  ;;  %v1637_v30 = vpop.permute.xlu0 %1636 }
 0x455   :  { %v1658_v12 = vmul.f32 %v3291_v18, %v1637_v30 }
 0x456   :  { %1678 = vrot.lane.b32.xlu1 %v1659_v45, %s2169_s3 }
 0x457   :  { %v1643_v50 = vpop.permute.xlu1 %1642  ;;  %1676 = vrot.lane.b32.xlu0 %v1658_v12, %s2169_s3 }
 0x458   :  { %v1661_v60 = vmul.f32 %v3296_v35, %v1643_v50  ;;  %v1641_v27 = vpop.permute.xlu0 %1640 }
 0x459   :  { %v1660_v9 = vmul.f32 %v3299_v36, %v1641_v27 }
 0x45a   :  { %1682 = vrot.lane.b32.xlu1 %v1661_v60, %s2169_s3 }
 0x45b   :  { %v1647_v49 = vpop.permute.xlu1 %1646  ;;  %1680 = vrot.lane.b32.xlu0 %v1660_v9, %s2169_s3 }
 0x45c   :  { %v1663_v19 = vmul.f32 %v3304_v24, %v1647_v49  ;;  %v1645_v51 = vpop.permute.xlu0 %1644 }
 0x45d   :  { %v1662_v48 = vmul.f32 %v3307_v33, %v1645_v51 }
 0x45e   :  { %1686 = vrot.lane.b32.xlu1 %v1663_v19, %s2169_s3 }
 0x45f   :  { %1684 = vrot.lane.b32.xlu0 %v1662_v48, %s2169_s3 }
 0x4c4   :  { %v1675_v42 = vpop.permute.xlu1 %1674 }
 0x4c5   :  { %v1697_v4 = vadd.f32 %v1675_v42, %v1617_v23  ;;  %v1673_v53 = vpop.permute.xlu0 %1672 }
 0x4c6   :  { %v1696_v2 = vadd.f32 %v1673_v53, %v1616_v59 }
 0x4c7   :  { %2151 = vtanh.f32 %v1697_v4 }
 0x4c8   :  { %2153 = vtanh.f32 %v1696_v2  ;;  %v1679_v54 = vpop.permute.xlu1 %1678 }
 0x4c9   :  { %v1699_v56 = vadd.f32 %v1679_v54, %v1619_v61  ;;  %v1677_v43 = vpop.permute.xlu0 %1676 }
 0x4ca   :  { %v1698_v25 = vadd.f32 %v1677_v43, %v1618_v10 }
 0x4cb   :  { %2155 = vtanh.f32 %v1699_v56 }
 0x4cc   :  { %2157 = vtanh.f32 %v1698_v25  ;;  %v1683_v3 = vpop.permute.xlu1 %1682 }
 0x4cd   :  { %v1701_v6 = vadd.f32 %v1683_v3, %v1621_v11  ;;  %v1681_v5 = vpop.permute.xlu0 %1680 }
 0x4ce   :  { %v1700_v55 = vadd.f32 %v1681_v5, %v1620_v1 }
 0x4cf   :  { %2159 = vtanh.f32 %v1701_v6 }
 0x4d0   :  { %2161 = vtanh.f32 %v1700_v55  ;;  %v1687_v0 = vpop.permute.xlu1 %1686 }
 0x4d1   :  { %v2152_v37 = vpop.eup %2151  ;;  %v1703_v15 = vadd.f32 %v1687_v0, %v1623_v39  ;;  %v1685_v63 = vpop.permute.xlu0 %1684 }
 0x4d2   :  { %v2154_v26 = vpop.eup %2153  ;;  %v1702_v52 = vadd.f32 %v1685_v63, %v1622_v13  ;;  %1722 = vrot.lane.b32.xlu1 %v2152_v37, %s2170_s9 }
 0x4d3   :  { %2163 = vtanh.f32 %v1703_v15  ;;  %1720 = vrot.lane.b32.xlu0 %v2154_v26, %s2170_s9 }
 0x4d4   :  { %2165 = vtanh.f32 %v1702_v52 }
 0x4d5   :  { %v2156_v20 = vpop.eup %2155 }
 0x4d6   :  { %v2158_v8 = vpop.eup %2157  ;;  %1726 = vrot.lane.b32.xlu1 %v2156_v20, %s2170_s9 }
 0x4d7   :  { %1724 = vrot.lane.b32.xlu0 %v2158_v8, %s2170_s9 }
 0x4d9   :  { %v2160_v7 = vpop.eup %2159 }
 0x4da   :  { %v2162_v34 = vpop.eup %2161  ;;  %1730 = vrot.lane.b32.xlu1 %v2160_v7, %s2170_s9 }
 0x4db   :  { %1728 = vrot.lane.b32.xlu0 %v2162_v34, %s2170_s9 }
 0x4dd   :  { %v2164_v22 = vpop.eup %2163 }
 0x4de   :  { %v2166_v45 = vpop.eup %2165  ;;  %1734 = vrot.lane.b32.xlu1 %v2164_v22, %s2170_s9 }
 0x4df   :  { %1732 = vrot.lane.b32.xlu0 %v2166_v45, %s2170_s9 }
 0x544   :  { %v1723_v30 = vpop.permute.xlu1 %1722 }
 0x545   :  { %v1745_v12 = vmul.f32 %v3281_v41, %v1723_v30  ;;  %v1721_v50 = vpop.permute.xlu0 %1720 }
 0x546   :  { %v1744_v60 = vmul.f32 %v3283_v40, %v1721_v50 }
 0x548   :  { %v2019_v27 = vpack.i.bf16 %v1745_v12, %v1744_v60  ;;  %v1727_v9 = vpop.permute.xlu1 %1726 }
 0x549   :  { %v1747_v49 = vmul.f32 %v3288_v29, %v1727_v9  ;;  %v1725_v19 = vpop.permute.xlu0 %1724 }
 0x54a   :  { %v1746_v51 = vmul.f32 %v3291_v18, %v1725_v19  ;;  %2020 = vrot.lane.b32.xlu0 %v2019_v27, %s2168_s8 }
 0x54c   :  { %v2024_v48 = vpack.i.bf16 %v1747_v49, %v1746_v51  ;;  %v1731_v23 = vpop.permute.xlu1 %1730 }
 0x54d   :  { %v1749_v42 = vmul.f32 %v3296_v35, %v1731_v23  ;;  %v1729_v28 = vpop.permute.xlu0 %1728 }
 0x54e   :  { %v1748_v59 = vmul.f32 %v3299_v36, %v1729_v28  ;;  %2025 = vrot.lane.b32.xlu1 %v2024_v48, %s2168_s8 }
 0x550   :  { %v2029_v41 = vpack.i.bf16 %v1749_v42, %v1748_v59  ;;  %v1735_v40 = vpop.permute.xlu1 %1734 }
 0x551   :  { %v1751_v4 = vmul.f32 %v3304_v24, %v1735_v40  ;;  %v1733_v53 = vpop.permute.xlu0 %1732 }
 0x552   :  { %v1750_v29 = vmul.f32 %v3307_v33, %v1733_v53  ;;  %2030 = vrot.lane.b32.xlu0 %v2029_v41, %s2168_s8 }
 0x554   :  { %v2034_v18 = vpack.i.bf16 %v1751_v4, %v1750_v29 }
 0x556   :  { %2035 = vrot.lane.b32.xlu1 %v2034_v18, %s2168_s8 }
 0x5bc   :  { %v2021_v2 = vpop.permute.xlu0 %2020 }
 0x5bd   :  { %v2023_v16 = vunpack.i.h.bf16 %v2021_v2  ;;  %v2022_v35 = vunpack.i.l.bf16 %v2021_v2 }
 0x5bf   :  { %v1793_v36 = vsel %vm148_vm4, %v2982_v31, %v2023_v16  ;;  %v1792_v61 = vsel %vm148_vm4, %v2972_v14, %v2022_v35 }
 0x5c0   :  { %v1899_v54 = vpack.c.bf16 %v1793_v36, %v1793_v36  ;;  %v1898_v24 = vpack.c.bf16 %v1792_v61, %v1792_v61  ;;  %v2026_v32 = vpop.permute.xlu1 %2025 }
 0x5c1   :  { %v2028_v10 = vunpack.i.h.bf16 %v2026_v32  ;;  %v2027_v33 = vunpack.i.l.bf16 %v2026_v32 }
 0x5c2   :  { %1834 = vst.msk [vmem:[%s3401_s4 + $0x4] sm:$0xf] %vm1832_vm9, %v1899_v54  ;;  %1833 = vst.msk [vmem:[%s3401_s4] sm:$0xf] %vm1832_vm9, %v1898_v24 }
 0x5c3   :  { %v1795_v31 = vsel %vm148_vm4, %v3022_v46, %v2028_v10  ;;  %v1794_v14 = vsel %vm148_vm4, %v2996_v62, %v2027_v33 }
 0x5c4   :  { %v1901_v56 = vpack.c.bf16 %v1795_v31, %v1795_v31  ;;  %v1900_v43 = vpack.c.bf16 %v1794_v14, %v1794_v14  ;;  %v2031_v25 = vpop.permute.xlu0 %2030 }
 0x5c5   :  { %v2033_v11 = vunpack.i.h.bf16 %v2031_v25  ;;  %v2032_v3 = vunpack.i.l.bf16 %v2031_v25 }
 0x5c6   :  { %1836 = vst.msk [vmem:[%s3401_s4 + $0xc] sm:$0xf] %vm1832_vm9, %v1901_v56  ;;  %1835 = vst.msk [vmem:[%s3401_s4 + $0x8] sm:$0xf] %vm1832_vm9, %v1900_v43 }
 0x5c7   :  { %v1797_v46 = vsel %vm148_vm4, %v3061_v21, %v2033_v11  ;;  %v1796_v62 = vsel %vm148_vm4, %v3075_v44, %v2032_v3 }
 0x5c8   :  { %v1903_v38 = vpack.c.bf16 %v1797_v46, %v1797_v46  ;;  %v1902_v1 = vpack.c.bf16 %v1796_v62, %v1796_v62  ;;  %v2036_v6 = vpop.permute.xlu1 %2035 }
 0x5c9   :  { %v2038_v5 = vunpack.i.h.bf16 %v2036_v6  ;;  %v2037_v55 = vunpack.i.l.bf16 %v2036_v6 }
 0x5ca   :  { %1838 = vst.msk [vmem:[%s3401_s4 + $0x14] sm:$0xf] %vm1832_vm9, %v1903_v38  ;;  %1837 = vst.msk [vmem:[%s3401_s4 + $0x10] sm:$0xf] %vm1832_vm9, %v1902_v1 }
 0x5cb   :  { %v1799_v21 = vsel %vm148_vm4, %v3173_v17, %v2038_v5  ;;  %v1798_v44 = vsel %vm148_vm4, %v3183_v57, %v2037_v55 }
 0x5cc   :  { %v1905_v47 = vpack.c.bf16 %v1799_v21, %v1799_v21  ;;  %v1904_v39 = vpack.c.bf16 %v1798_v44, %v1798_v44 }
 0x5ce   :  { %1840 = vst.msk [vmem:[%s3401_s4 + $0x1c] sm:$0xf] %vm1832_vm9, %v1905_v47  ;;  %1839 = vst.msk [vmem:[%s3401_s4 + $0x18] sm:$0xf] %vm1832_vm9, %v1904_v39 }

// kernel: orchmatchnet_forward.12
= control target key start
LH: loop header
LB: loop body
LE: loop exit
PB: predicated region body
PF: predicated region fallthrough
CT: control target
= control target key end

     0   :  { %s805_s12 = smov 0   ;;  %s807_s13 = smov 0   ;;  %s880_s0 = inlined_call_operand.vmem [shape: bf16[2,32], index: 0, kind: input, shape index: {}]   ;;  %s881_s1 = inlined_call_operand.vmem [shape: bf16[32,2048], index: 1, kind: input, shape index: {}]   ;;  %s882_s2 = inlined_call_operand.vmem [shape: f32[1,2048], index: 2, kind: input, shape index: {}]   ;;  %s883_s3 = inlined_call_operand.vmem [shape: bf16[2,2048], index: 3, kind: output, shape index: {}]  }
   0x1   :  { %s809_s14 = smov 0   ;;  %s811_s15 = smov 0  }
   0x2   :  { %s813_s16 = smov 0  }
   0x3 LB: > { %s28_s17 = sadd.s32 1, %s776_s15  ;;  %p76_p1 = scmp.ne.s32.totalorder %s768_s13, %s764_s12  ;;  %s780_s16 = sphi %s813_s16, %s13_s16   ;;  %s776_s15 = sphi %s811_s15, %s887_s15   ;;  %s772_s14 = sphi %s809_s14, %s886_s14   ;;  %s768_s13 = sphi %s807_s13, %s885_s13   ;;  %s764_s12 = sphi %s805_s12, %s884_s12  }
   0x4   : > { %p30_p0 = scmp.ge.s32.totalorder %s28_s17, 4  ;;  %p77_p2 = scmp.eq.s32.totalorder %s780_s16, 0 }
   0x5   : > { %s69_s19 = sadd.s32 1, %s768_s13  ;;  %p663_p5 = scmp.ge.s32.totalorder %s780_s16, 4 }
   0x6   : > { %s889_s17 = smov (%p30_p0, %s28_s17), 0  ;;  %p78_p3 = por %p77_p2, %p76_p1 }
   0x7   : > { %s65_s18 = ssub.s32 %s776_s15, %s889_s17  ;;  %165 = sbr.rel (%p663_p5) target bundleno = 22 (0x16), region = 20 }
   0x8   : > { %p67_p4 = scmp.eq.s32.totalorder %s65_s18, 0 }
   0xa   : > { %s840_s20 = scalar_select %p67_p4, %s768_s13, %s69_s19  }
   0xe   : > { %168 = sbr.rel (!%p78_p3) target bundleno = 22 (0x16), region = 24  ;;  %s170_s21 = sand.u32 (%p78_p3), 1, %s768_s13  }
   0xf   : > { %s686_s22 = sshll.u32 (%p78_p3), %s776_s15, 4  ;;  %s664_s23 = sshll.u32 (%p78_p3), %s170_s21, 6 }
  0x10   : > { %s178_s26 = scalar_lea.vmem (%p78_p3), %s881_s1, %s686_s22  ;;  %s172_s27 = scalar_lea.vmem (%p78_p3), [#allocation3], %s664_s23 }
  0x11   : > { %v191_v0 = vld [vmem:[%s178_s26] sm:$0xff] (%p78_p3)  ;;  %v193_v1 = vld [vmem:[%s178_s26 + $0x8] sm:$0xff] (%p78_p3) }
  0x12   : > { %v195_v2 = vld [vmem:[%s178_s26 + $0x40] sm:$0xff] (%p78_p3)  ;;  %192 = vst [vmem:[%s172_s27] sm:$0xff] (%p78_p3), %v191_v0  ;;  %194 = vst [vmem:[%s172_s27 + $0x8] sm:$0xff] (%p78_p3), %v193_v1  ;;  %v197_v3 = vld [vmem:[%s178_s26 + $0x48] sm:$0xff] (%p78_p3) }
  0x13   : > { %196 = vst [vmem:[%s172_s27 + $0x10] sm:$0xff] (%p78_p3), %v195_v2  ;;  %v199_v4 = vld [vmem:[%s178_s26 + $0x80] sm:$0xff] (%p78_p3)  ;;  %v201_v5 = vld [vmem:[%s178_s26 + $0x88] sm:$0xff] (%p78_p3)  ;;  %198 = vst [vmem:[%s172_s27 + $0x18] sm:$0xff] (%p78_p3), %v197_v3 }
  0x14   : > { %200 = vst [vmem:[%s172_s27 + $0x20] sm:$0xff] (%p78_p3), %v199_v4  ;;  %202 = vst [vmem:[%s172_s27 + $0x28] sm:$0xff] (%p78_p3), %v201_v5  ;;  %v203_v6 = vld [vmem:[%s178_s26 + $0xc0] sm:$0xff] (%p78_p3)  ;;  %v205_v7 = vld [vmem:[%s178_s26 + $0xc8] sm:$0xff] (%p78_p3) }
  0x15   : > { %204 = vst [vmem:[%s172_s27 + $0x30] sm:$0xff] %v203_v6  ;;  %206 = vst [vmem:[%s172_s27 + $0x38] sm:$0xff] %v205_v7 }
  0x16 PF: > { %p667_p6 = scmp.ge.s32.totalorder %s780_s16, 1  ;;  %p219_p7 = scmp.lt.s32.totalorder %s780_s16, 5 }
  0x18   : > { %p220_p8 = pnand %p667_p6, %p219_p7 }
  0x19   : > { %s226_s28 = sand.u32 (!%p220_p8), 1, %s764_s12   ;;  %v782_v8 = vmov (!%p220_p8), 0   ;;  %v291_v17 = vld [vmem:[%s880_s0] sm:$0x1] (!%p220_p8)  ;;  %vm340_vm0 = vcmask (!%p220_p8), 261120   ;;  %s669_s6 = sshll.u32 (!%p220_p8), %s772_s14, 2  ;;  %v435_v18 = vlaneseq (!%p220_p8) }
  0x1a   : > { %223 = sbr.rel (%p220_p8) target bundleno = 273 (0x111), region = 51  ;;  %s668_s29 = sshll.u32 (!%p220_p8), %s226_s28, 6  ;;  %376 = vmatprep.mubr.bf16.mxu0 (!%p220_p8), %v782_v8  ;;  %417 = vmatprep.mubr.bf16.mxu1 (!%p220_p8), %v782_v8  ;;  %v783_v20 = vmov (!%p220_p8), 1983009808   ;;  %v784_v52 = vmov (!%p220_p8), 1966171168  }
  0x1b   : > { %s228_s30 = scalar_lea.vmem (!%p220_p8), [#allocation3], %s668_s29  ;;  %p271_p9 = scmp.lt.s32.totalorder (!%p220_p8), %s669_s6, 15  ;;  %v436_v19 = vshrl.u32 (!%p220_p8), %v435_v18, 7  ;;  %v433_v21 = vunpack.c.l.s4 (!%p220_p8), %v783_v20  ;;  %v525_v53 = vunpack.c.l.s4 (!%p220_p8), %v784_v52 }
  0x1c   : > { %v730_v9 = vld [vmem:[%s228_s30 + $0x4] ss:$16 sps:$4 sm:$0xff] (!%p220_p8)   ;;  %v732_v10 = vld [vmem:[%s228_s30 + $0xc] ss:$16 sps:$4 sm:$0xff] (!%p220_p8)   ;;  %v734_v11 = vld [vmem:[%s228_s30] ss:$16 sps:$4 sm:$0xff] (!%p220_p8)  }
  0x1d   : > { %344 = vmatprep.subr.bf16.mxu0 (!%p220_p8), %v730_v9  ;;  %v735_v12 = vld [vmem:[%s228_s30 + $0x8] ss:$16 sps:$4 sm:$0xff] (!%p220_p8)   ;;  %385 = vmatprep.subr.bf16.mxu1 (!%p220_p8), %v732_v10  ;;  %v736_v13 = vld [vmem:[%s228_s30 + $0x24] ss:$16 sps:$4 sm:$0xff] (!%p220_p8)   ;;  %v738_v14 = vld [vmem:[%s228_s30 + $0x2c] ss:$16 sps:$4 sm:$0xff] (!%p220_p8)   ;;  %v434_v27 = vunpack.c.0.s8 (!%p220_p8), %v433_v21  ;;  %v526_v57 = vunpack.c.0.s8 (!%p220_p8), %v525_v53 }
  0x1e   : > { %345 = vmatpush1.bf16.msra.mxu0 (!%p220_p8), %v734_v11  ;;  %386 = vmatpush1.bf16.msra.mxu1 (!%p220_p8), %v735_v12  ;;  %v740_v15 = vld [vmem:[%s228_s30 + $0x20] ss:$16 sps:$4 sm:$0xff] (!%p220_p8)   ;;  %v741_v16 = vld [vmem:[%s228_s30 + $0x28] ss:$16 sps:$4 sm:$0xff] (!%p220_p8)   ;;  %v458_v22 = vsub.s32 (!%p220_p8), 0, %v436_v19  ;;  %v462_v23 = vsub.s32 (!%p220_p8), 1, %v436_v19 }
  0x1f   : > { %346 = vmatprep.subr.bf16.mxu0 (!%p220_p8), %v736_v13  ;;  %387 = vmatprep.subr.bf16.mxu1 (!%p220_p8), %v738_v14  ;;  %v466_v24 = vsub.s32 (!%p220_p8), 2, %v436_v19  ;;  %v470_v25 = vsub.s32 (!%p220_p8), 3, %v436_v19  ;;  %v437_v32 = vsub.s32 (!%p220_p8), %v434_v27, %v436_v19  ;;  %v529_v62 = vsub.s32 (!%p220_p8), %v526_v57, %v436_v19 }
  0x21   : > { %s891_s6 = smov (!%p271_p9, %s669_s6), 15 }
  0x22   : > { %347 = vmatpush1.bf16.msra.mxu0 %v740_v15  ;;  %388 = vmatpush1.bf16.msra.mxu1 %v741_v16  ;;  %s273_s9 = scalar_lea.vmem %s882_s2, %s891_s6  ;;  %s282_s12 = scalar_lea.vmem %s883_s3, %s891_s6 }
  0x23   : > { %v454_v26 = vld [vmem:[%s273_s9] sm:$0xf] }
  0x24   : > { %v459_v28 = vrot.slane %v454_v26, %v458_v22  ;;  %v463_v29 = vrot.slane %v454_v26, %v462_v23  ;;  %v467_v30 = vrot.slane %v454_v26, %v466_v24  ;;  %v471_v31 = vrot.slane %v454_v26, %v470_v25 }
  0x25   : > { %679 = vmatmul.mubr.msk.bf16.vlgmr.msra.gmra.mrb[0].mxu0 %vm340_vm0, %v291_v17  ;;  %680 = vmatmul.mubr.msk.bf16.vlgmr.msra.gmra.mrb[0].mxu1 %vm340_vm0, %v291_v17 }
  0x26   : > { %v472_v33 = vcombine.low %v459_v28, %v463_v29  ;;  %v473_v34 = vcombine.low %v467_v30, %v471_v31 }
  0x28   : > { %v480_v37 = vrot.slane %v472_v33, %v437_v32  ;;  %v487_v38 = vrot.slane %v473_v34, %v437_v32 }
  0x2a   : > { %v488_v49 = vcombine.low %v480_v37, %v487_v38 }
  0xf8   : > { %v378_v35 = vpop.f32.mrb[0].mxu0  ;;  %v419_v36 = vpop.f32.mrb[0].mxu1 }
  0xf9   : > { %v380_v39 = vpop.f32.mrb[1].mxu0  ;;  %v421_v40 = vpop.f32.mrb[1].mxu1 }
  0xfa   : > { %v430_v41 = vcombine.low %v378_v35, %v380_v39  ;;  %v431_v42 = vcombine.low %v419_v36, %v421_v40  ;;  %v382_v43 = vpop.f32.mrb[2].mxu0  ;;  %v423_v44 = vpop.f32.mrb[2].mxu1 }
  0xfb   : > { %v383_v45 = vpop.f32.mrb[3].mxu0  ;;  %v424_v46 = vpop.f32.mrb[3].mxu1 }
  0xfc   : > { %v438_v47 = vrot.slane %v430_v41, %v437_v32  ;;  %v445_v48 = vrot.slane %v431_v42, %v437_v32 }
  0xfe   : > { %v446_v50 = vcombine.low %v438_v47, %v445_v48 }
 0x100   : > { %v490_v51 = vadd.f32 %v488_v49, %v446_v50 }
 0x102   : > { %v491_v54 = vmax.f32 %v490_v51, 0.0 }
 0x104   : > { %v493_v55 = vcombine.high %v491_v54, %v491_v54  ;;  %v500_v56 = vrot.slane %v491_v54, %v437_v32 }
 0x106   : > { %v507_v58 = vrot.slane %v493_v55, %v437_v32  ;;  %v508_v59 = vcombine.high %v500_v56, %v500_v56 }
 0x108   : > { %v509_v60 = vcombine.high %v507_v58, %v507_v58  ;;  %v681_v61 = vpack.c.bf16 %v508_v59, %v500_v56 }
 0x10a   : > { %v682_v63 = vpack.c.bf16 %v509_v60, %v507_v58  ;;  %v530_v0 = vrot.slane %v681_v61, %v529_v62 }
 0x10c   : > { %v537_v1 = vrot.slane %v682_v63, %v529_v62 }
 0x10e   : > { %v538_v2 = vcombine.low %v530_v0, %v537_v1 }
 0x110   : > { %683 = vst.sshfl [vmem:[%s282_s12] sm:$0x55 pattern:$0x73625140] %v538_v2 }
 0x111 PF: > { %s13_s16 = sadd.s32 1, %s780_s16   ;;  %s884_s12 = smov %s768_s13 }
 0x112   : > { %p10_p10 = scmp.ge.s32.totalorder %s13_s16, 6   ;;  %s885_s13 = smov %s840_s20 }
 0x113   : > { %s886_s14 = smov %s776_s15  ;;  %s887_s15 = smov %s889_s17 }
 0x114   :  { %12 = sbr.rel (!%p10_p10) target bundleno = 3 (0x3), region = 104 }

// kernel: orchmatchnet_forward.13
= control target key start
LH: loop header
LB: loop body
LE: loop exit
PB: predicated region body
PF: predicated region fallthrough
CT: control target
= control target key end

     0   :  { %8 = vsyncpa [#allocation4], 0  ;;  %s971_s12 = smov 0   ;;  %s973_s13 = smov 0   ;;  %s1084_s0 = inlined_call_operand.vmem [shape: bf16[2,2048], index: 0, kind: input, shape index: {}]   ;;  %s1085_s1 = inlined_call_operand.vmem [shape: bf16[2048,128], index: 1, kind: input, shape index: {}]   ;;  %s1086_s2 = inlined_call_operand.vmem [shape: f32[1,128], index: 2, kind: input, shape index: {}]   ;;  %s1087_s3 = inlined_call_operand.hbm [shape: f32[2,128], index: 3, kind: output, shape index: {}]  }
   0x1   :  { %s975_s14 = smov 0  }
   0x2 LB: > { %s732_s15 = sadd.s32 4294967295, %s946_s14   ;;  %s26_s16 = sadd.s32 1, %s942_s13  ;;  %s946_s14 = sphi %s975_s14, %s14_s14   ;;  %s942_s13 = sphi %s973_s13, %s1090_s13   ;;  %s938_s12 = sphi %s971_s12, %s1089_s12  }
   0x3   : > { %p27_p0 = scmp.ge.s32.totalorder %s26_s16, 4  ;;  %p736_p1 = scmp.ge.s32.totalorder %s946_s14, 1 }
   0x4   : > { %p189_p2 = scmp.lt.s32.totalorder %s946_s14, 5 }
   0x5   : > { %s1092_s16 = smov (%p27_p0, %s26_s16), 0 }
   0x6   : > { %p190_p3 = pnand %p736_p1, %p189_p2 }
   0x7   : > { %s737_s17 = sshll.u32 (!%p190_p3), %s938_s12, 2  ;;  %s738_s18 = sshll.u32 (!%p190_p3), %s938_s12, 6 }
   0x8   : > { %193 = sbr.rel (%p190_p3) target bundleno = 340 (0x154), region = 32  ;;  %p225_p4 = scmp.lt.s32.totalorder (!%p190_p3), %s737_s17, 15 }
   0x9   : > { %p232_p5 = scmp.lt.s32.totalorder (!%p190_p3), %s738_s18, 255  ;;  %p740_p6 = scmp.ne.s32.totalorder (!%p190_p3), %s938_s12, 0 }
   0xf   : > { %s1094_s17 = smov (!%p225_p4, %s737_s17), 15  ;;  %s1096_s18 = smov (!%p232_p5, %s738_s18), 255 }
  0x10   : > { %s229_s21 = scalar_lea.vmem %s1084_s0, %s1094_s17  ;;  %s739_s22 = sshll.u32 %s1096_s18, 2  ;;  %v948_v0 = vmov (!%p740_p6), 0.0  }
  0x11   : > { %s1003_s25 = scalar_lea.vmem %s1085_s1, %s739_s22  ;;  %247 = sbr.rel (%p740_p6) target bundleno = 24 (0x18), region = 36  ;;  %248 = vst [vmem:[#allocation2] sm:$0x3] (!%p740_p6), %v948_v0 }
  0x18 PF: > { %v858_v1 = vld [vmem:[%s1003_s25 + $0x40] sm:$0xff]   ;;  %v862_v5 = vld [vmem:[%s1003_s25 + $0x48] sm:$0xff]   ;;  %v866_v9 = vld [vmem:[%s1003_s25 + $0x50] sm:$0xff]   ;;  %v327_v31 = vlaneseq  ;;  %v949_v35 = vmov 1966171168   ;;  %p774_p7 = scmp.ne.s32.totalorder %s938_s12, 3 }
  0x19   : > { %v859_v2 = vld [vmem:[%s1003_s25 + $0xc0] sm:$0xff]   ;;  %781 = vmatprep.subr.bf16.mxu0 %v858_v1  ;;  %v863_v6 = vld [vmem:[%s1003_s25 + $0xc8] sm:$0xff]   ;;  %v867_v10 = vld [vmem:[%s1003_s25 + $0xd0] sm:$0xff]   ;;  %v325_v36 = vunpack.c.l.s4 %v949_v35 }
  0x1a   : > { %v860_v3 = vld [vmem:[%s1003_s25] sm:$0xff]   ;;  %803 = vmatprep.subr.bf16.mxu1 %v859_v2  ;;  %v864_v7 = vld [vmem:[%s1003_s25 + $0x8] sm:$0xff]   ;;  %v868_v11 = vld [vmem:[%s1003_s25 + $0x10] sm:$0xff]   ;;  %v328_v37 = vshrl.u32 %v327_v31, 7 }
  0x1b   : > { %v861_v4 = vld [vmem:[%s1003_s25 + $0x80] sm:$0xff]   ;;  %782 = vmatpush3.bf16.msra.mxu0 %v860_v3  ;;  %v865_v8 = vld [vmem:[%s1003_s25 + $0x88] sm:$0xff]   ;;  %v869_v12 = vld [vmem:[%s1003_s25 + $0x90] sm:$0xff]   ;;  %v326_v39 = vunpack.c.0.s8 %v325_v36 }
  0x1c   : > { %804 = vmatpush3.bf16.msra.mxu1 %v861_v4  ;;  %783 = vmatprep.subr.bf16.mxu0 %v862_v5  ;;  %v870_v13 = vld [vmem:[%s1003_s25 + $0x58] sm:$0xff]   ;;  %v874_v17 = vld [vmem:[%s1003_s25 + $0x60] sm:$0xff]   ;;  %v878_v21 = vld [vmem:[%s1003_s25 + $0x68] sm:$0xff]  }
  0x1d   : > { %805 = vmatprep.subr.bf16.mxu1 %v863_v6  ;;  %v871_v14 = vld [vmem:[%s1003_s25 + $0xd8] sm:$0xff]   ;;  %v875_v18 = vld [vmem:[%s1003_s25 + $0xe0] sm:$0xff]   ;;  %v879_v22 = vld [vmem:[%s1003_s25 + $0xe8] sm:$0xff]   ;;  %v329_v40 = vsub.s32 %v326_v39, %v328_v37 }
  0x1e   : > { %v872_v15 = vld [vmem:[%s1003_s25 + $0x18] sm:$0xff]   ;;  %v876_v19 = vld [vmem:[%s1003_s25 + $0x20] sm:$0xff]   ;;  %v880_v23 = vld [vmem:[%s1003_s25 + $0x28] sm:$0xff]  }
  0x1f   : > { %784 = vmatpush3.bf16.msra.mxu0 %v864_v7  ;;  %v873_v16 = vld [vmem:[%s1003_s25 + $0x98] sm:$0xff]   ;;  %v877_v20 = vld [vmem:[%s1003_s25 + $0xa0] sm:$0xff]   ;;  %v881_v24 = vld [vmem:[%s1003_s25 + $0xa8] sm:$0xff]  }
  0x20   : > { %806 = vmatpush3.bf16.msra.mxu1 %v865_v8  ;;  %785 = vmatprep.subr.bf16.mxu0 %v866_v9  ;;  %v882_v25 = vld [vmem:[%s1003_s25 + $0x70] sm:$0xff]   ;;  %v886_v29 = vld [vmem:[%s1003_s25 + $0x78] sm:$0xff]   ;;  %v741_v34 = vld.sshfl [vmem:[%s229_s21] sm:$0x33 pattern:$0x75316420] }
  0x21   : > { %807 = vmatprep.subr.bf16.mxu1 %v867_v10  ;;  %v883_v26 = vld [vmem:[%s1003_s25 + $0xf0] sm:$0xff]   ;;  %v887_v30 = vld [vmem:[%s1003_s25 + $0xf8] sm:$0xff]   ;;  %v323_v38 = vcombine.high %v741_v34, %v741_v34  ;;  %v330_v42 = vrot.slane %v741_v34, %v329_v40  ;;  %v249_v54 = vld [vmem:[#allocation2] sm:$0x3] }
  0x22   : > { %v884_v27 = vld [vmem:[%s1003_s25 + $0x30] sm:$0xff]   ;;  %v888_v32 = vld [vmem:[%s1003_s25 + $0x38] sm:$0xff]   ;;  %v775_v59 = vld [vmem:[%s1086_s2] ss:$0 sm:$0xff] (!%p774_p7) }
  0x23   : > { %786 = vmatpush3.bf16.msra.mxu0 %v868_v11  ;;  %v885_v28 = vld [vmem:[%s1003_s25 + $0xb0] sm:$0xff]   ;;  %v889_v33 = vld [vmem:[%s1003_s25 + $0xb8] sm:$0xff]   ;;  %v337_v41 = vrot.slane %v323_v38, %v329_v40  ;;  %v338_v44 = vcombine.high %v330_v42, %v330_v42 }
  0x24   : > { %808 = vmatpush3.bf16.msra.mxu1 %v869_v12  ;;  %787 = vmatprep.subr.bf16.mxu0 %v870_v13 }
  0x25   : > { %809 = vmatprep.subr.bf16.mxu1 %v871_v14  ;;  %568 = vmatprep.mubr.bf16.mxu0 %v337_v41  ;;  %v339_v43 = vcombine.high %v337_v41, %v337_v41 }
  0x27   : > { %788 = vmatpush3.bf16.msra.mxu0 %v872_v15  ;;  %608 = vmatprep.mubr.bf16.mxu1 %v339_v43 }
  0x28   : > { %810 = vmatpush3.bf16.msra.mxu1 %v873_v16  ;;  %789 = vmatprep.subr.bf16.mxu0 %v874_v17 }
  0x29   : > { %811 = vmatprep.subr.bf16.mxu1 %v875_v18 }
  0x2b   : > { %790 = vmatpush3.bf16.msra.mxu0 %v876_v19 }
  0x2c   : > { %812 = vmatpush3.bf16.msra.mxu1 %v877_v20  ;;  %791 = vmatprep.subr.bf16.mxu0 %v878_v21 }
  0x2d   : > { %813 = vmatprep.subr.bf16.mxu1 %v879_v22 }
  0x2f   : > { %792 = vmatpush3.bf16.msra.mxu0 %v880_v23 }
  0x30   : > { %814 = vmatpush3.bf16.msra.mxu1 %v881_v24  ;;  %793 = vmatprep.subr.bf16.mxu0 %v882_v25 }
  0x31   : > { %815 = vmatprep.subr.bf16.mxu1 %v883_v26 }
  0x33   : > { %794 = vmatpush3.bf16.msra.mxu0 %v884_v27 }
  0x34   : > { %816 = vmatpush3.bf16.msra.mxu1 %v885_v28  ;;  %795 = vmatprep.subr.bf16.mxu0 %v886_v29 }
  0x35   : > { %817 = vmatprep.subr.bf16.mxu1 %v887_v30 }
  0x37   : > { %796 = vmatpush3.bf16.msra.mxu0 %v888_v32 }
  0x38   : > { %818 = vmatpush3.bf16.msra.mxu1 %v889_v33 }
  0x3a   : > { %569 = vmatmul.mubr.bf16.vlgmr.msra.gmra.mrb[0].mxu0 %v330_v42 }
  0x3b   : > { %609 = vmatmul.mubr.bf16.vlgmr.msra.gmra.mrb[0].mxu1 %v338_v44 }
 0x10d   : > { %v797_v45 = vpop.f32.mrb[0].mxu0 }
 0x10e   : > { %v798_v46 = vpop.f32.mrb[1].mxu0  ;;  %v819_v47 = vpop.f32.mrb[0].mxu1 }
 0x10f   : > { %v799_v48 = vadd.f32 %v798_v46, %v797_v45  ;;  %v800_v49 = vpop.f32.mrb[2].mxu0  ;;  %v820_v50 = vpop.f32.mrb[1].mxu1 }
 0x110   : > { %v801_v51 = vpop.f32.mrb[3].mxu0  ;;  %v821_v52 = vadd.f32 %v820_v50, %v819_v47  ;;  %v822_v53 = vpop.f32.mrb[2].mxu1  ;;  %621 = sbr.rel (%p774_p7) target bundleno = 315 (0x13b), region = 40 }
 0x111   : > { %v823_v55 = vpop.f32.mrb[3].mxu1 }
 0x112   : > { %v611_v56 = vadd.f32 %v821_v52, %v799_v48 }
 0x114   : > { %v616_v57 = vadd.f32 %v611_v56, %v249_v54 }
 0x116   : > { %617 = vst [vmem:[#allocation2] sm:$0x3] %v616_v57 }
 0x11d   : > { %v622_v58 = vld [vmem:[#allocation2] sm:$0x3] }
 0x11e   : > { %v630_v60 = vadd.f32 %v775_v59, %v622_v58 }
 0x120   : > { %v776_v61 = vmul.f32 -1.442695, %v630_v60 }
 0x122   : > { %890 = vpow2.f32 %v776_v61 }
 0x12c   : > { %v891_v62 = vpop.eup %890 }
 0x12d   : > { %v634_v63 = vadd.f32 1.0, %v891_v62 }
 0x12f   : > { %892 = vrcp.f32 %v634_v63 }
 0x139   : > { %v893_v0 = vpop.eup %892 }
 0x13a   : > { %637 = vst [vmem:[#allocation3] sm:$0x3] %v893_v0 }
 0x13b PF: > { %p1049_p8 = scmp.eq.s32.totalorder %s732_s15, 3  ;;  %s950_s4 = smov [#allocation3]  }
 0x13c   : > { %s648_s5 = sshll.u32 %s950_s4, 4  ;;  %s649_s5 = int_to_ptr.vmem [resolvable:$true] %s648_s5 }
 0x13d   : > { %s894_s6 = scalar_lea.vmem %s649_s5, 32  ;;  %p901_p12 = scmp.lt.s32.totalorder %s649_s5, %s649_s5 }
 0x13e   : > { %p895_p9 = scmp.ne.s32.totalorder %s649_s5, %s894_s6  ;;  %p902_p13 = scmp.lt.s32.totalorder %s894_s6, %s894_s6 }
 0x140   : > { %p896_p10 = pnand %p895_p9, %p1049_p8  ;;  %p903_p0 = por %p902_p13, %p901_p12 }
 0x142   : > { %p897_p11 = pneg %p896_p10 }
 0x144   : > { %p904_p1 = pnand %p903_p0, %p897_p11 }
 0x146   : > { %907 = shalt.err (!%p904_p1)
}
 0x147   : > { %s908_s9 = scalar_lea.hbm %s1087_s3, 32 }
 0x148   : > { %p909_p2 = scmp.ne.s32.totalorder %s1087_s3, %s908_s9  ;;  %p914_p5 = scmp.lt.u32.totalorder %s908_s9, %s1087_s3 }
 0x14a   : > { %p910_p3 = pnand %p909_p2, %p1049_p8 }
 0x14c   : > { %p911_p4 = pneg %p910_p3 }
 0x14e   : > { %p916_p6 = pnand %p914_p5, %p911_p4 }
 0x150   : > { %919 = shalt.err (!%p916_p6)
}
 0x151   : > { %826 = dma.vmem_to_hbm [thread:$0]  (%p1049_p8), %s649_s5, 32, %s1087_s3, [#allocation4]  }
 0x152   : > { %933 = dma.done.wait (%p1049_p8), [#allocation4], 32  }
 0x153   : > { %935 = vsyncadd (%p1049_p8), [#allocation4], 4294967264 }
 0x154 PF: > { %s14_s14 = sadd.s32 1, %s946_s14   ;;  %s1089_s12 = smov %s942_s13 }
 0x155   : > { %p11_p7 = scmp.ge.s32.totalorder %s14_s14, 6   ;;  %s1090_s13 = smov %s1092_s16 }
 0x157   :  { %13 = sbr.rel (!%p11_p7) target bundleno = 2 (0x2), region = 74 }
 0x15e   :  { %661 = vsyncpa [#allocation4], 1 }
 0x15f   :  { %663 = vsyncpa [#allocation4 + $0x1], 1 }

// kernel: orchmatchnet_forward.11
= control target key start
LH: loop header
LB: loop body
LE: loop exit
PB: predicated region body
PF: predicated region fallthrough
CT: control target
= control target key end

     0   :  { %s2108_s15 = smov 0   ;;  %s2488_s0 = inlined_call_operand.vmem [shape: bf16[2,32,2,2], index: 0, kind: input, shape index: {}]   ;;  %s2489_s1 = inlined_call_operand.vmem [shape: bf16[9,32,32], index: 1, kind: input, shape index: {}]   ;;  %s2490_s2 = inlined_call_operand.vmem [shape: f32[32,1], index: 2, kind: input, shape index: {}]   ;;  %s2491_s3 = inlined_call_operand.<no memory space> [shape: f32[1,1], index: 3, kind: input, shape index: {}]   ;;  %s2492_s4 = inlined_call_operand.vmem [shape: bf16[2,32,1], index: 4, kind: output, shape index: {}]  }
   0x1 LB: > { %s1744_s16 = sadd.s32 4294967295, %s2069_s15   ;;  %p1748_p0 = scmp.ge.s32.totalorder %s2069_s15, 1  ;;  %s2069_s15 = sphi %s2108_s15, %s16_s15  }
   0x2   : > { %p163_p1 = scmp.lt.s32.totalorder %s2069_s15, 3 }
   0x4   : > { %p164_p2 = pnand %p1748_p0, %p163_p1 }
   0x5   : > { %p188_p3 = scmp.lt.s32.totalorder (!%p164_p2), %s1744_s16, 1  ;;  %v275_v0 = vlaneseq (!%p164_p2)  ;;  %v2071_v1 = vmov (!%p164_p2), 1966171168   ;;  %vm198_vm0 = vcmask (!%p164_p2), 130048   ;;  %vm746_vm1 = vcmask (!%p164_p2), 1041409   ;;  %s2073_s20 = smov (!%p164_p2), 5  }
   0x6   : > { %167 = sbr.rel (%p164_p2) target bundleno = 829 (0x33d), region = 36  ;;  %v273_v2 = vunpack.c.l.s4 (!%p164_p2), %v2071_v1  ;;  %vm749_vm2 = vcmask (!%p164_p2), 1042434   ;;  %v2072_v5 = vmov (!%p164_p2), 0   ;;  %vm752_vm3 = vcmask (!%p164_p2), 1043459   ;;  %s2074_s21 = smov (!%p164_p2), 9  }
   0x7   : > { %v276_v3 = vshrl.u32 (!%p164_p2), %v275_v0, 7  ;;  %200 = vst.msk [vmem:[#allocation2 + $0x8] sm:$0xff] (!%p164_p2), %vm198_vm0, %v2072_v5  ;;  %199 = vst.msk [vmem:[#allocation2] sm:$0xff] (!%p164_p2), %vm198_vm0, %v2072_v5  ;;  %2024 = vset.pattern.permute.xlu1 (!%p164_p2), %v2072_v5  ;;  %2023 = vset.pattern.permute.xlu0 (!%p164_p2), %v2072_v5  ;;  %vm755_vm4 = vcmask (!%p164_p2), 1044484   ;;  %vm758_vm5 = vcmask (!%p164_p2), 1045509   ;;  %vm761_vm6 = vcmask (!%p164_p2), 1046534  }
   0x8   : > { %v274_v4 = vunpack.c.0.s8 (!%p164_p2), %v273_v2  ;;  %vm764_vm7 = vcmask (!%p164_p2), 1047559   ;;  %vm816_vm8 = vcmask (!%p164_p2), 56360   ;;  %vm883_vm9 = vcmask (!%p164_p2), 89160   ;;  %s2075_s24 = smov (!%p164_p2), 123   ;;  %s2076_s27 = smov (!%p164_p2), 122  }
   0x9   : > { %vm915_vm10 = vcmask (!%p164_p2), 261120   ;;  %s2077_s28 = smov (!%p164_p2), 127   ;;  %s2078_s29 = smov (!%p164_p2), 120   ;;  %vm1684_vm11 = vcmask (!%p164_p2), 3072  }
   0xa   : > { %v2124_v6 = vsub.s32 (!%p164_p2), %v274_v4, %v276_v3  ;;  %s2079_s30 = smov (!%p164_p2), 119   ;;  %s2080_s5 = smov (!%p164_p2), 126  }
   0xb   : > { %s2081_s6 = smov (!%p164_p2), 118   ;;  %s2082_s7 = smov (!%p164_p2), 124  }
   0xd   : > { %s2494_s16 = smov (!%p188_p3, %s1744_s16), 1 }
   0xe   : > { %s1749_s3 = sshll.u32 %s2494_s16, 5  ;;  %s1858_s26 = sshll.u32 %s2494_s16, 4 }
   0xf   : > { %s2122_s19 = scalar_lea.vmem %s2488_s0, %s1749_s3 }
  0x10   : > { %v1768_v7 = vld.sshfl [vmem:[%s2122_s19 + $0x10] sm:$0x1 pattern:$0x75316420] }
  0x11   : > { %v1769_v8 = vld.sshfl [vmem:[%s2122_s19 + $0x11] sm:$0x1 pattern:$0x75316420]  ;;  %v502_v9 = vrot.slane %v1768_v7, %v2124_v6 }
  0x12   : > { %v1770_v10 = vld.sshfl [vmem:[%s2122_s19 + $0x12] sm:$0x1 pattern:$0x75316420]  ;;  %v516_v11 = vrot.slane %v1769_v8, %v2124_v6 }
  0x13   : > { %v1771_v12 = vld.sshfl [vmem:[%s2122_s19 + $0x13] sm:$0x1 pattern:$0x75316420]  ;;  %v530_v13 = vrot.slane %v1770_v10, %v2124_v6  ;;  %v729_v14 = vunpack.c.l.b16 %v502_v9 }
  0x14   : > { %v1772_v15 = vld.sshfl [vmem:[%s2122_s19 + $0x14] sm:$0x1 pattern:$0x75316420]  ;;  %v544_v16 = vrot.slane %v1771_v12, %v2124_v6  ;;  %v730_v17 = vunpack.c.l.b16 %v516_v11 }
  0x15   : > { %v1773_v18 = vld.sshfl [vmem:[%s2122_s19 + $0x15] sm:$0x1 pattern:$0x75316420]  ;;  %v558_v19 = vrot.slane %v1772_v15, %v2124_v6  ;;  %v2137_v20 = vunpack.c.l.b16 %v530_v13  ;;  %v847_v21 = vrot.slane %v729_v14, 1 }
  0x16   : > { %v1774_v22 = vld.sshfl [vmem:[%s2122_s19 + $0x16] sm:$0x1 pattern:$0x75316420]  ;;  %v572_v23 = vrot.slane %v1773_v18, %v2124_v6  ;;  %v2141_v24 = vunpack.c.l.b16 %v544_v16  ;;  %v780_v25 = vrot.slane %v730_v17, 7 }
  0x17   : > { %v1775_v26 = vld.sshfl [vmem:[%s2122_s19 + $0x17] sm:$0x1 pattern:$0x75316420]  ;;  %v586_v27 = vrot.slane %v1774_v22, %v2124_v6  ;;  %v2145_v28 = vunpack.c.l.b16 %v558_v19  ;;  %v782_v29 = vrot.slane %v2137_v20, 6  ;;  %v2149_v30 = vsel %vm746_vm1, %v730_v17, %v847_v21 }
  0x18   : > { %v1776_v31 = vld.sshfl [vmem:[%s2122_s19 + $0x18] sm:$0x1 pattern:$0x75316420]  ;;  %v600_v32 = vrot.slane %v1775_v26, %v2124_v6  ;;  %v2153_v33 = vunpack.c.l.b16 %v572_v23  ;;  %v781_v34 = vsel %vm746_vm1, %v780_v25, %v729_v14  ;;  %v784_v35 = vrot.slane %v2141_v24, 5 }
  0x19   : > { %v1777_v36 = vld.sshfl [vmem:[%s2122_s19 + $0x19] sm:$0x1 pattern:$0x75316420]  ;;  %v614_v37 = vrot.slane %v1776_v31, %v2124_v6  ;;  %v2159_v38 = vunpack.c.l.b16 %v586_v27  ;;  %v783_v39 = vsel %vm749_vm2, %v782_v29, %v781_v34  ;;  %v786_v40 = vrot.slane %v2145_v28, 4 }
  0x1a   : > { %v1778_v41 = vld.sshfl [vmem:[%s2122_s19 + $0x1a] sm:$0x1 pattern:$0x75316420]  ;;  %v628_v42 = vrot.slane %v1777_v36, %v2124_v6  ;;  %v2165_v43 = vunpack.c.l.b16 %v600_v32  ;;  %v785_v44 = vsel %vm752_vm3, %v784_v35, %v783_v39  ;;  %v788_v45 = vrot.slane %v2153_v33, 3 }
  0x1b   : > { %v1779_v46 = vld.sshfl [vmem:[%s2122_s19 + $0x1b] sm:$0x1 pattern:$0x75316420]  ;;  %v642_v47 = vrot.slane %v1778_v41, %v2124_v6  ;;  %v2171_v48 = vunpack.c.l.b16 %v614_v37  ;;  %v787_v49 = vsel %vm755_vm4, %v786_v40, %v785_v44  ;;  %v790_v50 = vrot.slane %v2159_v38, 2 }
  0x1c   : > { %v1780_v51 = vld.sshfl [vmem:[%s2122_s19 + $0x1c] sm:$0x1 pattern:$0x75316420]  ;;  %v656_v52 = vrot.slane %v1779_v46, %v2124_v6  ;;  %v2177_v53 = vunpack.c.l.b16 %v628_v42  ;;  %v789_v54 = vsel %vm758_vm5, %v788_v45, %v787_v49  ;;  %v792_v55 = vrot.slane %v2165_v43, 1 }
  0x1d   : > { %v1781_v56 = vld.sshfl [vmem:[%s2122_s19 + $0x1d] sm:$0x1 pattern:$0x75316420]  ;;  %v670_v57 = vrot.slane %v1780_v51, %v2124_v6  ;;  %v2183_v58 = vunpack.c.l.b16 %v642_v47  ;;  %v791_v59 = vsel %vm761_vm6, %v790_v50, %v789_v54  ;;  %v861_v60 = vrot.slane %v2171_v48, 1 }
  0x1e   : > { %v1782_v61 = vld.sshfl [vmem:[%s2122_s19 + $0x1e] sm:$0x1 pattern:$0x75316420]  ;;  %v684_v62 = vrot.slane %v1781_v56, %v2124_v6  ;;  %v2189_v63 = vunpack.c.l.b16 %v656_v52  ;;  %v793_v0 = vsel %vm764_vm7, %v792_v55, %v791_v59  ;;  %v794_v1 = vrot.slane %v2177_v53, 7 }
  0x1f   : > { %v1783_v2 = vld.sshfl [vmem:[%s2122_s19 + $0x1f] sm:$0x1 pattern:$0x75316420]  ;;  %v698_v3 = vrot.slane %v1782_v61, %v2124_v6  ;;  %v2195_v4 = vunpack.c.l.b16 %v670_v57  ;;  %v796_v5 = vrot.slane %v2183_v58, 6  ;;  %v849_v7 = vrot.slane %v2137_v20, 7 }
  0x20   : > { %v712_v8 = vrot.slane %v1783_v2, %v2124_v6  ;;  %v2200_v9 = vunpack.c.l.b16 %v684_v62  ;;  %v795_v10 = vsel %vm746_vm1, %v794_v1, %v2171_v48  ;;  %v798_v11 = vrot.slane %v2189_v63, 5  ;;  %v1752_v12 = vld.sshfl [vmem:[%s2122_s19] sm:$0x1 pattern:$0x75316420] }
  0x21   : > { %v2206_v13 = vunpack.c.l.b16 %v698_v3  ;;  %v797_v14 = vsel %vm749_vm2, %v796_v5, %v795_v10  ;;  %v800_v15 = vrot.slane %v2195_v4, 4  ;;  %v1753_v16 = vld.sshfl [vmem:[%s2122_s19 + $0x1] sm:$0x1 pattern:$0x75316420]  ;;  %v278_v17 = vrot.slane %v1752_v12, %v2124_v6 }
  0x22   : > { %v2212_v18 = vunpack.c.l.b16 %v712_v8  ;;  %v799_v19 = vsel %vm752_vm3, %v798_v11, %v797_v14  ;;  %v802_v21 = vrot.slane %v2200_v9, 3  ;;  %v1754_v22 = vld.sshfl [vmem:[%s2122_s19 + $0x2] sm:$0x1 pattern:$0x75316420]  ;;  %v292_v23 = vrot.slane %v1753_v16, %v2124_v6 }
  0x23   : > { %v801_v25 = vsel %vm755_vm4, %v800_v15, %v799_v19  ;;  %v804_v26 = vrot.slane %v2206_v13, 2  ;;  %v1755_v27 = vld.sshfl [vmem:[%s2122_s19 + $0x3] sm:$0x1 pattern:$0x75316420]  ;;  %v306_v29 = vrot.slane %v1754_v22, %v2124_v6  ;;  %v2222_v31 = vunpack.c.l.b16 %v278_v17 }
  0x24   : > { %v803_v32 = vsel %vm758_vm5, %v802_v21, %v801_v25  ;;  %v806_v34 = vrot.slane %v2212_v18, 1  ;;  %v1756_v35 = vld.sshfl [vmem:[%s2122_s19 + $0x4] sm:$0x1 pattern:$0x75316420]  ;;  %v320_v36 = vrot.slane %v1755_v27, %v2124_v6  ;;  %v2228_v37 = vunpack.c.l.b16 %v292_v23 }
  0x25   : > { %v805_v39 = vsel %vm761_vm6, %v804_v26, %v803_v32  ;;  %v1757_v40 = vld.sshfl [vmem:[%s2122_s19 + $0x5] sm:$0x1 pattern:$0x75316420]  ;;  %v334_v41 = vrot.slane %v1756_v35, %v2124_v6  ;;  %v2233_v42 = vunpack.c.l.b16 %v306_v29  ;;  %v819_v44 = vrot.slane %v2222_v31, 1 }
  0x26   : > { %v807_v45 = vsel %vm764_vm7, %v806_v34, %v805_v39  ;;  %v1758_v46 = vld.sshfl [vmem:[%s2122_s19 + $0x6] sm:$0x1 pattern:$0x75316420]  ;;  %v348_v47 = vrot.slane %v1757_v40, %v2124_v6  ;;  %v2239_v49 = vunpack.c.l.b16 %v320_v36  ;;  %v745_v50 = vrot.slane %v2228_v37, 7 }
  0x27   : > { %v809_v51 = vpack.c.b16 %v807_v45, %v793_v0  ;;  %v1759_v52 = vld.sshfl [vmem:[%s2122_s19 + $0x7] sm:$0x1 pattern:$0x75316420]  ;;  %v362_v54 = vrot.slane %v1758_v46, %v2124_v6  ;;  %v2244_v55 = vunpack.c.l.b16 %v334_v41  ;;  %v748_v56 = vrot.slane %v2233_v42, 6 }
  0x28   : > { %v1760_v57 = vld.sshfl [vmem:[%s2122_s19 + $0x8] sm:$0x1 pattern:$0x75316420]  ;;  %v376_v59 = vrot.slane %v1759_v52, %v2124_v6  ;;  %v2249_v61 = vunpack.c.l.b16 %v348_v47  ;;  %v747_v62 = vsel %vm746_vm1, %v745_v50, %v2222_v31  ;;  %v751_v1 = vrot.slane %v2239_v49, 5 }
  0x29   : > { %812 = vrot.lane.b32.xlu1 %v809_v51, %s2073_s20  ;;  %v1761_v0 = vld.sshfl [vmem:[%s2122_s19 + $0x9] sm:$0x1 pattern:$0x75316420]  ;;  %v390_v2 = vrot.slane %v1760_v57, %v2124_v6  ;;  %v2257_v3 = vunpack.c.l.b16 %v362_v54  ;;  %v750_v5 = vsel %vm749_vm2, %v748_v56, %v747_v62  ;;  %v754_v8 = vrot.slane %v2244_v55, 4 }
  0x2a   : > { %v1762_v10 = vld.sshfl [vmem:[%s2122_s19 + $0xa] sm:$0x1 pattern:$0x75316420]  ;;  %v404_v11 = vrot.slane %v1761_v0, %v2124_v6  ;;  %v2263_v12 = vunpack.c.l.b16 %v376_v59  ;;  %v753_v14 = vsel %vm752_vm3, %v751_v1, %v750_v5  ;;  %v757_v15 = vrot.slane %v2249_v61, 3 }
  0x2b   : > { %v1763_v16 = vld.sshfl [vmem:[%s2122_s19 + $0xb] sm:$0x1 pattern:$0x75316420]  ;;  %v418_v17 = vrot.slane %v1762_v10, %v2124_v6  ;;  %v2269_v19 = vunpack.c.l.b16 %v390_v2  ;;  %v756_v21 = vsel %vm755_vm4, %v754_v8, %v753_v14  ;;  %v760_v22 = vrot.slane %v2257_v3, 2 }
  0x2c   : > { %v1764_v23 = vld.sshfl [vmem:[%s2122_s19 + $0xc] sm:$0x1 pattern:$0x75316420]  ;;  %v432_v25 = vrot.slane %v1763_v16, %v2124_v6  ;;  %v2275_v26 = vunpack.c.l.b16 %v404_v11  ;;  %v759_v27 = vsel %vm758_vm5, %v757_v15, %v756_v21  ;;  %v763_v29 = vrot.slane %v2263_v12, 1 }
  0x2d   : > { %v1765_v32 = vld.sshfl [vmem:[%s2122_s19 + $0xd] sm:$0x1 pattern:$0x75316420]  ;;  %v446_v34 = vrot.slane %v1764_v23, %v2124_v6  ;;  %v2281_v35 = vunpack.c.l.b16 %v418_v17  ;;  %v762_v36 = vsel %vm761_vm6, %v760_v22, %v759_v27  ;;  %v833_v39 = vrot.slane %v2269_v19, 1 }
  0x2e   : > { %v1766_v40 = vld.sshfl [vmem:[%s2122_s19 + $0xe] sm:$0x1 pattern:$0x75316420]  ;;  %v460_v41 = vrot.slane %v1765_v32, %v2124_v6  ;;  %v2287_v45 = vunpack.c.l.b16 %v432_v25  ;;  %v765_v46 = vsel %vm764_vm7, %v763_v29, %v762_v36  ;;  %v766_v47 = vrot.slane %v2275_v26, 7 }
  0x2f   : > { %v1767_v50 = vld.sshfl [vmem:[%s2122_s19 + $0xf] sm:$0x1 pattern:$0x75316420]  ;;  %v474_v51 = vrot.slane %v1766_v40, %v2124_v6  ;;  %v2293_v52 = vunpack.c.l.b16 %v446_v34  ;;  %v768_v54 = vrot.slane %v2281_v35, 6  ;;  %v850_v56 = vsel %vm749_vm2, %v849_v7, %v2149_v30 }
  0x30   : > { %v488_v57 = vrot.slane %v1767_v50, %v2124_v6  ;;  %v2301_v59 = vunpack.c.l.b16 %v460_v41  ;;  %v767_v62 = vsel %vm746_vm1, %v766_v47, %v2269_v19  ;;  %v770_v1 = vrot.slane %v2287_v45, 5 }
  0x31   : > { %v2306_v0 = vunpack.c.l.b16 %v474_v51  ;;  %v769_v2 = vsel %vm749_vm2, %v768_v54, %v767_v62  ;;  %v772_v5 = vrot.slane %v2293_v52, 4  ;;  %v851_v8 = vrot.slane %v2141_v24, 6 }
  0x32   : > { %v2311_v20 = vunpack.c.l.b16 %v488_v57  ;;  %v771_v30 = vsel %vm752_vm3, %v770_v1, %v769_v2  ;;  %v774_v6 = vrot.slane %v2301_v59, 3  ;;  %v853_v7 = vrot.slane %v2145_v28, 5 }
  0x33   : > { %v773_v10 = vsel %vm755_vm4, %v772_v5, %v771_v30  ;;  %v776_v11 = vrot.slane %v2306_v0, 2  ;;  %v852_v14 = vsel %vm752_vm3, %v851_v8, %v850_v56  ;;  %v855_v15 = vrot.slane %v2153_v33, 4 }
  0x34   : > { %v775_v16 = vsel %vm758_vm5, %v774_v6, %v773_v10  ;;  %v778_v24 = vrot.slane %v2311_v20, 1  ;;  %v854_v17 = vsel %vm755_vm4, %v853_v7, %v852_v14  ;;  %v857_v19 = vrot.slane %v2159_v38, 3  ;;  %v2047_v6 = vld [vmem:[%s2489_s1 + $0x10] sm:$0xff]   ;;  %v1597_v10 = vld [vmem:[%s2490_s2 + $0x8] sm:$0xff] }
  0x35   : > { %v777_v21 = vsel %vm761_vm6, %v776_v11, %v775_v16  ;;  %v856_v28 = vsel %vm758_vm5, %v855_v15, %v854_v17  ;;  %v859_v22 = vrot.slane %v2165_v43, 2  ;;  %v862_v23 = vsel %vm746_vm1, %v2177_v53, %v861_v60  ;;  %1903 = vmatprep.mubr.msk.bf16.mxu1 %vm915_vm10, %v2047_v6  ;;  %v1596_v11 = vld [vmem:[%s2490_s2] sm:$0xff]  ;;  %v1598_v14 = vld [vmem:[%s2490_s2 + $0x10] sm:$0xff]  ;;  %v1599_v15 = vld [vmem:[%s2490_s2 + $0x18] sm:$0xff] }
  0x36   : > { %v779_v33 = vsel %vm764_vm7, %v778_v24, %v777_v21  ;;  %v858_v25 = vsel %vm761_vm6, %v857_v19, %v856_v28  ;;  %v863_v27 = vrot.slane %v2183_v58, 7  ;;  %v865_v29 = vrot.slane %v2189_v63, 6  ;;  %v2046_v21 = vld [vmem:[%s2489_s1 + $0x48] sm:$0xff]  }
  0x37   : > { %v808_v38 = vpack.c.b16 %v779_v33, %v765_v46  ;;  %v860_v32 = vsel %vm764_vm7, %v859_v22, %v858_v25  ;;  %v867_v34 = vrot.slane %v2195_v4, 5  ;;  %v869_v43 = vrot.slane %v2200_v9, 4  ;;  %v2049_v22 = vld [vmem:[%s2489_s1 + $0x50] sm:$0xff]  }
  0x38   : > { %v864_v48 = vsel %vm749_vm2, %v863_v27, %v862_v23  ;;  %v871_v36 = vrot.slane %v2206_v13, 3  ;;  %v873_v53 = vrot.slane %v2212_v18, 2  ;;  %v820_v58 = vsel %vm746_vm1, %v2228_v37, %v819_v44  ;;  %v2048_v23 = vld [vmem:[%s2489_s1 + $0x18] sm:$0xff]   ;;  %v2051_v27 = vld [vmem:[%s2489_s1] sm:$0xff]  }
  0x39   : > { %810 = vrot.lane.b32.xlu0 %v808_v38, %s2073_s20  ;;  %v866_v60 = vsel %vm752_vm3, %v865_v29, %v864_v48  ;;  %v821_v63 = vrot.slane %v2233_v42, 7  ;;  %v823_v4 = vrot.slane %v2239_v49, 6  ;;  %v825_v9 = vrot.slane %v2244_v55, 5  ;;  %v2050_v29 = vld [vmem:[%s2489_s1 + $0x58] sm:$0xff]  }
  0x3a   : > { %v868_v40 = vsel %vm755_vm4, %v867_v34, %v866_v60  ;;  %v827_v13 = vrot.slane %v2249_v61, 4  ;;  %v829_v18 = vrot.slane %v2257_v3, 3  ;;  %v831_v31 = vrot.slane %v2263_v12, 2 }
  0x3b   : > { %v870_v37 = vsel %vm758_vm5, %v869_v43, %v868_v40  ;;  %v822_v44 = vsel %vm749_vm2, %v821_v63, %v820_v58  ;;  %v834_v41 = vsel %vm746_vm1, %v2275_v26, %v833_v39  ;;  %v835_v42 = vrot.slane %v2281_v35, 7  ;;  %v2052_v43 = vld [vmem:[%s2489_s1 + $0x8] sm:$0xff]   ;;  %v2057_v63 = vld [vmem:[%s2489_s1 + $0x70] sm:$0xff]  }
  0x3c   : > { %v872_v49 = vsel %vm761_vm6, %v871_v36, %v870_v37  ;;  %v824_v55 = vsel %vm752_vm3, %v823_v4, %v822_v44  ;;  %v837_v46 = vrot.slane %v2287_v45, 6  ;;  %v839_v61 = vrot.slane %v2293_v52, 5  ;;  %v2055_v36 = vld [vmem:[%s2489_s1 + $0x20] sm:$0xff]   ;;  %v2054_v58 = vld [vmem:[%s2489_s1 + $0x68] sm:$0xff]   ;;  %v2059_v40 = vld [vmem:[%s2489_s1 + $0x30] sm:$0xff]  }
  0x3d   : > { %v874_v3 = vsel %vm764_vm7, %v873_v53, %v872_v49  ;;  %v826_v12 = vsel %vm755_vm4, %v825_v9, %v824_v55  ;;  %v836_v47 = vsel %vm749_vm2, %v835_v42, %v834_v41  ;;  %v841_v50 = vrot.slane %v2301_v59, 4  ;;  %v2056_v9 = vld [vmem:[%s2489_s1 + $0x28] sm:$0xff]   ;;  %v2061_v37 = vld [vmem:[%s2489_s1 + $0x80] sm:$0xff]   ;;  %v2060_v44 = vld [vmem:[%s2489_s1 + $0x38] sm:$0xff]  }
  0x3e   : > { %v876_v51 = vpack.c.b16 %v874_v3, %v860_v32  ;;  %v828_v26 = vsel %vm758_vm5, %v827_v13, %v826_v12  ;;  %v838_v35 = vsel %vm752_vm3, %v837_v46, %v836_v47  ;;  %v843_v39 = vrot.slane %v2306_v0, 3  ;;  %v2053_v32 = vld [vmem:[%s2489_s1 + $0x60] sm:$0xff]   ;;  %v2062_v42 = vld [vmem:[%s2489_s1 + $0x88] sm:$0xff]  }
  0x3f   : > { %v830_v54 = vsel %vm761_vm6, %v829_v18, %v828_v26  ;;  %v840_v45 = vsel %vm755_vm4, %v839_v61, %v838_v35  ;;  %v845_v52 = vrot.slane %v2311_v20, 2  ;;  %v2045_v20 = vld [vmem:[%s2489_s1 + $0x40] sm:$0xff]  }
  0x40   : > { %879 = vrot.lane.b32.xlu1 %v876_v51, %s2074_s21  ;;  %v832_v56 = vsel %vm764_vm7, %v831_v31, %v830_v54  ;;  %v842_v57 = vsel %vm758_vm5, %v841_v50, %v840_v45  ;;  %1935 = vmatprep.mubr.msk.bf16.mxu0 %vm915_vm10, %v2045_v20  ;;  %v2058_v31 = vld [vmem:[%s2489_s1 + $0x78] sm:$0xff]  }
  0x41   : > { %v844_v59 = vsel %vm761_vm6, %v843_v39, %v842_v57 }
  0x42   : > { %v846_v62 = vsel %vm764_vm7, %v845_v52, %v844_v59 }
  0x43   : > { %v875_v1 = vpack.c.b16 %v846_v62, %v832_v56 }
  0x45   : > { %877 = vrot.lane.b32.xlu0 %v875_v1, %s2074_s21 }
  0x9b   : > { %v813_v0 = vpop.permute.xlu1 %812 }
  0x9c   : > { %818 = vst.msk [vmem:[#allocation2 + $0x8] sm:$0xff] %vm816_vm8, %v813_v0 }
  0xab   : > { %v811_v2 = vpop.permute.xlu0 %810 }
  0xac   : > { %817 = vst.msk [vmem:[#allocation2] sm:$0xff] %vm816_vm8, %v811_v2 }
  0xb2   : > { %v880_v5 = vpop.permute.xlu1 %879 }
  0xb3   : > { %885 = vst.msk [vmem:[#allocation2 + $0x8] sm:$0xff] %vm883_vm9, %v880_v5 }
  0xb7   : > { %v878_v8 = vpop.permute.xlu0 %877 }
  0xb8   : > { %884 = vst.msk [vmem:[#allocation2] sm:$0xff] %vm883_vm9, %v878_v8 }
  0xba   : > { %v2380_v30 = vld [vmem:[#allocation2 + $0x8] sm:$0xff] }
  0xbb   : > { %1213 = vrot.lane.b32.xlu1 %v2380_v30, %s2075_s24 }
  0xbf   : > { %v886_v7 = vld [vmem:[#allocation2] sm:$0xff] }
  0xc0   : > { %1211 = vrot.lane.b32.xlu0 %v886_v7, %s2075_s24  ;;  %1291 = vrot.lane.b32.xlu1 %v886_v7, %s2076_s27 }
  0xc4   : > { %909 = vrot.lane.b32.xlu0 %v886_v7, %s2077_s28  ;;  %1293 = vrot.lane.b32.xlu1 %v2380_v30, %s2076_s27 }
  0xc8   : > { %911 = vrot.lane.b32.xlu0 %v2380_v30, %s2077_s28  ;;  %1373 = vrot.lane.b32.xlu1 %v2380_v30, %s2078_s29 }
  0xcc   : > { %1371 = vrot.lane.b32.xlu0 %v886_v7, %s2078_s29  ;;  %1451 = vrot.lane.b32.xlu1 %v886_v7, %s2079_s30  ;;  %s196_s29 = scalar_lea.vmem %s2492_s4, %s1858_s26 }
  0xd0   : > { %1051 = vrot.lane.b32.xlu0 %v886_v7, %s2080_s5  ;;  %1453 = vrot.lane.b32.xlu1 %v2380_v30, %s2079_s30 }
  0xd4   : > { %1053 = vrot.lane.b32.xlu0 %v2380_v30, %s2080_s5  ;;  %1531 = vrot.lane.b32.xlu1 %v886_v7, %s2081_s6 }
  0xd8   : > { %1131 = vrot.lane.b32.xlu0 %v886_v7, %s2082_s7  ;;  %1533 = vrot.lane.b32.xlu1 %v2380_v30, %s2081_s6 }
  0xdc   : > { %1133 = vrot.lane.b32.xlu0 %v2380_v30, %s2082_s7  ;;  %1607 = vperm.xlu1 %2024, %v1597_v10  }
  0xe0   : > { %1602 = vperm.xlu0 %2023, %v1596_v11   ;;  %1612 = vperm.xlu1 %2024, %v1598_v14  }
  0xe4   : > { %1617 = vperm.xlu0 %2023, %v1599_v15  }
 0x12d   : > { %v1214_v16 = vpop.permute.xlu1 %1213 }
 0x132   : > { %v1212_v24 = vpop.permute.xlu0 %1211  ;;  %v1292_v17 = vpop.permute.xlu1 %1291 }
 0x133   : > { %1931 = vmatprep.subr.bf16.mxu0 %v1212_v24 }
 0x134   : > { %1932 = vmatpush3.bf16.msra.mxu0 %v1212_v24 }
 0x135   : > { %1933 = vmatprep.subr.bf16.mxu0 %v1214_v16 }
 0x136   : > { %v910_v19 = vpop.permute.xlu0 %909  ;;  %v1294_v33 = vpop.permute.xlu1 %1293 }
 0x137   : > { %1899 = vmatprep.subr.bf16.mxu1 %v910_v19 }
 0x138   : > { %1900 = vmatpush3.bf16.msra.mxu1 %v910_v19  ;;  %1934 = vmatpush3.bf16.msra.mxu0 %v1214_v16 }
 0x139   : > { %1939 = vmatprep.subr.bf16.mxu0 %v1292_v17 }
 0x13a   : > { %v912_v28 = vpop.permute.xlu0 %911  ;;  %v1374_v34 = vpop.permute.xlu1 %1373 }
 0x13b   : > { %1901 = vmatprep.subr.bf16.mxu1 %v912_v28  ;;  %1936 = vmatmul.mubr.msk.bf16.vlgmr.msra.gmra.mrb[0].mxu0 %vm915_vm10, %v2046_v21 }
 0x13c   : > { %1902 = vmatpush3.bf16.msra.mxu1 %v912_v28  ;;  %1940 = vmatpush3.bf16.msra.mxu0 %v1292_v17 }
 0x13d   : > { %1907 = vmatprep.subr.bf16.mxu1 %v886_v7  ;;  %1941 = vmatprep.subr.bf16.mxu0 %v1294_v33 }
 0x13e   : > { %v1372_v25 = vpop.permute.xlu0 %1371  ;;  %1943 = vmatprep.mubr.msk.bf16.mxu0 %vm915_vm10, %v2049_v22  ;;  %v1452_v53 = vpop.permute.xlu1 %1451 }
 0x13f   : > { %1904 = vmatmul.mubr.msk.bf16.vlgmr.msra.gmra.mrb[0].mxu1 %vm915_vm10, %v2048_v23 }
 0x140   : > { %1908 = vmatpush3.bf16.msra.mxu1 %v886_v7  ;;  %1942 = vmatpush3.bf16.msra.mxu0 %v1294_v33 }
 0x141   : > { %1909 = vmatprep.subr.bf16.mxu1 %v2380_v30  ;;  %1947 = vmatprep.subr.bf16.mxu0 %v1372_v25 }
 0x142   : > { %1911 = vmatprep.mubr.msk.bf16.mxu1 %vm915_vm10, %v2051_v27  ;;  %v1052_v38 = vpop.permute.xlu0 %1051  ;;  %v1454_v4 = vpop.permute.xlu1 %1453 }
 0x144   : > { %1910 = vmatpush3.bf16.msra.mxu1 %v2380_v30 }
 0x145   : > { %1915 = vmatprep.subr.bf16.mxu1 %v1052_v38 }
 0x146   : > { %v1054_v48 = vpop.permute.xlu0 %1053  ;;  %v1532_v13 = vpop.permute.xlu1 %1531 }
 0x147   : > { %1944 = vmatmul.mubr.msk.bf16.vlgmr.msra.gmra.mrb[0].mxu0 %vm915_vm10, %v2050_v29 }
 0x148   : > { %1948 = vmatpush3.bf16.msra.mxu0 %v1372_v25  ;;  %1951 = vmatprep.mubr.msk.bf16.mxu0 %vm915_vm10, %v2053_v32 }
 0x149   : > { %1949 = vmatprep.subr.bf16.mxu0 %v1374_v34 }
 0x14a   : > { %v1132_v60 = vpop.permute.xlu0 %1131  ;;  %v1534_v41 = vpop.permute.xlu1 %1533 }
 0x14b   : > { %1912 = vmatmul.mubr.msk.bf16.vlgmr.msra.gmra.mrb[0].mxu1 %vm915_vm10, %v2052_v43 }
 0x14c   : > { %1916 = vmatpush3.bf16.msra.mxu1 %v1052_v38  ;;  %1950 = vmatpush3.bf16.msra.mxu0 %v1374_v34 }
 0x14d   : > { %1917 = vmatprep.subr.bf16.mxu1 %v1054_v48  ;;  %1955 = vmatprep.subr.bf16.mxu0 %v1452_v53 }
 0x14e   : > { %1919 = vmatprep.mubr.msk.bf16.mxu1 %vm915_vm10, %v2055_v36  ;;  %v1134_v18 = vpop.permute.xlu0 %1133 }
 0x150   : > { %1918 = vmatpush3.bf16.msra.mxu1 %v1054_v48 }
 0x151   : > { %1923 = vmatprep.subr.bf16.mxu1 %v1132_v60 }
 0x153   : > { %1952 = vmatmul.mubr.msk.bf16.vlgmr.msra.gmra.mrb[0].mxu0 %vm915_vm10, %v2054_v58 }
 0x154   : > { %1956 = vmatpush3.bf16.msra.mxu0 %v1452_v53  ;;  %1959 = vmatprep.mubr.msk.bf16.mxu0 %vm915_vm10, %v2057_v63 }
 0x155   : > { %1957 = vmatprep.subr.bf16.mxu0 %v1454_v4 }
 0x157   : > { %1920 = vmatmul.mubr.msk.bf16.vlgmr.msra.gmra.mrb[0].mxu1 %vm915_vm10, %v2056_v9 }
 0x158   : > { %1924 = vmatpush3.bf16.msra.mxu1 %v1132_v60  ;;  %1958 = vmatpush3.bf16.msra.mxu0 %v1454_v4 }
 0x159   : > { %1925 = vmatprep.subr.bf16.mxu1 %v1134_v18  ;;  %1963 = vmatprep.subr.bf16.mxu0 %v1532_v13 }
 0x15a   : > { %1927 = vmatprep.mubr.msk.bf16.mxu1 %vm915_vm10, %v2059_v40 }
 0x15b   : > { %v1608_v61 = vpop.permute.xlu1 %1607 }
 0x15c   : > { %1926 = vmatpush3.bf16.msra.mxu1 %v1134_v18 }
 0x15f   : > { %1960 = vmatmul.mubr.msk.bf16.vlgmr.msra.gmra.mrb[0].mxu0 %vm915_vm10, %v2058_v31  ;;  %v1603_v12 = vpop.permute.xlu0 %1602  ;;  %v1613_v50 = vpop.permute.xlu1 %1612 }
 0x160   : > { %1964 = vmatpush3.bf16.msra.mxu0 %v1532_v13  ;;  %1967 = vmatprep.mubr.msk.bf16.mxu0 %vm915_vm10, %v2061_v37 }
 0x161   : > { %1965 = vmatprep.subr.bf16.mxu0 %v1534_v41 }
 0x163   : > { %1928 = vmatmul.mubr.msk.bf16.vlgmr.msra.gmra.mrb[0].mxu1 %vm915_vm10, %v2060_v44  ;;  %v1618_v57 = vpop.permute.xlu0 %1617 }
 0x164   : > { %1966 = vmatpush3.bf16.msra.mxu0 %v1534_v41 }
 0x16b   : > { %1968 = vmatmul.mubr.msk.bf16.vlgmr.msra.gmra.mrb[0].mxu0 %vm915_vm10, %v2062_v42 }
 0x236   : > { %v1929_v49 = vpop.f32.mrb[0].mxu1 }
 0x237   : > { %v1177_v55 = vpop.f32.mrb[1].mxu1 }
 0x238   : > { %v1930_v46 = vpop.f32.mrb[2].mxu1 }
 0x239   : > { %v1180_v3 = vpop.f32.mrb[3].mxu1 }
 0x23e   : > { %v1969_v47 = vpop.f32.mrb[0].mxu0 }
 0x23f   : > { %v1971_v51 = vadd.f32 %v1969_v47, %v1929_v49  ;;  %v1577_v26 = vpop.f32.mrb[1].mxu0 }
 0x240   : > { %v1972_v35 = vadd.f32 %v1577_v26, %v1177_v55  ;;  %v1970_v39 = vpop.f32.mrb[2].mxu0 }
 0x241   : > { %v1622_v54 = vadd.f32 %v1971_v51, %v1613_v50  ;;  %v1973_v45 = vadd.f32 %v1970_v39, %v1930_v46  ;;  %v1580_v52 = vpop.f32.mrb[3].mxu0 }
 0x242   : > { %v1620_v56 = vadd.f32 %v1972_v35, %v1603_v12  ;;  %v1974_v59 = vadd.f32 %v1580_v52, %v1180_v3 }
 0x243   : > { %v1623_v62 = vadd.f32 %v1973_v45, %v1618_v57  ;;  %v1626_v0 = vmax.f32 %v1622_v54, 0.0 }
 0x244   : > { %v1621_v1 = vadd.f32 %v1974_v59, %v1608_v61  ;;  %v1624_v5 = vmax.f32 %v1620_v56, 0.0 }
 0x245   : > { %v1627_v2 = vmax.f32 %v1623_v62, 0.0 }
 0x246   : > { %v1625_v8 = vmax.f32 %v1621_v1, 0.0 }
 0x247   : > { %v2030_v20 = vpack.i.bf16 %v1627_v2, %v1626_v0 }
 0x248   : > { %v2025_v30 = vpack.i.bf16 %v1625_v8, %v1624_v5 }
 0x249   : > { %2031 = vrot.lane.b32.xlu0 %v2030_v20, %s2077_s28 }
 0x24a   : > { %2026 = vrot.lane.b32.xlu1 %v2025_v30, %s2077_s28 }
 0x2bb   : > { %v2032_v6 = vpop.permute.xlu0 %2031 }
 0x2bc   : > { %v2034_v7 = vunpack.i.h.bf16 %v2032_v6  ;;  %v2033_v10 = vunpack.i.l.bf16 %v2032_v6  ;;  %v2027_v11 = vpop.permute.xlu1 %2026 }
 0x2bd   : > { %v2029_v14 = vunpack.i.h.bf16 %v2027_v11  ;;  %v2028_v15 = vunpack.i.l.bf16 %v2027_v11 }
 0x2be   : > { %v1647_v16 = vmax.f32 %v1627_v2, %v2034_v7  ;;  %v1646_v24 = vmax.f32 %v1626_v0, %v2033_v10 }
 0x2bf   : > { %v1645_v17 = vmax.f32 %v1625_v8, %v2029_v14  ;;  %v1644_v19 = vmax.f32 %v1624_v5, %v2028_v15 }
 0x2c0   : > { %v2040_v21 = vpack.i.bf16 %v1647_v16, %v1646_v24 }
 0x2c1   : > { %v2035_v28 = vpack.i.bf16 %v1645_v17, %v1644_v19 }
 0x2c2   : > { %2041 = vrot.lane.b32.xlu0 %v2040_v21, %s2082_s7 }
 0x2c3   : > { %2036 = vrot.lane.b32.xlu1 %v2035_v28, %s2082_s7 }
 0x334   : > { %v2042_v22 = vpop.permute.xlu0 %2041 }
 0x335   : > { %v2044_v23 = vunpack.i.h.bf16 %v2042_v22  ;;  %v2043_v33 = vunpack.i.l.bf16 %v2042_v22  ;;  %v2037_v25 = vpop.permute.xlu1 %2036 }
 0x336   : > { %v2039_v27 = vunpack.i.h.bf16 %v2037_v25  ;;  %v2038_v29 = vunpack.i.l.bf16 %v2037_v25 }
 0x337   : > { %v1667_v38 = vmax.f32 %v1647_v16, %v2044_v23  ;;  %v1666_v32 = vmax.f32 %v1646_v24, %v2043_v33 }
 0x338   : > { %v1665_v34 = vmax.f32 %v1645_v17, %v2039_v27  ;;  %v1664_v43 = vmax.f32 %v1644_v19, %v2038_v29 }
 0x339   : > { %v1862_v48 = vpack.c.bf16 %v1667_v38, %v1667_v38  ;;  %v1861_v36 = vpack.c.bf16 %v1666_v32, %v1666_v32 }
 0x33a   : > { %v1860_v53 = vpack.c.bf16 %v1665_v34, %v1665_v34  ;;  %v1859_v58 = vpack.c.bf16 %v1664_v43, %v1664_v43 }
 0x33b   : > { %1688 = vst.msk [vmem:[%s196_s29 + $0xc] sm:$0xf] %vm1684_vm11, %v1862_v48  ;;  %1687 = vst.msk [vmem:[%s196_s29 + $0x8] sm:$0xf] %vm1684_vm11, %v1861_v36 }
 0x33c   : > { %1686 = vst.msk [vmem:[%s196_s29 + $0x4] sm:$0xf] %vm1684_vm11, %v1860_v53  ;;  %1685 = vst.msk [vmem:[%s196_s29] sm:$0xf] %vm1684_vm11, %v1859_v58 }
 0x33d PF: > { %s16_s15 = sadd.s32 1, %s2069_s15  }
 0x33e   : > { %p13_p4 = scmp.ge.s32.totalorder %s16_s15, 4  }
 0x340   :  { %15 = sbr.rel (!%p13_p4) target bundleno = 1 (0x1), region = 74 }

</bundles_post_ra>
